<compile_context>
chip_gen: v7x
topology: tpu7x:2x2x1
jax: 0.10.0
libtpu: 0.0.40
codegen_flags: <defaults>
</compile_context>

<pallas_src>
import functools

import jax
import jax.numpy as jnp
from jax import lax
from jax.experimental import pallas as pl
from jax.experimental.pallas import tpu as pltpu

HIDDEN = 2048          # fixed by the module (fc1 out / fc2 in), multiple of 128
LN_EPS = 1e-5          # torch.nn.LayerNorm default
LANE = 128


def _round_up(x, m):
    return (x + m - 1) // m * m


def _tpu_vmem_capacity():
    try:
        return int(pltpu.get_tpu_info().vmem_capacity_bytes)
    except Exception:
        return 64 << 20   # conservative (v7x per-core) fallback


# --------------------------------------------------------------------------- #
# Kernel
# --------------------------------------------------------------------------- #
def _to_clip_mlp_kernel(x_ref, w1_ref, w1s_ref, p1_ref, w2_ref, w2s_ref, p2_ref,
                        o_ref, *, n_hidden, n_out, n_out_pad, eps):
    f32 = jnp.float32
    x = x_ref[...]
    if x.dtype != w1_ref.dtype:
        x = x.astype(w1_ref.dtype)

    # ---- fc1 (bias pre-centered: LN1 removes any constant feature shift) ----
    h = jnp.dot(x, w1_ref[...], preferred_element_type=f32)
    h = h + p1_ref[0:1, :]                                   # centered b1 (f32)

    # ---- LayerNorm(2048): mean via MXU matvec, centered (two-pass) variance ----
    inv_h = 1.0 / float(n_hidden)
    mu1 = jnp.dot(x, w1s_ref[...], preferred_element_type=f32) * inv_h     # (bm, 1)
    hc = h - mu1
    var1 = jnp.sum(hc * hc, axis=-1, keepdims=True) * inv_h
    h = hc * lax.rsqrt(var1 + eps) * p1_ref[1:2, :] + p1_ref[2:3, :]

    # ---- ReLU, cast to the fc2 operand dtype (bf16 weights keep a bf16 MXU pass) ----
    h = jnp.maximum(h, 0.0).astype(w2_ref.dtype)

    # ---- fc2 (bias centered over the real columns, zero in padded ones) ----
    y = jnp.dot(h, w2_ref[...], preferred_element_type=f32)
    y = y + p2_ref[0:1, :]

    # ---- LayerNorm(output_dim) on the lane-padded tile ----
    inv_o = 1.0 / float(n_out)
    mu2 = jnp.dot(h, w2s_ref[...], preferred_element_type=f32) * inv_o     # (bm, 1)
    yc = y - mu2
    # padded columns of y are exactly 0 -> each contributes mu2^2 to the sum; remove.
    ss = jnp.sum(yc * yc, axis=-1, keepdims=True) - float(n_out_pad) * (mu2 * mu2)
    var2 = jnp.maximum(ss * inv_o, 0.0)
    out = yc * lax.rsqrt(var2 + eps) * p2_ref[1:2, :] + p2_ref[2:3, :]
    o_ref[...] = out.astype(o_ref.dtype)


# --------------------------------------------------------------------------- #
# One-time parameter preprocessing (hoisted out of the hot path)
# --------------------------------------------------------------------------- #
def prepare_params(params, weight_dtype=None):
    """params = (w1, b1, g1, bt1, w2, b2, g2, bt2); weights stored (in, out)
    (transpose of torch.nn.Linear.weight).  Returns (arrays, meta)."""
    w1, b1, g1, bt1, w2, b2, g2, bt2 = params
    in_dim, hid = w1.shape
    out_dim = w2.shape[1]
    assert hid == HIDDEN and w2.shape[0] == HIDDEN

    if weight_dtype is not None:           # optional bf16 weights (v5e/v6e MXU path)
        w1 = w1.astype(weight_dtype)
        w2 = w2.astype(weight_dtype)

    in_p = _round_up(in_dim, LANE)
    out_p = _round_up(out_dim, LANE)
    f32 = jnp.float32

    # fc1 / LN1 ---------------------------------------------------------------
    w1p = jnp.pad(w1, ((0, in_p - in_dim), (0, 0)))
    w1s = jnp.sum(w1p.astype(f32), axis=1, keepdims=True).astype(w1.dtype)   # (in_p, 1)
    b1c = b1.astype(f32) - jnp.mean(b1.astype(f32))     # LN1 is shift-invariant
    p1 = jnp.zeros((8, hid), f32)
    p1 = p1.at[0].set(b1c).at[1].set(g1.astype(f32)).at[2].set(bt1.astype(f32))

    # fc2 / LN2 ---------------------------------------------------------------
    w2p = jnp.pad(w2, ((0, 0), (0, out_p - out_dim)))
    w2s = jnp.sum(w2p.astype(f32), axis=1, keepdims=True).astype(w2.dtype)   # (hid, 1)
    b2c = b2.astype(f32) - jnp.mean(b2.astype(f32))
    p2 = jnp.zeros((8, out_p), f32)
    p2 = p2.at[0, :out_dim].set(b2c)
    p2 = p2.at[1, :out_dim].set(g2.astype(f32))
    p2 = p2.at[2, :out_dim].set(bt2.astype(f32))

    arrays = (w1p, w1s, p1, w2p, w2s, p2)
    meta = {"in_dim": int(in_dim), "out_dim": int(out_dim)}
    return arrays, meta


# --------------------------------------------------------------------------- #
# pallas_call wrapper
# --------------------------------------------------------------------------- #
@functools.partial(jax.jit,
                   static_argnames=("out_dim", "bm", "vmem_limit", "single_buffer"))
def _to_clip_mlp_impl(x2d, w1p, w1s, p1, w2p, w2s, p2, *,
                      out_dim, bm, vmem_limit, single_buffer):
    m, in_dim = x2d.shape
    in_p, hid = w1p.shape
    out_p = w2p.shape[1]
    m_p = _round_up(max(m, bm), bm)

    x_pad = jnp.pad(x2d, ((0, m_p - m), (0, in_p - in_dim)))

    kernel = functools.partial(_to_clip_mlp_kernel, n_hidden=hid, n_out=out_dim,
                               n_out_pad=out_p - out_dim, eps=LN_EPS)

    if single_buffer:
        # constant-index blocks: second pipeline buffer is pure VMEM waste
        const = lambda shape: pl.BlockSpec(shape, lambda i: (0, 0),
                                           pipeline_mode=pl.Buffered(1))
    else:
        const = lambda shape: pl.BlockSpec(shape, lambda i: (0, 0))

    out = pl.pallas_call(
        kernel,
        out_shape=jax.ShapeDtypeStruct((m_p, out_p), x2d.dtype),
        grid_spec=pl.GridSpec(
            grid=(m_p // bm,),
            in_specs=[
                pl.BlockSpec((bm, in_p), lambda i: (i, 0)),   # x tile (pipelined)
                const((in_p, hid)),                           # W1 (resident)
                const((in_p, 1)),                             # row-sums of W1
                const((8, hid)),                              # packed [b1c, g1, bt1]
                const((hid, out_p)),                          # W2 (resident)
                const((hid, 1)),                              # row-sums of W2
                const((8, out_p)),                            # packed [b2c, g2, bt2]
            ],
            out_specs=pl.BlockSpec((bm, out_p), lambda i: (i, 0)),
        ),
        compiler_params=pltpu.CompilerParams(
            dimension_semantics=("parallel",),
            vmem_limit_bytes=vmem_limit),
    )(x_pad, w1p, w1s, p1, w2p, w2s, p2)

    return out[:m, :out_dim]


def _vmem_estimate(bm, in_p, hid, out_p, xsz, wsz):
    return (2 * bm * in_p * xsz                 # x tile (double-buffered)
            + 2 * bm * out_p * xsz              # out tile (double-buffered)
            + (in_p * hid + hid * out_p) * wsz  # resident weights (single buffer)
            + 3 * bm * hid * 4                  # f32 h / centered h / relu-cast copies
            + 2 * bm * out_p * 4                # f32 y / centered y
            + (2 << 20))                        # row-sums, packed params, headroom


_SINGLE_BUFFER_OK = None   # probed on first call (pl.Buffered(1) support)


def to_clip_mlp(hidden_states, prepared, block_m=None):
    """hidden_states: (..., input_dim) -> (..., output_dim)."""
    global _SINGLE_BUFFER_OK
    arrays, meta = prepared
    w1p, w1s, p1, w2p, w2s, p2 = arrays
    in_dim, out_dim = meta["in_dim"], meta["out_dim"]
    assert hidden_states.shape[-1] == in_dim

    lead = hidden_states.shape[:-1]
    x2d = hidden_states.reshape(-1, in_dim)
    m = x2d.shape[0]
    in_p, hid = w1p.shape
    out_p = w2p.shape[1]

    # ---- generation-aware VMEM budget & M-tile policy ----
    cap = _tpu_vmem_capacity()
    budget = min(int(cap * 0.8), cap - (8 << 20))     # ~51 MiB v7x / ~102 MiB v5e,v6e
    sub = 16 if hidden_states.dtype == jnp.bfloat16 else 8
    default_bm = 512 if cap >= (96 << 20) else 256
    if block_m is None:
        # >= 2 roughly-equal grid steps so v7x megacore uses both TensorCores
        bm = min(default_bm, _round_up(max(pl.cdiv(m, 2), 1), sub))
    else:
        bm = _round_up(max(block_m, sub), sub)
    bm = max(sub, bm)
    xsz = jnp.dtype(hidden_states.dtype).itemsize
    wsz = jnp.dtype(w1p.dtype).itemsize
    while bm > sub and _vmem_estimate(bm, in_p, hid, out_p, xsz, wsz) > budget:
        bm = max(sub, _round_up(bm // 2, sub))
    vmem_limit = int(max(budget, 32 << 20))

    kwargs = dict(out_dim=out_dim, bm=bm, vmem_limit=vmem_limit)
    if _SINGLE_BUFFER_OK is None:
        try:
            out = _to_clip_mlp_impl(x2d, *arrays, single_buffer=True, **kwargs)
            out = jax.block_until_ready(out)
            _SINGLE_BUFFER_OK = True
        except Exception:
            _SINGLE_BUFFER_OK = False
            out = _to_clip_mlp_impl(x2d, *arrays, single_buffer=False, **kwargs)
    else:
        out = _to_clip_mlp_impl(x2d, *arrays, single_buffer=_SINGLE_BUFFER_OK, **kwargs)

    return out.reshape(*lead, out_dim)


# --------------------------------------------------------------------------- #
# Reference / test harness
# --------------------------------------------------------------------------- #
def _layer_norm_ref(x, gamma, beta, eps):
    mu = jnp.mean(x, axis=-1, keepdims=True)
    var = jnp.mean(jnp.square(x - mu), axis=-1, keepdims=True)
    return (x - mu) * lax.rsqrt(var + eps) * gamma + beta


def reference(hidden_states, params):
    w1, b1, g1, bt1, w2, b2, g2, bt2 = params
    h = hidden_states @ w1 + b1
    h = _layer_norm_ref(h, g1, bt1, LN_EPS)
    h = jnp.maximum(h, 0.0)
    y = h @ w2 + b2
    return _layer_norm_ref(y, g2, bt2, LN_EPS)


def init_params(key, input_dim, output_dim, dtype=jnp.float32):
    k1, k2, k3, k4 = jax.random.split(key, 4)
    w1 = jax.random.uniform(k1, (input_dim, HIDDEN), dtype,
                            -1.0 / jnp.sqrt(input_dim), 1.0 / jnp.sqrt(input_dim))
    b1 = jax.random.uniform(k2, (HIDDEN,), dtype,
                            -1.0 / jnp.sqrt(input_dim), 1.0 / jnp.sqrt(input_dim))
    g1 = jnp.ones((HIDDEN,), dtype)
    bt1 = jnp.zeros((HIDDEN,), dtype)
    w2 = jax.random.uniform(k3, (HIDDEN, output_dim), dtype,
                            -1.0 / jnp.sqrt(HIDDEN), 1.0 / jnp.sqrt(HIDDEN))
    b2 = jax.random.uniform(k4, (output_dim,), dtype,
                            -1.0 / jnp.sqrt(HIDDEN), 1.0 / jnp.sqrt(HIDDEN))
    g2 = jnp.ones((output_dim,), dtype)
    bt2 = jnp.zeros((output_dim,), dtype)
    return (w1, b1, g1, bt1, w2, b2, g2, bt2)


if __name__ == "__main__":
    key = jax.random.PRNGKey(0)
    kx, kp, kx2, kp2 = jax.random.split(key, 4)

    # case 1: small shapes matching the module's intended use
    batch, seq, input_dim, output_dim = 2, 8, 32, 64
    x = jax.random.normal(kx, (batch, seq, input_dim), jnp.float32)
    params = init_params(kp, input_dim, output_dim)
    prepared = prepare_params(params)          # one-time (hoisted) preprocessing

    out = jax.block_until_ready(to_clip_mlp(x, prepared))
    ref = reference(x, params)
    assert out.shape == (batch, seq, output_dim)
    assert jnp.allclose(out, ref, atol=1e-4, rtol=1e-4), \
        float(jnp.max(jnp.abs(out - ref)))

    # case 2: non-aligned token count / feature dims -> padding + multi-step grid
    b2_, s2_, in2, out2 = 3, 37, 96, 72
    x2 = jax.random.normal(kx2, (b2_, s2_, in2), jnp.float32)
    params2 = init_params(kp2, in2, out2)
    prepared2 = prepare_params(params2)
    out2_ = jax.block_until_ready(to_clip_mlp(x2, prepared2, block_m=64))
    ref2 = reference(x2, params2)
    assert out2_.shape == (b2_, s2_, out2)
    assert jnp.allclose(out2_, ref2, atol=1e-4, rtol=1e-4), \
        float(jnp.max(jnp.abs(out2_ - ref2)))

    print("KERNEL_OK")
</pallas_src>

<mosaic_0001>
module attributes {stable_mosaic.version = 11 : i64} {
  func.func @_to_clip_mlp_kernel(%arg0: i32, %arg1: memref<8x128xf32, #tpu.memory_space<vmem>>, %arg2: memref<128x2048xf32, #tpu.memory_space<vmem>>, %arg3: memref<128x1xf32, #tpu.memory_space<vmem>>, %arg4: memref<8x2048xf32, #tpu.memory_space<vmem>>, %arg5: memref<2048x128xf32, #tpu.memory_space<vmem>>, %arg6: memref<2048x1xf32, #tpu.memory_space<vmem>>, %arg7: memref<8x128xf32, #tpu.memory_space<vmem>>, %arg8: memref<8x128xf32, #tpu.memory_space<vmem>>) attributes {dimension_semantics = [#tpu.dimension_semantics<parallel>], iteration_bounds = array<i64: 2>, scalar_prefetch = 0 : i64, scratch_operands = 0 : i64, tpu.core_type = #tpu.core_type<tc>, window_params = [{transform_indices = @transform_0, window_bounds = array<i64: 8, 128>}, {pipeline_mode = #tpu.pipeline_mode<synchronous>, transform_indices = @transform_1, window_bounds = array<i64: 128, 2048>}, {pipeline_mode = #tpu.pipeline_mode<synchronous>, transform_indices = @transform_2, window_bounds = array<i64: 128, 1>}, {pipeline_mode = #tpu.pipeline_mode<synchronous>, transform_indices = @transform_3, window_bounds = array<i64: 8, 2048>}, {pipeline_mode = #tpu.pipeline_mode<synchronous>, transform_indices = @transform_4, window_bounds = array<i64: 2048, 128>}, {pipeline_mode = #tpu.pipeline_mode<synchronous>, transform_indices = @transform_5, window_bounds = array<i64: 2048, 1>}, {pipeline_mode = #tpu.pipeline_mode<synchronous>, transform_indices = @transform_6, window_bounds = array<i64: 8, 128>}, {transform_indices = @transform_7, window_bounds = array<i64: 8, 128>}]} {
    %c0 = arith.constant 0 : index
    %c0_0 = arith.constant 0 : index
    %0 = vector.load %arg1[%c0, %c0_0] : memref<8x128xf32, #tpu.memory_space<vmem>>, vector<8x128xf32>
    %c0_1 = arith.constant 0 : index
    %c0_2 = arith.constant 0 : index
    %1 = vector.load %arg2[%c0_1, %c0_2] : memref<128x2048xf32, #tpu.memory_space<vmem>>, vector<128x2048xf32>
    %cst = arith.constant dense<0.000000e+00> : vector<8x2048xf32>
    %2 = tpu.matmul %0, %1, %cst {dimension_numbers = #tpu.dot_dimension_numbers<[1], [0], [0], [1], [0, 0, 1, 1], [], []>} : vector<8x128xf32>, vector<128x2048xf32>, vector<8x2048xf32> -> vector<8x2048xf32>
    %c0_3 = arith.constant 0 : index
    %c0_4 = arith.constant 0 : index
    %3 = vector.load %arg4[%c0_3, %c0_4] : memref<8x2048xf32, #tpu.memory_space<vmem>>, vector<1x2048xf32>
    %4 = vector.broadcast %3 : vector<1x2048xf32> to vector<8x2048xf32>
    %5 = arith.addf %2, %4 : vector<8x2048xf32>
    %c0_5 = arith.constant 0 : index
    %c0_6 = arith.constant 0 : index
    %6 = vector.load %arg3[%c0_5, %c0_6] : memref<128x1xf32, #tpu.memory_space<vmem>>, vector<128x1xf32>
    %cst_7 = arith.constant dense<0.000000e+00> : vector<8x1xf32>
    %7 = tpu.matmul %0, %6, %cst_7 {dimension_numbers = #tpu.dot_dimension_numbers<[1], [0], [0], [1], [0, 0, 1, 1], [], []>} : vector<8x128xf32>, vector<128x1xf32>, vector<8x1xf32> -> vector<8x1xf32>
    %cst_8 = arith.constant 4.8828125E-4 : f32
    %8 = vector.broadcast %cst_8 : f32 to vector<8x1xf32>
    %9 = arith.mulf %7, %8 : vector<8x1xf32>
    %10 = vector.broadcast %9 : vector<8x1xf32> to vector<8x2048xf32>
    %11 = arith.subf %5, %10 : vector<8x2048xf32>
    %12 = arith.mulf %11, %11 : vector<8x2048xf32>
    %cst_9 = arith.constant dense<0.000000e+00> : vector<8xf32>
    %13 = vector.multi_reduction <add>, %12, %cst_9 [1] : vector<8x2048xf32> to vector<8xf32>
    %14 = vector.shape_cast %13 : vector<8xf32> to vector<8x1xf32>
    %cst_10 = arith.constant 4.8828125E-4 : f32
    %15 = vector.broadcast %cst_10 : f32 to vector<8x1xf32>
    %16 = arith.mulf %14, %15 : vector<8x1xf32>
    %cst_11 = arith.constant 9.99999974E-6 : f32
    %17 = vector.broadcast %cst_11 : f32 to vector<8x1xf32>
    %18 = arith.addf %16, %17 : vector<8x1xf32>
    %19 = math.rsqrt %18 : vector<8x1xf32>
    %20 = vector.broadcast %19 : vector<8x1xf32> to vector<8x2048xf32>
    %21 = arith.mulf %11, %20 : vector<8x2048xf32>
    %c1 = arith.constant 1 : index
    %c0_12 = arith.constant 0 : index
    %22 = vector.load %arg4[%c1, %c0_12] : memref<8x2048xf32, #tpu.memory_space<vmem>>, vector<1x2048xf32>
    %23 = vector.broadcast %22 : vector<1x2048xf32> to vector<8x2048xf32>
    %24 = arith.mulf %21, %23 : vector<8x2048xf32>
    %c2 = arith.constant 2 : index
    %c0_13 = arith.constant 0 : index
    %25 = vector.load %arg4[%c2, %c0_13] : memref<8x2048xf32, #tpu.memory_space<vmem>>, vector<1x2048xf32>
    %26 = vector.broadcast %25 : vector<1x2048xf32> to vector<8x2048xf32>
    %27 = arith.addf %24, %26 : vector<8x2048xf32>
    %cst_14 = arith.constant 0.000000e+00 : f32
    %28 = vector.broadcast %cst_14 : f32 to vector<8x2048xf32>
    %29 = arith.maximumf %27, %28 : vector<8x2048xf32>
    %c0_15 = arith.constant 0 : index
    %c0_16 = arith.constant 0 : index
    %30 = vector.load %arg5[%c0_15, %c0_16] : memref<2048x128xf32, #tpu.memory_space<vmem>>, vector<2048x128xf32>
    %cst_17 = arith.constant dense<0.000000e+00> : vector<8x128xf32>
    %31 = tpu.matmul %29, %30, %cst_17 {dimension_numbers = #tpu.dot_dimension_numbers<[1], [0], [0], [1], [0, 0, 1, 1], [], []>} : vector<8x2048xf32>, vector<2048x128xf32>, vector<8x128xf32> -> vector<8x128xf32>
    %c0_18 = arith.constant 0 : index
    %c0_19 = arith.constant 0 : index
    %32 = vector.load %arg7[%c0_18, %c0_19] : memref<8x128xf32, #tpu.memory_space<vmem>>, vector<1x128xf32>
    %33 = vector.broadcast %32 : vector<1x128xf32> to vector<8x128xf32>
    %34 = arith.addf %31, %33 : vector<8x128xf32>
    %c0_20 = arith.constant 0 : index
    %c0_21 = arith.constant 0 : index
    %35 = vector.load %arg6[%c0_20, %c0_21] : memref<2048x1xf32, #tpu.memory_space<vmem>>, vector<2048x1xf32>
    %cst_22 = arith.constant dense<0.000000e+00> : vector<8x1xf32>
    %36 = tpu.matmul %29, %35, %cst_22 {dimension_numbers = #tpu.dot_dimension_numbers<[1], [0], [0], [1], [0, 0, 1, 1], [], []>} : vector<8x2048xf32>, vector<2048x1xf32>, vector<8x1xf32> -> vector<8x1xf32>
    %cst_23 = arith.constant 1.562500e-02 : f32
    %37 = vector.broadcast %cst_23 : f32 to vector<8x1xf32>
    %38 = arith.mulf %36, %37 : vector<8x1xf32>
    %39 = vector.broadcast %38 : vector<8x1xf32> to vector<8x128xf32>
    %40 = arith.subf %34, %39 : vector<8x128xf32>
    %41 = arith.mulf %40, %40 : vector<8x128xf32>
    %cst_24 = arith.constant dense<0.000000e+00> : vector<8xf32>
    %42 = vector.multi_reduction <add>, %41, %cst_24 [1] : vector<8x128xf32> to vector<8xf32>
    %43 = vector.shape_cast %42 : vector<8xf32> to vector<8x1xf32>
    %44 = arith.mulf %38, %38 : vector<8x1xf32>
    %cst_25 = arith.constant 6.400000e+01 : f32
    %45 = vector.broadcast %cst_25 : f32 to vector<8x1xf32>
    %46 = arith.mulf %45, %44 : vector<8x1xf32>
    %47 = arith.subf %43, %46 : vector<8x1xf32>
    %cst_26 = arith.constant 1.562500e-02 : f32
    %48 = vector.broadcast %cst_26 : f32 to vector<8x1xf32>
    %49 = arith.mulf %47, %48 : vector<8x1xf32>
    %cst_27 = arith.constant 0.000000e+00 : f32
    %50 = vector.broadcast %cst_27 : f32 to vector<8x1xf32>
    %51 = arith.maximumf %49, %50 : vector<8x1xf32>
    %cst_28 = arith.constant 9.99999974E-6 : f32
    %52 = vector.broadcast %cst_28 : f32 to vector<8x1xf32>
    %53 = arith.addf %51, %52 : vector<8x1xf32>
    %54 = math.rsqrt %53 : vector<8x1xf32>
    %55 = vector.broadcast %54 : vector<8x1xf32> to vector<8x128xf32>
    %56 = arith.mulf %40, %55 : vector<8x128xf32>
    %c1_29 = arith.constant 1 : index
    %c0_30 = arith.constant 0 : index
    %57 = vector.load %arg7[%c1_29, %c0_30] : memref<8x128xf32, #tpu.memory_space<vmem>>, vector<1x128xf32>
    %58 = vector.broadcast %57 : vector<1x128xf32> to vector<8x128xf32>
    %59 = arith.mulf %56, %58 : vector<8x128xf32>
    %c2_31 = arith.constant 2 : index
    %c0_32 = arith.constant 0 : index
    %60 = vector.load %arg7[%c2_31, %c0_32] : memref<8x128xf32, #tpu.memory_space<vmem>>, vector<1x128xf32>
    %61 = vector.broadcast %60 : vector<1x128xf32> to vector<8x128xf32>
    %62 = arith.addf %59, %61 : vector<8x128xf32>
    %c0_33 = arith.constant 0 : index
    %c0_34 = arith.constant 0 : index
    %63 = vector.load %arg8[%c0_33, %c0_34] : memref<8x128xf32, #tpu.memory_space<vmem>>, vector<8x128xf32>
    tpu.vector_store %arg8[%c0_33, %c0_34], %62 {strides = array<i32>} : memref<8x128xf32, #tpu.memory_space<vmem>>, vector<8x128xf32>,
    return
  }
  func.func @transform_0(%arg0: i32) -> (i32, i32) {
    %c0_i32 = arith.constant 0 : i32
    %c0_i32_0 = arith.constant 0 : i32
    return %arg0, %c0_i32 : i32, i32
  }
  func.func @transform_1(%arg0: i32) -> (i32, i32) {
    %c0_i32 = arith.constant 0 : i32
    %c0_i32_0 = arith.constant 0 : i32
    %c0_i32_1 = arith.constant 0 : i32
    return %c0_i32, %c0_i32_0 : i32, i32
  }
  func.func @transform_2(%arg0: i32) -> (i32, i32) {
    %c0_i32 = arith.constant 0 : i32
    %c0_i32_0 = arith.constant 0 : i32
    %c0_i32_1 = arith.constant 0 : i32
    return %c0_i32, %c0_i32_0 : i32, i32
  }
  func.func @transform_3(%arg0: i32) -> (i32, i32) {
    %c0_i32 = arith.constant 0 : i32
    %c0_i32_0 = arith.constant 0 : i32
    %c0_i32_1 = arith.constant 0 : i32
    return %c0_i32, %c0_i32_0 : i32, i32
  }
  func.func @transform_4(%arg0: i32) -> (i32, i32) {
    %c0_i32 = arith.constant 0 : i32
    %c0_i32_0 = arith.constant 0 : i32
    %c0_i32_1 = arith.constant 0 : i32
    return %c0_i32, %c0_i32_0 : i32, i32
  }
  func.func @transform_5(%arg0: i32) -> (i32, i32) {
    %c0_i32 = arith.constant 0 : i32
    %c0_i32_0 = arith.constant 0 : i32
    %c0_i32_1 = arith.constant 0 : i32
    return %c0_i32, %c0_i32_0 : i32, i32
  }
  func.func @transform_6(%arg0: i32) -> (i32, i32) {
    %c0_i32 = arith.constant 0 : i32
    %c0_i32_0 = arith.constant 0 : i32
    %c0_i32_1 = arith.constant 0 : i32
    return %c0_i32, %c0_i32_0 : i32, i32
  }
  func.func @transform_7(%arg0: i32) -> (i32, i32) {
    %c0_i32 = arith.constant 0 : i32
    %c0_i32_0 = arith.constant 0 : i32
    return %arg0, %c0_i32 : i32, i32
  }
}

module attributes {stable_mosaic.version = 11 : i64} {
  func.func @_to_clip_mlp_kernel(%arg0: i32, %arg1: memref<8x128xf32, #tpu.memory_space<vmem>>, %arg2: memref<128x2048xf32, #tpu.memory_space<vmem>>, %arg3: memref<128x1xf32, #tpu.memory_space<vmem>>, %arg4: memref<8x2048xf32, #tpu.memory_space<vmem>>, %arg5: memref<2048x128xf32, #tpu.memory_space<vmem>>, %arg6: memref<2048x1xf32, #tpu.memory_space<vmem>>, %arg7: memref<8x128xf32, #tpu.memory_space<vmem>>, %arg8: memref<8x128xf32, #tpu.memory_space<vmem>>) attributes {dimension_semantics = [#tpu.dimension_semantics<parallel>], iteration_bounds = array<i64: 2>, scalar_prefetch = 0 : i64, scratch_operands = 0 : i64, tpu.core_type = #tpu.core_type<tc>, window_params = [{transform_indices = @transform_0, window_bounds = array<i64: 8, 128>}, {pipeline_mode = #tpu.pipeline_mode<synchronous>, transform_indices = @transform_1, window_bounds = array<i64: 128, 2048>}, {pipeline_mode = #tpu.pipeline_mode<synchronous>, transform_indices = @transform_2, window_bounds = array<i64: 128, 1>}, {pipeline_mode = #tpu.pipeline_mode<synchronous>, transform_indices = @transform_3, window_bounds = array<i64: 8, 2048>}, {pipeline_mode = #tpu.pipeline_mode<synchronous>, transform_indices = @transform_4, window_bounds = array<i64: 2048, 128>}, {pipeline_mode = #tpu.pipeline_mode<synchronous>, transform_indices = @transform_5, window_bounds = array<i64: 2048, 1>}, {pipeline_mode = #tpu.pipeline_mode<synchronous>, transform_indices = @transform_6, window_bounds = array<i64: 8, 128>}, {transform_indices = @transform_7, window_bounds = array<i64: 8, 128>}]} {
    %c0 = arith.constant 0 : index
    %c0_0 = arith.constant 0 : index
    %0 = vector.load %arg1[%c0, %c0_0] : memref<8x128xf32, #tpu.memory_space<vmem>>, vector<8x128xf32>
    %c0_1 = arith.constant 0 : index
    %c0_2 = arith.constant 0 : index
    %1 = vector.load %arg2[%c0_1, %c0_2] : memref<128x2048xf32, #tpu.memory_space<vmem>>, vector<128x2048xf32>
    %cst = arith.constant dense<0.000000e+00> : vector<8x2048xf32>
    %2 = tpu.matmul %0, %1, %cst {dimension_numbers = #tpu.dot_dimension_numbers<[1], [0], [0], [1], [0, 0, 1, 1], [], []>} : vector<8x128xf32>, vector<128x2048xf32>, vector<8x2048xf32> -> vector<8x2048xf32>
    %c0_3 = arith.constant 0 : index
    %c0_4 = arith.constant 0 : index
    %3 = vector.load %arg4[%c0_3, %c0_4] : memref<8x2048xf32, #tpu.memory_space<vmem>>, vector<1x2048xf32>
    %4 = vector.broadcast %3 : vector<1x2048xf32> to vector<8x2048xf32>
    %5 = arith.addf %2, %4 : vector<8x2048xf32>
    %c0_5 = arith.constant 0 : index
    %c0_6 = arith.constant 0 : index
    %6 = vector.load %arg3[%c0_5, %c0_6] : memref<128x1xf32, #tpu.memory_space<vmem>>, vector<128x1xf32>
    %cst_7 = arith.constant dense<0.000000e+00> : vector<8x1xf32>
    %7 = tpu.matmul %0, %6, %cst_7 {dimension_numbers = #tpu.dot_dimension_numbers<[1], [0], [0], [1], [0, 0, 1, 1], [], []>} : vector<8x128xf32>, vector<128x1xf32>, vector<8x1xf32> -> vector<8x1xf32>
    %cst_8 = arith.constant 4.8828125E-4 : f32
    %8 = vector.broadcast %cst_8 : f32 to vector<8x1xf32>
    %9 = arith.mulf %7, %8 : vector<8x1xf32>
    %10 = vector.broadcast %9 : vector<8x1xf32> to vector<8x2048xf32>
    %11 = arith.subf %5, %10 : vector<8x2048xf32>
    %12 = arith.mulf %11, %11 : vector<8x2048xf32>
    %cst_9 = arith.constant dense<0.000000e+00> : vector<8xf32>
    %13 = vector.multi_reduction <add>, %12, %cst_9 [1] : vector<8x2048xf32> to vector<8xf32>
    %14 = vector.shape_cast %13 : vector<8xf32> to vector<8x1xf32>
    %cst_10 = arith.constant 4.8828125E-4 : f32
    %15 = vector.broadcast %cst_10 : f32 to vector<8x1xf32>
    %16 = arith.mulf %14, %15 : vector<8x1xf32>
    %cst_11 = arith.constant 9.99999974E-6 : f32
    %17 = vector.broadcast %cst_11 : f32 to vector<8x1xf32>
    %18 = arith.addf %16, %17 : vector<8x1xf32>
    %19 = math.rsqrt %18 : vector<8x1xf32>
    %20 = vector.broadcast %19 : vector<8x1xf32> to vector<8x2048xf32>
    %21 = arith.mulf %11, %20 : vector<8x2048xf32>
    %c1 = arith.constant 1 : index
    %c0_12 = arith.constant 0 : index
    %22 = vector.load %arg4[%c1, %c0_12] : memref<8x2048xf32, #tpu.memory_space<vmem>>, vector<1x2048xf32>
    %23 = vector.broadcast %22 : vector<1x2048xf32> to vector<8x2048xf32>
    %24 = arith.mulf %21, %23 : vector<8x2048xf32>
    %c2 = arith.constant 2 : index
    %c0_13 = arith.constant 0 : index
    %25 = vector.load %arg4[%c2, %c0_13] : memref<8x2048xf32, #tpu.memory_space<vmem>>, vector<1x2048xf32>
    %26 = vector.broadcast %25 : vector<1x2048xf32> to vector<8x2048xf32>
    %27 = arith.addf %24, %26 : vector<8x2048xf32>
    %cst_14 = arith.constant 0.000000e+00 : f32
    %28 = vector.broadcast %cst_14 : f32 to vector<8x2048xf32>
    %29 = arith.maximumf %27, %28 : vector<8x2048xf32>
    %c0_15 = arith.constant 0 : index
    %c0_16 = arith.constant 0 : index
    %30 = vector.load %arg5[%c0_15, %c0_16] : memref<2048x128xf32, #tpu.memory_space<vmem>>, vector<2048x128xf32>
    %cst_17 = arith.constant dense<0.000000e+00> : vector<8x128xf32>
    %31 = tpu.matmul %29, %30, %cst_17 {dimension_numbers = #tpu.dot_dimension_numbers<[1], [0], [0], [1], [0, 0, 1, 1], [], []>} : vector<8x2048xf32>, vector<2048x128xf32>, vector<8x128xf32> -> vector<8x128xf32>
    %c0_18 = arith.constant 0 : index
    %c0_19 = arith.constant 0 : index
    %32 = vector.load %arg7[%c0_18, %c0_19] : memref<8x128xf32, #tpu.memory_space<vmem>>, vector<1x128xf32>
    %33 = vector.broadcast %32 : vector<1x128xf32> to vector<8x128xf32>
    %34 = arith.addf %31, %33 : vector<8x128xf32>
    %c0_20 = arith.constant 0 : index
    %c0_21 = arith.constant 0 : index
    %35 = vector.load %arg6[%c0_20, %c0_21] : memref<2048x1xf32, #tpu.memory_space<vmem>>, vector<2048x1xf32>
    %cst_22 = arith.constant dense<0.000000e+00> : vector<8x1xf32>
    %36 = tpu.matmul %29, %35, %cst_22 {dimension_numbers = #tpu.dot_dimension_numbers<[1], [0], [0], [1], [0, 0, 1, 1], [], []>} : vector<8x2048xf32>, vector<2048x1xf32>, vector<8x1xf32> -> vector<8x1xf32>
    %cst_23 = arith.constant 1.562500e-02 : f32
    %37 = vector.broadcast %cst_23 : f32 to vector<8x1xf32>
    %38 = arith.mulf %36, %37 : vector<8x1xf32>
    %39 = vector.broadcast %38 : vector<8x1xf32> to vector<8x128xf32>
    %40 = arith.subf %34, %39 : vector<8x128xf32>
    %41 = arith.mulf %40, %40 : vector<8x128xf32>
    %cst_24 = arith.constant dense<0.000000e+00> : vector<8xf32>
    %42 = vector.multi_reduction <add>, %41, %cst_24 [1] : vector<8x128xf32> to vector<8xf32>
    %43 = vector.shape_cast %42 : vector<8xf32> to vector<8x1xf32>
    %44 = arith.mulf %38, %38 : vector<8x1xf32>
    %cst_25 = arith.constant 6.400000e+01 : f32
    %45 = vector.broadcast %cst_25 : f32 to vector<8x1xf32>
    %46 = arith.mulf %45, %44 : vector<8x1xf32>
    %47 = arith.subf %43, %46 : vector<8x1xf32>
    %cst_26 = arith.constant 1.562500e-02 : f32
    %48 = vector.broadcast %cst_26 : f32 to vector<8x1xf32>
    %49 = arith.mulf %47, %48 : vector<8x1xf32>
    %cst_27 = arith.constant 0.000000e+00 : f32
    %50 = vector.broadcast %cst_27 : f32 to vector<8x1xf32>
    %51 = arith.maximumf %49, %50 : vector<8x1xf32>
    %cst_28 = arith.constant 9.99999974E-6 : f32
    %52 = vector.broadcast %cst_28 : f32 to vector<8x1xf32>
    %53 = arith.addf %51, %52 : vector<8x1xf32>
    %54 = math.rsqrt %53 : vector<8x1xf32>
    %55 = vector.broadcast %54 : vector<8x1xf32> to vector<8x128xf32>
    %56 = arith.mulf %40, %55 : vector<8x128xf32>
    %c1_29 = arith.constant 1 : index
    %c0_30 = arith.constant 0 : index
    %57 = vector.load %arg7[%c1_29, %c0_30] : memref<8x128xf32, #tpu.memory_space<vmem>>, vector<1x128xf32>
    %58 = vector.broadcast %57 : vector<1x128xf32> to vector<8x128xf32>
    %59 = arith.mulf %56, %58 : vector<8x128xf32>
    %c2_31 = arith.constant 2 : index
    %c0_32 = arith.constant 0 : index
    %60 = vector.load %arg7[%c2_31, %c0_32] : memref<8x128xf32, #tpu.memory_space<vmem>>, vector<1x128xf32>
    %61 = vector.broadcast %60 : vector<1x128xf32> to vector<8x128xf32>
    %62 = arith.addf %59, %61 : vector<8x128xf32>
    %c0_33 = arith.constant 0 : index
    %c0_34 = arith.constant 0 : index
    %63 = vector.load %arg8[%c0_33, %c0_34] : memref<8x128xf32, #tpu.memory_space<vmem>>, vector<8x128xf32>
    tpu.vector_store %arg8[%c0_33, %c0_34], %62 {strides = array<i32>} : memref<8x128xf32, #tpu.memory_space<vmem>>, vector<8x128xf32>,
    return
  }
  func.func @transform_0(%arg0: i32) -> (i32, i32) {
    %c0_i32 = arith.constant 0 : i32
    %c0_i32_0 = arith.constant 0 : i32
    return %arg0, %c0_i32 : i32, i32
  }
  func.func @transform_1(%arg0: i32) -> (i32, i32) {
    %c0_i32 = arith.constant 0 : i32
    %c0_i32_0 = arith.constant 0 : i32
    %c0_i32_1 = arith.constant 0 : i32
    return %c0_i32, %c0_i32_0 : i32, i32
  }
  func.func @transform_2(%arg0: i32) -> (i32, i32) {
    %c0_i32 = arith.constant 0 : i32
    %c0_i32_0 = arith.constant 0 : i32
    %c0_i32_1 = arith.constant 0 : i32
    return %c0_i32, %c0_i32_0 : i32, i32
  }
  func.func @transform_3(%arg0: i32) -> (i32, i32) {
    %c0_i32 = arith.constant 0 : i32
    %c0_i32_0 = arith.constant 0 : i32
    %c0_i32_1 = arith.constant 0 : i32
    return %c0_i32, %c0_i32_0 : i32, i32
  }
  func.func @transform_4(%arg0: i32) -> (i32, i32) {
    %c0_i32 = arith.constant 0 : i32
    %c0_i32_0 = arith.constant 0 : i32
    %c0_i32_1 = arith.constant 0 : i32
    return %c0_i32, %c0_i32_0 : i32, i32
  }
  func.func @transform_5(%arg0: i32) -> (i32, i32) {
    %c0_i32 = arith.constant 0 : i32
    %c0_i32_0 = arith.constant 0 : i32
    %c0_i32_1 = arith.constant 0 : i32
    return %c0_i32, %c0_i32_0 : i32, i32
  }
  func.func @transform_6(%arg0: i32) -> (i32, i32) {
    %c0_i32 = arith.constant 0 : i32
    %c0_i32_0 = arith.constant 0 : i32
    %c0_i32_1 = arith.constant 0 : i32
    return %c0_i32, %c0_i32_0 : i32, i32
  }
  func.func @transform_7(%arg0: i32) -> (i32, i32) {
    %c0_i32 = arith.constant 0 : i32
    %c0_i32_0 = arith.constant 0 : i32
    return %arg0, %c0_i32 : i32, i32
  }
}

</mosaic_0001>

<bundles_post_ra>
// kernel: _to_clip_mlp_impl.1
= control target key start
LH: loop header
LB: loop body
LE: loop exit
PB: predicated region body
PF: predicated region fallthrough
CT: control target
= control target key end

     0   :  { %12 = vsyncpa [#allocation3], 0  ;;  %s7156_s0 = inlined_call_operand.vmem [shape: f32[16,128], index: 0, kind: input, shape index: {}]   ;;  %s7157_s1 = inlined_call_operand.vmem [shape: f32[128,2048], index: 1, kind: input, shape index: {}]   ;;  %s7158_s2 = inlined_call_operand.vmem [shape: f32[128,1], index: 2, kind: input, shape index: {}]   ;;  %s7159_s3 = inlined_call_operand.vmem [shape: f32[8,2048], index: 3, kind: input, shape index: {}]   ;;  %s7160_s4 = inlined_call_operand.hbm [shape: f32[2048,128], index: 4, kind: input, shape index: {}]   ;;  %s7161_s5 = inlined_call_operand.vmem [shape: f32[2048,1], index: 5, kind: input, shape index: {}]   ;;  %s7162_s6 = inlined_call_operand.vmem [shape: f32[8,128], index: 6, kind: input, shape index: {}]   ;;  %s7163_s7 = inlined_call_operand.hbm [shape: f32[16,128], index: 7, kind: output, shape index: {}]  }
   0x1   :  { %13 = vsyncpa [#allocation4], 0 }
   0x2   :  { %15 = vsyncpa [#allocation4 + $0x1], 0  ;;  %s4984_s24 = smov 0   ;;  %s4986_s25 = smov 0  }
   0x3   :  { %s4988_s26 = smov 0   ;;  %s4990_s27 = smov 0  }
   0x4 LB: > { %s5005_s28 = sadd.s32 4294967295, %s4934_s27   ;;  %s3349_s29 = sadd.s32 4294967294, %s4934_s27   ;;  %s4934_s27 = sphi %s4990_s27, %s7179_s27   ;;  %s4930_s26 = sphi %s4988_s26, %s7178_s26   ;;  %s4926_s25 = sphi %s4986_s25, %s7177_s25   ;;  %s4922_s24 = sphi %s4984_s24, %s7176_s24  }
   0x5   : > { %s5009_s30 = sadd.s32 1, %s4934_s27   ;;  %s180_s8 = sadd.s32 1, %s4930_s26 }
   0x6   : > { %s177_s9 = ssub.s32 %s4934_s27, %s5009_s30  ;;  %p190_p0 = scmp.ne.s32.totalorder %s4930_s26, %s4926_s25 }
   0x7   : > { %p178_p1 = scmp.eq.s32.totalorder %s177_s9, 0  ;;  %p191_p2 = scmp.eq.s32.totalorder %s5005_s28, 1 }
   0x8   : > { %p196_p3 = scmp.ne.s32.totalorder %s4926_s25, %s4922_s24  ;;  %p197_p4 = scmp.eq.s32.totalorder %s3349_s29, 1 }
   0x9   : > { %s5020_s10 = scalar_select %p178_p1, %s4930_s26, %s180_s8  }
   0xa   : > { %p5022_p5 = por %p191_p2, %p190_p0  ;;  %p5026_p6 = por %p197_p4, %p196_p3 }
   0xb   : > { %p3350_p7 = scmp.ge.s32.totalorder %s4934_s27, 1  ;;  %p204_p8 = scmp.lt.s32.totalorder %s4934_s27, 3 }
   0xc   : > { %s7167_s11 = scalar_select %p5022_p5, 1, 0 }
   0xd   : > { %s7168_s12 = scalar_select %p5026_p6, 1, 0 }
   0xe   : > { %p7164_p9 = scmp.eq.s32.totalorder %s5005_s28, 0  ;;  %p5033_p10 = pnand %p3350_p7, %p204_p8 }
   0xf   : > { %s4936_s14 = smov [#allocation2]   ;;  %s4840_s19 = scalar_lea.hbm %s7160_s4, 32768 }
  0x10   : > { %s7169_s13 = scalar_select %p5033_p10, 1, 0 }
  0x11   : > { %s225_s15 = sshll.u32 %s4936_s14, 4  ;;  %p4784_p11 = pneg %p5033_p10  ;;  %s226_s15 = int_to_ptr.vmem [resolvable:$true] %s225_s15 }
  0x12   : > { %p4841_p13 = scmp.ne.s32.totalorder %s7160_s4, %s4840_s19  ;;  %p4847_p3 = scmp.lt.u32.totalorder %s4840_s19, %s7160_s4 }
  0x13   : > { %p5041_p12 = pnand %p7164_p9, %p4784_p11 }
  0x15   : > { %p4842_p0 = pneg %p5041_p12 }
  0x17   : > { %p4843_p1 = pnand %p4842_p0, %p4841_p13 }
  0x19   : > { %p4844_p2 = pneg %p4843_p1 }
  0x1b   : > { %p4849_p4 = pnand %p4847_p3, %p4844_p2 }
  0x1d   : > { %4852 = shalt.err (!%p4849_p4)
}
  0x1e   : > { %s4853_s29 = scalar_lea.vmem %s226_s15, 32768  ;;  %p4861_p9 = scmp.lt.s32.totalorder %s226_s15, %s226_s15 }
  0x1f   : > { %p4854_p7 = scmp.ne.s32.totalorder %s226_s15, %s4853_s29  ;;  %p4862_p6 = scmp.lt.s32.totalorder %s4853_s29, %s4853_s29 }
  0x21   : > { %p4856_p8 = pnand %p4854_p7, %p4842_p0  ;;  %p4863_p5 = por %p4862_p6, %p4861_p9 }
  0x23   : > { %p4857_p11 = pneg %p4856_p8 }
  0x25   : > { %p4864_p10 = pnand %p4863_p5, %p4857_p11 }
  0x27   : > { %4867 = shalt.err (!%p4864_p10)
}
  0x28   : > { %s4937_s8 = smov 128   ;;  %s4938_s9 = smov 8  }
  0x29   : > { %4787 = dma.hbm_to_vmem [thread:$0]  (!%p5041_p12), %s7160_s4, 32768, %s226_s15, [#allocation3], %s4937_s8, %s4937_s8, %s4938_s9  }
  0x2a   : > { %p7171_p13 = scmp.ne.s32.totalorder %s7169_s13, 0 }
  0x2b   : > { %p7172_p1 = scmp.eq.s32.totalorder (!%p7171_p13), %s5005_s28, 0 }
  0x2c   : > { %254 = sbr.rel (%p7171_p13) target bundleno = 1644 (0x66c), region = 48 }
  0x33   : > { %4913 = dma.done.wait (%p7172_p1), [#allocation3], 32768   ;;  %p7173_p0 = pmov %p7172_p1 }
  0x34   : > { %v4939_v0 = vmov 0.0   ;;  %v291_v1 = vld [vmem:[%s7157_s1 + $0x8] sm:$0xff]  ;;  %v290_v3 = vld [vmem:[%s7157_s1] sm:$0xff]  ;;  %p285_p5 = scmp.lt.s32.totalorder %s5005_s28, 1  ;;  %vm4941_vm0 = vmmov 0   ;;  %s282_s8 = sand.u32 1, %s4926_s25  }
  0x35   : > { %4915 = vsyncadd (%p7173_p0), [#allocation3], 4294934528  ;;  %699 = vmatprep.mubr.f32.mxu0 %v4939_v0  ;;  %770 = vmatprep.mubr.f32.mxu1 %v4939_v0  ;;  %v307_v2 = vld [vmem:[%s7157_s1 + $0x88] sm:$0xff]  ;;  %v306_v5 = vld [vmem:[%s7157_s1 + $0x80] sm:$0xff]  ;;  %s3355_s9 = sshll.u32 %s282_s8, 3  ;;  %s3371_s16 = sshll.u32 %s5005_s28, 7 }
  0x36   : > { %v3986_v4 = vpack.c.bf16 %v307_v2, %v291_v1  ;;  %v323_v6 = vld [vmem:[%s7157_s1 + $0x108] sm:$0xff]  ;;  %v3988_v8 = vpack.c.bf16 %v306_v5, %v290_v3  ;;  %v322_v10 = vld [vmem:[%s7157_s1 + $0x100] sm:$0xff]  ;;  %s286_s13 = scalar_select %p285_p5, %s5005_s28, 1 }
  0x37   : > { %v339_v7 = vld [vmem:[%s7157_s1 + $0x188] sm:$0xff]  ;;  %v338_v11 = vld [vmem:[%s7157_s1 + $0x180] sm:$0xff]  ;;  %s284_s15 = scalar_lea.vmem [#allocation5], %s3355_s9  ;;  %s7114_s21 = scalar_lea.hbm %s7163_s7, %s3371_s16 }
  0x38   : > { %v3990_v9 = vpack.c.bf16 %v339_v7, %v323_v6  ;;  %v355_v12 = vld [vmem:[%s7157_s1 + $0x208] sm:$0xff]  ;;  %3987 = vmatprep.subr.bf16.mxu0 %v3986_v4  ;;  %v3992_v14 = vpack.c.bf16 %v338_v11, %v322_v10  ;;  %v354_v16 = vld [vmem:[%s7157_s1 + $0x200] sm:$0xff]  ;;  %s3356_s29 = sshll.u32 %s286_s13, 3  ;;  %s3278_s20 = sshll.u32 %s284_s15, 4  ;;  %s7116_s20 = int_to_ptr.vmem [resolvable:$true] %s3278_s20 }
  0x39   : > { %v371_v13 = vld [vmem:[%s7157_s1 + $0x288] sm:$0xff]  ;;  %3989 = vmatpush1.bf16.msra.mxu0 %v3988_v8  ;;  %v370_v17 = vld [vmem:[%s7157_s1 + $0x280] sm:$0xff]  ;;  %s288_s19 = scalar_lea.vmem %s7156_s0, %s3356_s29  ;;  %s3265_s22 = scalar_lea.sflag [#allocation4], %s282_s8 }
  0x3a   : > { %3991 = vmatprep.subr.bf16.mxu0 %v3990_v9  ;;  %v3994_v15 = vpack.c.bf16 %v371_v13, %v355_v12  ;;  %v387_v18 = vld [vmem:[%s7157_s1 + $0x308] sm:$0xff]  ;;  %v3996_v20 = vpack.c.bf16 %v370_v17, %v354_v16  ;;  %v386_v22 = vld [vmem:[%s7157_s1 + $0x300] sm:$0xff]  ;;  %s4868_s23 = scalar_lea.vmem %s7116_s20, 128  ;;  %p7174_p9 = scmp.ne.s32.totalorder %s7167_s11, 0 }
  0x3b   : > { %v403_v19 = vld [vmem:[%s7157_s1 + $0x388] sm:$0xff]  ;;  %v402_v23 = vld [vmem:[%s7157_s1 + $0x380] sm:$0xff]  ;;  %p4869_p6 = scmp.ne.s32.totalorder %s7116_s20, %s4868_s23  ;;  %s4943_s28 = smov [#allocation5]  }
  0x3c   : > { %v3998_v21 = vpack.c.bf16 %v403_v19, %v387_v18  ;;  %v419_v24 = vld [vmem:[%s7157_s1 + $0x408] sm:$0xff]  ;;  %v4000_v26 = vpack.c.bf16 %v402_v23, %v386_v22  ;;  %v418_v28 = vld [vmem:[%s7157_s1 + $0x400] sm:$0xff]  ;;  %v293_v23 = vld [vmem:[%s7157_s1 + $0x18] sm:$0xff]  ;;  %s4872_s9 = sshll.u32 %s4943_s28, 4  ;;  %s4873_s9 = int_to_ptr.vmem [resolvable:$false] %s4872_s9 }
  0x3d   : > { %3993 = vmatpush1.bf16.msra.mxu0 %v3992_v14  ;;  %v435_v25 = vld [vmem:[%s7157_s1 + $0x488] sm:$0xff]  ;;  %v434_v29 = vld [vmem:[%s7157_s1 + $0x480] sm:$0xff]  ;;  %p4870_p10 = pnand %p4869_p6, %p7174_p9  ;;  %s4874_s29 = scalar_lea.vmem %s4873_s9, 256 }
  0x3e   : > { %3995 = vmatprep.subr.bf16.mxu0 %v3994_v15  ;;  %v4002_v27 = vpack.c.bf16 %v435_v25, %v419_v24  ;;  %v451_v30 = vld [vmem:[%s7157_s1 + $0x508] sm:$0xff]  ;;  %v4004_v32 = vpack.c.bf16 %v434_v29, %v418_v28  ;;  %v450_v34 = vld [vmem:[%s7157_s1 + $0x500] sm:$0xff]  ;;  %v309_v24 = vld [vmem:[%s7157_s1 + $0x98] sm:$0xff]  ;;  %p4875_p2 = scmp.lt.s32.totalorder %s7116_s20, %s4873_s9  ;;  %p4876_p3 = scmp.lt.s32.totalorder %s4874_s29, %s4868_s23 }
  0x3f   : > { %v467_v31 = vld [vmem:[%s7157_s1 + $0x588] sm:$0xff]  ;;  %v466_v35 = vld [vmem:[%s7157_s1 + $0x580] sm:$0xff]  ;;  %v308_v28 = vld [vmem:[%s7157_s1 + $0x90] sm:$0xff]  ;;  %p4871_p12 = pneg %p4870_p10 }
  0x40   : > { %v4006_v33 = vpack.c.bf16 %v467_v31, %v451_v30  ;;  %v483_v36 = vld [vmem:[%s7157_s1 + $0x608] sm:$0xff]  ;;  %v4008_v38 = vpack.c.bf16 %v466_v35, %v450_v34  ;;  %v482_v40 = vld [vmem:[%s7157_s1 + $0x600] sm:$0xff]  ;;  %v325_v29 = vld [vmem:[%s7157_s1 + $0x118] sm:$0xff]  ;;  %p4877_p4 = por %p4876_p3, %p4875_p2 }
  0x41   : > { %3997 = vmatpush1.bf16.msra.mxu0 %v3996_v20  ;;  %v499_v37 = vld [vmem:[%s7157_s1 + $0x688] sm:$0xff]  ;;  %v498_v41 = vld [vmem:[%s7157_s1 + $0x680] sm:$0xff]  ;;  %v341_v31 = vld [vmem:[%s7157_s1 + $0x198] sm:$0xff] }
  0x42   : > { %3999 = vmatprep.subr.bf16.mxu0 %v3998_v21  ;;  %v4010_v39 = vpack.c.bf16 %v499_v37, %v483_v36  ;;  %v515_v42 = vld [vmem:[%s7157_s1 + $0x708] sm:$0xff]  ;;  %v4012_v44 = vpack.c.bf16 %v498_v41, %v482_v40  ;;  %v514_v46 = vld [vmem:[%s7157_s1 + $0x700] sm:$0xff]  ;;  %v4022_v34 = vpack.c.bf16 %v341_v31, %v325_v29  ;;  %v357_v35 = vld [vmem:[%s7157_s1 + $0x218] sm:$0xff]  ;;  %p4878_p7 = pnand %p4877_p4, %p4871_p12 }
  0x43   : > { %v531_v43 = vld [vmem:[%s7157_s1 + $0x788] sm:$0xff]  ;;  %v530_v47 = vld [vmem:[%s7157_s1 + $0x780] sm:$0xff]  ;;  %v373_v36 = vld [vmem:[%s7157_s1 + $0x298] sm:$0xff] }
  0x44   : > { %v4014_v45 = vpack.c.bf16 %v531_v43, %v515_v42  ;;  %v295_v48 = vld [vmem:[%s7157_s1 + $0x28] sm:$0xff]  ;;  %v4016_v50 = vpack.c.bf16 %v530_v47, %v514_v46  ;;  %v294_v52 = vld [vmem:[%s7157_s1 + $0x20] sm:$0xff]  ;;  %v4026_v43 = vpack.c.bf16 %v373_v36, %v357_v35  ;;  %v389_v47 = vld [vmem:[%s7157_s1 + $0x318] sm:$0xff] }
  0x45   : > { %4001 = vmatpush1.bf16.msra.mxu0 %v4000_v26  ;;  %v311_v49 = vld [vmem:[%s7157_s1 + $0xa8] sm:$0xff]  ;;  %v310_v53 = vld [vmem:[%s7157_s1 + $0xa0] sm:$0xff]  ;;  %v4018_v26 = vpack.c.bf16 %v309_v24, %v293_v23  ;;  %v484_v31 = vld [vmem:[%s7157_s1 + $0x610] sm:$0xff] }
  0x46   : > { %4003 = vmatprep.subr.bf16.mxu0 %v4002_v27  ;;  %v4050_v51 = vpack.c.bf16 %v311_v49, %v295_v48  ;;  %v327_v54 = vld [vmem:[%s7157_s1 + $0x128] sm:$0xff]  ;;  %v5188_v56 = vld [vmem:[%s288_s19] sm:$0xff]  ;;  %v4052_v57 = vpack.c.bf16 %v310_v53, %v294_v52  ;;  %v292_v27 = vld [vmem:[%s7157_s1 + $0x10] sm:$0xff] }
  0x47   : > { %v343_v55 = vld [vmem:[%s7157_s1 + $0x1a8] sm:$0xff]  ;;  %v326_v59 = vld [vmem:[%s7157_s1 + $0x120] sm:$0xff]  ;;  %v4020_v30 = vpack.c.bf16 %v308_v28, %v292_v27  ;;  %4019 = vmatprep.subr.bf16.mxu1 %v4018_v26  ;;  %v405_v48 = vld [vmem:[%s7157_s1 + $0x398] sm:$0xff] }
  0x48   : > { %v4054_v58 = vpack.c.bf16 %v343_v55, %v327_v54  ;;  %v342_v60 = vld [vmem:[%s7157_s1 + $0x1a0] sm:$0xff]  ;;  %v359_v61 = vld [vmem:[%s7157_s1 + $0x228] sm:$0xff]  ;;  %v4030_v55 = vpack.c.bf16 %v405_v48, %v389_v47 }
  0x49   : > { %4005 = vmatpush1.bf16.msra.mxu0 %v4004_v32  ;;  %v375_v62 = vld [vmem:[%s7157_s1 + $0x2a8] sm:$0xff]  ;;  %v4056_v63 = vpack.c.bf16 %v342_v60, %v326_v59  ;;  %v358_v2 = vld [vmem:[%s7157_s1 + $0x220] sm:$0xff]  ;;  %v324_v32 = vld [vmem:[%s7157_s1 + $0x110] sm:$0xff]  ;;  %4021 = vmatpush1.bf16.msra.mxu1 %v4020_v30 }
  0x4a   : > { %4007 = vmatprep.subr.bf16.mxu0 %v4006_v33  ;;  %v4058_v1 = vpack.c.bf16 %v375_v62, %v359_v61  ;;  %v374_v3 = vld [vmem:[%s7157_s1 + $0x2a0] sm:$0xff]  ;;  %v391_v4 = vld [vmem:[%s7157_s1 + $0x328] sm:$0xff]  ;;  %v340_v33 = vld [vmem:[%s7157_s1 + $0x190] sm:$0xff]  ;;  %4023 = vmatprep.subr.bf16.mxu1 %v4022_v34 }
  0x4b   : > { %v407_v5 = vld [vmem:[%s7157_s1 + $0x3a8] sm:$0xff]  ;;  %v4060_v6 = vpack.c.bf16 %v374_v3, %v358_v2  ;;  %v390_v8 = vld [vmem:[%s7157_s1 + $0x320] sm:$0xff]  ;;  %v4024_v40 = vpack.c.bf16 %v340_v33, %v324_v32  ;;  %v421_v60 = vld [vmem:[%s7157_s1 + $0x418] sm:$0xff] }
  0x4c   : > { %v4062_v7 = vpack.c.bf16 %v407_v5, %v391_v4  ;;  %v406_v9 = vld [vmem:[%s7157_s1 + $0x3a0] sm:$0xff]  ;;  %v423_v10 = vld [vmem:[%s7157_s1 + $0x428] sm:$0xff]  ;;  %v437_v61 = vld [vmem:[%s7157_s1 + $0x498] sm:$0xff] }
  0x4d   : > { %4009 = vmatpush1.bf16.msra.mxu0 %v4008_v38  ;;  %v439_v11 = vld [vmem:[%s7157_s1 + $0x4a8] sm:$0xff]  ;;  %v4064_v12 = vpack.c.bf16 %v406_v9, %v390_v8  ;;  %v422_v14 = vld [vmem:[%s7157_s1 + $0x420] sm:$0xff]  ;;  %4025 = vmatpush1.bf16.msra.mxu1 %v4024_v40  ;;  %v4034_v5 = vpack.c.bf16 %v437_v61, %v421_v60  ;;  %v436_v8 = vld [vmem:[%s7157_s1 + $0x490] sm:$0xff] }
  0x4e   : > { %4011 = vmatprep.subr.bf16.mxu0 %v4010_v39  ;;  %v4066_v13 = vpack.c.bf16 %v439_v11, %v423_v10  ;;  %v438_v15 = vld [vmem:[%s7157_s1 + $0x4a0] sm:$0xff]  ;;  %v455_v16 = vld [vmem:[%s7157_s1 + $0x528] sm:$0xff]  ;;  %4027 = vmatprep.subr.bf16.mxu1 %v4026_v43  ;;  %v453_v9 = vld [vmem:[%s7157_s1 + $0x518] sm:$0xff] }
  0x4f   : > { %v471_v17 = vld [vmem:[%s7157_s1 + $0x5a8] sm:$0xff]  ;;  %v454_v18 = vld [vmem:[%s7157_s1 + $0x520] sm:$0xff]  ;;  %v4068_v20 = vpack.c.bf16 %v438_v15, %v422_v14  ;;  %v469_v10 = vld [vmem:[%s7157_s1 + $0x598] sm:$0xff] }
  0x50   : > { %v470_v19 = vld [vmem:[%s7157_s1 + $0x5a0] sm:$0xff]  ;;  %v487_v21 = vld [vmem:[%s7157_s1 + $0x628] sm:$0xff]  ;;  %v4070_v25 = vpack.c.bf16 %v471_v17, %v455_v16  ;;  %v500_v32 = vld [vmem:[%s7157_s1 + $0x690] sm:$0xff] }
  0x51   : > { %4013 = vmatpush1.bf16.msra.mxu0 %v4012_v44  ;;  %v503_v22 = vld [vmem:[%s7157_s1 + $0x6a8] sm:$0xff]  ;;  %v4072_v37 = vpack.c.bf16 %v470_v19, %v454_v18  ;;  %v486_v38 = vld [vmem:[%s7157_s1 + $0x620] sm:$0xff]  ;;  %v356_v44 = vld [vmem:[%s7157_s1 + $0x210] sm:$0xff]  ;;  %v4038_v18 = vpack.c.bf16 %v469_v10, %v453_v9  ;;  %v4044_v40 = vpack.c.bf16 %v500_v32, %v484_v31 }
  0x52   : > { %4015 = vmatprep.subr.bf16.mxu0 %v4014_v45  ;;  %v502_v39 = vld [vmem:[%s7157_s1 + $0x6a0] sm:$0xff]  ;;  %v4074_v41 = vpack.c.bf16 %v503_v22, %v487_v21  ;;  %v519_v42 = vld [vmem:[%s7157_s1 + $0x728] sm:$0xff]  ;;  %v372_v45 = vld [vmem:[%s7157_s1 + $0x290] sm:$0xff] }
  0x53   : > { %v535_v46 = vld [vmem:[%s7157_s1 + $0x7a8] sm:$0xff]  ;;  %v4076_v49 = vpack.c.bf16 %v502_v39, %v486_v38  ;;  %v4028_v52 = vpack.c.bf16 %v372_v45, %v356_v44  ;;  %v298_v2 = vld [vmem:[%s7157_s1 + $0x40] sm:$0xff]  ;;  %v452_v19 = vld [vmem:[%s7157_s1 + $0x510] sm:$0xff] }
  0x54   : > { %v4078_v53 = vpack.c.bf16 %v535_v46, %v519_v42  ;;  %v299_v54 = vld [vmem:[%s7157_s1 + $0x48] sm:$0xff]  ;;  %v314_v3 = vld [vmem:[%s7157_s1 + $0xc0] sm:$0xff]  ;;  %v485_v21 = vld [vmem:[%s7157_s1 + $0x618] sm:$0xff] }
  0x55   : > { %4017 = vmatpush1.bf16.msra.mxu0 %v4016_v50  ;;  %v518_v50 = vld [vmem:[%s7157_s1 + $0x720] sm:$0xff]  ;;  %v315_v59 = vld [vmem:[%s7157_s1 + $0xc8] sm:$0xff]  ;;  %4029 = vmatpush1.bf16.msra.mxu1 %v4028_v52  ;;  %v4116_v11 = vpack.c.bf16 %v314_v3, %v298_v2  ;;  %v501_v22 = vld [vmem:[%s7157_s1 + $0x698] sm:$0xff] }
  0x56   : > { %4051 = vmatprep.subr.bf16.mxu0 %v4050_v51  ;;  %v534_v51 = vld [vmem:[%s7157_s1 + $0x7a0] sm:$0xff]  ;;  %v331_v4 = vld [vmem:[%s7157_s1 + $0x148] sm:$0xff]  ;;  %4031 = vmatprep.subr.bf16.mxu1 %v4030_v55  ;;  %v4042_v30 = vpack.c.bf16 %v501_v22, %v485_v21  ;;  %v517_v33 = vld [vmem:[%s7157_s1 + $0x718] sm:$0xff] }
  0x57   : > { %v4080_v62 = vpack.c.bf16 %v534_v51, %v518_v50  ;;  %v346_v14 = vld [vmem:[%s7157_s1 + $0x1c0] sm:$0xff]  ;;  %v363_v15 = vld [vmem:[%s7157_s1 + $0x248] sm:$0xff]  ;;  %v533_v34 = vld [vmem:[%s7157_s1 + $0x798] sm:$0xff] }
  0x58   : > { %700 = vmatmul.mubr.f32.vlgmr.msra.gmra.mrb[0].mxu0 %v5188_v56  ;;  %v379_v17 = vld [vmem:[%s7157_s1 + $0x2c8] sm:$0xff]  ;;  %v378_v26 = vld [vmem:[%s7157_s1 + $0x2c0] sm:$0xff]  ;;  %v4046_v42 = vpack.c.bf16 %v533_v34, %v517_v33  ;;  %v516_v43 = vld [vmem:[%s7157_s1 + $0x710] sm:$0xff] }
  0x59   : > { %4053 = vmatpush1.bf16.msra.mxu0 %v4052_v57  ;;  %841 = vmatprep.mubr.f32.mxu0 %v4939_v0  ;;  %v388_v57 = vld [vmem:[%s7157_s1 + $0x310] sm:$0xff]  ;;  %v4122_v24 = vpack.c.bf16 %v379_v17, %v363_v15  ;;  %v395_v27 = vld [vmem:[%s7157_s1 + $0x348] sm:$0xff]  ;;  %v410_v38 = vld [vmem:[%s7157_s1 + $0x3c0] sm:$0xff] }
  0x5a   : > { %4055 = vmatprep.subr.bf16.mxu0 %v4054_v58  ;;  %v404_v58 = vld [vmem:[%s7157_s1 + $0x390] sm:$0xff]  ;;  %v411_v29 = vld [vmem:[%s7157_s1 + $0x3c8] sm:$0xff]  ;;  %v297_v45 = vld [vmem:[%s7157_s1 + $0x38] sm:$0xff] }
  0x5b   : > { %v4126_v36 = vpack.c.bf16 %v411_v29, %v395_v27  ;;  %v427_v39 = vld [vmem:[%s7157_s1 + $0x448] sm:$0xff]  ;;  %v532_v44 = vld [vmem:[%s7157_s1 + $0x790] sm:$0xff]  ;;  %v313_v46 = vld [vmem:[%s7157_s1 + $0xb8] sm:$0xff] }
  0x5c   : > { %v442_v50 = vld [vmem:[%s7157_s1 + $0x4c0] sm:$0xff]  ;;  %v459_v51 = vld [vmem:[%s7157_s1 + $0x548] sm:$0xff]  ;;  %v4048_v52 = vpack.c.bf16 %v532_v44, %v516_v43  ;;  %v296_v55 = vld [vmem:[%s7157_s1 + $0x30] sm:$0xff] }
  0x5d   : > { %4057 = vmatpush1.bf16.msra.mxu0 %v4056_v63  ;;  %v4032_v63 = vpack.c.bf16 %v404_v58, %v388_v57  ;;  %v312_v57 = vld [vmem:[%s7157_s1 + $0xb0] sm:$0xff]  ;;  %v329_v58 = vld [vmem:[%s7157_s1 + $0x138] sm:$0xff]  ;;  %v507_v3 = vld [vmem:[%s7157_s1 + $0x6c8] sm:$0xff] }
  0x5e   : > { %4059 = vmatprep.subr.bf16.mxu0 %v4058_v1  ;;  %v4114_v1 = vpack.c.bf16 %v315_v59, %v299_v54  ;;  %v4082_v54 = vpack.c.bf16 %v313_v46, %v297_v45  ;;  %v345_v59 = vld [vmem:[%s7157_s1 + $0x1b8] sm:$0xff]  ;;  %v4084_v2 = vpack.c.bf16 %v312_v57, %v296_v55  ;;  %v539_v15 = vld [vmem:[%s7157_s1 + $0x7c8] sm:$0xff]  ;;  %v360_v17 = vld [vmem:[%s7157_s1 + $0x230] sm:$0xff] }
  0x5f   : > { %4033 = vmatpush1.bf16.msra.mxu1 %v4032_v63  ;;  %v474_v63 = vld [vmem:[%s7157_s1 + $0x5c0] sm:$0xff]  ;;  %v319_v27 = vld [vmem:[%s7157_s1 + $0xe8] sm:$0xff]  ;;  %v392_v29 = vld [vmem:[%s7157_s1 + $0x330] sm:$0xff] }
  0x60   : > { %4035 = vmatprep.subr.bf16.mxu1 %v4034_v5  ;;  %v328_v5 = vld [vmem:[%s7157_s1 + $0x130] sm:$0xff]  ;;  %v425_v31 = vld [vmem:[%s7157_s1 + $0x438] sm:$0xff] }
  0x61   : > { %4061 = vmatpush1.bf16.msra.mxu0 %v4060_v6  ;;  %v347_v6 = vld [vmem:[%s7157_s1 + $0x1c8] sm:$0xff]  ;;  %v441_v32 = vld [vmem:[%s7157_s1 + $0x4b8] sm:$0xff] }
  0x62   : > { %4063 = vmatprep.subr.bf16.mxu0 %v4062_v7  ;;  %v420_v7 = vld [vmem:[%s7157_s1 + $0x410] sm:$0xff]  ;;  %v457_v43 = vld [vmem:[%s7157_s1 + $0x538] sm:$0xff] }
  0x63   : > { %v4036_v16 = vpack.c.bf16 %v436_v8, %v420_v7  ;;  %v361_v7 = vld [vmem:[%s7157_s1 + $0x238] sm:$0xff] }
  0x64   : > { %v377_v8 = vld [vmem:[%s7157_s1 + $0x2b8] sm:$0xff] }
  0x65   : > { %4065 = vmatpush1.bf16.msra.mxu0 %v4064_v12  ;;  %v4118_v12 = vpack.c.bf16 %v347_v6, %v331_v4  ;;  %4037 = vmatpush1.bf16.msra.mxu1 %v4036_v16  ;;  %v4086_v4 = vpack.c.bf16 %v345_v59, %v329_v58  ;;  %v344_v6 = vld [vmem:[%s7157_s1 + $0x1b0] sm:$0xff]  ;;  %v4090_v16 = vpack.c.bf16 %v377_v8, %v361_v7  ;;  %v473_v44 = vld [vmem:[%s7157_s1 + $0x5b8] sm:$0xff] }
  0x66   : > { %4067 = vmatprep.subr.bf16.mxu0 %v4066_v13  ;;  %v330_v13 = vld [vmem:[%s7157_s1 + $0x140] sm:$0xff]  ;;  %4039 = vmatprep.subr.bf16.mxu1 %v4038_v18  ;;  %v376_v18 = vld [vmem:[%s7157_s1 + $0x2b0] sm:$0xff]  ;;  %v489_v55 = vld [vmem:[%s7157_s1 + $0x638] sm:$0xff] }
  0x67   : > { %v4120_v23 = vpack.c.bf16 %v346_v14, %v330_v13  ;;  %v523_v13 = vld [vmem:[%s7157_s1 + $0x748] sm:$0xff]  ;;  %v4088_v14 = vpack.c.bf16 %v344_v6, %v328_v5  ;;  %v505_v57 = vld [vmem:[%s7157_s1 + $0x6b8] sm:$0xff] }
  0x68   : > { %v4142_v22 = vpack.c.bf16 %v539_v15, %v523_v13  ;;  %v521_v5 = vld [vmem:[%s7157_s1 + $0x738] sm:$0xff]  ;;  %v447_v13 = vld [vmem:[%s7157_s1 + $0x4e8] sm:$0xff]  ;;  %v520_v15 = vld [vmem:[%s7157_s1 + $0x730] sm:$0xff] }
  0x69   : > { %4069 = vmatpush1.bf16.msra.mxu0 %v4068_v20  ;;  %v468_v20 = vld [vmem:[%s7157_s1 + $0x590] sm:$0xff]  ;;  %v537_v6 = vld [vmem:[%s7157_s1 + $0x7b8] sm:$0xff] }
  0x6a   : > { %4071 = vmatprep.subr.bf16.mxu0 %v4070_v25  ;;  %v362_v25 = vld [vmem:[%s7157_s1 + $0x240] sm:$0xff]  ;;  %v4040_v28 = vpack.c.bf16 %v468_v20, %v452_v19  ;;  %v393_v19 = vld [vmem:[%s7157_s1 + $0x338] sm:$0xff] }
  0x6b   : > { %v4124_v35 = vpack.c.bf16 %v378_v26, %v362_v25  ;;  %v409_v20 = vld [vmem:[%s7157_s1 + $0x3b8] sm:$0xff]  ;;  %v303_v25 = vld [vmem:[%s7157_s1 + $0x68] sm:$0xff]  ;;  %v4092_v26 = vpack.c.bf16 %v376_v18, %v360_v17 }
  0x6c   : > { %4041 = vmatpush1.bf16.msra.mxu1 %v4040_v28  ;;  %v4094_v28 = vpack.c.bf16 %v409_v20, %v393_v19  ;;  %v4178_v34 = vpack.c.bf16 %v319_v27, %v303_v25  ;;  %v301_v17 = vld [vmem:[%s7157_s1 + $0x58] sm:$0xff]  ;;  %v479_v25 = vld [vmem:[%s7157_s1 + $0x5e8] sm:$0xff]  ;;  %v300_v27 = vld [vmem:[%s7157_s1 + $0x50] sm:$0xff] }
  0x6d   : > { %4073 = vmatpush1.bf16.msra.mxu0 %v4072_v37  ;;  %v394_v37 = vld [vmem:[%s7157_s1 + $0x340] sm:$0xff]  ;;  %4043 = vmatprep.subr.bf16.mxu1 %v4042_v30  ;;  %v408_v30 = vld [vmem:[%s7157_s1 + $0x3b0] sm:$0xff]  ;;  %v317_v18 = vld [vmem:[%s7157_s1 + $0xd8] sm:$0xff] }
  0x6e   : > { %4075 = vmatprep.subr.bf16.mxu0 %v4074_v41  ;;  %v443_v41 = vld [vmem:[%s7157_s1 + $0x4c8] sm:$0xff]  ;;  %v4128_v47 = vpack.c.bf16 %v410_v38, %v394_v37  ;;  %v4096_v38 = vpack.c.bf16 %v408_v30, %v392_v29  ;;  %v333_v29 = vld [vmem:[%s7157_s1 + $0x158] sm:$0xff] }
  0x6f   : > { %v4130_v48 = vpack.c.bf16 %v443_v41, %v427_v39  ;;  %v335_v37 = vld [vmem:[%s7157_s1 + $0x168] sm:$0xff]  ;;  %v424_v41 = vld [vmem:[%s7157_s1 + $0x430] sm:$0xff]  ;;  %v349_v30 = vld [vmem:[%s7157_s1 + $0x1d8] sm:$0xff] }
  0x70   : > { %4045 = vmatpush1.bf16.msra.mxu1 %v4044_v40  ;;  %v351_v39 = vld [vmem:[%s7157_s1 + $0x1e8] sm:$0xff]  ;;  %v4098_v40 = vpack.c.bf16 %v441_v32, %v425_v31 }
  0x71   : > { %4077 = vmatpush1.bf16.msra.mxu0 %v4076_v49  ;;  %v426_v49 = vld [vmem:[%s7157_s1 + $0x440] sm:$0xff]  ;;  %4047 = vmatprep.subr.bf16.mxu1 %v4046_v42  ;;  %v440_v42 = vld [vmem:[%s7157_s1 + $0x4b0] sm:$0xff]  ;;  %v4182_v46 = vpack.c.bf16 %v351_v39, %v335_v37  ;;  %v511_v37 = vld [vmem:[%s7157_s1 + $0x6e8] sm:$0xff] }
  0x72   : > { %4079 = vmatprep.subr.bf16.mxu0 %v4078_v53  ;;  %v475_v53 = vld [vmem:[%s7157_s1 + $0x5c8] sm:$0xff]  ;;  %v4132_v60 = vpack.c.bf16 %v442_v50, %v426_v49  ;;  %v4100_v50 = vpack.c.bf16 %v440_v42, %v424_v41  ;;  %v332_v39 = vld [vmem:[%s7157_s1 + $0x150] sm:$0xff]  ;;  %v365_v41 = vld [vmem:[%s7157_s1 + $0x258] sm:$0xff] }
  0x73   : > { %v4134_v61 = vpack.c.bf16 %v475_v53, %v459_v51  ;;  %v367_v49 = vld [vmem:[%s7157_s1 + $0x268] sm:$0xff]  ;;  %v456_v53 = vld [vmem:[%s7157_s1 + $0x530] sm:$0xff]  ;;  %v381_v42 = vld [vmem:[%s7157_s1 + $0x2d8] sm:$0xff] }
  0x74   : > { %4049 = vmatpush1.bf16.msra.mxu1 %v4048_v52  ;;  %v383_v51 = vld [vmem:[%s7157_s1 + $0x2e8] sm:$0xff]  ;;  %v4102_v52 = vpack.c.bf16 %v473_v44, %v457_v43 }
  0x75   : > { %4081 = vmatpush1.bf16.msra.mxu0 %v4080_v62  ;;  %v458_v62 = vld [vmem:[%s7157_s1 + $0x540] sm:$0xff]  ;;  %4083 = vmatprep.subr.bf16.mxu1 %v4082_v54  ;;  %v472_v54 = vld [vmem:[%s7157_s1 + $0x5b0] sm:$0xff]  ;;  %v4186_v59 = vpack.c.bf16 %v383_v51, %v367_v49  ;;  %v543_v49 = vld [vmem:[%s7157_s1 + $0x7e8] sm:$0xff] }
  0x76   : > { %4115 = vmatprep.subr.bf16.mxu0 %v4114_v1  ;;  %v491_v1 = vld [vmem:[%s7157_s1 + $0x648] sm:$0xff]  ;;  %v4136_v9 = vpack.c.bf16 %v474_v63, %v458_v62  ;;  %v4104_v63 = vpack.c.bf16 %v472_v54, %v456_v53  ;;  %v364_v51 = vld [vmem:[%s7157_s1 + $0x250] sm:$0xff]  ;;  %v397_v53 = vld [vmem:[%s7157_s1 + $0x358] sm:$0xff] }
  0x77   : > { %771 = vmatmul.mubr.f32.vlgmr.msra.gmra.mrb[0].mxu1 %v5188_v56  ;;  %v4138_v10 = vpack.c.bf16 %v507_v3, %v491_v1  ;;  %v399_v62 = vld [vmem:[%s7157_s1 + $0x368] sm:$0xff]  ;;  %v488_v3 = vld [vmem:[%s7157_s1 + $0x630] sm:$0xff]  ;;  %v413_v54 = vld [vmem:[%s7157_s1 + $0x3d8] sm:$0xff] }
  0x78   : > { %842 = vmatmul.mubr.f32.vlgmr.msra.gmra.mrb[2].mxu0 %v5188_v56  ;;  %4085 = vmatpush1.bf16.msra.mxu1 %v4084_v2  ;;  %v415_v1 = vld [vmem:[%s7157_s1 + $0x3e8] sm:$0xff]  ;;  %v4106_v2 = vpack.c.bf16 %v505_v57, %v489_v55 }
  0x79   : > { %4117 = vmatpush1.bf16.msra.mxu0 %v4116_v11  ;;  %983 = vmatprep.mubr.f32.mxu0 %v4939_v0  ;;  %v490_v11 = vld [vmem:[%s7157_s1 + $0x640] sm:$0xff]  ;;  %v4190_v8 = vpack.c.bf16 %v415_v1, %v399_v62  ;;  %v396_v62 = vld [vmem:[%s7157_s1 + $0x350] sm:$0xff]  ;;  %v429_v1 = vld [vmem:[%s7157_s1 + $0x458] sm:$0xff] }
  0x7a   : > { %4119 = vmatprep.subr.bf16.mxu0 %v4118_v12  ;;  %v506_v12 = vld [vmem:[%s7157_s1 + $0x6c0] sm:$0xff]  ;;  %4087 = vmatprep.subr.bf16.mxu1 %v4086_v4  ;;  %v504_v4 = vld [vmem:[%s7157_s1 + $0x6b0] sm:$0xff] }
  0x7b   : > { %912 = vmatprep.mubr.f32.mxu1 %v4939_v0  ;;  %v4140_v21 = vpack.c.bf16 %v506_v12, %v490_v11  ;;  %v431_v11 = vld [vmem:[%s7157_s1 + $0x468] sm:$0xff]  ;;  %v4108_v12 = vpack.c.bf16 %v504_v4, %v488_v3  ;;  %v1203_v4 = vld [vmem:[%s7158_s2] sm:$0xff] }
  0x7c   : > { %4089 = vmatpush1.bf16.msra.mxu1 %v4088_v14  ;;  %v4110_v14 = vpack.c.bf16 %v537_v6, %v521_v5  ;;  %v4194_v20 = vpack.c.bf16 %v447_v13, %v431_v11  ;;  %v1204_v5 = vld [vmem:[%s7158_s2 + $0x8] sm:$0xff]  ;;  %v477_v11 = vld [vmem:[%s7157_s1 + $0x5d8] sm:$0xff]  ;;  %v4940_v13 = vmov 0.0|0.0  }
  0x7d   : > { %4121 = vmatpush1.bf16.msra.mxu0 %v4120_v23  ;;  %v522_v23 = vld [vmem:[%s7157_s1 + $0x740] sm:$0xff]  ;;  %4091 = vmatprep.subr.bf16.mxu1 %v4090_v16  ;;  %v536_v16 = vld [vmem:[%s7157_s1 + $0x7b0] sm:$0xff] }
  0x7e   : > { %4123 = vmatprep.subr.bf16.mxu0 %v4122_v24  ;;  %v538_v24 = vld [vmem:[%s7157_s1 + $0x7c0] sm:$0xff] }
  0x7f   : > { %v4144_v33 = vpack.c.bf16 %v538_v24, %v522_v23  ;;  %v463_v23 = vld [vmem:[%s7157_s1 + $0x568] sm:$0xff]  ;;  %v4112_v24 = vpack.c.bf16 %v536_v16, %v520_v15  ;;  %v1206_v15 = vld [vmem:[%s7158_s2 + $0x18] sm:$0xff] }
  0x80   : > { %4093 = vmatpush1.bf16.msra.mxu1 %v4092_v26  ;;  %v4146_v26 = vpack.c.bf16 %v317_v18, %v301_v17  ;;  %v4198_v32 = vpack.c.bf16 %v479_v25, %v463_v23  ;;  %v460_v18 = vld [vmem:[%s7157_s1 + $0x550] sm:$0xff]  ;;  %v1207_v23 = vld [vmem:[%s7158_s2 + $0x20] sm:$0xff] }
  0x81   : > { %4125 = vmatpush1.bf16.msra.mxu0 %v4124_v35  ;;  %v302_v35 = vld [vmem:[%s7157_s1 + $0x60] sm:$0xff]  ;;  %4095 = vmatprep.subr.bf16.mxu1 %v4094_v28  ;;  %v316_v28 = vld [vmem:[%s7157_s1 + $0xd0] sm:$0xff] }
  0x82   : > { %4127 = vmatprep.subr.bf16.mxu0 %v4126_v36  ;;  %v318_v36 = vld [vmem:[%s7157_s1 + $0xe0] sm:$0xff] }
  0x83   : > { %v4180_v45 = vpack.c.bf16 %v318_v36, %v302_v35  ;;  %v495_v35 = vld [vmem:[%s7157_s1 + $0x668] sm:$0xff]  ;;  %v4148_v36 = vpack.c.bf16 %v316_v28, %v300_v27  ;;  %v492_v27 = vld [vmem:[%s7157_s1 + $0x650] sm:$0xff] }
  0x84   : > { %4097 = vmatpush1.bf16.msra.mxu1 %v4096_v38  ;;  %v4150_v38 = vpack.c.bf16 %v349_v30, %v333_v29  ;;  %v4202_v44 = vpack.c.bf16 %v511_v37, %v495_v35  ;;  %v508_v28 = vld [vmem:[%s7157_s1 + $0x6d0] sm:$0xff]  ;;  %v525_v29 = vld [vmem:[%s7157_s1 + $0x758] sm:$0xff] }
  0x85   : > { %4129 = vmatpush1.bf16.msra.mxu0 %v4128_v47  ;;  %v334_v47 = vld [vmem:[%s7157_s1 + $0x160] sm:$0xff]  ;;  %4099 = vmatprep.subr.bf16.mxu1 %v4098_v40  ;;  %v348_v40 = vld [vmem:[%s7157_s1 + $0x1d0] sm:$0xff]  ;;  %v541_v30 = vld [vmem:[%s7157_s1 + $0x7d8] sm:$0xff] }
  0x86   : > { %4131 = vmatprep.subr.bf16.mxu0 %v4130_v48  ;;  %v350_v48 = vld [vmem:[%s7157_s1 + $0x1e0] sm:$0xff]  ;;  %v4174_v35 = vpack.c.bf16 %v541_v30, %v525_v29  ;;  %v540_v37 = vld [vmem:[%s7157_s1 + $0x7d0] sm:$0xff]  ;;  %v529_v30 = vld [vmem:[%s7157_s1 + $0x778] sm:$0xff] }
  0x87   : > { %v4184_v58 = vpack.c.bf16 %v350_v48, %v334_v47  ;;  %v527_v47 = vld [vmem:[%s7157_s1 + $0x768] sm:$0xff]  ;;  %v4152_v48 = vpack.c.bf16 %v348_v40, %v332_v39  ;;  %v321_v39 = vld [vmem:[%s7157_s1 + $0xf8] sm:$0xff]  ;;  %v512_v29 = vld [vmem:[%s7157_s1 + $0x6f0] sm:$0xff] }
  0x88   : > { %4101 = vmatpush1.bf16.msra.mxu1 %v4100_v50  ;;  %v4154_v50 = vpack.c.bf16 %v381_v42, %v365_v41  ;;  %v4206_v57 = vpack.c.bf16 %v543_v49, %v527_v47  ;;  %v1211_v41 = vld [vmem:[%s7158_s2 + $0x40] sm:$0xff]  ;;  %v1212_v42 = vld [vmem:[%s7158_s2 + $0x48] sm:$0xff]  ;;  %v337_v47 = vld [vmem:[%s7157_s1 + $0x178] sm:$0xff] }
  0x89   : > { %4133 = vmatpush1.bf16.msra.mxu0 %v4132_v60  ;;  %v366_v60 = vld [vmem:[%s7157_s1 + $0x260] sm:$0xff]  ;;  %4103 = vmatprep.subr.bf16.mxu1 %v4102_v52  ;;  %v380_v52 = vld [vmem:[%s7157_s1 + $0x2d0] sm:$0xff]  ;;  %v4255_v49 = vpack.c.bf16 %v1212_v42, %v1211_v41 }
  0x8a   : > { %4135 = vmatprep.subr.bf16.mxu0 %v4134_v61  ;;  %v382_v61 = vld [vmem:[%s7157_s1 + $0x2e0] sm:$0xff] }
  0x8b   : > { %v4188_v7 = vpack.c.bf16 %v382_v61, %v366_v60  ;;  %v4156_v60 = vpack.c.bf16 %v380_v52, %v364_v51  ;;  %v4158_v61 = vpack.c.bf16 %v413_v54, %v397_v53  ;;  %v1214_v51 = vld [vmem:[%s7158_s2 + $0x58] sm:$0xff]  ;;  %v336_v54 = vld [vmem:[%s7157_s1 + $0x170] sm:$0xff] }
  0x8c   : > { %4105 = vmatpush1.bf16.msra.mxu1 %v4104_v63  ;;  %v412_v63 = vld [vmem:[%s7157_s1 + $0x3d0] sm:$0xff] }
  0x8d   : > { %4137 = vmatpush1.bf16.msra.mxu0 %v4136_v9  ;;  %v398_v9 = vld [vmem:[%s7157_s1 + $0x360] sm:$0xff]  ;;  %4107 = vmatprep.subr.bf16.mxu1 %v4106_v2  ;;  %v445_v2 = vld [vmem:[%s7157_s1 + $0x4d8] sm:$0xff]  ;;  %v4160_v6 = vpack.c.bf16 %v412_v63, %v396_v62 }
  0x8e   : > { %4139 = vmatprep.subr.bf16.mxu0 %v4138_v10  ;;  %v414_v10 = vld [vmem:[%s7157_s1 + $0x3e0] sm:$0xff] }
  0x8f   : > { %v4192_v19 = vpack.c.bf16 %v414_v10, %v398_v9  ;;  %v444_v9 = vld [vmem:[%s7157_s1 + $0x4d0] sm:$0xff]  ;;  %v461_v10 = vld [vmem:[%s7157_s1 + $0x558] sm:$0xff] }
  0x90   : > { %4109 = vmatpush1.bf16.msra.mxu1 %v4108_v12  ;;  %v4243_v12 = vpack.c.bf16 %v1204_v5, %v1203_v4  ;;  %v4166_v17 = vpack.c.bf16 %v477_v11, %v461_v10  ;;  %v417_v4 = vld [vmem:[%s7157_s1 + $0x3f8] sm:$0xff]  ;;  %v416_v10 = vld [vmem:[%s7157_s1 + $0x3f0] sm:$0xff] }
  0x91   : > { %4141 = vmatpush1.bf16.msra.mxu0 %v4140_v21  ;;  %v430_v21 = vld [vmem:[%s7157_s1 + $0x460] sm:$0xff]  ;;  %4111 = vmatprep.subr.bf16.mxu1 %v4110_v14  ;;  %v1205_v14 = vld [vmem:[%s7158_s2 + $0x10] sm:$0xff]  ;;  %v433_v11 = vld [vmem:[%s7157_s1 + $0x478] sm:$0xff] }
  0x92   : > { %4143 = vmatprep.subr.bf16.mxu0 %v4142_v22  ;;  %v446_v22 = vld [vmem:[%s7157_s1 + $0x4e0] sm:$0xff] }
  0x93   : > { %v4196_v31 = vpack.c.bf16 %v446_v22, %v430_v21  ;;  %v509_v21 = vld [vmem:[%s7157_s1 + $0x6d8] sm:$0xff]  ;;  %v4246_v22 = vpack.c.bf16 %v1206_v15, %v1205_v14 }
  0x94   : > { %4113 = vmatpush1.bf16.msra.mxu1 %v4112_v24  ;;  %v1208_v24 = vld [vmem:[%s7158_s2 + $0x28] sm:$0xff] }
  0x95   : > { %4145 = vmatpush1.bf16.msra.mxu0 %v4144_v33  ;;  %v462_v33 = vld [vmem:[%s7157_s1 + $0x560] sm:$0xff]  ;;  %4147 = vmatprep.subr.bf16.mxu1 %v4146_v26 }
  0x96   : > { %4179 = vmatprep.subr.bf16.mxu0 %v4178_v34  ;;  %v478_v34 = vld [vmem:[%s7157_s1 + $0x5e0] sm:$0xff] }
  0x97   : > { %v4200_v43 = vpack.c.bf16 %v478_v34, %v462_v33  ;;  %913 = vmatmul.mubr.f32.vlgmr.msra.gmra.mrb[2].mxu1 %v5188_v56  ;;  %v1210_v33 = vld [vmem:[%s7158_s2 + $0x38] sm:$0xff]  ;;  %v4172_v34 = vpack.c.bf16 %v508_v28, %v492_v27  ;;  %v496_v28 = vld [vmem:[%s7157_s1 + $0x670] sm:$0xff] }
  0x98   : > { %984 = vmatmul.mubr.f32.vlgmr.msra.gmra.mrb[4].mxu0 %v5188_v56  ;;  %4149 = vmatpush1.bf16.msra.mxu1 %v4148_v36  ;;  %v524_v36 = vld [vmem:[%s7157_s1 + $0x750] sm:$0xff] }
  0x99   : > { %4181 = vmatpush1.bf16.msra.mxu0 %v4180_v45  ;;  %1125 = vmatprep.mubr.f32.mxu0 %v4939_v0  ;;  %v494_v45 = vld [vmem:[%s7157_s1 + $0x660] sm:$0xff] }
  0x9a   : > { %4183 = vmatprep.subr.bf16.mxu0 %v4182_v46  ;;  %v510_v46 = vld [vmem:[%s7157_s1 + $0x6e0] sm:$0xff]  ;;  %4151 = vmatprep.subr.bf16.mxu1 %v4150_v38  ;;  %v305_v38 = vld [vmem:[%s7157_s1 + $0x78] sm:$0xff] }
  0x9b   : > { %1054 = vmatprep.mubr.f32.mxu1 %v4939_v0  ;;  %v4204_v55 = vpack.c.bf16 %v510_v46, %v494_v45  ;;  %v304_v45 = vld [vmem:[%s7157_s1 + $0x70] sm:$0xff] }
  0x9c   : > { %4153 = vmatpush1.bf16.msra.mxu1 %v4152_v48  ;;  %v320_v46 = vld [vmem:[%s7157_s1 + $0xf0] sm:$0xff]  ;;  %v353_v48 = vld [vmem:[%s7157_s1 + $0x1f8] sm:$0xff] }
  0x9d   : > { %4185 = vmatpush1.bf16.msra.mxu0 %v4184_v58  ;;  %v526_v58 = vld [vmem:[%s7157_s1 + $0x760] sm:$0xff]  ;;  %4155 = vmatprep.subr.bf16.mxu1 %v4154_v50  ;;  %v1213_v50 = vld [vmem:[%s7158_s2 + $0x50] sm:$0xff]  ;;  %v4212_v52 = vpack.c.bf16 %v320_v46, %v304_v45  ;;  %v4214_v53 = vpack.c.bf16 %v353_v48, %v337_v47 }
  0x9e   : > { %4187 = vmatprep.subr.bf16.mxu0 %v4186_v59  ;;  %v542_v59 = vld [vmem:[%s7157_s1 + $0x7e0] sm:$0xff] }
  0x9f   : > { %v4208_v3 = vpack.c.bf16 %v542_v59, %v526_v58  ;;  %v385_v58 = vld [vmem:[%s7157_s1 + $0x2f8] sm:$0xff]  ;;  %v4258_v59 = vpack.c.bf16 %v1214_v51, %v1213_v50 }
  0xa0   : > { %4157 = vmatpush1.bf16.msra.mxu1 %v4156_v60  ;;  %v1215_v60 = vld [vmem:[%s7158_s2 + $0x60] sm:$0xff] }
  0xa1   : > { %4189 = vmatpush1.bf16.msra.mxu0 %v4188_v7  ;;  %4159 = vmatprep.subr.bf16.mxu1 %v4158_v61  ;;  %v4162_v7 = vpack.c.bf16 %v445_v2, %v429_v1  ;;  %v1216_v61 = vld [vmem:[%s7158_s2 + $0x68] sm:$0xff]  ;;  %v368_v1 = vld [vmem:[%s7157_s1 + $0x270] sm:$0xff] }
  0xa2   : > { %4191 = vmatprep.subr.bf16.mxu0 %v4190_v8  ;;  %v428_v8 = vld [vmem:[%s7157_s1 + $0x450] sm:$0xff]  ;;  %v4261_v5 = vpack.c.bf16 %v1216_v61, %v1215_v60  ;;  %v1640_v61 = vld [vmem:[#allocation2 + $0x188] sm:$0xff] }
  0xa3   : > { %v4164_v16 = vpack.c.bf16 %v444_v9, %v428_v8  ;;  %v384_v2 = vld [vmem:[%s7157_s1 + $0x2f0] sm:$0xff] }
  0xa4   : > { %4161 = vmatpush1.bf16.msra.mxu1 %v4160_v6  ;;  %v1217_v6 = vld [vmem:[%s7158_s2 + $0x70] sm:$0xff] }
  0xa5   : > { %4193 = vmatpush1.bf16.msra.mxu0 %v4192_v19  ;;  %4163 = vmatprep.subr.bf16.mxu1 %v4162_v7  ;;  %v476_v19 = vld [vmem:[%s7157_s1 + $0x5d0] sm:$0xff]  ;;  %v4220_v7 = vpack.c.bf16 %v384_v2, %v368_v1 }
  0xa6   : > { %4195 = vmatprep.subr.bf16.mxu0 %v4194_v20  ;;  %v493_v20 = vld [vmem:[%s7157_s1 + $0x658] sm:$0xff]  ;;  %v4168_v25 = vpack.c.bf16 %v476_v19, %v460_v18  ;;  %v400_v9 = vld [vmem:[%s7157_s1 + $0x370] sm:$0xff] }
  0xa7   : > { %v4170_v26 = vpack.c.bf16 %v509_v21, %v493_v20  ;;  %v4224_v15 = vpack.c.bf16 %v416_v10, %v400_v9  ;;  %v448_v18 = vld [vmem:[%s7157_s1 + $0x4f0] sm:$0xff]  ;;  %v465_v19 = vld [vmem:[%s7157_s1 + $0x578] sm:$0xff] }
  0xa8   : > { %4165 = vmatpush1.bf16.msra.mxu1 %v4164_v16 }
  0xa9   : > { %4197 = vmatpush1.bf16.msra.mxu0 %v4196_v31  ;;  %4167 = vmatprep.subr.bf16.mxu1 %v4166_v17  ;;  %v4249_v31 = vpack.c.bf16 %v1208_v24, %v1207_v23  ;;  %v432_v17 = vld [vmem:[%s7157_s1 + $0x470] sm:$0xff]  ;;  %v497_v24 = vld [vmem:[%s7157_s1 + $0x678] sm:$0xff] }
  0xaa   : > { %4199 = vmatprep.subr.bf16.mxu0 %v4198_v32  ;;  %v1209_v32 = vld [vmem:[%s7158_s2 + $0x30] sm:$0xff]  ;;  %v4228_v20 = vpack.c.bf16 %v448_v18, %v432_v17  ;;  %v1611_v17 = vld [vmem:[#allocation2 + $0xa0] sm:$0xff]  ;;  %v1612_v18 = vld [vmem:[#allocation2 + $0xa8] sm:$0xff] }
  0xab   : > { %v4252_v40 = vpack.c.bf16 %v1210_v33, %v1209_v32  ;;  %v480_v23 = vld [vmem:[%s7157_s1 + $0x5f0] sm:$0xff]  ;;  %v4236_v32 = vpack.c.bf16 %v512_v29, %v496_v28 }
  0xac   : > { %4169 = vmatpush1.bf16.msra.mxu1 %v4168_v25  ;;  %v513_v25 = vld [vmem:[%s7157_s1 + $0x6f8] sm:$0xff] }
  0xad   : > { %4201 = vmatpush1.bf16.msra.mxu0 %v4200_v43  ;;  %4171 = vmatprep.subr.bf16.mxu1 %v4170_v26  ;;  %v4176_v43 = vpack.c.bf16 %v540_v37, %v524_v36  ;;  %v4234_v27 = vpack.c.bf16 %v513_v25, %v497_v24  ;;  %v546_v25 = vld [vmem:[%s7159_s3] ss:$8 sm:$0xf] }
  0xae   : > { %4203 = vmatprep.subr.bf16.mxu0 %v4202_v44  ;;  %v4210_v44 = vpack.c.bf16 %v321_v39, %v305_v38  ;;  %v4942_v39 = vmov 0  }
  0xaf   : > { %4834 = vset.pattern.permute.xlu0 %v4942_v39  ;;  %4835 = vset.pattern.permute.xlu1 %v4942_v39 }
  0xb0   : > { %4173 = vmatpush1.bf16.msra.mxu1 %v4172_v34  ;;  %v528_v34 = vld [vmem:[%s7157_s1 + $0x770] sm:$0xff] }
  0xb1   : > { %4205 = vmatpush1.bf16.msra.mxu0 %v4204_v55  ;;  %4175 = vmatprep.subr.bf16.mxu1 %v4174_v35  ;;  %v352_v55 = vld [vmem:[%s7157_s1 + $0x1f0] sm:$0xff] }
  0xb2   : > { %4207 = vmatprep.subr.bf16.mxu0 %v4206_v57  ;;  %v369_v57 = vld [vmem:[%s7157_s1 + $0x278] sm:$0xff]  ;;  %v4216_v62 = vpack.c.bf16 %v352_v55, %v336_v54  ;;  %v544_v35 = vld [vmem:[%s7157_s1 + $0x7f0] sm:$0xff] }
  0xb3   : > { %v4218_v63 = vpack.c.bf16 %v385_v58, %v369_v57  ;;  %v4240_v36 = vpack.c.bf16 %v544_v35, %v528_v34  ;;  %v1607_v57 = vld [vmem:[#allocation2 + $0x80] sm:$0xff]  ;;  %v1608_v58 = vld [vmem:[#allocation2 + $0x88] sm:$0xff] }
  0xb4   : > { %4177 = vmatpush1.bf16.msra.mxu1 %v4176_v43  ;;  %v4266_v60 = vpack.c.bf16 %v1608_v58, %v1607_v57 }
  0xb5   : > { %4209 = vmatpush1.bf16.msra.mxu0 %v4208_v3  ;;  %4211 = vmatprep.subr.bf16.mxu1 %v4210_v44  ;;  %v401_v3 = vld [vmem:[%s7157_s1 + $0x378] sm:$0xff] }
  0xb6   : > { %4242 = vmatprep.subr.bf16.mxu0 %v4940_v13  ;;  %v4222_v8 = vpack.c.bf16 %v417_v4, %v401_v3  ;;  %v1623_v3 = vld [vmem:[#allocation2 + $0x100] sm:$0xff]  ;;  %v1624_v4 = vld [vmem:[#allocation2 + $0x108] sm:$0xff] }
  0xb7   : > { %1055 = vmatmul.mubr.f32.vlgmr.msra.gmra.mrb[4].mxu1 %v5188_v56 }
  0xb8   : > { %1126 = vmatmul.mubr.f32.vlgmr.msra.gmra.mrb[6].mxu0 %v5188_v56  ;;  %4213 = vmatpush1.bf16.msra.mxu1 %v4212_v52 }
  0xb9   : > { %4244 = vmatpush3.bf16.msra.mxu0 %v4243_v12  ;;  %3983 = vmatprep.mubr.msk.f32.mxu0 %vm4941_vm0, %v4939_v0  ;;  %v449_v12 = vld [vmem:[%s7157_s1 + $0x4f8] sm:$0xff] }
  0xba   : > { %4245 = vmatprep.subr.bf16.mxu0 %v4940_v13  ;;  %4215 = vmatprep.subr.bf16.mxu1 %v4214_v53  ;;  %v4226_v16 = vpack.c.bf16 %v449_v12, %v433_v11  ;;  %v1593_v11 = vld [vmem:[#allocation2 + $0x10] sm:$0xff]  ;;  %v1594_v12 = vld [vmem:[#allocation2 + $0x18] sm:$0xff] }
  0xbb   : > { %1196 = vmatprep.mubr.f32.mxu1 %v4939_v0  ;;  %v1218_v0 = vld [vmem:[%s7158_s2 + $0x78] sm:$0xff] }
  0xbc   : > { %4217 = vmatpush1.bf16.msra.mxu1 %v4216_v62  ;;  %v4264_v14 = vpack.c.bf16 %v1218_v0, %v1217_v6  ;;  %v1591_v62 = vld [vmem:[#allocation2] sm:$0xff]  ;;  %v4300_v6 = vpack.c.bf16 %v1624_v4, %v1623_v3  ;;  %v1610_v0 = vld [vmem:[#allocation2 + $0x98] sm:$0xff] }
  0xbd   : > { %4247 = vmatpush3.bf16.msra.mxu0 %v4246_v22  ;;  %4219 = vmatprep.subr.bf16.mxu1 %v4218_v63  ;;  %v464_v22 = vld [vmem:[%s7157_s1 + $0x570] sm:$0xff]  ;;  %v1592_v63 = vld [vmem:[#allocation2 + $0x8] sm:$0xff] }
  0xbe   : > { %4248 = vmatprep.subr.bf16.mxu0 %v4940_v13  ;;  %v4232_v26 = vpack.c.bf16 %v480_v23, %v464_v22  ;;  %v4268_v2 = vpack.c.bf16 %v1592_v63, %v1591_v62  ;;  %v555_v23 = vlaneseq }
  0xc0   : > { %4221 = vmatpush1.bf16.msra.mxu1 %v4220_v7  ;;  %v1641_v7 = vld [vmem:[#allocation2 + $0x190] sm:$0xff]  ;;  %v556_v24 = vshrl.u32 %v555_v23, 7 }
  0xc1   : > { %4250 = vmatpush3.bf16.msra.mxu0 %v4249_v31  ;;  %4223 = vmatprep.subr.bf16.mxu1 %v4222_v8  ;;  %v545_v31 = vld [vmem:[%s7157_s1 + $0x7f8] sm:$0xff] }
  0xc2   : > { %4251 = vmatprep.subr.bf16.mxu0 %v4940_v13  ;;  %v4238_v33 = vpack.c.bf16 %v545_v31, %v529_v30  ;;  %v1642_v8 = vld [vmem:[#allocation2 + $0x198] sm:$0xff]  ;;  %v5954_v28 = vsub.s32 0, %v556_v24  ;;  %v5956_v29 = vsub.s32 1, %v556_v24  ;;  %v5991_v63 = vsub.s32 7, %v556_v24 }
  0xc3   : > { %v4302_v10 = vpack.c.bf16 %v1642_v8, %v1641_v7 }
  0xc4   : > { %4225 = vmatpush1.bf16.msra.mxu1 %v4224_v15  ;;  %v4272_v15 = vpack.c.bf16 %v1594_v12, %v1593_v11 }
  0xc5   : > { %4253 = vmatpush3.bf16.msra.mxu0 %v4252_v40  ;;  %4227 = vmatprep.subr.bf16.mxu1 %v4226_v16  ;;  %v1626_v16 = vld [vmem:[#allocation2 + $0x118] sm:$0xff] }
  0xc6   : > { %4254 = vmatprep.subr.bf16.mxu0 %v4940_v13 }
  0xc8   : > { %4229 = vmatpush1.bf16.msra.mxu1 %v4228_v20  ;;  %v1643_v20 = vld [vmem:[#allocation2 + $0x1a0] sm:$0xff] }
  0xc9   : > { %4256 = vmatpush3.bf16.msra.mxu0 %v4255_v49 }
  0xca   : > { %4257 = vmatprep.subr.bf16.mxu0 %v4940_v13 }
  0xcd   : > { %4259 = vmatpush3.bf16.msra.mxu0 %v4258_v59  ;;  %v1639_v59 = vld [vmem:[#allocation2 + $0x180] sm:$0xff] }
  0xce   : > { %4260 = vmatprep.subr.bf16.mxu0 %v4940_v13  ;;  %v4298_v1 = vpack.c.bf16 %v1640_v61, %v1639_v59  ;;  %v3358_v59 = vld [vmem:[%s7159_s3 + $0x40] ss:$8 sm:$0xf0]  ;;  %v5988_v61 = vsub.s32 6, %v556_v24 }
  0xd1   : > { %4262 = vmatpush3.bf16.msra.mxu0 %v4261_v5  ;;  %v1609_v5 = vld [vmem:[#allocation2 + $0x90] sm:$0xff] }
  0xd2   : > { %4263 = vmatprep.subr.bf16.mxu0 %v4940_v13  ;;  %v481_v13 = vld [vmem:[%s7157_s1 + $0x5f8] sm:$0xff]  ;;  %v4270_v9 = vpack.c.bf16 %v1610_v0, %v1609_v5 }
  0xd3   : > { %v4230_v21 = vpack.c.bf16 %v481_v13, %v465_v19  ;;  %v4274_v13 = vpack.c.bf16 %v1612_v18, %v1611_v17 }
  0xd5   : > { %4265 = vmatpush3.bf16.msra.mxu0 %v4264_v14  ;;  %4231 = vmatprep.subr.bf16.mxu1 %v4230_v21  ;;  %v1625_v14 = vld [vmem:[#allocation2 + $0x110] sm:$0xff]  ;;  %v1644_v21 = vld [vmem:[#allocation2 + $0x1a8] sm:$0xff] }
  0xd6   : > { %4233 = vmatpush1.bf16.msra.mxu1 %v4232_v26  ;;  %4299 = vmatprep.subr.bf16.mxu0 %v4298_v1  ;;  %v4304_v19 = vpack.c.bf16 %v1626_v16, %v1625_v14  ;;  %v4306_v22 = vpack.c.bf16 %v1644_v21, %v1643_v20  ;;  %v547_v26 = vld [vmem:[%s7159_s3] ss:$8 sm:$0xf0] }
  0xd7   : > { %4235 = vmatprep.subr.bf16.mxu1 %v4234_v27  ;;  %v548_v27 = vor.u32 %v547_v26, %v546_v25 }
  0xd8   : > { %3984 = vmatmul.mubr.f32.vlgmr.msra.gmra.mrb[8].mxu0 %v5188_v56 }
  0xd9   : > { %4301 = vmatpush3.bf16.msra.mxu0 %v4300_v6  ;;  %v558_v30 = vrot.slane %v548_v27, %v5954_v28  ;;  %v562_v31 = vrot.slane %v548_v27, %v5956_v29  ;;  %v582_v6 = vrot.slane %v548_v27, %v5988_v61  ;;  %v586_v7 = vrot.slane %v548_v27, %v5991_v63 }
  0xda   : > { %4237 = vmatpush1.bf16.msra.mxu1 %v4236_v32  ;;  %4303 = vmatprep.subr.bf16.mxu0 %v4302_v10  ;;  %v5960_v32 = vsub.s32 2, %v556_v24 }
  0xdb   : > { %4239 = vmatprep.subr.bf16.mxu1 %v4238_v33  ;;  %v5962_v33 = vsub.s32 3, %v556_v24 }
  0xdc   : > { %v566_v39 = vrot.slane %v548_v27, %v5960_v32 }
  0xdd   : > { %4305 = vmatpush3.bf16.msra.mxu0 %v4304_v19 }
  0xde   : > { %4241 = vmatpush1.bf16.msra.mxu1 %v4240_v36  ;;  %4307 = vmatprep.subr.bf16.mxu0 %v4306_v22  ;;  %v5966_v36 = vsub.s32 4, %v556_v24 }
  0xdf   : > { %4267 = vmatprep.subr.bf16.mxu1 %v4266_v60 }
  0xe1   : > { %1197 = vmatmul.mubr.f32.vlgmr.msra.gmra.mrb[6].mxu1 %v5188_v56 }
  0xe2   : > { %4269 = vmatpush3.bf16.msra.mxu1 %v4268_v2 }
  0xe3   : > { %4271 = vmatprep.subr.bf16.mxu1 %v4270_v9 }
  0xe6   : > { %4273 = vmatpush3.bf16.msra.mxu1 %v4272_v15 }
  0xe7   : > { %4275 = vmatprep.subr.bf16.mxu1 %v4274_v13 }
 0x12b   : > { %v5916_v37 = vpop.f32.mrb[0].mxu0 }
 0x12c   : > { %v5918_v38 = vpop.f32.mrb[1].mxu0  ;;  %v702_v34 = vadd.f32 %v5916_v37, %v558_v30  ;;  %v3357_v37 = vld [vmem:[%s7159_s3 + $0x40] ss:$8 sm:$0xf] }
 0x12d   : > { %v704_v35 = vadd.f32 %v5918_v38, %v562_v31  ;;  %v574_v38 = vrot.slane %v548_v27, %v5966_v36  ;;  %v552_v5 = vor.u32 %v3358_v59, %v3357_v37 }
 0x12f   : > { %v590_v11 = vrot.slane %v552_v5, %v5954_v28 }
 0x14a   : > { %v5924_v42 = vpop.f32.mrb[0].mxu1 }
 0x14b   : > { %v5920_v40 = vpop.f32.mrb[2].mxu0  ;;  %v5926_v43 = vpop.f32.mrb[1].mxu1  ;;  %v773_v60 = vadd.f32 %v5924_v42, %v566_v39 }
 0x14c   : > { %v5922_v41 = vpop.f32.mrb[3].mxu0  ;;  %v844_v42 = vadd.f32 %v5920_v40, %v574_v38  ;;  %v618_v38 = vrot.slane %v552_v5, %v5991_v63 }
 0x16a   : > { %v5932_v56 = vpop.f32.mrb[2].mxu1 }
 0x16b   : > { %v5928_v44 = vpop.f32.mrb[4].mxu0  ;;  %v5934_v46 = vpop.f32.mrb[3].mxu1  ;;  %v915_v40 = vadd.f32 %v5932_v56, %v582_v6  ;;  %v598_v56 = vrot.slane %v552_v5, %v5960_v32 }
 0x16c   : > { %v5930_v45 = vpop.f32.mrb[5].mxu0  ;;  %v917_v16 = vadd.f32 %v5934_v46, %v586_v7  ;;  %v986_v13 = vadd.f32 %v5928_v44, %v590_v11  ;;  %v602_v46 = vrot.slane %v552_v5, %v5962_v33  ;;  %v606_v44 = vrot.slane %v552_v5, %v5966_v36 }
 0x18a   : > { %v5940_v49 = vpop.f32.mrb[4].mxu1 }
 0x18b   : > { %v5936_v47 = vpop.f32.mrb[6].mxu0  ;;  %v5942_v50 = vpop.f32.mrb[5].mxu1 }
 0x18c   : > { %v5938_v48 = vpop.f32.mrb[7].mxu0  ;;  %v1059_v39 = vadd.f32 %v5942_v50, %v602_v46  ;;  %v1128_v59 = vadd.f32 %v5936_v47, %v606_v44  ;;  %v1614_v46 = vld [vmem:[#allocation2 + $0xb8] sm:$0xff]  ;;  %v1597_v44 = vld [vmem:[#allocation2 + $0x30] sm:$0xff] }
 0x1ab   : > { %v1285_v51 = vpop.f32.mrb[8].mxu0 }
 0x1ac   : > { %v1289_v52 = vmul.f32 0.00048828125, %v1285_v51  ;;  %v3985_v53 = vpop.f32.mrb[9].mxu0  ;;  %v5969_v51 = vsub.s32 5, %v556_v24 }
 0x1ad   : > { %v570_v53 = vrot.slane %v548_v27, %v5962_v33 }
 0x1ae   : > { %1292 = vperm.xlu0 %4834, %v1289_v52   ;;  %v578_v62 = vrot.slane %v548_v27, %v5969_v51  ;;  %v1057_v27 = vadd.f32 %v5940_v49, %v598_v56  ;;  %v1627_v56 = vld [vmem:[#allocation2 + $0x120] sm:$0xff] }
 0x1af   : > { %v775_v1 = vadd.f32 %v5926_v43, %v570_v53 }
 0x1b0   : > { %v846_v43 = vadd.f32 %v5922_v41, %v578_v62  ;;  %v594_v41 = vrot.slane %v552_v5, %v5956_v29 }
 0x1b2   : > { %v988_v23 = vadd.f32 %v5930_v45, %v594_v41  ;;  %v610_v45 = vrot.slane %v552_v5, %v5969_v51 }
 0x1b4   : > { %v5944_v54 = vpop.f32.mrb[6].mxu1  ;;  %v1130_v50 = vadd.f32 %v5938_v48, %v610_v45  ;;  %v1629_v45 = vld [vmem:[#allocation2 + $0x130] sm:$0xff] }
 0x1b5   : > { %v5946_v55 = vpop.f32.mrb[7].mxu1 }
 0x1b6   : > { %v1201_v47 = vadd.f32 %v5946_v55, %v618_v38  ;;  %v1647_v38 = vld [vmem:[#allocation2 + $0x1c0] sm:$0xff] }
 0x22d   : > { %v5971_v52 = vpop.permute.xlu0 %1292 }
 0x22e   : > { %v5975_v57 = vsub.f32 %v702_v34, %v5971_v52  ;;  %v5978_v58 = vsub.f32 %v704_v35, %v5971_v52  ;;  %v5995_v2 = vsub.f32 %v773_v60, %v5971_v52  ;;  %v6004_v0 = vsub.f32 %v775_v1, %v5971_v52 }
 0x22f   : > { %v6009_v8 = vsub.f32 %v844_v42, %v5971_v52  ;;  %v6016_v12 = vsub.f32 %v846_v43, %v5971_v52  ;;  %v6023_v17 = vsub.f32 %v915_v40, %v5971_v52  ;;  %v6030_v20 = vsub.f32 %v917_v16, %v5971_v52 }
 0x230   : > { %v1311_v3 = vmul.f32 %v5975_v57, %v5975_v57  ;;  %v1312_v4 = vmul.f32 %v5978_v58, %v5978_v58  ;;  %v1313_v9 = vmul.f32 %v5995_v2, %v5995_v2  ;;  %v1314_v14 = vmul.f32 %v6004_v0, %v6004_v0 }
 0x231   : > { %v1315_v18 = vmul.f32 %v6009_v8, %v6009_v8  ;;  %v1316_v21 = vmul.f32 %v6016_v12, %v6016_v12  ;;  %v6037_v24 = vsub.f32 %v986_v13, %v5971_v52  ;;  %v1317_v25 = vmul.f32 %v6023_v17, %v6023_v17 }
 0x232   : > { %v1327_v10 = vadd.f32 %v1312_v4, %v1311_v3  ;;  %v6044_v30 = vsub.f32 %v988_v23, %v5971_v52  ;;  %v1318_v31 = vmul.f32 %v6030_v20, %v6030_v20  ;;  %v614_v35 = vrot.slane %v552_v5, %v5988_v61  ;;  %v1645_v23 = vld [vmem:[#allocation2 + $0x1b0] sm:$0xff] }
 0x233   : > { %v6052_v53 = vsub.f32 %v1057_v27, %v5971_v52  ;;  %v1319_v37 = vmul.f32 %v6037_v24, %v6037_v24  ;;  %v6059_v60 = vsub.f32 %v1059_v39, %v5971_v52  ;;  %v6066_v4 = vsub.f32 %v1128_v59, %v5971_v52  ;;  %v1598_v27 = vld [vmem:[#allocation2 + $0x38] sm:$0xff] }
 0x234   : > { %v1328_v15 = vadd.f32 %v1327_v10, %v1313_v9  ;;  %v1320_v62 = vmul.f32 %v6044_v30, %v6044_v30  ;;  %v1199_v3 = vadd.f32 %v5944_v54, %v614_v35  ;;  %v6072_v6 = vsub.f32 %v1130_v50, %v5971_v52  ;;  %v1630_v35 = vld [vmem:[#allocation2 + $0x138] sm:$0xff]  ;;  %v1600_v50 = vld [vmem:[#allocation2 + $0x48] sm:$0xff] }
 0x235   : > { %v1321_v42 = vmul.f32 %v6052_v53, %v6052_v53  ;;  %v1322_v7 = vmul.f32 %v6059_v60, %v6059_v60  ;;  %v1323_v54 = vmul.f32 %v6066_v4, %v6066_v4  ;;  %v6082_v10 = vsub.f32 %v1201_v47, %v5971_v52  ;;  %v1632_v47 = vld [vmem:[#allocation2 + $0x148] sm:$0xff] }
 0x236   : > { %v1329_v19 = vadd.f32 %v1328_v15, %v1314_v14  ;;  %v6077_v48 = vsub.f32 %v1199_v3, %v5971_v52  ;;  %v1324_v55 = vmul.f32 %v6072_v6, %v6072_v6  ;;  %v1628_v52 = vld [vmem:[#allocation2 + $0x128] sm:$0xff]  ;;  %v4312_v39 = vpack.c.bf16 %v1630_v35, %v1629_v45  ;;  %v1654_v35 = vld [vmem:[#allocation2 + $0x1f8] sm:$0xff] }
 0x237   : > { %v1326_v15 = vmul.f32 %v6082_v10, %v6082_v10 }
 0x238   : > { %v1330_v22 = vadd.f32 %v1329_v19, %v1315_v18  ;;  %v1325_v40 = vmul.f32 %v6077_v48, %v6077_v48  ;;  %v1595_v18 = vld [vmem:[#allocation2 + $0x20] sm:$0xff]  ;;  %v1596_v19 = vld [vmem:[#allocation2 + $0x28] sm:$0xff] }
 0x239   : > { %v4276_v13 = vpack.c.bf16 %v1596_v19, %v1595_v18  ;;  %v1634_v18 = vld [vmem:[#allocation2 + $0x158] sm:$0xff]  ;;  %v1619_v19 = vld [vmem:[#allocation2 + $0xe0] sm:$0xff] }
 0x23a   : > { %v1331_v26 = vadd.f32 %v1330_v22, %v1316_v21  ;;  %v4308_v21 = vpack.c.bf16 %v1628_v52, %v1627_v56  ;;  %v1613_v22 = vld [vmem:[#allocation2 + $0xb0] sm:$0xff]  ;;  %v1620_v56 = vld [vmem:[#allocation2 + $0xe8] sm:$0xff] }
 0x23b   : > { %4277 = vmatpush3.bf16.msra.mxu1 %v4276_v13  ;;  %v4290_v52 = vpack.c.bf16 %v1620_v56, %v1619_v19 }
 0x23c   : > { %v1332_v34 = vadd.f32 %v1331_v26, %v1317_v25  ;;  %4309 = vmatpush3.bf16.msra.mxu0 %v4308_v21  ;;  %v4278_v25 = vpack.c.bf16 %v1614_v46, %v1613_v22  ;;  %v1646_v26 = vld [vmem:[#allocation2 + $0x1b8] sm:$0xff]  ;;  %v1651_v21 = vld [vmem:[#allocation2 + $0x1e0] sm:$0xff]  ;;  %v1652_v22 = vld [vmem:[#allocation2 + $0x1e8] sm:$0xff] }
 0x23d   : > { %v1603_v46 = vld [vmem:[#allocation2 + $0x60] sm:$0xff] }
 0x23e   : > { %v1333_v49 = vadd.f32 %v1332_v34, %v1318_v31  ;;  %v4310_v31 = vpack.c.bf16 %v1646_v26, %v1645_v23  ;;  %v4280_v34 = vpack.c.bf16 %v1598_v27, %v1597_v44  ;;  %4279 = vmatprep.subr.bf16.mxu1 %v4278_v25  ;;  %v4322_v23 = vpack.c.bf16 %v1652_v22, %v1651_v21  ;;  %v1604_v25 = vld [vmem:[#allocation2 + $0x68] sm:$0xff]  ;;  %v1635_v26 = vld [vmem:[#allocation2 + $0x160] sm:$0xff]  ;;  %v1621_v27 = vld [vmem:[#allocation2 + $0xf0] sm:$0xff] }
 0x23f   : > { %v1636_v44 = vld [vmem:[#allocation2 + $0x168] sm:$0xff]  ;;  %v4292_v45 = vpack.c.bf16 %v1604_v25, %v1603_v46 }
 0x240   : > { %v1334_v1 = vadd.f32 %v1333_v49, %v1319_v37  ;;  %v1615_v37 = vld [vmem:[#allocation2 + $0xc0] sm:$0xff]  ;;  %v1616_v49 = vld [vmem:[#allocation2 + $0xc8] sm:$0xff]  ;;  %4311 = vmatprep.subr.bf16.mxu0 %v4310_v31  ;;  %4281 = vmatpush3.bf16.msra.mxu1 %v4280_v34  ;;  %v1622_v31 = vld [vmem:[#allocation2 + $0xf8] sm:$0xff] }
 0x241   : > { %v4282_v59 = vpack.c.bf16 %v1616_v49, %v1615_v37  ;;  %4313 = vmatpush3.bf16.msra.mxu0 %v4312_v39  ;;  %v1653_v34 = vld [vmem:[#allocation2 + $0x1f0] sm:$0xff]  ;;  %v4324_v39 = vpack.c.bf16 %v1636_v44, %v1635_v26  ;;  %v4294_v37 = vpack.c.bf16 %v1622_v31, %v1621_v27 }
 0x242   : > { %v1335_v5 = vadd.f32 %v1334_v1, %v1320_v62  ;;  %v1648_v62 = vld [vmem:[#allocation2 + $0x1c8] sm:$0xff]  ;;  %v1599_v1 = vld [vmem:[#allocation2 + $0x40] sm:$0xff]  ;;  %v1605_v49 = vld [vmem:[#allocation2 + $0x70] sm:$0xff] }
 0x243   : > { %v4314_v3 = vpack.c.bf16 %v1648_v62, %v1647_v38  ;;  %4283 = vmatprep.subr.bf16.mxu1 %v4282_v59  ;;  %v1606_v38 = vld [vmem:[#allocation2 + $0x78] sm:$0xff]  ;;  %v4326_v59 = vpack.c.bf16 %v1654_v35, %v1653_v34  ;;  %v1637_v62 = vld [vmem:[#allocation2 + $0x170] sm:$0xff]  ;;  %v1655_v35 = vld [vmem:[#allocation2 + $0x200] sm:$0xff] }
 0x244   : > { %v1336_v43 = vadd.f32 %v1335_v5, %v1321_v42  ;;  %v4284_v42 = vpack.c.bf16 %v1600_v50, %v1599_v1  ;;  %v1631_v5 = vld [vmem:[#allocation2 + $0x140] sm:$0xff]  ;;  %v1638_v1 = vld [vmem:[#allocation2 + $0x178] sm:$0xff]  ;;  %v4296_v50 = vpack.c.bf16 %v1606_v38, %v1605_v49 }
 0x245   : > { %4315 = vmatprep.subr.bf16.mxu0 %v4314_v3  ;;  %v4328_v3 = vpack.c.bf16 %v1638_v1, %v1637_v62  ;;  %v1656_v62 = vld [vmem:[#allocation2 + $0x208] sm:$0xff]  ;;  %v1687_v1 = vld [vmem:[#allocation2 + $0x300] sm:$0xff] }
 0x246   : > { %v1337_v9 = vadd.f32 %v1336_v43, %v1322_v7  ;;  %v1617_v7 = vld [vmem:[#allocation2 + $0xd0] sm:$0xff]  ;;  %v4316_v43 = vpack.c.bf16 %v1632_v47, %v1631_v5  ;;  %4285 = vmatpush3.bf16.msra.mxu1 %v4284_v42  ;;  %v1671_v42 = vld [vmem:[#allocation2 + $0x280] sm:$0xff]  ;;  %v1672_v5 = vld [vmem:[#allocation2 + $0x288] sm:$0xff] }
 0x247   : > { %v1703_v47 = vld [vmem:[#allocation2 + $0x380] sm:$0xff] }
 0x248   : > { %v1338_v11 = vadd.f32 %v1337_v9, %v1323_v54  ;;  %v1618_v54 = vld [vmem:[#allocation2 + $0xd8] sm:$0xff]  ;;  %v1649_v9 = vld [vmem:[#allocation2 + $0x1d0] sm:$0xff]  ;;  %4317 = vmatpush3.bf16.msra.mxu0 %v4316_v43  ;;  %v1704_v43 = vld [vmem:[#allocation2 + $0x388] sm:$0xff] }
 0x24a   : > { %v1339_v14 = vadd.f32 %v1338_v11, %v1324_v55  ;;  %v1650_v55 = vld [vmem:[#allocation2 + $0x1d8] sm:$0xff]  ;;  %v4286_v11 = vpack.c.bf16 %v1618_v54, %v1617_v7  ;;  %v4330_v7 = vpack.c.bf16 %v1672_v5, %v1671_v42  ;;  %v4362_v54 = vpack.c.bf16 %v1704_v43, %v1703_v47  ;;  %v1673_v43 = vld [vmem:[#allocation2 + $0x290] sm:$0xff] }
 0x24c   : > { %v1340_v41 = vadd.f32 %v1339_v14, %v1325_v40  ;;  %v4318_v40 = vpack.c.bf16 %v1650_v55, %v1649_v9  ;;  %v1601_v14 = vld [vmem:[#allocation2 + $0x50] sm:$0xff]  ;;  %4287 = vmatprep.subr.bf16.mxu1 %v4286_v11 }
 0x24e   : > { %v1341_v16 = vadd.f32 %v1340_v41, %v1326_v15  ;;  %v1602_v15 = vld [vmem:[#allocation2 + $0x58] sm:$0xff]  ;;  %v1633_v41 = vld [vmem:[#allocation2 + $0x150] sm:$0xff]  ;;  %4319 = vmatprep.subr.bf16.mxu0 %v4318_v40 }
 0x24f   : > { %v4320_v13 = vpack.c.bf16 %v1634_v18, %v1633_v41  ;;  %v3359_v40 = vld [vmem:[%s7159_s3 + $0x1] ss:$8 sm:$0xf]  ;;  %v3364_v41 = vld [vmem:[%s7159_s3 + $0x2] ss:$8 sm:$0xf0] }
 0x250   : > { %1342 = vadd.xlane.f32.xlu0 %v1341_v16  ;;  %v4288_v16 = vpack.c.bf16 %v1602_v15, %v1601_v14  ;;  %v3360_v14 = vld [vmem:[%s7159_s3 + $0x1] ss:$8 sm:$0xf0]  ;;  %v3363_v15 = vld [vmem:[%s7159_s3 + $0x2] ss:$8 sm:$0xf] }
 0x251   : > { %4321 = vmatpush3.bf16.msra.mxu0 %v4320_v13  ;;  %v6104_v18 = vor.u32 %v3364_v41, %v3363_v15  ;;  %v1674_v15 = vld [vmem:[#allocation2 + $0x298] sm:$0xff]  ;;  %v1705_v41 = vld [vmem:[#allocation2 + $0x390] sm:$0xff] }
 0x252   : > { %4289 = vmatpush3.bf16.msra.mxu1 %v4288_v16  ;;  %4323 = vmatprep.subr.bf16.mxu0 %v4322_v23  ;;  %v6102_v16 = vor.u32 %v3360_v14, %v3359_v40 }
 0x253   : > { %4291 = vmatprep.subr.bf16.mxu1 %v4290_v52  ;;  %v1486_v13 = vrot.slane %v6104_v18, %v5956_v29  ;;  %v1494_v52 = vrot.slane %v6104_v18, %v5962_v33  ;;  %v1482_v23 = vrot.slane %v6104_v18, %v5954_v28  ;;  %v1490_v25 = vrot.slane %v6104_v18, %v5960_v32 }
 0x254   : > { %v1380_v19 = vrot.slane %v6102_v16, %v5956_v29  ;;  %v1388_v56 = vrot.slane %v6102_v16, %v5962_v33  ;;  %v1376_v21 = vrot.slane %v6102_v16, %v5954_v28  ;;  %v1384_v22 = vrot.slane %v6102_v16, %v5960_v32 }
 0x255   : > { %4325 = vmatpush3.bf16.msra.mxu0 %v4324_v39  ;;  %v1396_v26 = vrot.slane %v6102_v16, %v5969_v51  ;;  %v1404_v44 = vrot.slane %v6102_v16, %v5991_v63 }
 0x256   : > { %4293 = vmatpush3.bf16.msra.mxu1 %v4292_v45  ;;  %4327 = vmatprep.subr.bf16.mxu0 %v4326_v59 }
 0x257   : > { %4295 = vmatprep.subr.bf16.mxu1 %v4294_v37  ;;  %v1502_v37 = vrot.slane %v6104_v18, %v5969_v51 }
 0x259   : > { %4329 = vmatpush3.bf16.msra.mxu0 %v4328_v3 }
 0x25a   : > { %4297 = vmatpush3.bf16.msra.mxu1 %v4296_v50  ;;  %4363 = vmatprep.subr.bf16.mxu0 %v4362_v54  ;;  %v3365_v54 = vld [vmem:[%s7159_s3 + $0x42] ss:$8 sm:$0xf] }
 0x25b   : > { %4331 = vmatprep.subr.bf16.mxu1 %v4330_v7 }
 0x2dd   : > { %v1343_v9 = vpop.xlane.xlu0 %1342 }
 0x2de   : > { %v1344_v55 = vmul.f32 0.00048828125, %v1343_v9  ;;  %v3366_v9 = vld [vmem:[%s7159_s3 + $0x42] ss:$8 sm:$0xf0] }
 0x2e0   : > { %v1345_v11 = vadd.f32 1e-05, %v1344_v55  ;;  %v4332_v55 = vpack.c.bf16 %v1656_v62, %v1655_v35  ;;  %v1707_v35 = vld [vmem:[#allocation2 + $0x3a0] sm:$0xff] }
 0x2e2   : > { %4836 = vrsqrt.f32 %v1345_v11 }
 0x2ec   : > { %v6118_v46 = vpop.eup %4836 }
 0x2ed   : > { %v1348_v27 = vmul.f32 %v6118_v46, %v5978_v58  ;;  %v1350_v31 = vmul.f32 %v6118_v46, %v6004_v0  ;;  %v1347_v34 = vmul.f32 %v6118_v46, %v5975_v57  ;;  %v1349_v45 = vmul.f32 %v6118_v46, %v5995_v2  ;;  %v1688_v2 = vld [vmem:[#allocation2 + $0x308] sm:$0xff] }
 0x2ee   : > { %v1352_v39 = vmul.f32 %v6118_v46, %v6016_v12  ;;  %v1354_v49 = vmul.f32 %v6118_v46, %v6030_v20  ;;  %v1510_v58 = vrot.slane %v6104_v18, %v5991_v63  ;;  %v3361_v12 = vld [vmem:[%s7159_s3 + $0x41] ss:$8 sm:$0xf]  ;;  %v4364_v11 = vpack.c.bf16 %v1688_v2, %v1687_v1 }
 0x2ef   : > { %v1454_v0 = vmul.f32 %v1380_v19, %v1348_v27  ;;  %v1456_v38 = vmul.f32 %v1388_v56, %v1350_v31  ;;  %v1453_v59 = vmul.f32 %v1376_v21, %v1347_v34  ;;  %v1455_v57 = vmul.f32 %v1384_v22, %v1349_v45  ;;  %v3362_v20 = vld [vmem:[%s7159_s3 + $0x41] ss:$8 sm:$0xf0] }
 0x2f0   : > { %v1458_v50 = vmul.f32 %v1396_v26, %v1352_v39  ;;  %v1460_v3 = vmul.f32 %v1404_v44, %v1354_v49  ;;  %v1706_v19 = vld [vmem:[#allocation2 + $0x398] sm:$0xff]  ;;  %v1657_v22 = vld [vmem:[#allocation2 + $0x210] sm:$0xff]  ;;  %v1675_v44 = vld [vmem:[#allocation2 + $0x2a0] sm:$0xff]  ;;  %v6172_v27 = vor.u32 %v3362_v20, %v3361_v12  ;;  %v4334_v31 = vpack.c.bf16 %v1674_v15, %v1673_v43 }
 0x2f1   : > { %v6150_v42 = vadd.f32 %v1486_v13, %v1454_v0  ;;  %v6152_v5 = vadd.f32 %v1494_v52, %v1456_v38  ;;  %v6154_v47 = vadd.f32 %v1482_v23, %v1453_v59  ;;  %v6156_v7 = vadd.f32 %v1490_v25, %v1455_v57  ;;  %v1658_v23 = vld [vmem:[#allocation2 + $0x218] sm:$0xff]  ;;  %v1689_v25 = vld [vmem:[#allocation2 + $0x310] sm:$0xff]  ;;  %v1676_v45 = vld [vmem:[#allocation2 + $0x2a8] sm:$0xff] }
 0x2f2   : > { %v6164_v40 = vadd.f32 %v1502_v37, %v1458_v50  ;;  %v6166_v14 = vadd.f32 %v1510_v58, %v1460_v3  ;;  %v1690_v26 = vld [vmem:[#allocation2 + $0x318] sm:$0xff]  ;;  %v4366_v34 = vpack.c.bf16 %v1706_v19, %v1705_v41  ;;  %v1708_v39 = vld [vmem:[#allocation2 + $0x3a8] sm:$0xff]  ;;  %v6184_v58 = vor.u32 %v3366_v9, %v3365_v54  ;;  %v1659_v59 = vld [vmem:[#allocation2 + $0x220] sm:$0xff] }
 0x2f3   : > { %v1576_v56 = vmax.f32 %v6150_v42, 0.0  ;;  %v1578_v13 = vmax.f32 %v6152_v5, 0.0  ;;  %v1575_v52 = vmax.f32 %v6154_v47, 0.0  ;;  %v1577_v21 = vmax.f32 %v6156_v7, 0.0  ;;  %v1660_v57 = vld [vmem:[#allocation2 + $0x228] sm:$0xff]  ;;  %v1691_v2 = vld [vmem:[#allocation2 + $0x320] sm:$0xff] }
 0x2f4   : > { %v1580_v37 = vmax.f32 %v6164_v40, 0.0  ;;  %v1582_v49 = vmax.f32 %v6166_v14, 0.0  ;;  %v4336_v0 = vpack.c.bf16 %v1658_v23, %v1657_v22  ;;  %v4368_v38 = vpack.c.bf16 %v1690_v26, %v1689_v25  ;;  %v1692_v50 = vld [vmem:[#allocation2 + $0x328] sm:$0xff]  ;;  %v1677_v3 = vld [vmem:[#allocation2 + $0x2b0] sm:$0xff]  ;;  %v1678_v20 = vld [vmem:[#allocation2 + $0x2b8] sm:$0xff] }
 0x2f5   : > { %1916 = vmatprep.mubr.f32.mxu1 %v1576_v56  ;;  %1986 = vmatprep.mubr.f32.mxu0 %v1578_v13  ;;  %v4338_v62 = vpack.c.bf16 %v1676_v45, %v1675_v44  ;;  %v4370_v1 = vpack.c.bf16 %v1708_v39, %v1707_v35  ;;  %v1424_v12 = vrot.slane %v6172_v27, %v5966_v36  ;;  %v1709_v43 = vld [vmem:[#allocation2 + $0x3b0] sm:$0xff]  ;;  %v1710_v54 = vld [vmem:[#allocation2 + $0x3b8] sm:$0xff]  ;;  %v1680_v35 = vld [vmem:[#allocation2 + $0x2c8] sm:$0xff] }
 0x2f6   : > { %1917 = vmatmul.mubr.f32.vlgmr.msra.gmra.mrb[8].mxu1 %v1575_v52  ;;  %1987 = vmatmul.mubr.f32.vlgmr.msra.gmra.mrb[10].mxu0 %v1577_v21  ;;  %v1432_v9 = vrot.slane %v6172_v27, %v5988_v61  ;;  %v1530_v15 = vrot.slane %v6184_v58, %v5966_v36  ;;  %v4372_v41 = vpack.c.bf16 %v1692_v50, %v1691_v2  ;;  %v1661_v19 = vld [vmem:[#allocation2 + $0x230] sm:$0xff]  ;;  %v1662_v22 = vld [vmem:[#allocation2 + $0x238] sm:$0xff]  ;;  %v1711_v39 = vld [vmem:[#allocation2 + $0x3c0] sm:$0xff] }
 0x2f7   : > { %4333 = vmatpush3.bf16.msra.mxu1 %v4332_v55  ;;  %4365 = vmatpush3.bf16.msra.mxu0 %v4364_v11  ;;  %v4340_v55 = vpack.c.bf16 %v1660_v57, %v1659_v59  ;;  %v1359_v11 = vmul.f32 %v6118_v46, %v6066_v4  ;;  %v1361_v23 = vmul.f32 %v6118_v46, %v6077_v48  ;;  %v1694_v4 = vld [vmem:[#allocation2 + $0x338] sm:$0xff]  ;;  %v1663_v2 = vld [vmem:[#allocation2 + $0x240] sm:$0xff]  ;;  %v1664_v50 = vld [vmem:[#allocation2 + $0x248] sm:$0xff] }
 0x2f8   : > { %2056 = vmatprep.mubr.f32.mxu1 %v1580_v37  ;;  %2126 = vmatprep.mubr.f32.mxu0 %v1582_v49  ;;  %v1538_v25 = vrot.slane %v6184_v58, %v5988_v61  ;;  %v4342_v26 = vpack.c.bf16 %v1678_v20, %v1677_v3  ;;  %v4374_v44 = vpack.c.bf16 %v1710_v54, %v1709_v43  ;;  %v1695_v20 = vld [vmem:[#allocation2 + $0x340] sm:$0xff]  ;;  %v1681_v43 = vld [vmem:[#allocation2 + $0x2d0] sm:$0xff]  ;;  %v1682_v54 = vld [vmem:[#allocation2 + $0x2d8] sm:$0xff] }
 0x2f9   : > { %4335 = vmatprep.subr.bf16.mxu1 %v4334_v31  ;;  %4367 = vmatprep.subr.bf16.mxu0 %v4366_v34  ;;  %v1693_v31 = vld [vmem:[#allocation2 + $0x330] sm:$0xff]  ;;  %v1679_v34 = vld [vmem:[#allocation2 + $0x2c0] sm:$0xff]  ;;  %v1465_v45 = vmul.f32 %v1424_v12, %v1359_v11  ;;  %v4344_v48 = vpack.c.bf16 %v1662_v22, %v1661_v19  ;;  %v1696_v12 = vld [vmem:[#allocation2 + $0x348] sm:$0xff] }
 0x2fa   : > { %v4376_v57 = vpack.c.bf16 %v1694_v4, %v1693_v31  ;;  %v1713_v11 = vld [vmem:[#allocation2 + $0x3d0] sm:$0xff]  ;;  %v1666_v19 = vld [vmem:[#allocation2 + $0x258] sm:$0xff]  ;;  %v1684_v31 = vld [vmem:[#allocation2 + $0x2e8] sm:$0xff] }
 0x2fb   : > { %4337 = vmatpush3.bf16.msra.mxu1 %v4336_v0  ;;  %4369 = vmatpush3.bf16.msra.mxu0 %v4368_v38  ;;  %v1712_v0 = vld [vmem:[#allocation2 + $0x3c8] sm:$0xff]  ;;  %v1467_v38 = vmul.f32 %v1432_v9, %v1361_v23  ;;  %v6202_v59 = vadd.f32 %v1530_v15, %v1465_v45  ;;  %v1714_v9 = vld [vmem:[#allocation2 + $0x3d8] sm:$0xff]  ;;  %v4380_v15 = vpack.c.bf16 %v1696_v12, %v1695_v20  ;;  %v1697_v22 = vld [vmem:[#allocation2 + $0x350] sm:$0xff] }
 0x2fc   : > { %4339 = vmatprep.subr.bf16.mxu1 %v4338_v62  ;;  %4371 = vmatprep.subr.bf16.mxu0 %v4370_v1  ;;  %v4346_v1 = vpack.c.bf16 %v1680_v35, %v1679_v34  ;;  %v4378_v3 = vpack.c.bf16 %v1712_v0, %v1711_v39  ;;  %v4350_v23 = vpack.c.bf16 %v1682_v54, %v1681_v43  ;;  %v1715_v4 = vld [vmem:[#allocation2 + $0x3e0] sm:$0xff]  ;;  %v1716_v34 = vld [vmem:[#allocation2 + $0x3e8] sm:$0xff]  ;;  %v1686_v20 = vld [vmem:[#allocation2 + $0x2f8] sm:$0xff] }
 0x2fd   : > { %v6204_v62 = vadd.f32 %v1538_v25, %v1467_v38  ;;  %v4382_v25 = vpack.c.bf16 %v1714_v9, %v1713_v11  ;;  %v1392_v45 = vrot.slane %v6102_v16, %v5966_v36  ;;  %v1400_v35 = vrot.slane %v6102_v16, %v5988_v61  ;;  %v1717_v43 = vld [vmem:[#allocation2 + $0x3f0] sm:$0xff]  ;;  %v1718_v54 = vld [vmem:[#allocation2 + $0x3f8] sm:$0xff]  ;;  %v2512_v7 = vld [vmem:[%s7161_s5 + $0x320] sm:$0xff] }
 0x2fe   : > { %v1351_v12 = vmul.f32 %v6118_v46, %v6009_v8  ;;  %v1353_v16 = vmul.f32 %v6118_v46, %v6023_v17  ;;  %v1356_v11 = vmul.f32 %v6118_v46, %v6044_v30  ;;  %v1412_v9 = vrot.slane %v6172_v27, %v5956_v29  ;;  %v2466_v5 = vld [vmem:[%s7161_s5 + $0x1b0] sm:$0xff] }
 0x2ff   : > { %4341 = vmatpush3.bf16.msra.mxu1 %v4340_v55  ;;  %4373 = vmatpush3.bf16.msra.mxu0 %v4372_v41  ;;  %v4348_v55 = vpack.c.bf16 %v1664_v50, %v1663_v2  ;;  %v1665_v41 = vld [vmem:[#allocation2 + $0x250] sm:$0xff]  ;;  %v1699_v2 = vld [vmem:[#allocation2 + $0x360] sm:$0xff]  ;;  %v4386_v50 = vpack.c.bf16 %v1716_v34, %v1715_v4  ;;  %v1358_v8 = vmul.f32 %v6118_v46, %v6059_v60  ;;  %v1768_v4 = vld [vmem:[#allocation2 + $0x588] sm:$0xff] }
 0x300   : > { %4343 = vmatprep.subr.bf16.mxu1 %v4342_v26  ;;  %4375 = vmatprep.subr.bf16.mxu0 %v4374_v44  ;;  %v1698_v26 = vld [vmem:[#allocation2 + $0x358] sm:$0xff]  ;;  %v1683_v44 = vld [vmem:[#allocation2 + $0x2e0] sm:$0xff]  ;;  %v4352_v39 = vpack.c.bf16 %v1666_v19, %v1665_v41  ;;  %v1420_v17 = vrot.slane %v6172_v27, %v5962_v33  ;;  %v1462_v34 = vmul.f32 %v1412_v9, %v1356_v11  ;;  %v2530_v14 = vld [vmem:[%s7161_s5 + $0x3b0] sm:$0xff] }
 0x301   : > { %v4384_v0 = vpack.c.bf16 %v1698_v26, %v1697_v22  ;;  %v4354_v38 = vpack.c.bf16 %v1684_v31, %v1683_v44  ;;  %v1669_v22 = vld [vmem:[#allocation2 + $0x270] sm:$0xff]  ;;  %v1702_v26 = vld [vmem:[#allocation2 + $0x378] sm:$0xff]  ;;  %v1457_v44 = vmul.f32 %v1392_v45, %v1351_v12  ;;  %v1736_v31 = vld [vmem:[#allocation2 + $0x488] sm:$0xff] }
 0x302   : > { %v1767_v60 = vld [vmem:[#allocation2 + $0x580] sm:$0xff]  ;;  %v1752_v12 = vld [vmem:[#allocation2 + $0x508] sm:$0xff]  ;;  %v1770_v11 = vld [vmem:[#allocation2 + $0x598] sm:$0xff] }
 0x303   : > { %4345 = vmatpush3.bf16.msra.mxu1 %v4344_v48  ;;  %4377 = vmatpush3.bf16.msra.mxu0 %v4376_v57  ;;  %v1667_v48 = vld [vmem:[#allocation2 + $0x260] sm:$0xff]  ;;  %v1668_v57 = vld [vmem:[#allocation2 + $0x268] sm:$0xff] }
 0x304   : > { %4347 = vmatprep.subr.bf16.mxu1 %v4346_v1  ;;  %4379 = vmatprep.subr.bf16.mxu0 %v4378_v3  ;;  %v1700_v1 = vld [vmem:[#allocation2 + $0x368] sm:$0xff]  ;;  %v1685_v3 = vld [vmem:[#allocation2 + $0x2f0] sm:$0xff]  ;;  %v4356_v41 = vpack.c.bf16 %v1668_v57, %v1667_v48  ;;  %v1526_v48 = vrot.slane %v6184_v58, %v5962_v33 }
 0x305   : > { %v4388_v19 = vpack.c.bf16 %v1700_v1, %v1699_v2  ;;  %v4358_v30 = vpack.c.bf16 %v1686_v20, %v1685_v3  ;;  %v1719_v1 = vld [vmem:[#allocation2 + $0x400] sm:$0xff]  ;;  %v1720_v3 = vld [vmem:[#allocation2 + $0x408] sm:$0xff] }
 0x306   : > { %v4396_v9 = vpack.c.bf16 %v1720_v3, %v1719_v1  ;;  %v1774_v1 = vld [vmem:[#allocation2 + $0x5b8] sm:$0xff] }
 0x307   : > { %4349 = vmatpush3.bf16.msra.mxu1 %v4348_v55  ;;  %4381 = vmatpush3.bf16.msra.mxu0 %v4380_v15  ;;  %v1498_v55 = vrot.slane %v6104_v18, %v5966_v36  ;;  %v1506_v15 = vrot.slane %v6104_v18, %v5988_v61  ;;  %v4390_v36 = vpack.c.bf16 %v1718_v54, %v1717_v43  ;;  %v1735_v18 = vld [vmem:[#allocation2 + $0x480] sm:$0xff]  ;;  %v1738_v43 = vld [vmem:[#allocation2 + $0x498] sm:$0xff]  ;;  %v1769_v54 = vld [vmem:[#allocation2 + $0x590] sm:$0xff] }
 0x308   : > { %4351 = vmatprep.subr.bf16.mxu1 %v4350_v23  ;;  %4383 = vmatprep.subr.bf16.mxu0 %v4382_v25  ;;  %v1670_v23 = vld [vmem:[#allocation2 + $0x278] sm:$0xff]  ;;  %v1701_v25 = vld [vmem:[#allocation2 + $0x370] sm:$0xff]  ;;  %v1459_v61 = vmul.f32 %v1400_v35, %v1353_v16  ;;  %v4394_v2 = vpack.c.bf16 %v1736_v31, %v1735_v18  ;;  %v1772_v18 = vld [vmem:[#allocation2 + $0x5a8] sm:$0xff] }
 0x309   : > { %v4392_v57 = vpack.c.bf16 %v1702_v26, %v1701_v25  ;;  %v6230_v45 = vadd.f32 %v1498_v55, %v1457_v44  ;;  %v1737_v16 = vld [vmem:[#allocation2 + $0x490] sm:$0xff]  ;;  %v1754_v25 = vld [vmem:[#allocation2 + $0x518] sm:$0xff]  ;;  %v1740_v26 = vld [vmem:[#allocation2 + $0x4a8] sm:$0xff] }
 0x30a   : > { %v6232_v35 = vadd.f32 %v1506_v15, %v1459_v61  ;;  %v1771_v61 = vld [vmem:[#allocation2 + $0x5a0] sm:$0xff] }
 0x30b   : > { %4353 = vmatpush3.bf16.msra.mxu1 %v4352_v39  ;;  %4385 = vmatpush3.bf16.msra.mxu0 %v4384_v0  ;;  %v1518_v39 = vrot.slane %v6184_v58, %v5956_v29  ;;  %v1464_v0 = vmul.f32 %v1420_v17, %v1358_v8  ;;  %v1751_v29 = vld [vmem:[#allocation2 + $0x500] sm:$0xff]  ;;  %v1579_v55 = vmax.f32 %v6230_v45, 0.0  ;;  %v1721_v17 = vld [vmem:[#allocation2 + $0x410] sm:$0xff] }
 0x30c   : > { %4355 = vmatprep.subr.bf16.mxu1 %v4354_v38  ;;  %4387 = vmatprep.subr.bf16.mxu0 %v4386_v50  ;;  %v4360_v38 = vpack.c.bf16 %v1670_v23, %v1669_v22  ;;  %v4426_v50 = vpack.c.bf16 %v1768_v4, %v1767_v60  ;;  %v1581_v15 = vmax.f32 %v6232_v35, 0.0  ;;  %v4428_v8 = vpack.c.bf16 %v1752_v12, %v1751_v29  ;;  %v2576_v35 = vld [vmem:[%s7161_s5 + $0x520] sm:$0xff] }
 0x30d   : > { %v6234_v20 = vadd.f32 %v1518_v39, %v1462_v34  ;;  %v6236_v33 = vadd.f32 %v1526_v48, %v1464_v0  ;;  %v4398_v22 = vpack.c.bf16 %v1738_v43, %v1737_v16  ;;  %v4430_v23 = vpack.c.bf16 %v1770_v11, %v1769_v54  ;;  %v1723_v34 = vld [vmem:[#allocation2 + $0x420] sm:$0xff]  ;;  %v1724_v39 = vld [vmem:[#allocation2 + $0x428] sm:$0xff]  ;;  %v1725_v16 = vld [vmem:[#allocation2 + $0x430] sm:$0xff] }
 0x30e   : > { %v1755_v0 = vld [vmem:[#allocation2 + $0x520] sm:$0xff]  ;;  %v4434_v48 = vpack.c.bf16 %v1772_v18, %v1771_v61  ;;  %v4404_v3 = vpack.c.bf16 %v1724_v39, %v1723_v34  ;;  %v1726_v43 = vld [vmem:[#allocation2 + $0x438] sm:$0xff]  ;;  %v1757_v54 = vld [vmem:[#allocation2 + $0x530] sm:$0xff] }
 0x30f   : > { %4357 = vmatpush3.bf16.msra.mxu1 %v4356_v41  ;;  %4389 = vmatpush3.bf16.msra.mxu0 %v4388_v19  ;;  %v1722_v41 = vld [vmem:[#allocation2 + $0x418] sm:$0xff]  ;;  %v1753_v19 = vld [vmem:[#allocation2 + $0x510] sm:$0xff]  ;;  %v1586_v44 = vmax.f32 %v6236_v33, 0.0  ;;  %v1759_v61 = vld [vmem:[#allocation2 + $0x540] sm:$0xff] }
 0x310   : > { %4359 = vmatprep.subr.bf16.mxu1 %v4358_v30  ;;  %4391 = vmatprep.subr.bf16.mxu0 %v4390_v36  ;;  %v1584_v30 = vmax.f32 %v6234_v20, 0.0  ;;  %v1739_v36 = vld [vmem:[#allocation2 + $0x4a0] sm:$0xff]  ;;  %v4400_v31 = vpack.c.bf16 %v1722_v41, %v1721_v17  ;;  %v4432_v60 = vpack.c.bf16 %v1754_v25, %v1753_v19  ;;  %v1744_v17 = vld [vmem:[#allocation2 + $0x4c8] sm:$0xff]  ;;  %v1777_v34 = vld [vmem:[#allocation2 + $0x5d0] sm:$0xff] }
 0x311   : > { %v4402_v4 = vpack.c.bf16 %v1740_v26, %v1739_v36  ;;  %v1775_v41 = vld [vmem:[#allocation2 + $0x5c0] sm:$0xff]  ;;  %v1776_v19 = vld [vmem:[#allocation2 + $0x5c8] sm:$0xff]  ;;  %v1778_v39 = vld [vmem:[#allocation2 + $0x5d8] sm:$0xff] }
 0x312   : > { %v1727_v36 = vld [vmem:[#allocation2 + $0x440] sm:$0xff]  ;;  %v1728_v26 = vld [vmem:[#allocation2 + $0x448] sm:$0xff]  ;;  %v4442_v18 = vpack.c.bf16 %v1776_v19, %v1775_v41  ;;  %v2594_v33 = vld [vmem:[%s7161_s5 + $0x5b0] sm:$0xff] }
 0x313   : > { %4361 = vmatpush3.bf16.msra.mxu1 %v4360_v38  ;;  %4393 = vmatpush3.bf16.msra.mxu0 %v4392_v57  ;;  %v1756_v38 = vld [vmem:[#allocation2 + $0x528] sm:$0xff]  ;;  %v1741_v57 = vld [vmem:[#allocation2 + $0x4b0] sm:$0xff]  ;;  %v1763_v19 = vld [vmem:[#allocation2 + $0x560] sm:$0xff] }
 0x314   : > { %4395 = vmatprep.subr.bf16.mxu1 %v4394_v2  ;;  %4427 = vmatprep.subr.bf16.mxu0 %v4426_v50  ;;  %v1742_v2 = vld [vmem:[#allocation2 + $0x4b8] sm:$0xff]  ;;  %v1773_v50 = vld [vmem:[#allocation2 + $0x5b0] sm:$0xff]  ;;  %v4436_v29 = vpack.c.bf16 %v1756_v38, %v1755_v0  ;;  %v4412_v0 = vpack.c.bf16 %v1728_v26, %v1727_v36  ;;  %v1732_v41 = vld [vmem:[#allocation2 + $0x468] sm:$0xff] }
 0x315   : > { %v4406_v12 = vpack.c.bf16 %v1742_v2, %v1741_v57  ;;  %v4438_v11 = vpack.c.bf16 %v1774_v1, %v1773_v50  ;;  %v1729_v57 = vld [vmem:[#allocation2 + $0x450] sm:$0xff]  ;;  %v1730_v2 = vld [vmem:[#allocation2 + $0x458] sm:$0xff]  ;;  %v4446_v1 = vpack.c.bf16 %v1778_v39, %v1777_v34  ;;  %v1428_v34 = vrot.slane %v6172_v27, %v5969_v51 }
 0x316   : > { %2057 = vmatmul.mubr.f32.vlgmr.msra.gmra.mrb[10].mxu1 %v1579_v55  ;;  %2127 = vmatmul.mubr.f32.vlgmr.msra.gmra.mrb[12].mxu0 %v1581_v15  ;;  %v1761_v50 = vld [vmem:[#allocation2 + $0x550] sm:$0xff]  ;;  %v1750_v26 = vld [vmem:[#allocation2 + $0x4f8] sm:$0xff]  ;;  %v1514_v39 = vrot.slane %v6184_v58, %v5954_v28 }
 0x317   : > { %4397 = vmatpush3.bf16.msra.mxu1 %v4396_v9  ;;  %2196 = vmatprep.mubr.f32.mxu1 %v1584_v30  ;;  %v1758_v9 = vld [vmem:[#allocation2 + $0x538] sm:$0xff]  ;;  %v1749_v36 = vld [vmem:[#allocation2 + $0x4f0] sm:$0xff] }
 0x318   : > { %4429 = vmatpush3.bf16.msra.mxu0 %v4428_v8  ;;  %2266 = vmatprep.mubr.f32.mxu0 %v1586_v44  ;;  %v1743_v8 = vld [vmem:[#allocation2 + $0x4c0] sm:$0xff] }
 0x319   : > { %4399 = vmatprep.subr.bf16.mxu1 %v4398_v22  ;;  %4431 = vmatprep.subr.bf16.mxu0 %v4430_v23  ;;  %v4408_v22 = vpack.c.bf16 %v1726_v43, %v1725_v16  ;;  %v4440_v23 = vpack.c.bf16 %v1758_v9, %v1757_v54  ;;  %v4410_v25 = vpack.c.bf16 %v1744_v17, %v1743_v8  ;;  %v1779_v16 = vld [vmem:[#allocation2 + $0x5e0] sm:$0xff]  ;;  %v1780_v43 = vld [vmem:[#allocation2 + $0x5e8] sm:$0xff] }
 0x31a   : > { %v4416_v54 = vpack.c.bf16 %v1730_v2, %v1729_v57  ;;  %v1731_v17 = vld [vmem:[#allocation2 + $0x460] sm:$0xff]  ;;  %v1733_v57 = vld [vmem:[#allocation2 + $0x470] sm:$0xff] }
 0x31b   : > { %4401 = vmatpush3.bf16.msra.mxu1 %v4400_v31  ;;  %v1760_v31 = vld [vmem:[#allocation2 + $0x548] sm:$0xff]  ;;  %v1765_v2 = vld [vmem:[#allocation2 + $0x570] sm:$0xff] }
 0x31c   : > { %4433 = vmatpush3.bf16.msra.mxu0 %v4432_v60  ;;  %4403 = vmatprep.subr.bf16.mxu1 %v4402_v4  ;;  %v1745_v60 = vld [vmem:[#allocation2 + $0x4d0] sm:$0xff]  ;;  %v1746_v4 = vld [vmem:[#allocation2 + $0x4d8] sm:$0xff] }
 0x31d   : > { %4435 = vmatprep.subr.bf16.mxu0 %v4434_v48  ;;  %v4444_v48 = vpack.c.bf16 %v1760_v31, %v1759_v61  ;;  %v4414_v38 = vpack.c.bf16 %v1746_v4, %v1745_v60  ;;  %v1357_v61 = vmul.f32 %v6118_v46, %v6052_v53  ;;  %v1781_v31 = vld [vmem:[#allocation2 + $0x5f0] sm:$0xff]  ;;  %v1782_v60 = vld [vmem:[#allocation2 + $0x5f8] sm:$0xff]  ;;  %v1360_v4 = vmul.f32 %v6118_v46, %v6072_v6 }
 0x31e   : > { %v1436_v53 = vrot.slane %v6172_v27, %v5991_v63  ;;  %v1734_v6 = vld [vmem:[#allocation2 + $0x478] sm:$0xff] }
 0x31f   : > { %4405 = vmatpush3.bf16.msra.mxu1 %v4404_v3  ;;  %v1762_v3 = vld [vmem:[#allocation2 + $0x558] sm:$0xff] }
 0x320   : > { %4437 = vmatpush3.bf16.msra.mxu0 %v4436_v29  ;;  %4407 = vmatprep.subr.bf16.mxu1 %v4406_v12  ;;  %v1747_v29 = vld [vmem:[#allocation2 + $0x4e0] sm:$0xff]  ;;  %v1748_v12 = vld [vmem:[#allocation2 + $0x4e8] sm:$0xff]  ;;  %v4448_v9 = vpack.c.bf16 %v1762_v3, %v1761_v50  ;;  %v1766_v3 = vld [vmem:[#allocation2 + $0x578] sm:$0xff] }
 0x321   : > { %4439 = vmatprep.subr.bf16.mxu0 %v4438_v11  ;;  %v1408_v11 = vrot.slane %v6172_v27, %v5954_v28  ;;  %v4418_v8 = vpack.c.bf16 %v1748_v12, %v1747_v29  ;;  %v1522_v28 = vrot.slane %v6184_v58, %v5960_v32  ;;  %v1799_v12 = vld [vmem:[#allocation2 + $0x680] sm:$0xff] }
 0x323   : > { %4409 = vmatpush3.bf16.msra.mxu1 %v4408_v22  ;;  %v1355_v22 = vmul.f32 %v6118_v46, %v6037_v24  ;;  %v4420_v24 = vpack.c.bf16 %v1732_v41, %v1731_v17  ;;  %v1783_v41 = vld [vmem:[#allocation2 + $0x600] sm:$0xff] }
 0x324   : > { %4441 = vmatpush3.bf16.msra.mxu0 %v4440_v23  ;;  %4411 = vmatprep.subr.bf16.mxu1 %v4410_v25  ;;  %v4450_v23 = vpack.c.bf16 %v1780_v43, %v1779_v16  ;;  %v1764_v25 = vld [vmem:[#allocation2 + $0x568] sm:$0xff]  ;;  %v1534_v43 = vrot.slane %v6184_v58, %v5969_v51 }
 0x325   : > { %4443 = vmatprep.subr.bf16.mxu0 %v4442_v18  ;;  %v1416_v18 = vrot.slane %v6172_v27, %v5960_v32  ;;  %v1461_v50 = vmul.f32 %v1408_v11, %v1355_v22  ;;  %v1832_v16 = vld [vmem:[#allocation2 + $0x788] sm:$0xff]  ;;  %v1466_v27 = vmul.f32 %v1428_v34, %v1360_v4  ;;  %v1542_v11 = vrot.slane %v6184_v58, %v5991_v63  ;;  %v1785_v34 = vld [vmem:[#allocation2 + $0x610] sm:$0xff] }
 0x326   : > { %v1816_v51 = vld [vmem:[#allocation2 + $0x708] sm:$0xff] }
 0x327   : > { %4413 = vmatpush3.bf16.msra.mxu1 %v4412_v0  ;;  %v1362_v0 = vmul.f32 %v6118_v46, %v6082_v10  ;;  %v1463_v29 = vmul.f32 %v1416_v18, %v1357_v61  ;;  %v1800_v10 = vld [vmem:[#allocation2 + $0x688] sm:$0xff]  ;;  %v1831_v46 = vld [vmem:[#allocation2 + $0x780] sm:$0xff]  ;;  %v6274_v17 = vadd.f32 %v1514_v39, %v1461_v50  ;;  %v1802_v61 = vld [vmem:[#allocation2 + $0x698] sm:$0xff] }
 0x328   : > { %4445 = vmatpush3.bf16.msra.mxu0 %v4444_v48  ;;  %4415 = vmatprep.subr.bf16.mxu1 %v4414_v38  ;;  %v4452_v48 = vpack.c.bf16 %v1764_v25, %v1763_v19  ;;  %v4422_v38 = vpack.c.bf16 %v1750_v26, %v1749_v36  ;;  %v4458_v32 = vpack.c.bf16 %v1800_v10, %v1799_v12  ;;  %v1784_v19 = vld [vmem:[#allocation2 + $0x608] sm:$0xff]  ;;  %v1815_v25 = vld [vmem:[#allocation2 + $0x700] sm:$0xff]  ;;  %v1801_v26 = vld [vmem:[#allocation2 + $0x690] sm:$0xff] }
 0x329   : > { %4447 = vmatprep.subr.bf16.mxu0 %v4446_v1  ;;  %v4454_v1 = vpack.c.bf16 %v1782_v60, %v1781_v31  ;;  %v6276_v22 = vadd.f32 %v1522_v28, %v1463_v29  ;;  %v6278_v36 = vadd.f32 %v1534_v43, %v1466_v27  ;;  %v4460_v63 = vpack.c.bf16 %v1784_v19, %v1783_v41  ;;  %v1833_v18 = vld [vmem:[#allocation2 + $0x790] sm:$0xff]  ;;  %v1834_v31 = vld [vmem:[#allocation2 + $0x798] sm:$0xff]  ;;  %v1835_v50 = vld [vmem:[#allocation2 + $0x7a0] sm:$0xff] }
 0x32a   : > { %v1583_v60 = vmax.f32 %v6274_v17, 0.0  ;;  %v4492_v4 = vpack.c.bf16 %v1816_v51, %v1815_v25  ;;  %v1817_v39 = vld [vmem:[#allocation2 + $0x710] sm:$0xff]  ;;  %v1787_v10 = vld [vmem:[#allocation2 + $0x620] sm:$0xff]  ;;  %v1820_v43 = vld [vmem:[#allocation2 + $0x728] sm:$0xff] }
 0x32b   : > { %4417 = vmatpush3.bf16.msra.mxu1 %v4416_v54  ;;  %v4424_v54 = vpack.c.bf16 %v1734_v6, %v1733_v57  ;;  %v1804_v57 = vld [vmem:[#allocation2 + $0x6a8] sm:$0xff]  ;;  %v1588_v6 = vmax.f32 %v6278_v36, 0.0  ;;  %v1790_v25 = vld [vmem:[#allocation2 + $0x638] sm:$0xff]  ;;  %v1821_v51 = vld [vmem:[#allocation2 + $0x730] sm:$0xff] }
 0x32c   : > { %4449 = vmatpush3.bf16.msra.mxu0 %v4448_v9  ;;  %4419 = vmatprep.subr.bf16.mxu1 %v4418_v8  ;;  %v1468_v9 = vmul.f32 %v1436_v53, %v1362_v0  ;;  %v4456_v8 = vpack.c.bf16 %v1766_v3, %v1765_v2  ;;  %v1585_v0 = vmax.f32 %v6276_v22, 0.0  ;;  %v4462_v53 = vpack.c.bf16 %v1802_v61, %v1801_v26  ;;  %v1822_v61 = vld [vmem:[#allocation2 + $0x738] sm:$0xff]  ;;  %v2640_v22 = vld [vmem:[%s7161_s5 + $0x720] sm:$0xff] }
 0x32d   : > { %4451 = vmatprep.subr.bf16.mxu0 %v4450_v23  ;;  %v4490_v23 = vpack.c.bf16 %v1832_v16, %v1831_v46  ;;  %v4494_v2 = vpack.c.bf16 %v1834_v31, %v1833_v18  ;;  %v1788_v46 = vld [vmem:[#allocation2 + $0x628] sm:$0xff]  ;;  %v1819_v16 = vld [vmem:[#allocation2 + $0x720] sm:$0xff] }
 0x32e   : > { %v6280_v58 = vadd.f32 %v1542_v11, %v1468_v9  ;;  %v1806_v9 = vld [vmem:[#allocation2 + $0x6b8] sm:$0xff]  ;;  %v1837_v11 = vld [vmem:[#allocation2 + $0x7b0] sm:$0xff]  ;;  %v4500_v41 = vpack.c.bf16 %v1820_v43, %v1819_v16  ;;  %v1808_v18 = vld [vmem:[#allocation2 + $0x6c8] sm:$0xff] }
 0x32f   : > { %4421 = vmatpush3.bf16.msra.mxu1 %v4420_v24  ;;  %v1786_v24 = vld [vmem:[#allocation2 + $0x618] sm:$0xff]  ;;  %v1839_v31 = vld [vmem:[#allocation2 + $0x7c0] sm:$0xff]  ;;  %v1793_v16 = vld [vmem:[#allocation2 + $0x650] sm:$0xff] }
 0x330   : > { %4453 = vmatpush3.bf16.msra.mxu0 %v4452_v48  ;;  %4423 = vmatprep.subr.bf16.mxu1 %v4422_v38  ;;  %v1818_v48 = vld [vmem:[#allocation2 + $0x718] sm:$0xff]  ;;  %v1803_v38 = vld [vmem:[#allocation2 + $0x6a0] sm:$0xff]  ;;  %v1590_v3 = vmax.f32 %v6280_v58, 0.0  ;;  %v4464_v29 = vpack.c.bf16 %v1786_v24, %v1785_v34  ;;  %v4504_v24 = vpack.c.bf16 %v1822_v61, %v1821_v51  ;;  %v1825_v43 = vld [vmem:[#allocation2 + $0x750] sm:$0xff] }
 0x331   : > { %4455 = vmatprep.subr.bf16.mxu0 %v4454_v1  ;;  %v1836_v1 = vld [vmem:[#allocation2 + $0x7a8] sm:$0xff]  ;;  %v4496_v28 = vpack.c.bf16 %v1818_v48, %v1817_v39  ;;  %v4466_v12 = vpack.c.bf16 %v1804_v57, %v1803_v38  ;;  %v1823_v38 = vld [vmem:[#allocation2 + $0x740] sm:$0xff]  ;;  %v2658_v58 = vld [vmem:[%s7161_s5 + $0x7b0] sm:$0xff] }
 0x332   : > { %v4498_v27 = vpack.c.bf16 %v1836_v1, %v1835_v50  ;;  %v1792_v48 = vld [vmem:[#allocation2 + $0x648] sm:$0xff]  ;;  %v1809_v50 = vld [vmem:[#allocation2 + $0x6d0] sm:$0xff]  ;;  %v1810_v1 = vld [vmem:[#allocation2 + $0x6d8] sm:$0xff] }
 0x333   : > { %4425 = vmatpush3.bf16.msra.mxu1 %v4424_v54  ;;  %v1805_v54 = vld [vmem:[#allocation2 + $0x6b0] sm:$0xff]  ;;  %v1795_v51 = vld [vmem:[#allocation2 + $0x660] sm:$0xff] }
 0x334   : > { %4457 = vmatpush3.bf16.msra.mxu0 %v4456_v8  ;;  %4459 = vmatprep.subr.bf16.mxu1 %v4458_v32  ;;  %v1838_v8 = vld [vmem:[#allocation2 + $0x7b8] sm:$0xff]  ;;  %v4468_v32 = vpack.c.bf16 %v1788_v46, %v1787_v10  ;;  %v4470_v19 = vpack.c.bf16 %v1806_v9, %v1805_v54  ;;  %v4478_v46 = vpack.c.bf16 %v1810_v1, %v1809_v50  ;;  %v1827_v61 = vld [vmem:[#allocation2 + $0x760] sm:$0xff] }
 0x335   : > { %4491 = vmatprep.subr.bf16.mxu0 %v4490_v23  ;;  %v1789_v23 = vld [vmem:[#allocation2 + $0x630] sm:$0xff]  ;;  %v4502_v26 = vpack.c.bf16 %v1838_v8, %v1837_v11  ;;  %v1826_v9 = vld [vmem:[#allocation2 + $0x758] sm:$0xff]  ;;  %v1811_v11 = vld [vmem:[#allocation2 + $0x6e0] sm:$0xff] }
 0x336   : > { %2197 = vmatmul.mubr.f32.vlgmr.msra.gmra.mrb[12].mxu1 %v1583_v60  ;;  %v4472_v34 = vpack.c.bf16 %v1790_v25, %v1789_v23  ;;  %v1812_v8 = vld [vmem:[#allocation2 + $0x6e8] sm:$0xff]  ;;  %v4512_v23 = vpack.c.bf16 %v1826_v9, %v1825_v43  ;;  %v1830_v1 = vld [vmem:[#allocation2 + $0x778] sm:$0xff]  ;;  %v2412_v43 = vld [vmem:[%s7161_s5] sm:$0xff] }
 0x337   : > { %2267 = vmatmul.mubr.f32.vlgmr.msra.gmra.mrb[14].mxu0 %v1585_v0  ;;  %4461 = vmatpush3.bf16.msra.mxu1 %v4460_v63  ;;  %v1807_v63 = vld [vmem:[#allocation2 + $0x6c0] sm:$0xff]  ;;  %v4482_v25 = vpack.c.bf16 %v1812_v8, %v1811_v11  ;;  %v2445_v8 = vld [vmem:[%s7161_s5 + $0x108] sm:$0xff] }
 0x338   : > { %2336 = vmatprep.mubr.f32.mxu1 %v1588_v6  ;;  %4493 = vmatpush3.bf16.msra.mxu0 %v4492_v4  ;;  %v1840_v4 = vld [vmem:[#allocation2 + $0x7c8] sm:$0xff]  ;;  %v4474_v39 = vpack.c.bf16 %v1808_v18, %v1807_v63  ;;  %v2444_v11 = vld [vmem:[%s7161_s5 + $0x100] sm:$0xff] }
 0x339   : > { %2406 = vmatprep.mubr.f32.mxu0 %v1590_v3  ;;  %4463 = vmatprep.subr.bf16.mxu1 %v4462_v53  ;;  %v1791_v53 = vld [vmem:[#allocation2 + $0x640] sm:$0xff]  ;;  %v4506_v57 = vpack.c.bf16 %v1840_v4, %v1839_v31  ;;  %v1828_v18 = vld [vmem:[#allocation2 + $0x768] sm:$0xff]  ;;  %v1813_v31 = vld [vmem:[#allocation2 + $0x6f0] sm:$0xff] }
 0x33a   : > { %4495 = vmatprep.subr.bf16.mxu0 %v4494_v2  ;;  %v1824_v2 = vld [vmem:[#allocation2 + $0x748] sm:$0xff]  ;;  %v1814_v4 = vld [vmem:[#allocation2 + $0x6f8] sm:$0xff] }
 0x33b   : > { %4465 = vmatpush3.bf16.msra.mxu1 %v4464_v29  ;;  %v1841_v29 = vld [vmem:[#allocation2 + $0x7d0] sm:$0xff]  ;;  %v4508_v10 = vpack.c.bf16 %v1824_v2, %v1823_v38 }
 0x33c   : > { %4497 = vmatpush3.bf16.msra.mxu0 %v4496_v28  ;;  %4467 = vmatprep.subr.bf16.mxu1 %v4466_v12  ;;  %v1842_v28 = vld [vmem:[#allocation2 + $0x7d8] sm:$0xff]  ;;  %v4476_v12 = vpack.c.bf16 %v1792_v48, %v1791_v53  ;;  %v4516_v53 = vpack.c.bf16 %v1828_v18, %v1827_v61  ;;  %v4486_v48 = vpack.c.bf16 %v1814_v4, %v1813_v31  ;;  %v1797_v38 = vld [vmem:[#allocation2 + $0x670] sm:$0xff]  ;;  %v1589_v31 = vmax.f32 %v6204_v62, 0.0 }
 0x33d   : > { %4499 = vmatprep.subr.bf16.mxu0 %v4498_v27  ;;  %v1794_v27 = vld [vmem:[#allocation2 + $0x658] sm:$0xff]  ;;  %v4510_v54 = vpack.c.bf16 %v1842_v28, %v1841_v29  ;;  %v1829_v2 = vld [vmem:[#allocation2 + $0x770] sm:$0xff]  ;;  %v2428_v29 = vld [vmem:[%s7161_s5 + $0x80] sm:$0xff] }
 0x33e   : > { %v2429_v28 = vld [vmem:[%s7161_s5 + $0x88] sm:$0xff]  ;;  %v2414_v61 = vld [vmem:[%s7161_s5 + $0x10] sm:$0xff] }
 0x33f   : > { %4469 = vmatpush3.bf16.msra.mxu1 %v4468_v32  ;;  %v1843_v32 = vld [vmem:[#allocation2 + $0x7e0] sm:$0xff]  ;;  %v2446_v18 = vld [vmem:[%s7161_s5 + $0x110] sm:$0xff] }
 0x340   : > { %4501 = vmatpush3.bf16.msra.mxu0 %v4500_v41  ;;  %4471 = vmatprep.subr.bf16.mxu1 %v4470_v19  ;;  %v1844_v41 = vld [vmem:[#allocation2 + $0x7e8] sm:$0xff]  ;;  %v4480_v19 = vpack.c.bf16 %v1794_v27, %v1793_v16  ;;  %v4520_v16 = vpack.c.bf16 %v1830_v1, %v1829_v2  ;;  %v4522_v27 = vpack.c.bf16 %v2429_v28, %v2428_v29  ;;  %v2416_v1 = vld [vmem:[%s7161_s5 + $0x20] sm:$0xff] }
 0x341   : > { %4503 = vmatprep.subr.bf16.mxu0 %v4502_v26  ;;  %v1796_v26 = vld [vmem:[#allocation2 + $0x668] sm:$0xff]  ;;  %v4514_v63 = vpack.c.bf16 %v1844_v41, %v1843_v32  ;;  %v2430_v32 = vld [vmem:[%s7161_s5 + $0x90] sm:$0xff]  ;;  %v2431_v41 = vld [vmem:[%s7161_s5 + $0x98] sm:$0xff] }
 0x342   : > { %v4526_v4 = vpack.c.bf16 %v2431_v41, %v2430_v32  ;;  %v2417_v29 = vld [vmem:[%s7161_s5 + $0x28] sm:$0xff]  ;;  %v2448_v28 = vld [vmem:[%s7161_s5 + $0x120] sm:$0xff] }
 0x343   : > { %4473 = vmatpush3.bf16.msra.mxu1 %v4472_v34  ;;  %v1845_v34 = vld [vmem:[#allocation2 + $0x7f0] sm:$0xff]  ;;  %v2436_v32 = vld [vmem:[%s7161_s5 + $0xc0] sm:$0xff]  ;;  %v2437_v41 = vld [vmem:[%s7161_s5 + $0xc8] sm:$0xff] }
 0x344   : > { %4505 = vmatpush3.bf16.msra.mxu0 %v4504_v24  ;;  %4475 = vmatprep.subr.bf16.mxu1 %v4474_v39  ;;  %v1846_v24 = vld [vmem:[#allocation2 + $0x7f8] sm:$0xff]  ;;  %v4484_v39 = vpack.c.bf16 %v1796_v26, %v1795_v51  ;;  %v1587_v51 = vmax.f32 %v6202_v59, 0.0  ;;  %v4556_v26 = vpack.c.bf16 %v2445_v8, %v2444_v11 }
 0x345   : > { %4507 = vmatprep.subr.bf16.mxu0 %v4506_v57  ;;  %v1798_v57 = vld [vmem:[#allocation2 + $0x678] sm:$0xff]  ;;  %v4518_v50 = vpack.c.bf16 %v1846_v24, %v1845_v34  ;;  %v2432_v24 = vld [vmem:[%s7161_s5 + $0xa0] sm:$0xff] }
 0x346   : > { %v2447_v34 = vld [vmem:[%s7161_s5 + $0x118] sm:$0xff] }
 0x347   : > { %4477 = vmatpush3.bf16.msra.mxu1 %v4476_v12  ;;  %v2460_v12 = vld [vmem:[%s7161_s5 + $0x180] sm:$0xff]  ;;  %v4560_v2 = vpack.c.bf16 %v2447_v34, %v2446_v18  ;;  %v2451_v8 = vld [vmem:[%s7161_s5 + $0x138] sm:$0xff]  ;;  %v2421_v18 = vld [vmem:[%s7161_s5 + $0x48] sm:$0xff] }
 0x348   : > { %4509 = vmatpush3.bf16.msra.mxu0 %v4508_v10  ;;  %4479 = vmatprep.subr.bf16.mxu1 %v4478_v46  ;;  %v2461_v10 = vld [vmem:[%s7161_s5 + $0x188] sm:$0xff]  ;;  %v4488_v46 = vpack.c.bf16 %v1798_v57, %v1797_v38 }
 0x349   : > { %4511 = vmatprep.subr.bf16.mxu0 %v4510_v54  ;;  %v2413_v54 = vld [vmem:[%s7161_s5 + $0x8] sm:$0xff]  ;;  %v4554_v9 = vpack.c.bf16 %v2461_v10, %v2460_v12  ;;  %v2434_v12 = vld [vmem:[%s7161_s5 + $0xb0] sm:$0xff]  ;;  %v2435_v10 = vld [vmem:[%s7161_s5 + $0xb8] sm:$0xff] }
 0x34a   : > { %v2465_v38 = vld [vmem:[%s7161_s5 + $0x1a8] sm:$0xff] }
 0x34b   : > { %4481 = vmatpush3.bf16.msra.mxu1 %v4480_v19  ;;  %v4524_v19 = vpack.c.bf16 %v2413_v54, %v2412_v43  ;;  %v2418_v43 = vld [vmem:[%s7161_s5 + $0x30] sm:$0xff]  ;;  %v2419_v54 = vld [vmem:[%s7161_s5 + $0x38] sm:$0xff] }
 0x34c   : > { %4513 = vmatpush3.bf16.msra.mxu0 %v4512_v23  ;;  %4483 = vmatprep.subr.bf16.mxu1 %v4482_v25  ;;  %v2462_v23 = vld [vmem:[%s7161_s5 + $0x190] sm:$0xff]  ;;  %v2463_v25 = vld [vmem:[%s7161_s5 + $0x198] sm:$0xff] }
 0x34d   : > { %4515 = vmatprep.subr.bf16.mxu0 %v4514_v63  ;;  %v2415_v63 = vld [vmem:[%s7161_s5 + $0x18] sm:$0xff] }
 0x34e   : > { %v4528_v57 = vpack.c.bf16 %v2415_v63, %v2414_v61  ;;  %v4538_v61 = vpack.c.bf16 %v2437_v41, %v2436_v32  ;;  %v2420_v63 = vld [vmem:[%s7161_s5 + $0x40] sm:$0xff]  ;;  %v2442_v32 = vld [vmem:[%s7161_s5 + $0xf0] sm:$0xff]  ;;  %v2443_v41 = vld [vmem:[%s7161_s5 + $0xf8] sm:$0xff] }
 0x34f   : > { %4485 = vmatpush3.bf16.msra.mxu1 %v4484_v39  ;;  %v2433_v39 = vld [vmem:[%s7161_s5 + $0xa8] sm:$0xff] }
 0x350   : > { %4517 = vmatpush3.bf16.msra.mxu0 %v4516_v53  ;;  %4487 = vmatprep.subr.bf16.mxu1 %v4486_v48  ;;  %v4558_v53 = vpack.c.bf16 %v2463_v25, %v2462_v23  ;;  %v2464_v48 = vld [vmem:[%s7161_s5 + $0x1a0] sm:$0xff]  ;;  %v2469_v23 = vld [vmem:[%s7161_s5 + $0x1c8] sm:$0xff]  ;;  %v4536_v25 = vpack.c.bf16 %v2419_v54, %v2418_v43 }
 0x351   : > { %4519 = vmatprep.subr.bf16.mxu0 %v4518_v50  ;;  %v4530_v50 = vpack.c.bf16 %v2433_v39, %v2432_v24  ;;  %v4562_v42 = vpack.c.bf16 %v2465_v38, %v2464_v48  ;;  %v2453_v24 = vld [vmem:[%s7161_s5 + $0x148] sm:$0xff]  ;;  %v2438_v39 = vld [vmem:[%s7161_s5 + $0xd0] sm:$0xff]  ;;  %v2471_v38 = vld [vmem:[%s7161_s5 + $0x1d8] sm:$0xff] }
 0x352   : > { %v2470_v48 = vld [vmem:[%s7161_s5 + $0x1d0] sm:$0xff]  ;;  %v2424_v43 = vld [vmem:[%s7161_s5 + $0x60] sm:$0xff]  ;;  %v2425_v54 = vld [vmem:[%s7161_s5 + $0x68] sm:$0xff] }
 0x353   : > { %4489 = vmatpush3.bf16.msra.mxu1 %v4488_v46  ;;  %v4532_v46 = vpack.c.bf16 %v2417_v29, %v2416_v1  ;;  %v2422_v1 = vld [vmem:[%s7161_s5 + $0x50] sm:$0xff]  ;;  %v2423_v29 = vld [vmem:[%s7161_s5 + $0x58] sm:$0xff] }
 0x354   : > { %4521 = vmatpush3.bf16.msra.mxu0 %v4520_v16  ;;  %4523 = vmatprep.subr.bf16.mxu1 %v4522_v27  ;;  %v4534_v27 = vpack.c.bf16 %v2435_v10, %v2434_v12  ;;  %v2440_v12 = vld [vmem:[%s7161_s5 + $0xe0] sm:$0xff]  ;;  %v2441_v10 = vld [vmem:[%s7161_s5 + $0xe8] sm:$0xff] }
 0x355   : > { %4555 = vmatprep.subr.bf16.mxu0 %v4554_v9  ;;  %v2450_v9 = vld [vmem:[%s7161_s5 + $0x130] sm:$0xff] }
 0x356   : > { %2337 = vmatmul.mubr.f32.vlgmr.msra.gmra.mrb[14].mxu1 %v1587_v51 }
 0x357   : > { %2407 = vmatmul.mubr.f32.vlgmr.msra.gmra.mrb[16].mxu0 %v1589_v31  ;;  %4525 = vmatpush3.bf16.msra.mxu1 %v4524_v19  ;;  %v2468_v19 = vld [vmem:[%s7161_s5 + $0x1c0] sm:$0xff] }
 0x358   : > { %2732 = vmatprep.mubr.f32.mxu1 %v1576_v56  ;;  %4557 = vmatpush3.bf16.msra.mxu0 %v4556_v26  ;;  %v2449_v56 = vld [vmem:[%s7161_s5 + $0x128] sm:$0xff]  ;;  %v4568_v26 = vpack.c.bf16 %v2451_v8, %v2450_v9  ;;  %v4570_v34 = vpack.c.bf16 %v2469_v23, %v2468_v19  ;;  %v2456_v9 = vld [vmem:[%s7161_s5 + $0x160] sm:$0xff]  ;;  %v2474_v19 = vld [vmem:[%s7161_s5 + $0x1f0] sm:$0xff] }
 0x359   : > { %2802 = vmatprep.mubr.f32.mxu0 %v1578_v13  ;;  %4527 = vmatprep.subr.bf16.mxu1 %v4526_v4  ;;  %v2467_v13 = vld [vmem:[%s7161_s5 + $0x1b8] sm:$0xff]  ;;  %v4564_v16 = vpack.c.bf16 %v2449_v56, %v2448_v28  ;;  %v2452_v4 = vld [vmem:[%s7161_s5 + $0x140] sm:$0xff]  ;;  %v2454_v28 = vld [vmem:[%s7161_s5 + $0x150] sm:$0xff] }
 0x35a   : > { %4559 = vmatprep.subr.bf16.mxu0 %v4558_v53  ;;  %v4566_v11 = vpack.c.bf16 %v2467_v13, %v2466_v5  ;;  %v2439_v53 = vld [vmem:[%s7161_s5 + $0xd8] sm:$0xff]  ;;  %v2472_v5 = vld [vmem:[%s7161_s5 + $0x1e0] sm:$0xff]  ;;  %v2473_v13 = vld [vmem:[%s7161_s5 + $0x1e8] sm:$0xff] }
 0x35b   : > { %4529 = vmatpush3.bf16.msra.mxu1 %v4528_v57  ;;  %v4540_v57 = vpack.c.bf16 %v2421_v18, %v2420_v63  ;;  %v2455_v56 = vld [vmem:[%s7161_s5 + $0x158] sm:$0xff]  ;;  %v2457_v8 = vld [vmem:[%s7161_s5 + $0x168] sm:$0xff]  ;;  %v2426_v63 = vld [vmem:[%s7161_s5 + $0x70] sm:$0xff] }
 0x35c   : > { %4561 = vmatpush3.bf16.msra.mxu0 %v4560_v2  ;;  %4531 = vmatprep.subr.bf16.mxu1 %v4530_v50  ;;  %v4572_v2 = vpack.c.bf16 %v2453_v24, %v2452_v4  ;;  %v4542_v50 = vpack.c.bf16 %v2439_v53, %v2438_v39  ;;  %v2475_v23 = vld [vmem:[%s7161_s5 + $0x1f8] sm:$0xff]  ;;  %v2458_v4 = vld [vmem:[%s7161_s5 + $0x170] sm:$0xff]  ;;  %v2492_v39 = vld [vmem:[%s7161_s5 + $0x280] sm:$0xff] }
 0x35d   : > { %4563 = vmatprep.subr.bf16.mxu0 %v4562_v42  ;;  %v4574_v42 = vpack.c.bf16 %v2471_v38, %v2470_v48  ;;  %v2427_v18 = vld [vmem:[%s7161_s5 + $0x78] sm:$0xff]  ;;  %v2493_v53 = vld [vmem:[%s7161_s5 + $0x288] sm:$0xff]  ;;  %v2524_v48 = vld [vmem:[%s7161_s5 + $0x380] sm:$0xff] }
 0x35e   : > { %v2459_v24 = vld [vmem:[%s7161_s5 + $0x178] sm:$0xff]  ;;  %v2525_v38 = vld [vmem:[%s7161_s5 + $0x388] sm:$0xff] }
 0x35f   : > { %4533 = vmatpush3.bf16.msra.mxu1 %v4532_v46  ;;  %v4544_v46 = vpack.c.bf16 %v2423_v29, %v2422_v1  ;;  %v2476_v1 = vld [vmem:[%s7161_s5 + $0x200] sm:$0xff]  ;;  %v2477_v29 = vld [vmem:[%s7161_s5 + $0x208] sm:$0xff] }
 0x360   : > { %4565 = vmatpush3.bf16.msra.mxu0 %v4564_v16  ;;  %4535 = vmatprep.subr.bf16.mxu1 %v4534_v27  ;;  %v4576_v16 = vpack.c.bf16 %v2455_v56, %v2454_v28  ;;  %v4546_v27 = vpack.c.bf16 %v2441_v10, %v2440_v12  ;;  %v4618_v28 = vpack.c.bf16 %v2525_v38, %v2524_v48  ;;  %v2509_v56 = vld [vmem:[%s7161_s5 + $0x308] sm:$0xff]  ;;  %v2494_v12 = vld [vmem:[%s7161_s5 + $0x290] sm:$0xff]  ;;  %v2495_v10 = vld [vmem:[%s7161_s5 + $0x298] sm:$0xff] }
 0x361   : > { %4567 = vmatprep.subr.bf16.mxu0 %v4566_v11  ;;  %v4578_v11 = vpack.c.bf16 %v2473_v13, %v2472_v5  ;;  %v4588_v5 = vpack.c.bf16 %v2477_v29, %v2476_v1  ;;  %v2526_v13 = vld [vmem:[%s7161_s5 + $0x390] sm:$0xff]  ;;  %v2515_v38 = vld [vmem:[%s7161_s5 + $0x338] sm:$0xff]  ;;  %v2533_v1 = vld [vmem:[%s7161_s5 + $0x3c8] sm:$0xff] }
 0x363   : > { %4537 = vmatpush3.bf16.msra.mxu1 %v4536_v25  ;;  %v4548_v25 = vpack.c.bf16 %v2425_v54, %v2424_v43  ;;  %v2479_v43 = vld [vmem:[%s7161_s5 + $0x218] sm:$0xff]  ;;  %v2510_v54 = vld [vmem:[%s7161_s5 + $0x310] sm:$0xff] }
 0x364   : > { %4569 = vmatpush3.bf16.msra.mxu0 %v4568_v26  ;;  %4539 = vmatprep.subr.bf16.mxu1 %v4538_v61  ;;  %v4580_v26 = vpack.c.bf16 %v2457_v8, %v2456_v9  ;;  %v4550_v61 = vpack.c.bf16 %v2443_v41, %v2442_v32  ;;  %v4590_v9 = vpack.c.bf16 %v2495_v10, %v2494_v12  ;;  %v2496_v8 = vld [vmem:[%s7161_s5 + $0x2a0] sm:$0xff]  ;;  %v2497_v32 = vld [vmem:[%s7161_s5 + $0x2a8] sm:$0xff] }
 0x365   : > { %4571 = vmatprep.subr.bf16.mxu0 %v4570_v34  ;;  %v4582_v34 = vpack.c.bf16 %v2475_v23, %v2474_v19  ;;  %v2528_v19 = vld [vmem:[%s7161_s5 + $0x3a0] sm:$0xff]  ;;  %v2529_v23 = vld [vmem:[%s7161_s5 + $0x3a8] sm:$0xff] }
 0x366   : > { %v4626_v40 = vpack.c.bf16 %v2529_v23, %v2528_v19  ;;  %v2485_v12 = vld [vmem:[%s7161_s5 + $0x248] sm:$0xff]  ;;  %v2516_v10 = vld [vmem:[%s7161_s5 + $0x340] sm:$0xff]  ;;  %v2519_v23 = vld [vmem:[%s7161_s5 + $0x358] sm:$0xff] }
 0x367   : > { %4541 = vmatpush3.bf16.msra.mxu1 %v4540_v57  ;;  %v4552_v57 = vpack.c.bf16 %v2427_v18, %v2426_v63  ;;  %v2499_v63 = vld [vmem:[%s7161_s5 + $0x2b8] sm:$0xff] }
 0x368   : > { %4573 = vmatpush3.bf16.msra.mxu0 %v4572_v2  ;;  %4543 = vmatprep.subr.bf16.mxu1 %v4542_v50  ;;  %v4584_v2 = vpack.c.bf16 %v2459_v24, %v2458_v4  ;;  %v4586_v50 = vpack.c.bf16 %v2493_v53, %v2492_v39  ;;  %v2482_v24 = vld [vmem:[%s7161_s5 + $0x230] sm:$0xff]  ;;  %v2483_v39 = vld [vmem:[%s7161_s5 + $0x238] sm:$0xff] }
 0x369   : > { %4575 = vmatprep.subr.bf16.mxu0 %v4574_v42  ;;  %v2508_v42 = vld [vmem:[%s7161_s5 + $0x300] sm:$0xff]  ;;  %v2514_v53 = vld [vmem:[%s7161_s5 + $0x330] sm:$0xff]  ;;  %v4600_v29 = vpack.c.bf16 %v2483_v39, %v2482_v24  ;;  %v2539_v24 = vld [vmem:[%s7161_s5 + $0x3f8] sm:$0xff] }
 0x36b   : > { %4545 = vmatpush3.bf16.msra.mxu1 %v4544_v46  ;;  %v2527_v46 = vld [vmem:[%s7161_s5 + $0x398] sm:$0xff] }
 0x36c   : > { %4577 = vmatpush3.bf16.msra.mxu0 %v4576_v16  ;;  %4547 = vmatprep.subr.bf16.mxu1 %v4546_v27  ;;  %v4620_v16 = vpack.c.bf16 %v2509_v56, %v2508_v42  ;;  %v2478_v27 = vld [vmem:[%s7161_s5 + $0x210] sm:$0xff]  ;;  %v4622_v41 = vpack.c.bf16 %v2527_v46, %v2526_v13  ;;  %v2484_v56 = vld [vmem:[%s7161_s5 + $0x240] sm:$0xff]  ;;  %v2517_v13 = vld [vmem:[%s7161_s5 + $0x348] sm:$0xff] }
 0x36d   : > { %4579 = vmatprep.subr.bf16.mxu0 %v4578_v11  ;;  %v2511_v11 = vld [vmem:[%s7161_s5 + $0x318] sm:$0xff]  ;;  %v2502_v46 = vld [vmem:[%s7161_s5 + $0x2d0] sm:$0xff] }
 0x36e   : > { %v4624_v47 = vpack.c.bf16 %v2511_v11, %v2510_v54  ;;  %v4604_v54 = vpack.c.bf16 %v2485_v12, %v2484_v56  ;;  %v2589_v56 = vld [vmem:[%s7161_s5 + $0x588] sm:$0xff] }
 0x36f   : > { %4549 = vmatpush3.bf16.msra.mxu1 %v4548_v25  ;;  %v4592_v25 = vpack.c.bf16 %v2479_v43, %v2478_v27  ;;  %v2534_v27 = vld [vmem:[%s7161_s5 + $0x3d0] sm:$0xff]  ;;  %v2535_v43 = vld [vmem:[%s7161_s5 + $0x3d8] sm:$0xff] }
 0x370   : > { %4581 = vmatpush3.bf16.msra.mxu0 %v4580_v26  ;;  %4551 = vmatprep.subr.bf16.mxu1 %v4550_v61  ;;  %v2480_v26 = vld [vmem:[%s7161_s5 + $0x220] sm:$0xff]  ;;  %v2481_v61 = vld [vmem:[%s7161_s5 + $0x228] sm:$0xff]  ;;  %v4638_v19 = vpack.c.bf16 %v2535_v43, %v2534_v27 }
 0x371   : > { %4583 = vmatprep.subr.bf16.mxu0 %v4582_v34  ;;  %v4596_v18 = vpack.c.bf16 %v2481_v61, %v2480_v26  ;;  %v2537_v26 = vld [vmem:[%s7161_s5 + $0x3e8] sm:$0xff]  ;;  %v2572_v27 = vld [vmem:[%s7161_s5 + $0x500] sm:$0xff] }
 0x372   : > { %v2573_v43 = vld [vmem:[%s7161_s5 + $0x508] sm:$0xff] }
 0x373   : > { %4553 = vmatpush3.bf16.msra.mxu1 %v4552_v57  ;;  %v2500_v57 = vld [vmem:[%s7161_s5 + $0x2c0] sm:$0xff] }
 0x374   : > { %4585 = vmatpush3.bf16.msra.mxu0 %v4584_v2  ;;  %4587 = vmatprep.subr.bf16.mxu1 %v4586_v50  ;;  %v2501_v2 = vld [vmem:[%s7161_s5 + $0x2c8] sm:$0xff]  ;;  %v2532_v50 = vld [vmem:[%s7161_s5 + $0x3c0] sm:$0xff] }
 0x375   : > { %4619 = vmatprep.subr.bf16.mxu0 %v4618_v28  ;;  %v4632_v28 = vpack.c.bf16 %v2515_v38, %v2514_v53  ;;  %v4602_v42 = vpack.c.bf16 %v2501_v2, %v2500_v57  ;;  %v2490_v38 = vld [vmem:[%s7161_s5 + $0x270] sm:$0xff]  ;;  %v2491_v57 = vld [vmem:[%s7161_s5 + $0x278] sm:$0xff] }
 0x376   : > { %2733 = vmatmul.mubr.f32.vlgmr.msra.gmra.mrb[16].mxu1 %v1575_v52  ;;  %v4594_v52 = vpack.c.bf16 %v2497_v32, %v2496_v8  ;;  %v2486_v8 = vld [vmem:[%s7161_s5 + $0x250] sm:$0xff]  ;;  %v2487_v32 = vld [vmem:[%s7161_s5 + $0x258] sm:$0xff]  ;;  %v4616_v12 = vpack.c.bf16 %v2491_v57, %v2490_v38  ;;  %v2564_v57 = vld [vmem:[%s7161_s5 + $0x4c0] sm:$0xff] }
 0x377   : > { %2803 = vmatmul.mubr.f32.vlgmr.msra.gmra.mrb[18].mxu0 %v1577_v21  ;;  %4589 = vmatpush3.bf16.msra.mxu1 %v4588_v5  ;;  %v2513_v21 = vld [vmem:[%s7161_s5 + $0x328] sm:$0xff]  ;;  %v4634_v5 = vpack.c.bf16 %v2533_v1, %v2532_v50  ;;  %v4608_v61 = vpack.c.bf16 %v2487_v32, %v2486_v8  ;;  %v2522_v2 = vld [vmem:[%s7161_s5 + $0x370] sm:$0xff]  ;;  %v2523_v1 = vld [vmem:[%s7161_s5 + $0x378] sm:$0xff] }
 0x378   : > { %2872 = vmatprep.mubr.f32.mxu1 %v1580_v37  ;;  %4621 = vmatpush3.bf16.msra.mxu0 %v4620_v16  ;;  %v2498_v37 = vld [vmem:[%s7161_s5 + $0x2b0] sm:$0xff]  ;;  %v4628_v4 = vpack.c.bf16 %v2513_v21, %v2512_v7  ;;  %v2503_v16 = vld [vmem:[%s7161_s5 + $0x2d8] sm:$0xff]  ;;  %v2488_v21 = vld [vmem:[%s7161_s5 + $0x260] sm:$0xff] }
 0x379   : > { %2942 = vmatprep.mubr.f32.mxu0 %v1582_v49  ;;  %4591 = vmatprep.subr.bf16.mxu1 %v4590_v9  ;;  %v2531_v49 = vld [vmem:[%s7161_s5 + $0x3b8] sm:$0xff]  ;;  %v4598_v34 = vpack.c.bf16 %v2499_v63, %v2498_v37  ;;  %v4636_v9 = vpack.c.bf16 %v2517_v13, %v2516_v10  ;;  %v4606_v11 = vpack.c.bf16 %v2503_v16, %v2502_v46  ;;  %v2489_v37 = vld [vmem:[%s7161_s5 + $0x268] sm:$0xff]  ;;  %v2520_v63 = vld [vmem:[%s7161_s5 + $0x360] sm:$0xff] }
 0x37a   : > { %4623 = vmatprep.subr.bf16.mxu0 %v4622_v41  ;;  %v4630_v48 = vpack.c.bf16 %v2531_v49, %v2530_v14  ;;  %v2518_v41 = vld [vmem:[%s7161_s5 + $0x350] sm:$0xff]  ;;  %v2521_v49 = vld [vmem:[%s7161_s5 + $0x368] sm:$0xff]  ;;  %v4612_v39 = vpack.c.bf16 %v2489_v37, %v2488_v21  ;;  %v4648_v10 = vpack.c.bf16 %v2523_v1, %v2522_v2  ;;  %v2540_v13 = vld [vmem:[%s7161_s5 + $0x400] sm:$0xff] }
 0x37b   : > { %4593 = vmatpush3.bf16.msra.mxu1 %v4592_v25  ;;  %v2504_v25 = vld [vmem:[%s7161_s5 + $0x2e0] sm:$0xff]  ;;  %v4640_v7 = vpack.c.bf16 %v2519_v23, %v2518_v41  ;;  %v4644_v53 = vpack.c.bf16 %v2521_v49, %v2520_v63  ;;  %v2541_v46 = vld [vmem:[%s7161_s5 + $0x408] sm:$0xff]  ;;  %v2590_v8 = vld [vmem:[%s7161_s5 + $0x590] sm:$0xff]  ;;  %v4684_v41 = vpack.c.bf16 %v2573_v43, %v2572_v27 }
 0x37c   : > { %4625 = vmatpush3.bf16.msra.mxu0 %v4624_v47  ;;  %4595 = vmatprep.subr.bf16.mxu1 %v4594_v52  ;;  %v2505_v47 = vld [vmem:[%s7161_s5 + $0x2e8] sm:$0xff]  ;;  %v2536_v52 = vld [vmem:[%s7161_s5 + $0x3e0] sm:$0xff]  ;;  %v2591_v32 = vld [vmem:[%s7161_s5 + $0x598] sm:$0xff] }
 0x37d   : > { %4627 = vmatprep.subr.bf16.mxu0 %v4626_v40  ;;  %v4610_v40 = vpack.c.bf16 %v2505_v47, %v2504_v25  ;;  %v4642_v14 = vpack.c.bf16 %v2537_v26, %v2536_v52  ;;  %v2543_v23 = vld [vmem:[%s7161_s5 + $0x418] sm:$0xff]  ;;  %v2574_v25 = vld [vmem:[%s7161_s5 + $0x510] sm:$0xff]  ;;  %v2560_v26 = vld [vmem:[%s7161_s5 + $0x4a0] sm:$0xff] }
 0x37e   : > { %v2575_v52 = vld [vmem:[%s7161_s5 + $0x518] sm:$0xff]  ;;  %v2593_v21 = vld [vmem:[%s7161_s5 + $0x5a8] sm:$0xff]  ;;  %v2544_v63 = vld [vmem:[%s7161_s5 + $0x420] sm:$0xff] }
 0x37f   : > { %4597 = vmatpush3.bf16.msra.mxu1 %v4596_v18  ;;  %v2506_v18 = vld [vmem:[%s7161_s5 + $0x2f0] sm:$0xff]  ;;  %v4688_v45 = vpack.c.bf16 %v2575_v52, %v2574_v25  ;;  %v2563_v49 = vld [vmem:[%s7161_s5 + $0x4b8] sm:$0xff]  ;;  %v2565_v2 = vld [vmem:[%s7161_s5 + $0x4c8] sm:$0xff] }
 0x380   : > { %4629 = vmatpush3.bf16.msra.mxu0 %v4628_v4  ;;  %4599 = vmatprep.subr.bf16.mxu1 %v4598_v34  ;;  %v2507_v4 = vld [vmem:[%s7161_s5 + $0x2f8] sm:$0xff]  ;;  %v2538_v34 = vld [vmem:[%s7161_s5 + $0x3f0] sm:$0xff]  ;;  %v2597_v1 = vld [vmem:[%s7161_s5 + $0x5c8] sm:$0xff] }
 0x381   : > { %4631 = vmatprep.subr.bf16.mxu0 %v4630_v48  ;;  %v4614_v48 = vpack.c.bf16 %v2507_v4, %v2506_v18  ;;  %v4646_v50 = vpack.c.bf16 %v2539_v24, %v2538_v34  ;;  %v2546_v24 = vld [vmem:[%s7161_s5 + $0x430] sm:$0xff]  ;;  %v2579_v38 = vld [vmem:[%s7161_s5 + $0x538] sm:$0xff]  ;;  %v2568_v25 = vld [vmem:[%s7161_s5 + $0x4e0] sm:$0xff] }
 0x382   : > { %v2598_v27 = vld [vmem:[%s7161_s5 + $0x5d0] sm:$0xff]  ;;  %v2599_v43 = vld [vmem:[%s7161_s5 + $0x5d8] sm:$0xff]  ;;  %v2600_v52 = vld [vmem:[%s7161_s5 + $0x5e0] sm:$0xff] }
 0x383   : > { %4601 = vmatpush3.bf16.msra.mxu1 %v4600_v29  ;;  %v2556_v29 = vld [vmem:[%s7161_s5 + $0x480] sm:$0xff] }
 0x384   : > { %4633 = vmatpush3.bf16.msra.mxu0 %v4632_v28  ;;  %4603 = vmatprep.subr.bf16.mxu1 %v4602_v42  ;;  %v2557_v28 = vld [vmem:[%s7161_s5 + $0x488] sm:$0xff]  ;;  %v2588_v42 = vld [vmem:[%s7161_s5 + $0x580] sm:$0xff] }
 0x385   : > { %4635 = vmatprep.subr.bf16.mxu0 %v4634_v5  ;;  %v4650_v5 = vpack.c.bf16 %v2557_v28, %v2556_v29  ;;  %v4682_v16 = vpack.c.bf16 %v2589_v56, %v2588_v42  ;;  %v4666_v42 = vpack.c.bf16 %v2565_v2, %v2564_v57  ;;  %v2548_v56 = vld [vmem:[%s7161_s5 + $0x440] sm:$0xff] }
 0x387   : > { %4605 = vmatpush3.bf16.msra.mxu1 %v4604_v54  ;;  %v2558_v54 = vld [vmem:[%s7161_s5 + $0x490] sm:$0xff] }
 0x388   : > { %4637 = vmatpush3.bf16.msra.mxu0 %v4636_v9  ;;  %4607 = vmatprep.subr.bf16.mxu1 %v4606_v11  ;;  %v2559_v9 = vld [vmem:[%s7161_s5 + $0x498] sm:$0xff]  ;;  %v4652_v11 = vpack.c.bf16 %v2541_v46, %v2540_v13  ;;  %v2581_v13 = vld [vmem:[%s7161_s5 + $0x548] sm:$0xff]  ;;  %v2566_v46 = vld [vmem:[%s7161_s5 + $0x4d0] sm:$0xff] }
 0x389   : > { %4639 = vmatprep.subr.bf16.mxu0 %v4638_v19  ;;  %v2542_v19 = vld [vmem:[%s7161_s5 + $0x410] sm:$0xff]  ;;  %v4654_v47 = vpack.c.bf16 %v2559_v9, %v2558_v54 }
 0x38a   : > { %v4656_v37 = vpack.c.bf16 %v2543_v23, %v2542_v19  ;;  %v4702_v19 = vpack.c.bf16 %v2599_v43, %v2598_v27  ;;  %v2583_v23 = vld [vmem:[%s7161_s5 + $0x558] sm:$0xff]  ;;  %v2606_v27 = vld [vmem:[%s7161_s5 + $0x610] sm:$0xff] }
 0x38b   : > { %4609 = vmatpush3.bf16.msra.mxu1 %v4608_v61  ;;  %v2561_v61 = vld [vmem:[%s7161_s5 + $0x4a8] sm:$0xff]  ;;  %v2607_v43 = vld [vmem:[%s7161_s5 + $0x618] sm:$0xff] }
 0x38c   : > { %4641 = vmatpush3.bf16.msra.mxu0 %v4640_v7  ;;  %4611 = vmatprep.subr.bf16.mxu1 %v4610_v40  ;;  %v4686_v7 = vpack.c.bf16 %v2591_v32, %v2590_v8  ;;  %v2592_v40 = vld [vmem:[%s7161_s5 + $0x5a0] sm:$0xff]  ;;  %v2550_v8 = vld [vmem:[%s7161_s5 + $0x450] sm:$0xff]  ;;  %v2551_v32 = vld [vmem:[%s7161_s5 + $0x458] sm:$0xff] }
 0x38d   : > { %4643 = vmatprep.subr.bf16.mxu0 %v4642_v14  ;;  %v2545_v14 = vld [vmem:[%s7161_s5 + $0x428] sm:$0xff]  ;;  %v4690_v20 = vpack.c.bf16 %v2593_v21, %v2592_v40  ;;  %v2552_v21 = vld [vmem:[%s7161_s5 + $0x460] sm:$0xff] }
 0x38e   : > { %v4660_v18 = vpack.c.bf16 %v2545_v14, %v2544_v63  ;;  %v2585_v63 = vld [vmem:[%s7161_s5 + $0x568] sm:$0xff]  ;;  %v2570_v14 = vld [vmem:[%s7161_s5 + $0x4f0] sm:$0xff] }
 0x38f   : > { %4613 = vmatpush3.bf16.msra.mxu1 %v4612_v39  ;;  %v2547_v39 = vld [vmem:[%s7161_s5 + $0x438] sm:$0xff] }
 0x390   : > { %4645 = vmatpush3.bf16.msra.mxu0 %v4644_v53  ;;  %4615 = vmatprep.subr.bf16.mxu1 %v4614_v48  ;;  %v2578_v53 = vld [vmem:[%s7161_s5 + $0x530] sm:$0xff]  ;;  %v4664_v29 = vpack.c.bf16 %v2547_v39, %v2546_v24  ;;  %v2587_v24 = vld [vmem:[%s7161_s5 + $0x578] sm:$0xff]  ;;  %v2620_v39 = vld [vmem:[%s7161_s5 + $0x680] sm:$0xff] }
 0x391   : > { %4647 = vmatprep.subr.bf16.mxu0 %v4646_v50  ;;  %v2596_v50 = vld [vmem:[%s7161_s5 + $0x5c0] sm:$0xff]  ;;  %v4696_v28 = vpack.c.bf16 %v2579_v38, %v2578_v53  ;;  %v2621_v53 = vld [vmem:[%s7161_s5 + $0x688] sm:$0xff] }
 0x392   : > { %v2653_v38 = vld [vmem:[%s7161_s5 + $0x788] sm:$0xff] }
 0x393   : > { %4617 = vmatpush3.bf16.msra.mxu1 %v4616_v12  ;;  %v2549_v12 = vld [vmem:[%s7161_s5 + $0x448] sm:$0xff] }
 0x394   : > { %4649 = vmatpush3.bf16.msra.mxu0 %v4648_v10  ;;  %4651 = vmatprep.subr.bf16.mxu1 %v4650_v5  ;;  %v2580_v10 = vld [vmem:[%s7161_s5 + $0x540] sm:$0xff]  ;;  %v4698_v5 = vpack.c.bf16 %v2597_v1, %v2596_v50  ;;  %v4668_v54 = vpack.c.bf16 %v2549_v12, %v2548_v56  ;;  %v4714_v50 = vpack.c.bf16 %v2621_v53, %v2620_v39  ;;  %v2637_v56 = vld [vmem:[%s7161_s5 + $0x708] sm:$0xff]  ;;  %v2622_v12 = vld [vmem:[%s7161_s5 + $0x690] sm:$0xff] }
 0x395   : > { %4683 = vmatprep.subr.bf16.mxu0 %v4682_v16  ;;  %v2567_v16 = vld [vmem:[%s7161_s5 + $0x4d8] sm:$0xff]  ;;  %v4700_v9 = vpack.c.bf16 %v2581_v13, %v2580_v10  ;;  %v2604_v1 = vld [vmem:[%s7161_s5 + $0x600] sm:$0xff]  ;;  %v2654_v13 = vld [vmem:[%s7161_s5 + $0x790] sm:$0xff] }
 0x396   : > { %2873 = vmatmul.mubr.f32.vlgmr.msra.gmra.mrb[18].mxu1 %v1579_v55  ;;  %v4658_v55 = vpack.c.bf16 %v2561_v61, %v2560_v26  ;;  %v2601_v26 = vld [vmem:[%s7161_s5 + $0x5e8] sm:$0xff]  ;;  %v4672_v61 = vpack.c.bf16 %v2551_v32, %v2550_v8  ;;  %v2623_v10 = vld [vmem:[%s7161_s5 + $0x698] sm:$0xff]  ;;  %v2624_v8 = vld [vmem:[%s7161_s5 + $0x6a0] sm:$0xff] }
 0x397   : > { %2943 = vmatmul.mubr.f32.vlgmr.msra.gmra.mrb[20].mxu0 %v1581_v15  ;;  %4653 = vmatpush3.bf16.msra.mxu1 %v4652_v11  ;;  %v2577_v15 = vld [vmem:[%s7161_s5 + $0x528] sm:$0xff]  ;;  %v4670_v11 = vpack.c.bf16 %v2567_v16, %v2566_v46  ;;  %v2655_v46 = vld [vmem:[%s7161_s5 + $0x798] sm:$0xff]  ;;  %v2630_v39 = vld [vmem:[%s7161_s5 + $0x6d0] sm:$0xff] }
 0x398   : > { %3012 = vmatprep.mubr.f32.mxu1 %v1584_v30  ;;  %4685 = vmatpush3.bf16.msra.mxu0 %v4684_v41  ;;  %v2562_v30 = vld [vmem:[%s7161_s5 + $0x4b0] sm:$0xff]  ;;  %v4692_v4 = vpack.c.bf16 %v2577_v15, %v2576_v35  ;;  %v2571_v35 = vld [vmem:[%s7161_s5 + $0x4f8] sm:$0xff]  ;;  %v2625_v32 = vld [vmem:[%s7161_s5 + $0x6a8] sm:$0xff] }
 0x399   : > { %3082 = vmatprep.mubr.f32.mxu0 %v1586_v44  ;;  %4655 = vmatprep.subr.bf16.mxu1 %v4654_v47  ;;  %v2595_v44 = vld [vmem:[%s7161_s5 + $0x5b8] sm:$0xff]  ;;  %v4662_v34 = vpack.c.bf16 %v2563_v49, %v2562_v30  ;;  %v2582_v41 = vld [vmem:[%s7161_s5 + $0x550] sm:$0xff]  ;;  %v2569_v47 = vld [vmem:[%s7161_s5 + $0x4e8] sm:$0xff] }
 0x39a   : > { %4687 = vmatprep.subr.bf16.mxu0 %v4686_v7  ;;  %v4694_v48 = vpack.c.bf16 %v2595_v44, %v2594_v33  ;;  %v4704_v7 = vpack.c.bf16 %v2583_v23, %v2582_v41  ;;  %v4674_v40 = vpack.c.bf16 %v2569_v47, %v2568_v25  ;;  %v2603_v15 = vld [vmem:[%s7161_s5 + $0x5f8] sm:$0xff]  ;;  %v4678_v33 = vpack.c.bf16 %v2571_v35, %v2570_v14  ;;  %v2554_v44 = vld [vmem:[%s7161_s5 + $0x470] sm:$0xff]  ;;  %v2657_v23 = vld [vmem:[%s7161_s5 + $0x7a8] sm:$0xff] }
 0x39b   : > { %4657 = vmatpush3.bf16.msra.mxu1 %v4656_v37  ;;  %v2553_v37 = vld [vmem:[%s7161_s5 + $0x468] sm:$0xff]  ;;  %v4750_v41 = vpack.c.bf16 %v2655_v46, %v2654_v13  ;;  %v4720_v25 = vpack.c.bf16 %v2607_v43, %v2606_v27  ;;  %v2608_v47 = vld [vmem:[%s7161_s5 + $0x620] sm:$0xff]  ;;  %v2631_v53 = vld [vmem:[%s7161_s5 + $0x6d8] sm:$0xff] }
 0x39c   : > { %4689 = vmatpush3.bf16.msra.mxu0 %v4688_v45  ;;  %4659 = vmatprep.subr.bf16.mxu1 %v4658_v55  ;;  %v2584_v45 = vld [vmem:[%s7161_s5 + $0x560] sm:$0xff]  ;;  %v4706_v55 = vpack.c.bf16 %v2601_v26, %v2600_v52  ;;  %v4676_v30 = vpack.c.bf16 %v2553_v37, %v2552_v21  ;;  %v2609_v52 = vld [vmem:[%s7161_s5 + $0x628] sm:$0xff]  ;;  %v2627_v26 = vld [vmem:[%s7161_s5 + $0x6b8] sm:$0xff] }
 0x39d   : > { %4691 = vmatprep.subr.bf16.mxu0 %v4690_v20  ;;  %v2602_v20 = vld [vmem:[%s7161_s5 + $0x5f0] sm:$0xff]  ;;  %v4708_v49 = vpack.c.bf16 %v2585_v63, %v2584_v45  ;;  %v2611_v37 = vld [vmem:[%s7161_s5 + $0x638] sm:$0xff]  ;;  %v2628_v14 = vld [vmem:[%s7161_s5 + $0x6c0] sm:$0xff] }
 0x39e   : > { %v2610_v21 = vld [vmem:[%s7161_s5 + $0x630] sm:$0xff]  ;;  %v2643_v63 = vld [vmem:[%s7161_s5 + $0x738] sm:$0xff]  ;;  %v2629_v35 = vld [vmem:[%s7161_s5 + $0x6c8] sm:$0xff] }
 0x39f   : > { %4661 = vmatpush3.bf16.msra.mxu1 %v4660_v18  ;;  %v2555_v18 = vld [vmem:[%s7161_s5 + $0x478] sm:$0xff]  ;;  %v2642_v45 = vld [vmem:[%s7161_s5 + $0x730] sm:$0xff]  ;;  %v2665_v13 = vld [vmem:[%s7161_s5 + $0x7e8] sm:$0xff] }
 0x3a0   : > { %4693 = vmatpush3.bf16.msra.mxu0 %v4692_v4  ;;  %4663 = vmatprep.subr.bf16.mxu1 %v4662_v34  ;;  %v2586_v4 = vld [vmem:[%s7161_s5 + $0x570] sm:$0xff]  ;;  %v4710_v34 = vpack.c.bf16 %v2603_v15, %v2602_v20  ;;  %v4680_v57 = vpack.c.bf16 %v2555_v18, %v2554_v44  ;;  %v2660_v20 = vld [vmem:[%s7161_s5 + $0x7c0] sm:$0xff]  ;;  %v2661_v15 = vld [vmem:[%s7161_s5 + $0x7c8] sm:$0xff] }
 0x3a1   : > { %4695 = vmatprep.subr.bf16.mxu0 %v4694_v48  ;;  %v2652_v48 = vld [vmem:[%s7161_s5 + $0x780] sm:$0xff]  ;;  %v4712_v2 = vpack.c.bf16 %v2587_v24, %v2586_v4  ;;  %v2613_v18 = vld [vmem:[%s7161_s5 + $0x648] sm:$0xff] }
 0x3a2   : > { %v2612_v44 = vld [vmem:[%s7161_s5 + $0x640] sm:$0xff]  ;;  %v2645_v24 = vld [vmem:[%s7161_s5 + $0x748] sm:$0xff] }
 0x3a3   : > { %4665 = vmatpush3.bf16.msra.mxu1 %v4664_v29  ;;  %v2605_v29 = vld [vmem:[%s7161_s5 + $0x608] sm:$0xff]  ;;  %v2644_v4 = vld [vmem:[%s7161_s5 + $0x740] sm:$0xff] }
 0x3a4   : > { %4697 = vmatpush3.bf16.msra.mxu0 %v4696_v28  ;;  %4667 = vmatprep.subr.bf16.mxu1 %v4666_v42  ;;  %v4746_v28 = vpack.c.bf16 %v2653_v38, %v2652_v48  ;;  %v2636_v42 = vld [vmem:[%s7161_s5 + $0x700] sm:$0xff]  ;;  %v2662_v48 = vld [vmem:[%s7161_s5 + $0x7d0] sm:$0xff]  ;;  %v2663_v38 = vld [vmem:[%s7161_s5 + $0x7d8] sm:$0xff] }
 0x3a5   : > { %4699 = vmatprep.subr.bf16.mxu0 %v4698_v5  ;;  %v4716_v5 = vpack.c.bf16 %v2605_v29, %v2604_v1  ;;  %v4748_v16 = vpack.c.bf16 %v2637_v56, %v2636_v42  ;;  %v2614_v1 = vld [vmem:[%s7161_s5 + $0x650] sm:$0xff]  ;;  %v2615_v29 = vld [vmem:[%s7161_s5 + $0x658] sm:$0xff]  ;;  %v4766_v42 = vpack.c.bf16 %v2663_v38, %v2662_v48  ;;  %v2616_v43 = vld [vmem:[%s7161_s5 + $0x660] sm:$0xff] }
 0x3a6   : > { %v2647_v56 = vld [vmem:[%s7161_s5 + $0x758] sm:$0xff]  ;;  %v4736_v46 = vpack.c.bf16 %v2615_v29, %v2614_v1 }
 0x3a7   : > { %4669 = vmatpush3.bf16.msra.mxu1 %v4668_v54  ;;  %v2638_v54 = vld [vmem:[%s7161_s5 + $0x710] sm:$0xff] }
 0x3a8   : > { %4701 = vmatpush3.bf16.msra.mxu0 %v4700_v9  ;;  %4671 = vmatprep.subr.bf16.mxu1 %v4670_v11  ;;  %v4718_v9 = vpack.c.bf16 %v2623_v10, %v2622_v12  ;;  %v2639_v11 = vld [vmem:[%s7161_s5 + $0x718] sm:$0xff]  ;;  %v2632_v12 = vld [vmem:[%s7161_s5 + $0x6e0] sm:$0xff]  ;;  %v2633_v10 = vld [vmem:[%s7161_s5 + $0x6e8] sm:$0xff] }
 0x3a9   : > { %4703 = vmatprep.subr.bf16.mxu0 %v4702_v19  ;;  %v2656_v19 = vld [vmem:[%s7161_s5 + $0x7a0] sm:$0xff]  ;;  %v4752_v17 = vpack.c.bf16 %v2639_v11, %v2638_v54  ;;  %v4738_v27 = vpack.c.bf16 %v2633_v10, %v2632_v12  ;;  %v2617_v54 = vld [vmem:[%s7161_s5 + $0x668] sm:$0xff] }
 0x3aa   : > { %v4754_v36 = vpack.c.bf16 %v2657_v23, %v2656_v19  ;;  %v2634_v19 = vld [vmem:[%s7161_s5 + $0x6f0] sm:$0xff]  ;;  %v2635_v23 = vld [vmem:[%s7161_s5 + $0x6f8] sm:$0xff] }
 0x3ab   : > { %4673 = vmatpush3.bf16.msra.mxu1 %v4672_v61  ;;  %v4724_v61 = vpack.c.bf16 %v2609_v52, %v2608_v47  ;;  %v2666_v47 = vld [vmem:[%s7161_s5 + $0x7f0] sm:$0xff]  ;;  %v2667_v52 = vld [vmem:[%s7161_s5 + $0x7f8] sm:$0xff] }
 0x3ac   : > { %4705 = vmatpush3.bf16.msra.mxu0 %v4704_v7  ;;  %4675 = vmatprep.subr.bf16.mxu1 %v4674_v40 }
 0x3ad   : > { %4707 = vmatprep.subr.bf16.mxu0 %v4706_v55 }
 0x3af   : > { %4677 = vmatpush3.bf16.msra.mxu1 %v4676_v30  ;;  %v4728_v30 = vpack.c.bf16 %v2611_v37, %v2610_v21  ;;  %v2651_v21 = vld [vmem:[%s7161_s5 + $0x778] sm:$0xff] }
 0x3b0   : > { %4709 = vmatpush3.bf16.msra.mxu0 %v4708_v49  ;;  %4679 = vmatprep.subr.bf16.mxu1 %v4678_v33  ;;  %v4760_v49 = vpack.c.bf16 %v2643_v63, %v2642_v45  ;;  %v4730_v33 = vpack.c.bf16 %v2629_v35, %v2628_v14 }
 0x3b1   : > { %4711 = vmatprep.subr.bf16.mxu0 %v4710_v34  ;;  %v4762_v34 = vpack.c.bf16 %v2661_v15, %v2660_v20 }
 0x3b3   : > { %4681 = vmatpush3.bf16.msra.mxu1 %v4680_v57  ;;  %v4732_v57 = vpack.c.bf16 %v2613_v18, %v2612_v44 }
 0x3b4   : > { %4713 = vmatpush3.bf16.msra.mxu0 %v4712_v2  ;;  %4715 = vmatprep.subr.bf16.mxu1 %v4714_v50  ;;  %v4764_v2 = vpack.c.bf16 %v2645_v24, %v2644_v4  ;;  %v4734_v50 = vpack.c.bf16 %v2631_v53, %v2630_v39 }
 0x3b5   : > { %4747 = vmatprep.subr.bf16.mxu0 %v4746_v28  ;;  %v2646_v28 = vld [vmem:[%s7161_s5 + $0x750] sm:$0xff] }
 0x3b6   : > { %3013 = vmatmul.mubr.f32.vlgmr.msra.gmra.mrb[20].mxu1 %v1583_v60  ;;  %v4722_v60 = vpack.c.bf16 %v2625_v32, %v2624_v8 }
 0x3b7   : > { %3083 = vmatmul.mubr.f32.vlgmr.msra.gmra.mrb[22].mxu0 %v1585_v0  ;;  %4717 = vmatpush3.bf16.msra.mxu1 %v4716_v5  ;;  %v2641_v0 = vld [vmem:[%s7161_s5 + $0x728] sm:$0xff]  ;;  %v2664_v5 = vld [vmem:[%s7161_s5 + $0x7e0] sm:$0xff] }
 0x3b8   : > { %3152 = vmatprep.mubr.f32.mxu1 %v1588_v6  ;;  %4749 = vmatpush3.bf16.msra.mxu0 %v4748_v16  ;;  %v2626_v6 = vld [vmem:[%s7161_s5 + $0x6b0] sm:$0xff]  ;;  %v4756_v7 = vpack.c.bf16 %v2641_v0, %v2640_v22  ;;  %v4768_v16 = vpack.c.bf16 %v2647_v56, %v2646_v28  ;;  %v4770_v32 = vpack.c.bf16 %v2665_v13, %v2664_v5 }
 0x3b9   : > { %3222 = vmatprep.mubr.f32.mxu0 %v1590_v3  ;;  %4719 = vmatprep.subr.bf16.mxu1 %v4718_v9  ;;  %v2659_v3 = vld [vmem:[%s7161_s5 + $0x7b8] sm:$0xff]  ;;  %v4726_v40 = vpack.c.bf16 %v2627_v26, %v2626_v6  ;;  %v2648_v9 = vld [vmem:[%s7161_s5 + $0x760] sm:$0xff]  ;;  %v4740_v0 = vpack.c.bf16 %v2617_v54, %v2616_v43  ;;  %v4742_v26 = vpack.c.bf16 %v2635_v23, %v2634_v19 }
 0x3ba   : > { %4751 = vmatprep.subr.bf16.mxu0 %v4750_v41  ;;  %v4758_v55 = vpack.c.bf16 %v2659_v3, %v2658_v58  ;;  %v2649_v41 = vld [vmem:[%s7161_s5 + $0x768] sm:$0xff]  ;;  %v2618_v58 = vld [vmem:[%s7161_s5 + $0x670] sm:$0xff]  ;;  %v2619_v3 = vld [vmem:[%s7161_s5 + $0x678] sm:$0xff] }
 0x3bb   : > { %4721 = vmatpush3.bf16.msra.mxu1 %v4720_v25  ;;  %v3367_v25 = vld [vmem:[%s7162_s6] ss:$0 sm:$0xff]  ;;  %v4772_v6 = vpack.c.bf16 %v2649_v41, %v2648_v9  ;;  %v4744_v45 = vpack.c.bf16 %v2619_v3, %v2618_v58 }
 0x3bc   : > { %4753 = vmatpush3.bf16.msra.mxu0 %v4752_v17  ;;  %4723 = vmatprep.subr.bf16.mxu1 %v4722_v60 }
 0x3bd   : > { %4755 = vmatprep.subr.bf16.mxu0 %v4754_v36 }
 0x3bf   : > { %4725 = vmatpush3.bf16.msra.mxu1 %v4724_v61 }
 0x3c0   : > { %4757 = vmatpush3.bf16.msra.mxu0 %v4756_v7  ;;  %4727 = vmatprep.subr.bf16.mxu1 %v4726_v40  ;;  %v4774_v7 = vpack.c.bf16 %v2667_v52, %v2666_v47  ;;  %v2650_v40 = vld [vmem:[%s7161_s5 + $0x770] sm:$0xff] }
 0x3c1   : > { %4759 = vmatprep.subr.bf16.mxu0 %v4758_v55  ;;  %v4776_v55 = vpack.c.bf16 %v2651_v21, %v2650_v40 }
 0x3c3   : > { %4729 = vmatpush3.bf16.msra.mxu1 %v4728_v30 }
 0x3c4   : > { %4761 = vmatpush3.bf16.msra.mxu0 %v4760_v49  ;;  %4731 = vmatprep.subr.bf16.mxu1 %v4730_v33 }
 0x3c5   : > { %4763 = vmatprep.subr.bf16.mxu0 %v4762_v34 }
 0x3c7   : > { %4733 = vmatpush3.bf16.msra.mxu1 %v4732_v57 }
 0x3c8   : > { %4765 = vmatpush3.bf16.msra.mxu0 %v4764_v2  ;;  %4735 = vmatprep.subr.bf16.mxu1 %v4734_v50 }
 0x3c9   : > { %v3423_v11 = vpop.f32.mrb[8].mxu1  ;;  %v3458_v8 = vpop.f32.mrb[10].mxu0  ;;  %4767 = vmatprep.subr.bf16.mxu0 %v4766_v42 }
 0x3ca   : > { %v3424_v17 = vpop.f32.mrb[9].mxu1  ;;  %v3459_v60 = vpop.f32.mrb[11].mxu0 }
 0x3cb   : > { %v3425_v22 = vadd.f32 %v3424_v17, %v3423_v11  ;;  %v3460_v36 = vadd.f32 %v3459_v60, %v3458_v8  ;;  %4737 = vmatpush3.bf16.msra.mxu1 %v4736_v46 }
 0x3cc   : > { %4769 = vmatpush3.bf16.msra.mxu0 %v4768_v16  ;;  %4739 = vmatprep.subr.bf16.mxu1 %v4738_v27 }
 0x3cd   : > { %v1919_v61 = vadd.f32 %v3425_v22, %v3367_v25  ;;  %4771 = vmatprep.subr.bf16.mxu0 %v4770_v32 }
 0x3cf   : > { %v1989_v37 = vadd.f32 %v3460_v36, %v1919_v61  ;;  %4741 = vmatpush3.bf16.msra.mxu1 %v4740_v0 }
 0x3d0   : > { %4773 = vmatpush3.bf16.msra.mxu0 %v4772_v6  ;;  %4743 = vmatprep.subr.bf16.mxu1 %v4742_v26 }
 0x3d1   : > { %4775 = vmatprep.subr.bf16.mxu0 %v4774_v7 }
 0x3d3   : > { %4745 = vmatpush3.bf16.msra.mxu1 %v4744_v45 }
 0x3d4   : > { %4777 = vmatpush3.bf16.msra.mxu0 %v4776_v55 }
 0x3d6   : > { %3153 = vmatmul.mubr.f32.vlgmr.msra.gmra.mrb[22].mxu1 %v1587_v51 }
 0x3d7   : > { %3223 = vmatmul.mubr.f32.vlgmr.msra.gmra.mrb[24].mxu0 %v1589_v31 }
 0x3e9   : > { %v3493_v63 = vpop.f32.mrb[10].mxu1  ;;  %v3528_v14 = vpop.f32.mrb[12].mxu0 }
 0x3ea   : > { %v3494_v35 = vpop.f32.mrb[11].mxu1  ;;  %v3529_v20 = vpop.f32.mrb[13].mxu0 }
 0x3eb   : > { %v3495_v15 = vadd.f32 %v3494_v35, %v3493_v63  ;;  %v3530_v30 = vadd.f32 %v3529_v20, %v3528_v14  ;;  %v3368_v20 = vld [vmem:[%s7162_s6 + $0x1] ss:$0 sm:$0xff] }
 0x3ed   : > { %v2059_v49 = vadd.f32 %v3495_v15, %v1989_v37 }
 0x3ef   : > { %v2129_v33 = vadd.f32 %v3530_v30, %v2059_v49  ;;  %v3369_v49 = vld [vmem:[%s7162_s6 + $0x2] ss:$0 sm:$0xff] }
 0x409   : > { %v3563_v44 = vpop.f32.mrb[12].mxu1 }
 0x40a   : > { %v3598_v18 = vpop.f32.mrb[14].mxu0  ;;  %v3564_v4 = vpop.f32.mrb[13].mxu1 }
 0x40b   : > { %v3565_v34 = vadd.f32 %v3564_v4, %v3563_v44  ;;  %v3599_v24 = vpop.f32.mrb[15].mxu0 }
 0x40c   : > { %v3600_v39 = vadd.f32 %v3599_v24, %v3598_v18 }
 0x40d   : > { %v2199_v53 = vadd.f32 %v3565_v34, %v2129_v33 }
 0x40f   : > { %v2269_v59 = vadd.f32 %v3600_v39, %v2199_v53 }
 0x429   : > { %v3633_v51 = vpop.f32.mrb[14].mxu1 }
 0x42a   : > { %v3668_v48 = vpop.f32.mrb[16].mxu0  ;;  %v3634_v62 = vpop.f32.mrb[15].mxu1 }
 0x42b   : > { %v3635_v31 = vadd.f32 %v3634_v62, %v3633_v51  ;;  %v3669_v38 = vpop.f32.mrb[17].mxu0 }
 0x42c   : > { %v3670_v57 = vadd.f32 %v3669_v38, %v3668_v48 }
 0x42d   : > { %v2339_v2 = vadd.f32 %v3635_v31, %v2269_v59 }
 0x42f   : > { %v2409_v50 = vadd.f32 %v3670_v57, %v2339_v2 }
 0x449   : > { %v3703_v1 = vpop.f32.mrb[16].mxu1 }
 0x44a   : > { %v3738_v29 = vpop.f32.mrb[18].mxu0  ;;  %v3704_v28 = vpop.f32.mrb[17].mxu1 }
 0x44b   : > { %v3705_v42 = vadd.f32 %v3704_v28, %v3703_v1  ;;  %v3739_v56 = vpop.f32.mrb[19].mxu0 }
 0x44c   : > { %v3740_v12 = vadd.f32 %v3739_v56, %v3738_v29 }
 0x44e   : > { %v2805_v10 = vadd.f32 %v3740_v12, %v3705_v42 }
 0x469   : > { %v3773_v5 = vpop.f32.mrb[18].mxu1 }
 0x46a   : > { %v3808_v13 = vpop.f32.mrb[20].mxu0  ;;  %v3774_v46 = vpop.f32.mrb[19].mxu1 }
 0x46b   : > { %v3775_v16 = vadd.f32 %v3774_v46, %v3773_v5  ;;  %v3809_v27 = vpop.f32.mrb[21].mxu0 }
 0x46c   : > { %v3810_v43 = vadd.f32 %v3809_v27, %v3808_v13 }
 0x46d   : > { %v2875_v54 = vadd.f32 %v3775_v16, %v2805_v10 }
 0x46f   : > { %v2945_v9 = vadd.f32 %v3810_v43, %v2875_v54 }
 0x489   : > { %v3843_v11 = vpop.f32.mrb[20].mxu1 }
 0x48a   : > { %v3878_v8 = vpop.f32.mrb[22].mxu0  ;;  %v3844_v32 = vpop.f32.mrb[21].mxu1 }
 0x48b   : > { %v3845_v41 = vadd.f32 %v3844_v32, %v3843_v11  ;;  %v3879_v19 = vpop.f32.mrb[23].mxu0 }
 0x48c   : > { %v3880_v23 = vadd.f32 %v3879_v19, %v3878_v8 }
 0x48d   : > { %v3015_v25 = vadd.f32 %v3845_v41, %v2945_v9 }
 0x48f   : > { %v3085_v17 = vadd.f32 %v3880_v23, %v3015_v25 }
 0x4a9   : > { %v3913_v60 = vpop.f32.mrb[22].mxu1 }
 0x4aa   : > { %v3948_v47 = vpop.f32.mrb[24].mxu0  ;;  %v3914_v52 = vpop.f32.mrb[23].mxu1 }
 0x4ab   : > { %v3915_v22 = vadd.f32 %v3914_v52, %v3913_v60  ;;  %v3949_v36 = vpop.f32.mrb[25].mxu0 }
 0x4ac   : > { %v3950_v0 = vadd.f32 %v3949_v36, %v3948_v47 }
 0x4ad   : > { %v3155_v6 = vadd.f32 %v3915_v22, %v3085_v17 }
 0x4af   : > { %v3225_v26 = vadd.f32 %v3950_v0, %v3155_v6 }
 0x4b1   : > { %v3228_v58 = vmul.f32 0.015625, %v3225_v26 }
 0x4b3   : > { %3231 = vperm.xlu1 %4835, %v3228_v58   ;;  %v3238_v40 = vmul.f32 %v3228_v58, %v3228_v58 }
 0x4b5   : > { %v3239_v21 = vmul.f32 64.0, %v3238_v40 }
 0x532   : > { %v3232_v3 = vpop.permute.xlu1 %3231 }
 0x533   : > { %v3234_v61 = vsub.f32 %v2409_v50, %v3232_v3 }
 0x535   : > { %v3235_v7 = vmul.f32 %v3234_v61, %v3234_v61 }
 0x537   : > { %3236 = vadd.xlane.f32.xlu1 %v3235_v7 }
 0x5c4   : > { %v3237_v37 = vpop.xlane.xlu1 %3236 }
 0x5c5   : > { %v3240_v45 = vsub.f32 %v3237_v37, %v3239_v21 }
 0x5c7   : > { %v3241_v55 = vmul.f32 0.015625, %v3240_v45 }
 0x5c9   : > { %v3242_v63 = vmax.f32 %v3241_v55, 0.0 }
 0x5cb   : > { %v3243_v14 = vadd.f32 1e-05, %v3242_v63 }
 0x5cd   : > { %4838 = vrsqrt.f32 %v3243_v14 }
 0x5d7   : > { %v4839_v35 = vpop.eup %4838 }
 0x5d8   : > { %3247 = vperm.xlu0 %4834, %v4839_v35  }
 0x657   : > { %v3248_v15 = vpop.permute.xlu0 %3247 }
 0x658   : > { %v3250_v30 = vmul.f32 %v3248_v15, %v3234_v61 }
 0x65a   : > { %v3256_v33 = vmul.f32 %v3368_v20, %v3250_v30 }
 0x65c   : > { %v3262_v44 = vadd.f32 %v3369_v49, %v3256_v33 }
 0x65e   : > { %3263 = vst [vmem:[%s284_s15] sm:$0xff] %v3262_v44 }
 0x65f   : > { %4881 = shalt.err (!%p4878_p7)
}
 0x660   : > { %s4882_s8 = scalar_lea.hbm %s7114_s21, 128  ;;  %s4886_s18 = scalar_lea.hbm %s7163_s7, 256 }
 0x661   : > { %p4883_p8 = scmp.ne.s32.totalorder %s7114_s21, %s4882_s8  ;;  %p4887_p1 = scmp.lt.u32.totalorder %s7114_s21, %s7163_s7 }
 0x662   : > { %p4888_p0 = scmp.lt.u32.totalorder %s4886_s18, %s4882_s8  ;;  %p4890_p6 = scmp.lt.u32.totalorder %s4882_s8, %s7114_s21 }
 0x663   : > { %p4884_p11 = pnand %p4883_p8, %p7174_p9 }
 0x664   : > { %p4889_p5 = por %p4888_p0, %p4887_p1 }
 0x665   : > { %p4885_p13 = pneg %p4884_p11 }
 0x666   : > { %p4891_p10 = por %p4890_p6, %p4889_p5 }
 0x668   : > { %p4892_p12 = pnand %p4891_p10, %p4885_p13 }
 0x66a   : > { %4895 = shalt.err (!%p4892_p12)
}
 0x66b   : > { %4782 = dma.vmem_to_hbm [thread:$0]  (%p7174_p9), %s7116_s20, 128, %s7114_s21, %s3265_s22  }
 0x66c PF: > { %p4794_p2 = scmp.ge.s32.totalorder %s4934_s27, 2  ;;  %s3290_s13 = sand.u32 1, %s4922_s24  }
 0x66d   : > { %p7175_p3 = scmp.ne.s32.totalorder %s7168_s12, 0  ;;  %s3291_s19 = scalar_lea.sflag [#allocation4], %s3290_s13 }
 0x66f   : > { %p4789_p4 = pnand %p4794_p2, %p7175_p3 }
 0x671   : > { %4917 = dma.done.wait (!%p4789_p4), %s3291_s19, 128  }
 0x672   : > { %4919 = vsyncadd (!%p4789_p4), %s3291_s19, 4294967168  ;;  %p18_p7 = scmp.ge.s32.totalorder %s5009_s30, 4   ;;  %s7176_s24 = smov %s4926_s25 }
 0x673   : > { %s7177_s25 = smov %s4930_s26  ;;  %s7178_s26 = smov %s5020_s10 }
 0x674   : > { %s7179_s27 = smov %s5009_s30  ;;  %20 = sbr.rel (!%p18_p7) target bundleno = 4 (0x4), region = 93 }
 0x67b   :  { %3296 = vsyncpa [#allocation3], 1 }
 0x67c   :  { %3298 = vsyncpa [#allocation3 + $0x1], 1 }
 0x67d   :  { %3299 = vsyncpa [#allocation4], 1 }
 0x67e   :  { %3301 = vsyncpa [#allocation4 + $0x1], 1 }

// kernel: _to_clip_mlp_impl.1
= control target key start
LH: loop header
LB: loop body
LE: loop exit
PB: predicated region body
PF: predicated region fallthrough
CT: control target
= control target key end

     0   :  { %12 = vsyncpa [#allocation3], 0  ;;  %s7156_s0 = inlined_call_operand.vmem [shape: f32[16,128], index: 0, kind: input, shape index: {}]   ;;  %s7157_s1 = inlined_call_operand.vmem [shape: f32[128,2048], index: 1, kind: input, shape index: {}]   ;;  %s7158_s2 = inlined_call_operand.vmem [shape: f32[128,1], index: 2, kind: input, shape index: {}]   ;;  %s7159_s3 = inlined_call_operand.vmem [shape: f32[8,2048], index: 3, kind: input, shape index: {}]   ;;  %s7160_s4 = inlined_call_operand.hbm [shape: f32[2048,128], index: 4, kind: input, shape index: {}]   ;;  %s7161_s5 = inlined_call_operand.vmem [shape: f32[2048,1], index: 5, kind: input, shape index: {}]   ;;  %s7162_s6 = inlined_call_operand.vmem [shape: f32[8,128], index: 6, kind: input, shape index: {}]   ;;  %s7163_s7 = inlined_call_operand.hbm [shape: f32[16,128], index: 7, kind: output, shape index: {}]  }
   0x1   :  { %13 = vsyncpa [#allocation4], 0 }
   0x2   :  { %15 = vsyncpa [#allocation4 + $0x1], 0  ;;  %s4984_s24 = smov 0   ;;  %s4986_s25 = smov 0  }
   0x3   :  { %s4988_s26 = smov 0   ;;  %s4990_s27 = smov 0  }
   0x4 LB: > { %s5005_s28 = sadd.s32 4294967295, %s4934_s27   ;;  %s3349_s29 = sadd.s32 4294967294, %s4934_s27   ;;  %s4934_s27 = sphi %s4990_s27, %s7179_s27   ;;  %s4930_s26 = sphi %s4988_s26, %s7178_s26   ;;  %s4926_s25 = sphi %s4986_s25, %s7177_s25   ;;  %s4922_s24 = sphi %s4984_s24, %s7176_s24  }
   0x5   : > { %s5009_s30 = sadd.s32 1, %s4934_s27   ;;  %s180_s8 = sadd.s32 1, %s4930_s26 }
   0x6   : > { %s177_s9 = ssub.s32 %s4934_s27, %s5009_s30  ;;  %p190_p0 = scmp.ne.s32.totalorder %s4930_s26, %s4926_s25 }
   0x7   : > { %p178_p1 = scmp.eq.s32.totalorder %s177_s9, 0  ;;  %p191_p2 = scmp.eq.s32.totalorder %s5005_s28, 1 }
   0x8   : > { %p196_p3 = scmp.ne.s32.totalorder %s4926_s25, %s4922_s24  ;;  %p197_p4 = scmp.eq.s32.totalorder %s3349_s29, 1 }
   0x9   : > { %s5020_s10 = scalar_select %p178_p1, %s4930_s26, %s180_s8  }
   0xa   : > { %p5022_p5 = por %p191_p2, %p190_p0  ;;  %p5026_p6 = por %p197_p4, %p196_p3 }
   0xb   : > { %p3350_p7 = scmp.ge.s32.totalorder %s4934_s27, 1  ;;  %p204_p8 = scmp.lt.s32.totalorder %s4934_s27, 3 }
   0xc   : > { %s7167_s11 = scalar_select %p5022_p5, 1, 0 }
   0xd   : > { %s7168_s12 = scalar_select %p5026_p6, 1, 0 }
   0xe   : > { %p7164_p9 = scmp.eq.s32.totalorder %s5005_s28, 0  ;;  %p5033_p10 = pnand %p3350_p7, %p204_p8 }
   0xf   : > { %s4936_s14 = smov [#allocation2]   ;;  %s4840_s19 = scalar_lea.hbm %s7160_s4, 32768 }
  0x10   : > { %s7169_s13 = scalar_select %p5033_p10, 1, 0 }
  0x11   : > { %s225_s15 = sshll.u32 %s4936_s14, 4  ;;  %p4784_p11 = pneg %p5033_p10  ;;  %s226_s15 = int_to_ptr.vmem [resolvable:$true] %s225_s15 }
  0x12   : > { %p4841_p13 = scmp.ne.s32.totalorder %s7160_s4, %s4840_s19  ;;  %p4847_p3 = scmp.lt.u32.totalorder %s4840_s19, %s7160_s4 }
  0x13   : > { %p5041_p12 = pnand %p7164_p9, %p4784_p11 }
  0x15   : > { %p4842_p0 = pneg %p5041_p12 }
  0x17   : > { %p4843_p1 = pnand %p4842_p0, %p4841_p13 }
  0x19   : > { %p4844_p2 = pneg %p4843_p1 }
  0x1b   : > { %p4849_p4 = pnand %p4847_p3, %p4844_p2 }
  0x1d   : > { %4852 = shalt.err (!%p4849_p4)
}
  0x1e   : > { %s4853_s29 = scalar_lea.vmem %s226_s15, 32768  ;;  %p4861_p9 = scmp.lt.s32.totalorder %s226_s15, %s226_s15 }
  0x1f   : > { %p4854_p7 = scmp.ne.s32.totalorder %s226_s15, %s4853_s29  ;;  %p4862_p6 = scmp.lt.s32.totalorder %s4853_s29, %s4853_s29 }
  0x21   : > { %p4856_p8 = pnand %p4854_p7, %p4842_p0  ;;  %p4863_p5 = por %p4862_p6, %p4861_p9 }
  0x23   : > { %p4857_p11 = pneg %p4856_p8 }
  0x25   : > { %p4864_p10 = pnand %p4863_p5, %p4857_p11 }
  0x27   : > { %4867 = shalt.err (!%p4864_p10)
}
  0x28   : > { %s4937_s8 = smov 128   ;;  %s4938_s9 = smov 8  }
  0x29   : > { %4787 = dma.hbm_to_vmem [thread:$0]  (!%p5041_p12), %s7160_s4, 32768, %s226_s15, [#allocation3], %s4937_s8, %s4937_s8, %s4938_s9  }
  0x2a   : > { %p7171_p13 = scmp.ne.s32.totalorder %s7169_s13, 0 }
  0x2b   : > { %p7172_p1 = scmp.eq.s32.totalorder (!%p7171_p13), %s5005_s28, 0 }
  0x2c   : > { %254 = sbr.rel (%p7171_p13) target bundleno = 1644 (0x66c), region = 48 }
  0x33   : > { %4913 = dma.done.wait (%p7172_p1), [#allocation3], 32768   ;;  %p7173_p0 = pmov %p7172_p1 }
  0x34   : > { %v4939_v0 = vmov 0.0   ;;  %v291_v1 = vld [vmem:[%s7157_s1 + $0x8] sm:$0xff]  ;;  %v290_v3 = vld [vmem:[%s7157_s1] sm:$0xff]  ;;  %p285_p5 = scmp.lt.s32.totalorder %s5005_s28, 1  ;;  %vm4941_vm0 = vmmov 0   ;;  %s282_s8 = sand.u32 1, %s4926_s25  }
  0x35   : > { %4915 = vsyncadd (%p7173_p0), [#allocation3], 4294934528  ;;  %699 = vmatprep.mubr.f32.mxu0 %v4939_v0  ;;  %770 = vmatprep.mubr.f32.mxu1 %v4939_v0  ;;  %v307_v2 = vld [vmem:[%s7157_s1 + $0x88] sm:$0xff]  ;;  %v306_v5 = vld [vmem:[%s7157_s1 + $0x80] sm:$0xff]  ;;  %s3355_s9 = sshll.u32 %s282_s8, 3  ;;  %s3371_s16 = sshll.u32 %s5005_s28, 7 }
  0x36   : > { %v3986_v4 = vpack.c.bf16 %v307_v2, %v291_v1  ;;  %v323_v6 = vld [vmem:[%s7157_s1 + $0x108] sm:$0xff]  ;;  %v3988_v8 = vpack.c.bf16 %v306_v5, %v290_v3  ;;  %v322_v10 = vld [vmem:[%s7157_s1 + $0x100] sm:$0xff]  ;;  %s286_s13 = scalar_select %p285_p5, %s5005_s28, 1 }
  0x37   : > { %v339_v7 = vld [vmem:[%s7157_s1 + $0x188] sm:$0xff]  ;;  %v338_v11 = vld [vmem:[%s7157_s1 + $0x180] sm:$0xff]  ;;  %s284_s15 = scalar_lea.vmem [#allocation5], %s3355_s9  ;;  %s7114_s21 = scalar_lea.hbm %s7163_s7, %s3371_s16 }
  0x38   : > { %v3990_v9 = vpack.c.bf16 %v339_v7, %v323_v6  ;;  %v355_v12 = vld [vmem:[%s7157_s1 + $0x208] sm:$0xff]  ;;  %3987 = vmatprep.subr.bf16.mxu0 %v3986_v4  ;;  %v3992_v14 = vpack.c.bf16 %v338_v11, %v322_v10  ;;  %v354_v16 = vld [vmem:[%s7157_s1 + $0x200] sm:$0xff]  ;;  %s3356_s29 = sshll.u32 %s286_s13, 3  ;;  %s3278_s20 = sshll.u32 %s284_s15, 4  ;;  %s7116_s20 = int_to_ptr.vmem [resolvable:$true] %s3278_s20 }
  0x39   : > { %v371_v13 = vld [vmem:[%s7157_s1 + $0x288] sm:$0xff]  ;;  %3989 = vmatpush1.bf16.msra.mxu0 %v3988_v8  ;;  %v370_v17 = vld [vmem:[%s7157_s1 + $0x280] sm:$0xff]  ;;  %s288_s19 = scalar_lea.vmem %s7156_s0, %s3356_s29  ;;  %s3265_s22 = scalar_lea.sflag [#allocation4], %s282_s8 }
  0x3a   : > { %3991 = vmatprep.subr.bf16.mxu0 %v3990_v9  ;;  %v3994_v15 = vpack.c.bf16 %v371_v13, %v355_v12  ;;  %v387_v18 = vld [vmem:[%s7157_s1 + $0x308] sm:$0xff]  ;;  %v3996_v20 = vpack.c.bf16 %v370_v17, %v354_v16  ;;  %v386_v22 = vld [vmem:[%s7157_s1 + $0x300] sm:$0xff]  ;;  %s4868_s23 = scalar_lea.vmem %s7116_s20, 128  ;;  %p7174_p9 = scmp.ne.s32.totalorder %s7167_s11, 0 }
  0x3b   : > { %v403_v19 = vld [vmem:[%s7157_s1 + $0x388] sm:$0xff]  ;;  %v402_v23 = vld [vmem:[%s7157_s1 + $0x380] sm:$0xff]  ;;  %p4869_p6 = scmp.ne.s32.totalorder %s7116_s20, %s4868_s23  ;;  %s4943_s28 = smov [#allocation5]  }
  0x3c   : > { %v3998_v21 = vpack.c.bf16 %v403_v19, %v387_v18  ;;  %v419_v24 = vld [vmem:[%s7157_s1 + $0x408] sm:$0xff]  ;;  %v4000_v26 = vpack.c.bf16 %v402_v23, %v386_v22  ;;  %v418_v28 = vld [vmem:[%s7157_s1 + $0x400] sm:$0xff]  ;;  %v293_v23 = vld [vmem:[%s7157_s1 + $0x18] sm:$0xff]  ;;  %s4872_s9 = sshll.u32 %s4943_s28, 4  ;;  %s4873_s9 = int_to_ptr.vmem [resolvable:$false] %s4872_s9 }
  0x3d   : > { %3993 = vmatpush1.bf16.msra.mxu0 %v3992_v14  ;;  %v435_v25 = vld [vmem:[%s7157_s1 + $0x488] sm:$0xff]  ;;  %v434_v29 = vld [vmem:[%s7157_s1 + $0x480] sm:$0xff]  ;;  %p4870_p10 = pnand %p4869_p6, %p7174_p9  ;;  %s4874_s29 = scalar_lea.vmem %s4873_s9, 256 }
  0x3e   : > { %3995 = vmatprep.subr.bf16.mxu0 %v3994_v15  ;;  %v4002_v27 = vpack.c.bf16 %v435_v25, %v419_v24  ;;  %v451_v30 = vld [vmem:[%s7157_s1 + $0x508] sm:$0xff]  ;;  %v4004_v32 = vpack.c.bf16 %v434_v29, %v418_v28  ;;  %v450_v34 = vld [vmem:[%s7157_s1 + $0x500] sm:$0xff]  ;;  %v309_v24 = vld [vmem:[%s7157_s1 + $0x98] sm:$0xff]  ;;  %p4875_p2 = scmp.lt.s32.totalorder %s7116_s20, %s4873_s9  ;;  %p4876_p3 = scmp.lt.s32.totalorder %s4874_s29, %s4868_s23 }
  0x3f   : > { %v467_v31 = vld [vmem:[%s7157_s1 + $0x588] sm:$0xff]  ;;  %v466_v35 = vld [vmem:[%s7157_s1 + $0x580] sm:$0xff]  ;;  %v308_v28 = vld [vmem:[%s7157_s1 + $0x90] sm:$0xff]  ;;  %p4871_p12 = pneg %p4870_p10 }
  0x40   : > { %v4006_v33 = vpack.c.bf16 %v467_v31, %v451_v30  ;;  %v483_v36 = vld [vmem:[%s7157_s1 + $0x608] sm:$0xff]  ;;  %v4008_v38 = vpack.c.bf16 %v466_v35, %v450_v34  ;;  %v482_v40 = vld [vmem:[%s7157_s1 + $0x600] sm:$0xff]  ;;  %v325_v29 = vld [vmem:[%s7157_s1 + $0x118] sm:$0xff]  ;;  %p4877_p4 = por %p4876_p3, %p4875_p2 }
  0x41   : > { %3997 = vmatpush1.bf16.msra.mxu0 %v3996_v20  ;;  %v499_v37 = vld [vmem:[%s7157_s1 + $0x688] sm:$0xff]  ;;  %v498_v41 = vld [vmem:[%s7157_s1 + $0x680] sm:$0xff]  ;;  %v341_v31 = vld [vmem:[%s7157_s1 + $0x198] sm:$0xff] }
  0x42   : > { %3999 = vmatprep.subr.bf16.mxu0 %v3998_v21  ;;  %v4010_v39 = vpack.c.bf16 %v499_v37, %v483_v36  ;;  %v515_v42 = vld [vmem:[%s7157_s1 + $0x708] sm:$0xff]  ;;  %v4012_v44 = vpack.c.bf16 %v498_v41, %v482_v40  ;;  %v514_v46 = vld [vmem:[%s7157_s1 + $0x700] sm:$0xff]  ;;  %v4022_v34 = vpack.c.bf16 %v341_v31, %v325_v29  ;;  %v357_v35 = vld [vmem:[%s7157_s1 + $0x218] sm:$0xff]  ;;  %p4878_p7 = pnand %p4877_p4, %p4871_p12 }
  0x43   : > { %v531_v43 = vld [vmem:[%s7157_s1 + $0x788] sm:$0xff]  ;;  %v530_v47 = vld [vmem:[%s7157_s1 + $0x780] sm:$0xff]  ;;  %v373_v36 = vld [vmem:[%s7157_s1 + $0x298] sm:$0xff] }
  0x44   : > { %v4014_v45 = vpack.c.bf16 %v531_v43, %v515_v42  ;;  %v295_v48 = vld [vmem:[%s7157_s1 + $0x28] sm:$0xff]  ;;  %v4016_v50 = vpack.c.bf16 %v530_v47, %v514_v46  ;;  %v294_v52 = vld [vmem:[%s7157_s1 + $0x20] sm:$0xff]  ;;  %v4026_v43 = vpack.c.bf16 %v373_v36, %v357_v35  ;;  %v389_v47 = vld [vmem:[%s7157_s1 + $0x318] sm:$0xff] }
  0x45   : > { %4001 = vmatpush1.bf16.msra.mxu0 %v4000_v26  ;;  %v311_v49 = vld [vmem:[%s7157_s1 + $0xa8] sm:$0xff]  ;;  %v310_v53 = vld [vmem:[%s7157_s1 + $0xa0] sm:$0xff]  ;;  %v4018_v26 = vpack.c.bf16 %v309_v24, %v293_v23  ;;  %v484_v31 = vld [vmem:[%s7157_s1 + $0x610] sm:$0xff] }
  0x46   : > { %4003 = vmatprep.subr.bf16.mxu0 %v4002_v27  ;;  %v4050_v51 = vpack.c.bf16 %v311_v49, %v295_v48  ;;  %v327_v54 = vld [vmem:[%s7157_s1 + $0x128] sm:$0xff]  ;;  %v5188_v56 = vld [vmem:[%s288_s19] sm:$0xff]  ;;  %v4052_v57 = vpack.c.bf16 %v310_v53, %v294_v52  ;;  %v292_v27 = vld [vmem:[%s7157_s1 + $0x10] sm:$0xff] }
  0x47   : > { %v343_v55 = vld [vmem:[%s7157_s1 + $0x1a8] sm:$0xff]  ;;  %v326_v59 = vld [vmem:[%s7157_s1 + $0x120] sm:$0xff]  ;;  %v4020_v30 = vpack.c.bf16 %v308_v28, %v292_v27  ;;  %4019 = vmatprep.subr.bf16.mxu1 %v4018_v26  ;;  %v405_v48 = vld [vmem:[%s7157_s1 + $0x398] sm:$0xff] }
  0x48   : > { %v4054_v58 = vpack.c.bf16 %v343_v55, %v327_v54  ;;  %v342_v60 = vld [vmem:[%s7157_s1 + $0x1a0] sm:$0xff]  ;;  %v359_v61 = vld [vmem:[%s7157_s1 + $0x228] sm:$0xff]  ;;  %v4030_v55 = vpack.c.bf16 %v405_v48, %v389_v47 }
  0x49   : > { %4005 = vmatpush1.bf16.msra.mxu0 %v4004_v32  ;;  %v375_v62 = vld [vmem:[%s7157_s1 + $0x2a8] sm:$0xff]  ;;  %v4056_v63 = vpack.c.bf16 %v342_v60, %v326_v59  ;;  %v358_v2 = vld [vmem:[%s7157_s1 + $0x220] sm:$0xff]  ;;  %v324_v32 = vld [vmem:[%s7157_s1 + $0x110] sm:$0xff]  ;;  %4021 = vmatpush1.bf16.msra.mxu1 %v4020_v30 }
  0x4a   : > { %4007 = vmatprep.subr.bf16.mxu0 %v4006_v33  ;;  %v4058_v1 = vpack.c.bf16 %v375_v62, %v359_v61  ;;  %v374_v3 = vld [vmem:[%s7157_s1 + $0x2a0] sm:$0xff]  ;;  %v391_v4 = vld [vmem:[%s7157_s1 + $0x328] sm:$0xff]  ;;  %v340_v33 = vld [vmem:[%s7157_s1 + $0x190] sm:$0xff]  ;;  %4023 = vmatprep.subr.bf16.mxu1 %v4022_v34 }
  0x4b   : > { %v407_v5 = vld [vmem:[%s7157_s1 + $0x3a8] sm:$0xff]  ;;  %v4060_v6 = vpack.c.bf16 %v374_v3, %v358_v2  ;;  %v390_v8 = vld [vmem:[%s7157_s1 + $0x320] sm:$0xff]  ;;  %v4024_v40 = vpack.c.bf16 %v340_v33, %v324_v32  ;;  %v421_v60 = vld [vmem:[%s7157_s1 + $0x418] sm:$0xff] }
  0x4c   : > { %v4062_v7 = vpack.c.bf16 %v407_v5, %v391_v4  ;;  %v406_v9 = vld [vmem:[%s7157_s1 + $0x3a0] sm:$0xff]  ;;  %v423_v10 = vld [vmem:[%s7157_s1 + $0x428] sm:$0xff]  ;;  %v437_v61 = vld [vmem:[%s7157_s1 + $0x498] sm:$0xff] }
  0x4d   : > { %4009 = vmatpush1.bf16.msra.mxu0 %v4008_v38  ;;  %v439_v11 = vld [vmem:[%s7157_s1 + $0x4a8] sm:$0xff]  ;;  %v4064_v12 = vpack.c.bf16 %v406_v9, %v390_v8  ;;  %v422_v14 = vld [vmem:[%s7157_s1 + $0x420] sm:$0xff]  ;;  %4025 = vmatpush1.bf16.msra.mxu1 %v4024_v40  ;;  %v4034_v5 = vpack.c.bf16 %v437_v61, %v421_v60  ;;  %v436_v8 = vld [vmem:[%s7157_s1 + $0x490] sm:$0xff] }
  0x4e   : > { %4011 = vmatprep.subr.bf16.mxu0 %v4010_v39  ;;  %v4066_v13 = vpack.c.bf16 %v439_v11, %v423_v10  ;;  %v438_v15 = vld [vmem:[%s7157_s1 + $0x4a0] sm:$0xff]  ;;  %v455_v16 = vld [vmem:[%s7157_s1 + $0x528] sm:$0xff]  ;;  %4027 = vmatprep.subr.bf16.mxu1 %v4026_v43  ;;  %v453_v9 = vld [vmem:[%s7157_s1 + $0x518] sm:$0xff] }
  0x4f   : > { %v471_v17 = vld [vmem:[%s7157_s1 + $0x5a8] sm:$0xff]  ;;  %v454_v18 = vld [vmem:[%s7157_s1 + $0x520] sm:$0xff]  ;;  %v4068_v20 = vpack.c.bf16 %v438_v15, %v422_v14  ;;  %v469_v10 = vld [vmem:[%s7157_s1 + $0x598] sm:$0xff] }
  0x50   : > { %v470_v19 = vld [vmem:[%s7157_s1 + $0x5a0] sm:$0xff]  ;;  %v487_v21 = vld [vmem:[%s7157_s1 + $0x628] sm:$0xff]  ;;  %v4070_v25 = vpack.c.bf16 %v471_v17, %v455_v16  ;;  %v500_v32 = vld [vmem:[%s7157_s1 + $0x690] sm:$0xff] }
  0x51   : > { %4013 = vmatpush1.bf16.msra.mxu0 %v4012_v44  ;;  %v503_v22 = vld [vmem:[%s7157_s1 + $0x6a8] sm:$0xff]  ;;  %v4072_v37 = vpack.c.bf16 %v470_v19, %v454_v18  ;;  %v486_v38 = vld [vmem:[%s7157_s1 + $0x620] sm:$0xff]  ;;  %v356_v44 = vld [vmem:[%s7157_s1 + $0x210] sm:$0xff]  ;;  %v4038_v18 = vpack.c.bf16 %v469_v10, %v453_v9  ;;  %v4044_v40 = vpack.c.bf16 %v500_v32, %v484_v31 }
  0x52   : > { %4015 = vmatprep.subr.bf16.mxu0 %v4014_v45  ;;  %v502_v39 = vld [vmem:[%s7157_s1 + $0x6a0] sm:$0xff]  ;;  %v4074_v41 = vpack.c.bf16 %v503_v22, %v487_v21  ;;  %v519_v42 = vld [vmem:[%s7157_s1 + $0x728] sm:$0xff]  ;;  %v372_v45 = vld [vmem:[%s7157_s1 + $0x290] sm:$0xff] }
  0x53   : > { %v535_v46 = vld [vmem:[%s7157_s1 + $0x7a8] sm:$0xff]  ;;  %v4076_v49 = vpack.c.bf16 %v502_v39, %v486_v38  ;;  %v4028_v52 = vpack.c.bf16 %v372_v45, %v356_v44  ;;  %v298_v2 = vld [vmem:[%s7157_s1 + $0x40] sm:$0xff]  ;;  %v452_v19 = vld [vmem:[%s7157_s1 + $0x510] sm:$0xff] }
  0x54   : > { %v4078_v53 = vpack.c.bf16 %v535_v46, %v519_v42  ;;  %v299_v54 = vld [vmem:[%s7157_s1 + $0x48] sm:$0xff]  ;;  %v314_v3 = vld [vmem:[%s7157_s1 + $0xc0] sm:$0xff]  ;;  %v485_v21 = vld [vmem:[%s7157_s1 + $0x618] sm:$0xff] }
  0x55   : > { %4017 = vmatpush1.bf16.msra.mxu0 %v4016_v50  ;;  %v518_v50 = vld [vmem:[%s7157_s1 + $0x720] sm:$0xff]  ;;  %v315_v59 = vld [vmem:[%s7157_s1 + $0xc8] sm:$0xff]  ;;  %4029 = vmatpush1.bf16.msra.mxu1 %v4028_v52  ;;  %v4116_v11 = vpack.c.bf16 %v314_v3, %v298_v2  ;;  %v501_v22 = vld [vmem:[%s7157_s1 + $0x698] sm:$0xff] }
  0x56   : > { %4051 = vmatprep.subr.bf16.mxu0 %v4050_v51  ;;  %v534_v51 = vld [vmem:[%s7157_s1 + $0x7a0] sm:$0xff]  ;;  %v331_v4 = vld [vmem:[%s7157_s1 + $0x148] sm:$0xff]  ;;  %4031 = vmatprep.subr.bf16.mxu1 %v4030_v55  ;;  %v4042_v30 = vpack.c.bf16 %v501_v22, %v485_v21  ;;  %v517_v33 = vld [vmem:[%s7157_s1 + $0x718] sm:$0xff] }
  0x57   : > { %v4080_v62 = vpack.c.bf16 %v534_v51, %v518_v50  ;;  %v346_v14 = vld [vmem:[%s7157_s1 + $0x1c0] sm:$0xff]  ;;  %v363_v15 = vld [vmem:[%s7157_s1 + $0x248] sm:$0xff]  ;;  %v533_v34 = vld [vmem:[%s7157_s1 + $0x798] sm:$0xff] }
  0x58   : > { %700 = vmatmul.mubr.f32.vlgmr.msra.gmra.mrb[0].mxu0 %v5188_v56  ;;  %v379_v17 = vld [vmem:[%s7157_s1 + $0x2c8] sm:$0xff]  ;;  %v378_v26 = vld [vmem:[%s7157_s1 + $0x2c0] sm:$0xff]  ;;  %v4046_v42 = vpack.c.bf16 %v533_v34, %v517_v33  ;;  %v516_v43 = vld [vmem:[%s7157_s1 + $0x710] sm:$0xff] }
  0x59   : > { %4053 = vmatpush1.bf16.msra.mxu0 %v4052_v57  ;;  %841 = vmatprep.mubr.f32.mxu0 %v4939_v0  ;;  %v388_v57 = vld [vmem:[%s7157_s1 + $0x310] sm:$0xff]  ;;  %v4122_v24 = vpack.c.bf16 %v379_v17, %v363_v15  ;;  %v395_v27 = vld [vmem:[%s7157_s1 + $0x348] sm:$0xff]  ;;  %v410_v38 = vld [vmem:[%s7157_s1 + $0x3c0] sm:$0xff] }
  0x5a   : > { %4055 = vmatprep.subr.bf16.mxu0 %v4054_v58  ;;  %v404_v58 = vld [vmem:[%s7157_s1 + $0x390] sm:$0xff]  ;;  %v411_v29 = vld [vmem:[%s7157_s1 + $0x3c8] sm:$0xff]  ;;  %v297_v45 = vld [vmem:[%s7157_s1 + $0x38] sm:$0xff] }
  0x5b   : > { %v4126_v36 = vpack.c.bf16 %v411_v29, %v395_v27  ;;  %v427_v39 = vld [vmem:[%s7157_s1 + $0x448] sm:$0xff]  ;;  %v532_v44 = vld [vmem:[%s7157_s1 + $0x790] sm:$0xff]  ;;  %v313_v46 = vld [vmem:[%s7157_s1 + $0xb8] sm:$0xff] }
  0x5c   : > { %v442_v50 = vld [vmem:[%s7157_s1 + $0x4c0] sm:$0xff]  ;;  %v459_v51 = vld [vmem:[%s7157_s1 + $0x548] sm:$0xff]  ;;  %v4048_v52 = vpack.c.bf16 %v532_v44, %v516_v43  ;;  %v296_v55 = vld [vmem:[%s7157_s1 + $0x30] sm:$0xff] }
  0x5d   : > { %4057 = vmatpush1.bf16.msra.mxu0 %v4056_v63  ;;  %v4032_v63 = vpack.c.bf16 %v404_v58, %v388_v57  ;;  %v312_v57 = vld [vmem:[%s7157_s1 + $0xb0] sm:$0xff]  ;;  %v329_v58 = vld [vmem:[%s7157_s1 + $0x138] sm:$0xff]  ;;  %v507_v3 = vld [vmem:[%s7157_s1 + $0x6c8] sm:$0xff] }
  0x5e   : > { %4059 = vmatprep.subr.bf16.mxu0 %v4058_v1  ;;  %v4114_v1 = vpack.c.bf16 %v315_v59, %v299_v54  ;;  %v4082_v54 = vpack.c.bf16 %v313_v46, %v297_v45  ;;  %v345_v59 = vld [vmem:[%s7157_s1 + $0x1b8] sm:$0xff]  ;;  %v4084_v2 = vpack.c.bf16 %v312_v57, %v296_v55  ;;  %v539_v15 = vld [vmem:[%s7157_s1 + $0x7c8] sm:$0xff]  ;;  %v360_v17 = vld [vmem:[%s7157_s1 + $0x230] sm:$0xff] }
  0x5f   : > { %4033 = vmatpush1.bf16.msra.mxu1 %v4032_v63  ;;  %v474_v63 = vld [vmem:[%s7157_s1 + $0x5c0] sm:$0xff]  ;;  %v319_v27 = vld [vmem:[%s7157_s1 + $0xe8] sm:$0xff]  ;;  %v392_v29 = vld [vmem:[%s7157_s1 + $0x330] sm:$0xff] }
  0x60   : > { %4035 = vmatprep.subr.bf16.mxu1 %v4034_v5  ;;  %v328_v5 = vld [vmem:[%s7157_s1 + $0x130] sm:$0xff]  ;;  %v425_v31 = vld [vmem:[%s7157_s1 + $0x438] sm:$0xff] }
  0x61   : > { %4061 = vmatpush1.bf16.msra.mxu0 %v4060_v6  ;;  %v347_v6 = vld [vmem:[%s7157_s1 + $0x1c8] sm:$0xff]  ;;  %v441_v32 = vld [vmem:[%s7157_s1 + $0x4b8] sm:$0xff] }
  0x62   : > { %4063 = vmatprep.subr.bf16.mxu0 %v4062_v7  ;;  %v420_v7 = vld [vmem:[%s7157_s1 + $0x410] sm:$0xff]  ;;  %v457_v43 = vld [vmem:[%s7157_s1 + $0x538] sm:$0xff] }
  0x63   : > { %v4036_v16 = vpack.c.bf16 %v436_v8, %v420_v7  ;;  %v361_v7 = vld [vmem:[%s7157_s1 + $0x238] sm:$0xff] }
  0x64   : > { %v377_v8 = vld [vmem:[%s7157_s1 + $0x2b8] sm:$0xff] }
  0x65   : > { %4065 = vmatpush1.bf16.msra.mxu0 %v4064_v12  ;;  %v4118_v12 = vpack.c.bf16 %v347_v6, %v331_v4  ;;  %4037 = vmatpush1.bf16.msra.mxu1 %v4036_v16  ;;  %v4086_v4 = vpack.c.bf16 %v345_v59, %v329_v58  ;;  %v344_v6 = vld [vmem:[%s7157_s1 + $0x1b0] sm:$0xff]  ;;  %v4090_v16 = vpack.c.bf16 %v377_v8, %v361_v7  ;;  %v473_v44 = vld [vmem:[%s7157_s1 + $0x5b8] sm:$0xff] }
  0x66   : > { %4067 = vmatprep.subr.bf16.mxu0 %v4066_v13  ;;  %v330_v13 = vld [vmem:[%s7157_s1 + $0x140] sm:$0xff]  ;;  %4039 = vmatprep.subr.bf16.mxu1 %v4038_v18  ;;  %v376_v18 = vld [vmem:[%s7157_s1 + $0x2b0] sm:$0xff]  ;;  %v489_v55 = vld [vmem:[%s7157_s1 + $0x638] sm:$0xff] }
  0x67   : > { %v4120_v23 = vpack.c.bf16 %v346_v14, %v330_v13  ;;  %v523_v13 = vld [vmem:[%s7157_s1 + $0x748] sm:$0xff]  ;;  %v4088_v14 = vpack.c.bf16 %v344_v6, %v328_v5  ;;  %v505_v57 = vld [vmem:[%s7157_s1 + $0x6b8] sm:$0xff] }
  0x68   : > { %v4142_v22 = vpack.c.bf16 %v539_v15, %v523_v13  ;;  %v521_v5 = vld [vmem:[%s7157_s1 + $0x738] sm:$0xff]  ;;  %v447_v13 = vld [vmem:[%s7157_s1 + $0x4e8] sm:$0xff]  ;;  %v520_v15 = vld [vmem:[%s7157_s1 + $0x730] sm:$0xff] }
  0x69   : > { %4069 = vmatpush1.bf16.msra.mxu0 %v4068_v20  ;;  %v468_v20 = vld [vmem:[%s7157_s1 + $0x590] sm:$0xff]  ;;  %v537_v6 = vld [vmem:[%s7157_s1 + $0x7b8] sm:$0xff] }
  0x6a   : > { %4071 = vmatprep.subr.bf16.mxu0 %v4070_v25  ;;  %v362_v25 = vld [vmem:[%s7157_s1 + $0x240] sm:$0xff]  ;;  %v4040_v28 = vpack.c.bf16 %v468_v20, %v452_v19  ;;  %v393_v19 = vld [vmem:[%s7157_s1 + $0x338] sm:$0xff] }
  0x6b   : > { %v4124_v35 = vpack.c.bf16 %v378_v26, %v362_v25  ;;  %v409_v20 = vld [vmem:[%s7157_s1 + $0x3b8] sm:$0xff]  ;;  %v303_v25 = vld [vmem:[%s7157_s1 + $0x68] sm:$0xff]  ;;  %v4092_v26 = vpack.c.bf16 %v376_v18, %v360_v17 }
  0x6c   : > { %4041 = vmatpush1.bf16.msra.mxu1 %v4040_v28  ;;  %v4094_v28 = vpack.c.bf16 %v409_v20, %v393_v19  ;;  %v4178_v34 = vpack.c.bf16 %v319_v27, %v303_v25  ;;  %v301_v17 = vld [vmem:[%s7157_s1 + $0x58] sm:$0xff]  ;;  %v479_v25 = vld [vmem:[%s7157_s1 + $0x5e8] sm:$0xff]  ;;  %v300_v27 = vld [vmem:[%s7157_s1 + $0x50] sm:$0xff] }
  0x6d   : > { %4073 = vmatpush1.bf16.msra.mxu0 %v4072_v37  ;;  %v394_v37 = vld [vmem:[%s7157_s1 + $0x340] sm:$0xff]  ;;  %4043 = vmatprep.subr.bf16.mxu1 %v4042_v30  ;;  %v408_v30 = vld [vmem:[%s7157_s1 + $0x3b0] sm:$0xff]  ;;  %v317_v18 = vld [vmem:[%s7157_s1 + $0xd8] sm:$0xff] }
  0x6e   : > { %4075 = vmatprep.subr.bf16.mxu0 %v4074_v41  ;;  %v443_v41 = vld [vmem:[%s7157_s1 + $0x4c8] sm:$0xff]  ;;  %v4128_v47 = vpack.c.bf16 %v410_v38, %v394_v37  ;;  %v4096_v38 = vpack.c.bf16 %v408_v30, %v392_v29  ;;  %v333_v29 = vld [vmem:[%s7157_s1 + $0x158] sm:$0xff] }
  0x6f   : > { %v4130_v48 = vpack.c.bf16 %v443_v41, %v427_v39  ;;  %v335_v37 = vld [vmem:[%s7157_s1 + $0x168] sm:$0xff]  ;;  %v424_v41 = vld [vmem:[%s7157_s1 + $0x430] sm:$0xff]  ;;  %v349_v30 = vld [vmem:[%s7157_s1 + $0x1d8] sm:$0xff] }
  0x70   : > { %4045 = vmatpush1.bf16.msra.mxu1 %v4044_v40  ;;  %v351_v39 = vld [vmem:[%s7157_s1 + $0x1e8] sm:$0xff]  ;;  %v4098_v40 = vpack.c.bf16 %v441_v32, %v425_v31 }
  0x71   : > { %4077 = vmatpush1.bf16.msra.mxu0 %v4076_v49  ;;  %v426_v49 = vld [vmem:[%s7157_s1 + $0x440] sm:$0xff]  ;;  %4047 = vmatprep.subr.bf16.mxu1 %v4046_v42  ;;  %v440_v42 = vld [vmem:[%s7157_s1 + $0x4b0] sm:$0xff]  ;;  %v4182_v46 = vpack.c.bf16 %v351_v39, %v335_v37  ;;  %v511_v37 = vld [vmem:[%s7157_s1 + $0x6e8] sm:$0xff] }
  0x72   : > { %4079 = vmatprep.subr.bf16.mxu0 %v4078_v53  ;;  %v475_v53 = vld [vmem:[%s7157_s1 + $0x5c8] sm:$0xff]  ;;  %v4132_v60 = vpack.c.bf16 %v442_v50, %v426_v49  ;;  %v4100_v50 = vpack.c.bf16 %v440_v42, %v424_v41  ;;  %v332_v39 = vld [vmem:[%s7157_s1 + $0x150] sm:$0xff]  ;;  %v365_v41 = vld [vmem:[%s7157_s1 + $0x258] sm:$0xff] }
  0x73   : > { %v4134_v61 = vpack.c.bf16 %v475_v53, %v459_v51  ;;  %v367_v49 = vld [vmem:[%s7157_s1 + $0x268] sm:$0xff]  ;;  %v456_v53 = vld [vmem:[%s7157_s1 + $0x530] sm:$0xff]  ;;  %v381_v42 = vld [vmem:[%s7157_s1 + $0x2d8] sm:$0xff] }
  0x74   : > { %4049 = vmatpush1.bf16.msra.mxu1 %v4048_v52  ;;  %v383_v51 = vld [vmem:[%s7157_s1 + $0x2e8] sm:$0xff]  ;;  %v4102_v52 = vpack.c.bf16 %v473_v44, %v457_v43 }
  0x75   : > { %4081 = vmatpush1.bf16.msra.mxu0 %v4080_v62  ;;  %v458_v62 = vld [vmem:[%s7157_s1 + $0x540] sm:$0xff]  ;;  %4083 = vmatprep.subr.bf16.mxu1 %v4082_v54  ;;  %v472_v54 = vld [vmem:[%s7157_s1 + $0x5b0] sm:$0xff]  ;;  %v4186_v59 = vpack.c.bf16 %v383_v51, %v367_v49  ;;  %v543_v49 = vld [vmem:[%s7157_s1 + $0x7e8] sm:$0xff] }
  0x76   : > { %4115 = vmatprep.subr.bf16.mxu0 %v4114_v1  ;;  %v491_v1 = vld [vmem:[%s7157_s1 + $0x648] sm:$0xff]  ;;  %v4136_v9 = vpack.c.bf16 %v474_v63, %v458_v62  ;;  %v4104_v63 = vpack.c.bf16 %v472_v54, %v456_v53  ;;  %v364_v51 = vld [vmem:[%s7157_s1 + $0x250] sm:$0xff]  ;;  %v397_v53 = vld [vmem:[%s7157_s1 + $0x358] sm:$0xff] }
  0x77   : > { %771 = vmatmul.mubr.f32.vlgmr.msra.gmra.mrb[0].mxu1 %v5188_v56  ;;  %v4138_v10 = vpack.c.bf16 %v507_v3, %v491_v1  ;;  %v399_v62 = vld [vmem:[%s7157_s1 + $0x368] sm:$0xff]  ;;  %v488_v3 = vld [vmem:[%s7157_s1 + $0x630] sm:$0xff]  ;;  %v413_v54 = vld [vmem:[%s7157_s1 + $0x3d8] sm:$0xff] }
  0x78   : > { %842 = vmatmul.mubr.f32.vlgmr.msra.gmra.mrb[2].mxu0 %v5188_v56  ;;  %4085 = vmatpush1.bf16.msra.mxu1 %v4084_v2  ;;  %v415_v1 = vld [vmem:[%s7157_s1 + $0x3e8] sm:$0xff]  ;;  %v4106_v2 = vpack.c.bf16 %v505_v57, %v489_v55 }
  0x79   : > { %4117 = vmatpush1.bf16.msra.mxu0 %v4116_v11  ;;  %983 = vmatprep.mubr.f32.mxu0 %v4939_v0  ;;  %v490_v11 = vld [vmem:[%s7157_s1 + $0x640] sm:$0xff]  ;;  %v4190_v8 = vpack.c.bf16 %v415_v1, %v399_v62  ;;  %v396_v62 = vld [vmem:[%s7157_s1 + $0x350] sm:$0xff]  ;;  %v429_v1 = vld [vmem:[%s7157_s1 + $0x458] sm:$0xff] }
  0x7a   : > { %4119 = vmatprep.subr.bf16.mxu0 %v4118_v12  ;;  %v506_v12 = vld [vmem:[%s7157_s1 + $0x6c0] sm:$0xff]  ;;  %4087 = vmatprep.subr.bf16.mxu1 %v4086_v4  ;;  %v504_v4 = vld [vmem:[%s7157_s1 + $0x6b0] sm:$0xff] }
  0x7b   : > { %912 = vmatprep.mubr.f32.mxu1 %v4939_v0  ;;  %v4140_v21 = vpack.c.bf16 %v506_v12, %v490_v11  ;;  %v431_v11 = vld [vmem:[%s7157_s1 + $0x468] sm:$0xff]  ;;  %v4108_v12 = vpack.c.bf16 %v504_v4, %v488_v3  ;;  %v1203_v4 = vld [vmem:[%s7158_s2] sm:$0xff] }
  0x7c   : > { %4089 = vmatpush1.bf16.msra.mxu1 %v4088_v14  ;;  %v4110_v14 = vpack.c.bf16 %v537_v6, %v521_v5  ;;  %v4194_v20 = vpack.c.bf16 %v447_v13, %v431_v11  ;;  %v1204_v5 = vld [vmem:[%s7158_s2 + $0x8] sm:$0xff]  ;;  %v477_v11 = vld [vmem:[%s7157_s1 + $0x5d8] sm:$0xff]  ;;  %v4940_v13 = vmov 0.0|0.0  }
  0x7d   : > { %4121 = vmatpush1.bf16.msra.mxu0 %v4120_v23  ;;  %v522_v23 = vld [vmem:[%s7157_s1 + $0x740] sm:$0xff]  ;;  %4091 = vmatprep.subr.bf16.mxu1 %v4090_v16  ;;  %v536_v16 = vld [vmem:[%s7157_s1 + $0x7b0] sm:$0xff] }
  0x7e   : > { %4123 = vmatprep.subr.bf16.mxu0 %v4122_v24  ;;  %v538_v24 = vld [vmem:[%s7157_s1 + $0x7c0] sm:$0xff] }
  0x7f   : > { %v4144_v33 = vpack.c.bf16 %v538_v24, %v522_v23  ;;  %v463_v23 = vld [vmem:[%s7157_s1 + $0x568] sm:$0xff]  ;;  %v4112_v24 = vpack.c.bf16 %v536_v16, %v520_v15  ;;  %v1206_v15 = vld [vmem:[%s7158_s2 + $0x18] sm:$0xff] }
  0x80   : > { %4093 = vmatpush1.bf16.msra.mxu1 %v4092_v26  ;;  %v4146_v26 = vpack.c.bf16 %v317_v18, %v301_v17  ;;  %v4198_v32 = vpack.c.bf16 %v479_v25, %v463_v23  ;;  %v460_v18 = vld [vmem:[%s7157_s1 + $0x550] sm:$0xff]  ;;  %v1207_v23 = vld [vmem:[%s7158_s2 + $0x20] sm:$0xff] }
  0x81   : > { %4125 = vmatpush1.bf16.msra.mxu0 %v4124_v35  ;;  %v302_v35 = vld [vmem:[%s7157_s1 + $0x60] sm:$0xff]  ;;  %4095 = vmatprep.subr.bf16.mxu1 %v4094_v28  ;;  %v316_v28 = vld [vmem:[%s7157_s1 + $0xd0] sm:$0xff] }
  0x82   : > { %4127 = vmatprep.subr.bf16.mxu0 %v4126_v36  ;;  %v318_v36 = vld [vmem:[%s7157_s1 + $0xe0] sm:$0xff] }
  0x83   : > { %v4180_v45 = vpack.c.bf16 %v318_v36, %v302_v35  ;;  %v495_v35 = vld [vmem:[%s7157_s1 + $0x668] sm:$0xff]  ;;  %v4148_v36 = vpack.c.bf16 %v316_v28, %v300_v27  ;;  %v492_v27 = vld [vmem:[%s7157_s1 + $0x650] sm:$0xff] }
  0x84   : > { %4097 = vmatpush1.bf16.msra.mxu1 %v4096_v38  ;;  %v4150_v38 = vpack.c.bf16 %v349_v30, %v333_v29  ;;  %v4202_v44 = vpack.c.bf16 %v511_v37, %v495_v35  ;;  %v508_v28 = vld [vmem:[%s7157_s1 + $0x6d0] sm:$0xff]  ;;  %v525_v29 = vld [vmem:[%s7157_s1 + $0x758] sm:$0xff] }
  0x85   : > { %4129 = vmatpush1.bf16.msra.mxu0 %v4128_v47  ;;  %v334_v47 = vld [vmem:[%s7157_s1 + $0x160] sm:$0xff]  ;;  %4099 = vmatprep.subr.bf16.mxu1 %v4098_v40  ;;  %v348_v40 = vld [vmem:[%s7157_s1 + $0x1d0] sm:$0xff]  ;;  %v541_v30 = vld [vmem:[%s7157_s1 + $0x7d8] sm:$0xff] }
  0x86   : > { %4131 = vmatprep.subr.bf16.mxu0 %v4130_v48  ;;  %v350_v48 = vld [vmem:[%s7157_s1 + $0x1e0] sm:$0xff]  ;;  %v4174_v35 = vpack.c.bf16 %v541_v30, %v525_v29  ;;  %v540_v37 = vld [vmem:[%s7157_s1 + $0x7d0] sm:$0xff]  ;;  %v529_v30 = vld [vmem:[%s7157_s1 + $0x778] sm:$0xff] }
  0x87   : > { %v4184_v58 = vpack.c.bf16 %v350_v48, %v334_v47  ;;  %v527_v47 = vld [vmem:[%s7157_s1 + $0x768] sm:$0xff]  ;;  %v4152_v48 = vpack.c.bf16 %v348_v40, %v332_v39  ;;  %v321_v39 = vld [vmem:[%s7157_s1 + $0xf8] sm:$0xff]  ;;  %v512_v29 = vld [vmem:[%s7157_s1 + $0x6f0] sm:$0xff] }
  0x88   : > { %4101 = vmatpush1.bf16.msra.mxu1 %v4100_v50  ;;  %v4154_v50 = vpack.c.bf16 %v381_v42, %v365_v41  ;;  %v4206_v57 = vpack.c.bf16 %v543_v49, %v527_v47  ;;  %v1211_v41 = vld [vmem:[%s7158_s2 + $0x40] sm:$0xff]  ;;  %v1212_v42 = vld [vmem:[%s7158_s2 + $0x48] sm:$0xff]  ;;  %v337_v47 = vld [vmem:[%s7157_s1 + $0x178] sm:$0xff] }
  0x89   : > { %4133 = vmatpush1.bf16.msra.mxu0 %v4132_v60  ;;  %v366_v60 = vld [vmem:[%s7157_s1 + $0x260] sm:$0xff]  ;;  %4103 = vmatprep.subr.bf16.mxu1 %v4102_v52  ;;  %v380_v52 = vld [vmem:[%s7157_s1 + $0x2d0] sm:$0xff]  ;;  %v4255_v49 = vpack.c.bf16 %v1212_v42, %v1211_v41 }
  0x8a   : > { %4135 = vmatprep.subr.bf16.mxu0 %v4134_v61  ;;  %v382_v61 = vld [vmem:[%s7157_s1 + $0x2e0] sm:$0xff] }
  0x8b   : > { %v4188_v7 = vpack.c.bf16 %v382_v61, %v366_v60  ;;  %v4156_v60 = vpack.c.bf16 %v380_v52, %v364_v51  ;;  %v4158_v61 = vpack.c.bf16 %v413_v54, %v397_v53  ;;  %v1214_v51 = vld [vmem:[%s7158_s2 + $0x58] sm:$0xff]  ;;  %v336_v54 = vld [vmem:[%s7157_s1 + $0x170] sm:$0xff] }
  0x8c   : > { %4105 = vmatpush1.bf16.msra.mxu1 %v4104_v63  ;;  %v412_v63 = vld [vmem:[%s7157_s1 + $0x3d0] sm:$0xff] }
  0x8d   : > { %4137 = vmatpush1.bf16.msra.mxu0 %v4136_v9  ;;  %v398_v9 = vld [vmem:[%s7157_s1 + $0x360] sm:$0xff]  ;;  %4107 = vmatprep.subr.bf16.mxu1 %v4106_v2  ;;  %v445_v2 = vld [vmem:[%s7157_s1 + $0x4d8] sm:$0xff]  ;;  %v4160_v6 = vpack.c.bf16 %v412_v63, %v396_v62 }
  0x8e   : > { %4139 = vmatprep.subr.bf16.mxu0 %v4138_v10  ;;  %v414_v10 = vld [vmem:[%s7157_s1 + $0x3e0] sm:$0xff] }
  0x8f   : > { %v4192_v19 = vpack.c.bf16 %v414_v10, %v398_v9  ;;  %v444_v9 = vld [vmem:[%s7157_s1 + $0x4d0] sm:$0xff]  ;;  %v461_v10 = vld [vmem:[%s7157_s1 + $0x558] sm:$0xff] }
  0x90   : > { %4109 = vmatpush1.bf16.msra.mxu1 %v4108_v12  ;;  %v4243_v12 = vpack.c.bf16 %v1204_v5, %v1203_v4  ;;  %v4166_v17 = vpack.c.bf16 %v477_v11, %v461_v10  ;;  %v417_v4 = vld [vmem:[%s7157_s1 + $0x3f8] sm:$0xff]  ;;  %v416_v10 = vld [vmem:[%s7157_s1 + $0x3f0] sm:$0xff] }
  0x91   : > { %4141 = vmatpush1.bf16.msra.mxu0 %v4140_v21  ;;  %v430_v21 = vld [vmem:[%s7157_s1 + $0x460] sm:$0xff]  ;;  %4111 = vmatprep.subr.bf16.mxu1 %v4110_v14  ;;  %v1205_v14 = vld [vmem:[%s7158_s2 + $0x10] sm:$0xff]  ;;  %v433_v11 = vld [vmem:[%s7157_s1 + $0x478] sm:$0xff] }
  0x92   : > { %4143 = vmatprep.subr.bf16.mxu0 %v4142_v22  ;;  %v446_v22 = vld [vmem:[%s7157_s1 + $0x4e0] sm:$0xff] }
  0x93   : > { %v4196_v31 = vpack.c.bf16 %v446_v22, %v430_v21  ;;  %v509_v21 = vld [vmem:[%s7157_s1 + $0x6d8] sm:$0xff]  ;;  %v4246_v22 = vpack.c.bf16 %v1206_v15, %v1205_v14 }
  0x94   : > { %4113 = vmatpush1.bf16.msra.mxu1 %v4112_v24  ;;  %v1208_v24 = vld [vmem:[%s7158_s2 + $0x28] sm:$0xff] }
  0x95   : > { %4145 = vmatpush1.bf16.msra.mxu0 %v4144_v33  ;;  %v462_v33 = vld [vmem:[%s7157_s1 + $0x560] sm:$0xff]  ;;  %4147 = vmatprep.subr.bf16.mxu1 %v4146_v26 }
  0x96   : > { %4179 = vmatprep.subr.bf16.mxu0 %v4178_v34  ;;  %v478_v34 = vld [vmem:[%s7157_s1 + $0x5e0] sm:$0xff] }
  0x97   : > { %v4200_v43 = vpack.c.bf16 %v478_v34, %v462_v33  ;;  %913 = vmatmul.mubr.f32.vlgmr.msra.gmra.mrb[2].mxu1 %v5188_v56  ;;  %v1210_v33 = vld [vmem:[%s7158_s2 + $0x38] sm:$0xff]  ;;  %v4172_v34 = vpack.c.bf16 %v508_v28, %v492_v27  ;;  %v496_v28 = vld [vmem:[%s7157_s1 + $0x670] sm:$0xff] }
  0x98   : > { %984 = vmatmul.mubr.f32.vlgmr.msra.gmra.mrb[4].mxu0 %v5188_v56  ;;  %4149 = vmatpush1.bf16.msra.mxu1 %v4148_v36  ;;  %v524_v36 = vld [vmem:[%s7157_s1 + $0x750] sm:$0xff] }
  0x99   : > { %4181 = vmatpush1.bf16.msra.mxu0 %v4180_v45  ;;  %1125 = vmatprep.mubr.f32.mxu0 %v4939_v0  ;;  %v494_v45 = vld [vmem:[%s7157_s1 + $0x660] sm:$0xff] }
  0x9a   : > { %4183 = vmatprep.subr.bf16.mxu0 %v4182_v46  ;;  %v510_v46 = vld [vmem:[%s7157_s1 + $0x6e0] sm:$0xff]  ;;  %4151 = vmatprep.subr.bf16.mxu1 %v4150_v38  ;;  %v305_v38 = vld [vmem:[%s7157_s1 + $0x78] sm:$0xff] }
  0x9b   : > { %1054 = vmatprep.mubr.f32.mxu1 %v4939_v0  ;;  %v4204_v55 = vpack.c.bf16 %v510_v46, %v494_v45  ;;  %v304_v45 = vld [vmem:[%s7157_s1 + $0x70] sm:$0xff] }
  0x9c   : > { %4153 = vmatpush1.bf16.msra.mxu1 %v4152_v48  ;;  %v320_v46 = vld [vmem:[%s7157_s1 + $0xf0] sm:$0xff]  ;;  %v353_v48 = vld [vmem:[%s7157_s1 + $0x1f8] sm:$0xff] }
  0x9d   : > { %4185 = vmatpush1.bf16.msra.mxu0 %v4184_v58  ;;  %v526_v58 = vld [vmem:[%s7157_s1 + $0x760] sm:$0xff]  ;;  %4155 = vmatprep.subr.bf16.mxu1 %v4154_v50  ;;  %v1213_v50 = vld [vmem:[%s7158_s2 + $0x50] sm:$0xff]  ;;  %v4212_v52 = vpack.c.bf16 %v320_v46, %v304_v45  ;;  %v4214_v53 = vpack.c.bf16 %v353_v48, %v337_v47 }
  0x9e   : > { %4187 = vmatprep.subr.bf16.mxu0 %v4186_v59  ;;  %v542_v59 = vld [vmem:[%s7157_s1 + $0x7e0] sm:$0xff] }
  0x9f   : > { %v4208_v3 = vpack.c.bf16 %v542_v59, %v526_v58  ;;  %v385_v58 = vld [vmem:[%s7157_s1 + $0x2f8] sm:$0xff]  ;;  %v4258_v59 = vpack.c.bf16 %v1214_v51, %v1213_v50 }
  0xa0   : > { %4157 = vmatpush1.bf16.msra.mxu1 %v4156_v60  ;;  %v1215_v60 = vld [vmem:[%s7158_s2 + $0x60] sm:$0xff] }
  0xa1   : > { %4189 = vmatpush1.bf16.msra.mxu0 %v4188_v7  ;;  %4159 = vmatprep.subr.bf16.mxu1 %v4158_v61  ;;  %v4162_v7 = vpack.c.bf16 %v445_v2, %v429_v1  ;;  %v1216_v61 = vld [vmem:[%s7158_s2 + $0x68] sm:$0xff]  ;;  %v368_v1 = vld [vmem:[%s7157_s1 + $0x270] sm:$0xff] }
  0xa2   : > { %4191 = vmatprep.subr.bf16.mxu0 %v4190_v8  ;;  %v428_v8 = vld [vmem:[%s7157_s1 + $0x450] sm:$0xff]  ;;  %v4261_v5 = vpack.c.bf16 %v1216_v61, %v1215_v60  ;;  %v1640_v61 = vld [vmem:[#allocation2 + $0x188] sm:$0xff] }
  0xa3   : > { %v4164_v16 = vpack.c.bf16 %v444_v9, %v428_v8  ;;  %v384_v2 = vld [vmem:[%s7157_s1 + $0x2f0] sm:$0xff] }
  0xa4   : > { %4161 = vmatpush1.bf16.msra.mxu1 %v4160_v6  ;;  %v1217_v6 = vld [vmem:[%s7158_s2 + $0x70] sm:$0xff] }
  0xa5   : > { %4193 = vmatpush1.bf16.msra.mxu0 %v4192_v19  ;;  %4163 = vmatprep.subr.bf16.mxu1 %v4162_v7  ;;  %v476_v19 = vld [vmem:[%s7157_s1 + $0x5d0] sm:$0xff]  ;;  %v4220_v7 = vpack.c.bf16 %v384_v2, %v368_v1 }
  0xa6   : > { %4195 = vmatprep.subr.bf16.mxu0 %v4194_v20  ;;  %v493_v20 = vld [vmem:[%s7157_s1 + $0x658] sm:$0xff]  ;;  %v4168_v25 = vpack.c.bf16 %v476_v19, %v460_v18  ;;  %v400_v9 = vld [vmem:[%s7157_s1 + $0x370] sm:$0xff] }
  0xa7   : > { %v4170_v26 = vpack.c.bf16 %v509_v21, %v493_v20  ;;  %v4224_v15 = vpack.c.bf16 %v416_v10, %v400_v9  ;;  %v448_v18 = vld [vmem:[%s7157_s1 + $0x4f0] sm:$0xff]  ;;  %v465_v19 = vld [vmem:[%s7157_s1 + $0x578] sm:$0xff] }
  0xa8   : > { %4165 = vmatpush1.bf16.msra.mxu1 %v4164_v16 }
  0xa9   : > { %4197 = vmatpush1.bf16.msra.mxu0 %v4196_v31  ;;  %4167 = vmatprep.subr.bf16.mxu1 %v4166_v17  ;;  %v4249_v31 = vpack.c.bf16 %v1208_v24, %v1207_v23  ;;  %v432_v17 = vld [vmem:[%s7157_s1 + $0x470] sm:$0xff]  ;;  %v497_v24 = vld [vmem:[%s7157_s1 + $0x678] sm:$0xff] }
  0xaa   : > { %4199 = vmatprep.subr.bf16.mxu0 %v4198_v32  ;;  %v1209_v32 = vld [vmem:[%s7158_s2 + $0x30] sm:$0xff]  ;;  %v4228_v20 = vpack.c.bf16 %v448_v18, %v432_v17  ;;  %v1611_v17 = vld [vmem:[#allocation2 + $0xa0] sm:$0xff]  ;;  %v1612_v18 = vld [vmem:[#allocation2 + $0xa8] sm:$0xff] }
  0xab   : > { %v4252_v40 = vpack.c.bf16 %v1210_v33, %v1209_v32  ;;  %v480_v23 = vld [vmem:[%s7157_s1 + $0x5f0] sm:$0xff]  ;;  %v4236_v32 = vpack.c.bf16 %v512_v29, %v496_v28 }
  0xac   : > { %4169 = vmatpush1.bf16.msra.mxu1 %v4168_v25  ;;  %v513_v25 = vld [vmem:[%s7157_s1 + $0x6f8] sm:$0xff] }
  0xad   : > { %4201 = vmatpush1.bf16.msra.mxu0 %v4200_v43  ;;  %4171 = vmatprep.subr.bf16.mxu1 %v4170_v26  ;;  %v4176_v43 = vpack.c.bf16 %v540_v37, %v524_v36  ;;  %v4234_v27 = vpack.c.bf16 %v513_v25, %v497_v24  ;;  %v546_v25 = vld [vmem:[%s7159_s3] ss:$8 sm:$0xf] }
  0xae   : > { %4203 = vmatprep.subr.bf16.mxu0 %v4202_v44  ;;  %v4210_v44 = vpack.c.bf16 %v321_v39, %v305_v38  ;;  %v4942_v39 = vmov 0  }
  0xaf   : > { %4834 = vset.pattern.permute.xlu0 %v4942_v39  ;;  %4835 = vset.pattern.permute.xlu1 %v4942_v39 }
  0xb0   : > { %4173 = vmatpush1.bf16.msra.mxu1 %v4172_v34  ;;  %v528_v34 = vld [vmem:[%s7157_s1 + $0x770] sm:$0xff] }
  0xb1   : > { %4205 = vmatpush1.bf16.msra.mxu0 %v4204_v55  ;;  %4175 = vmatprep.subr.bf16.mxu1 %v4174_v35  ;;  %v352_v55 = vld [vmem:[%s7157_s1 + $0x1f0] sm:$0xff] }
  0xb2   : > { %4207 = vmatprep.subr.bf16.mxu0 %v4206_v57  ;;  %v369_v57 = vld [vmem:[%s7157_s1 + $0x278] sm:$0xff]  ;;  %v4216_v62 = vpack.c.bf16 %v352_v55, %v336_v54  ;;  %v544_v35 = vld [vmem:[%s7157_s1 + $0x7f0] sm:$0xff] }
  0xb3   : > { %v4218_v63 = vpack.c.bf16 %v385_v58, %v369_v57  ;;  %v4240_v36 = vpack.c.bf16 %v544_v35, %v528_v34  ;;  %v1607_v57 = vld [vmem:[#allocation2 + $0x80] sm:$0xff]  ;;  %v1608_v58 = vld [vmem:[#allocation2 + $0x88] sm:$0xff] }
  0xb4   : > { %4177 = vmatpush1.bf16.msra.mxu1 %v4176_v43  ;;  %v4266_v60 = vpack.c.bf16 %v1608_v58, %v1607_v57 }
  0xb5   : > { %4209 = vmatpush1.bf16.msra.mxu0 %v4208_v3  ;;  %4211 = vmatprep.subr.bf16.mxu1 %v4210_v44  ;;  %v401_v3 = vld [vmem:[%s7157_s1 + $0x378] sm:$0xff] }
  0xb6   : > { %4242 = vmatprep.subr.bf16.mxu0 %v4940_v13  ;;  %v4222_v8 = vpack.c.bf16 %v417_v4, %v401_v3  ;;  %v1623_v3 = vld [vmem:[#allocation2 + $0x100] sm:$0xff]  ;;  %v1624_v4 = vld [vmem:[#allocation2 + $0x108] sm:$0xff] }
  0xb7   : > { %1055 = vmatmul.mubr.f32.vlgmr.msra.gmra.mrb[4].mxu1 %v5188_v56 }
  0xb8   : > { %1126 = vmatmul.mubr.f32.vlgmr.msra.gmra.mrb[6].mxu0 %v5188_v56  ;;  %4213 = vmatpush1.bf16.msra.mxu1 %v4212_v52 }
  0xb9   : > { %4244 = vmatpush3.bf16.msra.mxu0 %v4243_v12  ;;  %3983 = vmatprep.mubr.msk.f32.mxu0 %vm4941_vm0, %v4939_v0  ;;  %v449_v12 = vld [vmem:[%s7157_s1 + $0x4f8] sm:$0xff] }
  0xba   : > { %4245 = vmatprep.subr.bf16.mxu0 %v4940_v13  ;;  %4215 = vmatprep.subr.bf16.mxu1 %v4214_v53  ;;  %v4226_v16 = vpack.c.bf16 %v449_v12, %v433_v11  ;;  %v1593_v11 = vld [vmem:[#allocation2 + $0x10] sm:$0xff]  ;;  %v1594_v12 = vld [vmem:[#allocation2 + $0x18] sm:$0xff] }
  0xbb   : > { %1196 = vmatprep.mubr.f32.mxu1 %v4939_v0  ;;  %v1218_v0 = vld [vmem:[%s7158_s2 + $0x78] sm:$0xff] }
  0xbc   : > { %4217 = vmatpush1.bf16.msra.mxu1 %v4216_v62  ;;  %v4264_v14 = vpack.c.bf16 %v1218_v0, %v1217_v6  ;;  %v1591_v62 = vld [vmem:[#allocation2] sm:$0xff]  ;;  %v4300_v6 = vpack.c.bf16 %v1624_v4, %v1623_v3  ;;  %v1610_v0 = vld [vmem:[#allocation2 + $0x98] sm:$0xff] }
  0xbd   : > { %4247 = vmatpush3.bf16.msra.mxu0 %v4246_v22  ;;  %4219 = vmatprep.subr.bf16.mxu1 %v4218_v63  ;;  %v464_v22 = vld [vmem:[%s7157_s1 + $0x570] sm:$0xff]  ;;  %v1592_v63 = vld [vmem:[#allocation2 + $0x8] sm:$0xff] }
  0xbe   : > { %4248 = vmatprep.subr.bf16.mxu0 %v4940_v13  ;;  %v4232_v26 = vpack.c.bf16 %v480_v23, %v464_v22  ;;  %v4268_v2 = vpack.c.bf16 %v1592_v63, %v1591_v62  ;;  %v555_v23 = vlaneseq }
  0xc0   : > { %4221 = vmatpush1.bf16.msra.mxu1 %v4220_v7  ;;  %v1641_v7 = vld [vmem:[#allocation2 + $0x190] sm:$0xff]  ;;  %v556_v24 = vshrl.u32 %v555_v23, 7 }
  0xc1   : > { %4250 = vmatpush3.bf16.msra.mxu0 %v4249_v31  ;;  %4223 = vmatprep.subr.bf16.mxu1 %v4222_v8  ;;  %v545_v31 = vld [vmem:[%s7157_s1 + $0x7f8] sm:$0xff] }
  0xc2   : > { %4251 = vmatprep.subr.bf16.mxu0 %v4940_v13  ;;  %v4238_v33 = vpack.c.bf16 %v545_v31, %v529_v30  ;;  %v1642_v8 = vld [vmem:[#allocation2 + $0x198] sm:$0xff]  ;;  %v5954_v28 = vsub.s32 0, %v556_v24  ;;  %v5956_v29 = vsub.s32 1, %v556_v24  ;;  %v5991_v63 = vsub.s32 7, %v556_v24 }
  0xc3   : > { %v4302_v10 = vpack.c.bf16 %v1642_v8, %v1641_v7 }
  0xc4   : > { %4225 = vmatpush1.bf16.msra.mxu1 %v4224_v15  ;;  %v4272_v15 = vpack.c.bf16 %v1594_v12, %v1593_v11 }
  0xc5   : > { %4253 = vmatpush3.bf16.msra.mxu0 %v4252_v40  ;;  %4227 = vmatprep.subr.bf16.mxu1 %v4226_v16  ;;  %v1626_v16 = vld [vmem:[#allocation2 + $0x118] sm:$0xff] }
  0xc6   : > { %4254 = vmatprep.subr.bf16.mxu0 %v4940_v13 }
  0xc8   : > { %4229 = vmatpush1.bf16.msra.mxu1 %v4228_v20  ;;  %v1643_v20 = vld [vmem:[#allocation2 + $0x1a0] sm:$0xff] }
  0xc9   : > { %4256 = vmatpush3.bf16.msra.mxu0 %v4255_v49 }
  0xca   : > { %4257 = vmatprep.subr.bf16.mxu0 %v4940_v13 }
  0xcd   : > { %4259 = vmatpush3.bf16.msra.mxu0 %v4258_v59  ;;  %v1639_v59 = vld [vmem:[#allocation2 + $0x180] sm:$0xff] }
  0xce   : > { %4260 = vmatprep.subr.bf16.mxu0 %v4940_v13  ;;  %v4298_v1 = vpack.c.bf16 %v1640_v61, %v1639_v59  ;;  %v3358_v59 = vld [vmem:[%s7159_s3 + $0x40] ss:$8 sm:$0xf0]  ;;  %v5988_v61 = vsub.s32 6, %v556_v24 }
  0xd1   : > { %4262 = vmatpush3.bf16.msra.mxu0 %v4261_v5  ;;  %v1609_v5 = vld [vmem:[#allocation2 + $0x90] sm:$0xff] }
  0xd2   : > { %4263 = vmatprep.subr.bf16.mxu0 %v4940_v13  ;;  %v481_v13 = vld [vmem:[%s7157_s1 + $0x5f8] sm:$0xff]  ;;  %v4270_v9 = vpack.c.bf16 %v1610_v0, %v1609_v5 }
  0xd3   : > { %v4230_v21 = vpack.c.bf16 %v481_v13, %v465_v19  ;;  %v4274_v13 = vpack.c.bf16 %v1612_v18, %v1611_v17 }
  0xd5   : > { %4265 = vmatpush3.bf16.msra.mxu0 %v4264_v14  ;;  %4231 = vmatprep.subr.bf16.mxu1 %v4230_v21  ;;  %v1625_v14 = vld [vmem:[#allocation2 + $0x110] sm:$0xff]  ;;  %v1644_v21 = vld [vmem:[#allocation2 + $0x1a8] sm:$0xff] }
  0xd6   : > { %4233 = vmatpush1.bf16.msra.mxu1 %v4232_v26  ;;  %4299 = vmatprep.subr.bf16.mxu0 %v4298_v1  ;;  %v4304_v19 = vpack.c.bf16 %v1626_v16, %v1625_v14  ;;  %v4306_v22 = vpack.c.bf16 %v1644_v21, %v1643_v20  ;;  %v547_v26 = vld [vmem:[%s7159_s3] ss:$8 sm:$0xf0] }
  0xd7   : > { %4235 = vmatprep.subr.bf16.mxu1 %v4234_v27  ;;  %v548_v27 = vor.u32 %v547_v26, %v546_v25 }
  0xd8   : > { %3984 = vmatmul.mubr.f32.vlgmr.msra.gmra.mrb[8].mxu0 %v5188_v56 }
  0xd9   : > { %4301 = vmatpush3.bf16.msra.mxu0 %v4300_v6  ;;  %v558_v30 = vrot.slane %v548_v27, %v5954_v28  ;;  %v562_v31 = vrot.slane %v548_v27, %v5956_v29  ;;  %v582_v6 = vrot.slane %v548_v27, %v5988_v61  ;;  %v586_v7 = vrot.slane %v548_v27, %v5991_v63 }
  0xda   : > { %4237 = vmatpush1.bf16.msra.mxu1 %v4236_v32  ;;  %4303 = vmatprep.subr.bf16.mxu0 %v4302_v10  ;;  %v5960_v32 = vsub.s32 2, %v556_v24 }
  0xdb   : > { %4239 = vmatprep.subr.bf16.mxu1 %v4238_v33  ;;  %v5962_v33 = vsub.s32 3, %v556_v24 }
  0xdc   : > { %v566_v39 = vrot.slane %v548_v27, %v5960_v32 }
  0xdd   : > { %4305 = vmatpush3.bf16.msra.mxu0 %v4304_v19 }
  0xde   : > { %4241 = vmatpush1.bf16.msra.mxu1 %v4240_v36  ;;  %4307 = vmatprep.subr.bf16.mxu0 %v4306_v22  ;;  %v5966_v36 = vsub.s32 4, %v556_v24 }
  0xdf   : > { %4267 = vmatprep.subr.bf16.mxu1 %v4266_v60 }
  0xe1   : > { %1197 = vmatmul.mubr.f32.vlgmr.msra.gmra.mrb[6].mxu1 %v5188_v56 }
  0xe2   : > { %4269 = vmatpush3.bf16.msra.mxu1 %v4268_v2 }
  0xe3   : > { %4271 = vmatprep.subr.bf16.mxu1 %v4270_v9 }
  0xe6   : > { %4273 = vmatpush3.bf16.msra.mxu1 %v4272_v15 }
  0xe7   : > { %4275 = vmatprep.subr.bf16.mxu1 %v4274_v13 }
 0x12b   : > { %v5916_v37 = vpop.f32.mrb[0].mxu0 }
 0x12c   : > { %v5918_v38 = vpop.f32.mrb[1].mxu0  ;;  %v702_v34 = vadd.f32 %v5916_v37, %v558_v30  ;;  %v3357_v37 = vld [vmem:[%s7159_s3 + $0x40] ss:$8 sm:$0xf] }
 0x12d   : > { %v704_v35 = vadd.f32 %v5918_v38, %v562_v31  ;;  %v574_v38 = vrot.slane %v548_v27, %v5966_v36  ;;  %v552_v5 = vor.u32 %v3358_v59, %v3357_v37 }
 0x12f   : > { %v590_v11 = vrot.slane %v552_v5, %v5954_v28 }
 0x14a   : > { %v5924_v42 = vpop.f32.mrb[0].mxu1 }
 0x14b   : > { %v5920_v40 = vpop.f32.mrb[2].mxu0  ;;  %v5926_v43 = vpop.f32.mrb[1].mxu1  ;;  %v773_v60 = vadd.f32 %v5924_v42, %v566_v39 }
 0x14c   : > { %v5922_v41 = vpop.f32.mrb[3].mxu0  ;;  %v844_v42 = vadd.f32 %v5920_v40, %v574_v38  ;;  %v618_v38 = vrot.slane %v552_v5, %v5991_v63 }
 0x16a   : > { %v5932_v56 = vpop.f32.mrb[2].mxu1 }
 0x16b   : > { %v5928_v44 = vpop.f32.mrb[4].mxu0  ;;  %v5934_v46 = vpop.f32.mrb[3].mxu1  ;;  %v915_v40 = vadd.f32 %v5932_v56, %v582_v6  ;;  %v598_v56 = vrot.slane %v552_v5, %v5960_v32 }
 0x16c   : > { %v5930_v45 = vpop.f32.mrb[5].mxu0  ;;  %v917_v16 = vadd.f32 %v5934_v46, %v586_v7  ;;  %v986_v13 = vadd.f32 %v5928_v44, %v590_v11  ;;  %v602_v46 = vrot.slane %v552_v5, %v5962_v33  ;;  %v606_v44 = vrot.slane %v552_v5, %v5966_v36 }
 0x18a   : > { %v5940_v49 = vpop.f32.mrb[4].mxu1 }
 0x18b   : > { %v5936_v47 = vpop.f32.mrb[6].mxu0  ;;  %v5942_v50 = vpop.f32.mrb[5].mxu1 }
 0x18c   : > { %v5938_v48 = vpop.f32.mrb[7].mxu0  ;;  %v1059_v39 = vadd.f32 %v5942_v50, %v602_v46  ;;  %v1128_v59 = vadd.f32 %v5936_v47, %v606_v44  ;;  %v1614_v46 = vld [vmem:[#allocation2 + $0xb8] sm:$0xff]  ;;  %v1597_v44 = vld [vmem:[#allocation2 + $0x30] sm:$0xff] }
 0x1ab   : > { %v1285_v51 = vpop.f32.mrb[8].mxu0 }
 0x1ac   : > { %v1289_v52 = vmul.f32 0.00048828125, %v1285_v51  ;;  %v3985_v53 = vpop.f32.mrb[9].mxu0  ;;  %v5969_v51 = vsub.s32 5, %v556_v24 }
 0x1ad   : > { %v570_v53 = vrot.slane %v548_v27, %v5962_v33 }
 0x1ae   : > { %1292 = vperm.xlu0 %4834, %v1289_v52   ;;  %v578_v62 = vrot.slane %v548_v27, %v5969_v51  ;;  %v1057_v27 = vadd.f32 %v5940_v49, %v598_v56  ;;  %v1627_v56 = vld [vmem:[#allocation2 + $0x120] sm:$0xff] }
 0x1af   : > { %v775_v1 = vadd.f32 %v5926_v43, %v570_v53 }
 0x1b0   : > { %v846_v43 = vadd.f32 %v5922_v41, %v578_v62  ;;  %v594_v41 = vrot.slane %v552_v5, %v5956_v29 }
 0x1b2   : > { %v988_v23 = vadd.f32 %v5930_v45, %v594_v41  ;;  %v610_v45 = vrot.slane %v552_v5, %v5969_v51 }
 0x1b4   : > { %v5944_v54 = vpop.f32.mrb[6].mxu1  ;;  %v1130_v50 = vadd.f32 %v5938_v48, %v610_v45  ;;  %v1629_v45 = vld [vmem:[#allocation2 + $0x130] sm:$0xff] }
 0x1b5   : > { %v5946_v55 = vpop.f32.mrb[7].mxu1 }
 0x1b6   : > { %v1201_v47 = vadd.f32 %v5946_v55, %v618_v38  ;;  %v1647_v38 = vld [vmem:[#allocation2 + $0x1c0] sm:$0xff] }
 0x22d   : > { %v5971_v52 = vpop.permute.xlu0 %1292 }
 0x22e   : > { %v5975_v57 = vsub.f32 %v702_v34, %v5971_v52  ;;  %v5978_v58 = vsub.f32 %v704_v35, %v5971_v52  ;;  %v5995_v2 = vsub.f32 %v773_v60, %v5971_v52  ;;  %v6004_v0 = vsub.f32 %v775_v1, %v5971_v52 }
 0x22f   : > { %v6009_v8 = vsub.f32 %v844_v42, %v5971_v52  ;;  %v6016_v12 = vsub.f32 %v846_v43, %v5971_v52  ;;  %v6023_v17 = vsub.f32 %v915_v40, %v5971_v52  ;;  %v6030_v20 = vsub.f32 %v917_v16, %v5971_v52 }
 0x230   : > { %v1311_v3 = vmul.f32 %v5975_v57, %v5975_v57  ;;  %v1312_v4 = vmul.f32 %v5978_v58, %v5978_v58  ;;  %v1313_v9 = vmul.f32 %v5995_v2, %v5995_v2  ;;  %v1314_v14 = vmul.f32 %v6004_v0, %v6004_v0 }
 0x231   : > { %v1315_v18 = vmul.f32 %v6009_v8, %v6009_v8  ;;  %v1316_v21 = vmul.f32 %v6016_v12, %v6016_v12  ;;  %v6037_v24 = vsub.f32 %v986_v13, %v5971_v52  ;;  %v1317_v25 = vmul.f32 %v6023_v17, %v6023_v17 }
 0x232   : > { %v1327_v10 = vadd.f32 %v1312_v4, %v1311_v3  ;;  %v6044_v30 = vsub.f32 %v988_v23, %v5971_v52  ;;  %v1318_v31 = vmul.f32 %v6030_v20, %v6030_v20  ;;  %v614_v35 = vrot.slane %v552_v5, %v5988_v61  ;;  %v1645_v23 = vld [vmem:[#allocation2 + $0x1b0] sm:$0xff] }
 0x233   : > { %v6052_v53 = vsub.f32 %v1057_v27, %v5971_v52  ;;  %v1319_v37 = vmul.f32 %v6037_v24, %v6037_v24  ;;  %v6059_v60 = vsub.f32 %v1059_v39, %v5971_v52  ;;  %v6066_v4 = vsub.f32 %v1128_v59, %v5971_v52  ;;  %v1598_v27 = vld [vmem:[#allocation2 + $0x38] sm:$0xff] }
 0x234   : > { %v1328_v15 = vadd.f32 %v1327_v10, %v1313_v9  ;;  %v1320_v62 = vmul.f32 %v6044_v30, %v6044_v30  ;;  %v1199_v3 = vadd.f32 %v5944_v54, %v614_v35  ;;  %v6072_v6 = vsub.f32 %v1130_v50, %v5971_v52  ;;  %v1630_v35 = vld [vmem:[#allocation2 + $0x138] sm:$0xff]  ;;  %v1600_v50 = vld [vmem:[#allocation2 + $0x48] sm:$0xff] }
 0x235   : > { %v1321_v42 = vmul.f32 %v6052_v53, %v6052_v53  ;;  %v1322_v7 = vmul.f32 %v6059_v60, %v6059_v60  ;;  %v1323_v54 = vmul.f32 %v6066_v4, %v6066_v4  ;;  %v6082_v10 = vsub.f32 %v1201_v47, %v5971_v52  ;;  %v1632_v47 = vld [vmem:[#allocation2 + $0x148] sm:$0xff] }
 0x236   : > { %v1329_v19 = vadd.f32 %v1328_v15, %v1314_v14  ;;  %v6077_v48 = vsub.f32 %v1199_v3, %v5971_v52  ;;  %v1324_v55 = vmul.f32 %v6072_v6, %v6072_v6  ;;  %v1628_v52 = vld [vmem:[#allocation2 + $0x128] sm:$0xff]  ;;  %v4312_v39 = vpack.c.bf16 %v1630_v35, %v1629_v45  ;;  %v1654_v35 = vld [vmem:[#allocation2 + $0x1f8] sm:$0xff] }
 0x237   : > { %v1326_v15 = vmul.f32 %v6082_v10, %v6082_v10 }
 0x238   : > { %v1330_v22 = vadd.f32 %v1329_v19, %v1315_v18  ;;  %v1325_v40 = vmul.f32 %v6077_v48, %v6077_v48  ;;  %v1595_v18 = vld [vmem:[#allocation2 + $0x20] sm:$0xff]  ;;  %v1596_v19 = vld [vmem:[#allocation2 + $0x28] sm:$0xff] }
 0x239   : > { %v4276_v13 = vpack.c.bf16 %v1596_v19, %v1595_v18  ;;  %v1634_v18 = vld [vmem:[#allocation2 + $0x158] sm:$0xff]  ;;  %v1619_v19 = vld [vmem:[#allocation2 + $0xe0] sm:$0xff] }
 0x23a   : > { %v1331_v26 = vadd.f32 %v1330_v22, %v1316_v21  ;;  %v4308_v21 = vpack.c.bf16 %v1628_v52, %v1627_v56  ;;  %v1613_v22 = vld [vmem:[#allocation2 + $0xb0] sm:$0xff]  ;;  %v1620_v56 = vld [vmem:[#allocation2 + $0xe8] sm:$0xff] }
 0x23b   : > { %4277 = vmatpush3.bf16.msra.mxu1 %v4276_v13  ;;  %v4290_v52 = vpack.c.bf16 %v1620_v56, %v1619_v19 }
 0x23c   : > { %v1332_v34 = vadd.f32 %v1331_v26, %v1317_v25  ;;  %4309 = vmatpush3.bf16.msra.mxu0 %v4308_v21  ;;  %v4278_v25 = vpack.c.bf16 %v1614_v46, %v1613_v22  ;;  %v1646_v26 = vld [vmem:[#allocation2 + $0x1b8] sm:$0xff]  ;;  %v1651_v21 = vld [vmem:[#allocation2 + $0x1e0] sm:$0xff]  ;;  %v1652_v22 = vld [vmem:[#allocation2 + $0x1e8] sm:$0xff] }
 0x23d   : > { %v1603_v46 = vld [vmem:[#allocation2 + $0x60] sm:$0xff] }
 0x23e   : > { %v1333_v49 = vadd.f32 %v1332_v34, %v1318_v31  ;;  %v4310_v31 = vpack.c.bf16 %v1646_v26, %v1645_v23  ;;  %v4280_v34 = vpack.c.bf16 %v1598_v27, %v1597_v44  ;;  %4279 = vmatprep.subr.bf16.mxu1 %v4278_v25  ;;  %v4322_v23 = vpack.c.bf16 %v1652_v22, %v1651_v21  ;;  %v1604_v25 = vld [vmem:[#allocation2 + $0x68] sm:$0xff]  ;;  %v1635_v26 = vld [vmem:[#allocation2 + $0x160] sm:$0xff]  ;;  %v1621_v27 = vld [vmem:[#allocation2 + $0xf0] sm:$0xff] }
 0x23f   : > { %v1636_v44 = vld [vmem:[#allocation2 + $0x168] sm:$0xff]  ;;  %v4292_v45 = vpack.c.bf16 %v1604_v25, %v1603_v46 }
 0x240   : > { %v1334_v1 = vadd.f32 %v1333_v49, %v1319_v37  ;;  %v1615_v37 = vld [vmem:[#allocation2 + $0xc0] sm:$0xff]  ;;  %v1616_v49 = vld [vmem:[#allocation2 + $0xc8] sm:$0xff]  ;;  %4311 = vmatprep.subr.bf16.mxu0 %v4310_v31  ;;  %4281 = vmatpush3.bf16.msra.mxu1 %v4280_v34  ;;  %v1622_v31 = vld [vmem:[#allocation2 + $0xf8] sm:$0xff] }
 0x241   : > { %v4282_v59 = vpack.c.bf16 %v1616_v49, %v1615_v37  ;;  %4313 = vmatpush3.bf16.msra.mxu0 %v4312_v39  ;;  %v1653_v34 = vld [vmem:[#allocation2 + $0x1f0] sm:$0xff]  ;;  %v4324_v39 = vpack.c.bf16 %v1636_v44, %v1635_v26  ;;  %v4294_v37 = vpack.c.bf16 %v1622_v31, %v1621_v27 }
 0x242   : > { %v1335_v5 = vadd.f32 %v1334_v1, %v1320_v62  ;;  %v1648_v62 = vld [vmem:[#allocation2 + $0x1c8] sm:$0xff]  ;;  %v1599_v1 = vld [vmem:[#allocation2 + $0x40] sm:$0xff]  ;;  %v1605_v49 = vld [vmem:[#allocation2 + $0x70] sm:$0xff] }
 0x243   : > { %v4314_v3 = vpack.c.bf16 %v1648_v62, %v1647_v38  ;;  %4283 = vmatprep.subr.bf16.mxu1 %v4282_v59  ;;  %v1606_v38 = vld [vmem:[#allocation2 + $0x78] sm:$0xff]  ;;  %v4326_v59 = vpack.c.bf16 %v1654_v35, %v1653_v34  ;;  %v1637_v62 = vld [vmem:[#allocation2 + $0x170] sm:$0xff]  ;;  %v1655_v35 = vld [vmem:[#allocation2 + $0x200] sm:$0xff] }
 0x244   : > { %v1336_v43 = vadd.f32 %v1335_v5, %v1321_v42  ;;  %v4284_v42 = vpack.c.bf16 %v1600_v50, %v1599_v1  ;;  %v1631_v5 = vld [vmem:[#allocation2 + $0x140] sm:$0xff]  ;;  %v1638_v1 = vld [vmem:[#allocation2 + $0x178] sm:$0xff]  ;;  %v4296_v50 = vpack.c.bf16 %v1606_v38, %v1605_v49 }
 0x245   : > { %4315 = vmatprep.subr.bf16.mxu0 %v4314_v3  ;;  %v4328_v3 = vpack.c.bf16 %v1638_v1, %v1637_v62  ;;  %v1656_v62 = vld [vmem:[#allocation2 + $0x208] sm:$0xff]  ;;  %v1687_v1 = vld [vmem:[#allocation2 + $0x300] sm:$0xff] }
 0x246   : > { %v1337_v9 = vadd.f32 %v1336_v43, %v1322_v7  ;;  %v1617_v7 = vld [vmem:[#allocation2 + $0xd0] sm:$0xff]  ;;  %v4316_v43 = vpack.c.bf16 %v1632_v47, %v1631_v5  ;;  %4285 = vmatpush3.bf16.msra.mxu1 %v4284_v42  ;;  %v1671_v42 = vld [vmem:[#allocation2 + $0x280] sm:$0xff]  ;;  %v1672_v5 = vld [vmem:[#allocation2 + $0x288] sm:$0xff] }
 0x247   : > { %v1703_v47 = vld [vmem:[#allocation2 + $0x380] sm:$0xff] }
 0x248   : > { %v1338_v11 = vadd.f32 %v1337_v9, %v1323_v54  ;;  %v1618_v54 = vld [vmem:[#allocation2 + $0xd8] sm:$0xff]  ;;  %v1649_v9 = vld [vmem:[#allocation2 + $0x1d0] sm:$0xff]  ;;  %4317 = vmatpush3.bf16.msra.mxu0 %v4316_v43  ;;  %v1704_v43 = vld [vmem:[#allocation2 + $0x388] sm:$0xff] }
 0x24a   : > { %v1339_v14 = vadd.f32 %v1338_v11, %v1324_v55  ;;  %v1650_v55 = vld [vmem:[#allocation2 + $0x1d8] sm:$0xff]  ;;  %v4286_v11 = vpack.c.bf16 %v1618_v54, %v1617_v7  ;;  %v4330_v7 = vpack.c.bf16 %v1672_v5, %v1671_v42  ;;  %v4362_v54 = vpack.c.bf16 %v1704_v43, %v1703_v47  ;;  %v1673_v43 = vld [vmem:[#allocation2 + $0x290] sm:$0xff] }
 0x24c   : > { %v1340_v41 = vadd.f32 %v1339_v14, %v1325_v40  ;;  %v4318_v40 = vpack.c.bf16 %v1650_v55, %v1649_v9  ;;  %v1601_v14 = vld [vmem:[#allocation2 + $0x50] sm:$0xff]  ;;  %4287 = vmatprep.subr.bf16.mxu1 %v4286_v11 }
 0x24e   : > { %v1341_v16 = vadd.f32 %v1340_v41, %v1326_v15  ;;  %v1602_v15 = vld [vmem:[#allocation2 + $0x58] sm:$0xff]  ;;  %v1633_v41 = vld [vmem:[#allocation2 + $0x150] sm:$0xff]  ;;  %4319 = vmatprep.subr.bf16.mxu0 %v4318_v40 }
 0x24f   : > { %v4320_v13 = vpack.c.bf16 %v1634_v18, %v1633_v41  ;;  %v3359_v40 = vld [vmem:[%s7159_s3 + $0x1] ss:$8 sm:$0xf]  ;;  %v3364_v41 = vld [vmem:[%s7159_s3 + $0x2] ss:$8 sm:$0xf0] }
 0x250   : > { %1342 = vadd.xlane.f32.xlu0 %v1341_v16  ;;  %v4288_v16 = vpack.c.bf16 %v1602_v15, %v1601_v14  ;;  %v3360_v14 = vld [vmem:[%s7159_s3 + $0x1] ss:$8 sm:$0xf0]  ;;  %v3363_v15 = vld [vmem:[%s7159_s3 + $0x2] ss:$8 sm:$0xf] }
 0x251   : > { %4321 = vmatpush3.bf16.msra.mxu0 %v4320_v13  ;;  %v6104_v18 = vor.u32 %v3364_v41, %v3363_v15  ;;  %v1674_v15 = vld [vmem:[#allocation2 + $0x298] sm:$0xff]  ;;  %v1705_v41 = vld [vmem:[#allocation2 + $0x390] sm:$0xff] }
 0x252   : > { %4289 = vmatpush3.bf16.msra.mxu1 %v4288_v16  ;;  %4323 = vmatprep.subr.bf16.mxu0 %v4322_v23  ;;  %v6102_v16 = vor.u32 %v3360_v14, %v3359_v40 }
 0x253   : > { %4291 = vmatprep.subr.bf16.mxu1 %v4290_v52  ;;  %v1486_v13 = vrot.slane %v6104_v18, %v5956_v29  ;;  %v1494_v52 = vrot.slane %v6104_v18, %v5962_v33  ;;  %v1482_v23 = vrot.slane %v6104_v18, %v5954_v28  ;;  %v1490_v25 = vrot.slane %v6104_v18, %v5960_v32 }
 0x254   : > { %v1380_v19 = vrot.slane %v6102_v16, %v5956_v29  ;;  %v1388_v56 = vrot.slane %v6102_v16, %v5962_v33  ;;  %v1376_v21 = vrot.slane %v6102_v16, %v5954_v28  ;;  %v1384_v22 = vrot.slane %v6102_v16, %v5960_v32 }
 0x255   : > { %4325 = vmatpush3.bf16.msra.mxu0 %v4324_v39  ;;  %v1396_v26 = vrot.slane %v6102_v16, %v5969_v51  ;;  %v1404_v44 = vrot.slane %v6102_v16, %v5991_v63 }
 0x256   : > { %4293 = vmatpush3.bf16.msra.mxu1 %v4292_v45  ;;  %4327 = vmatprep.subr.bf16.mxu0 %v4326_v59 }
 0x257   : > { %4295 = vmatprep.subr.bf16.mxu1 %v4294_v37  ;;  %v1502_v37 = vrot.slane %v6104_v18, %v5969_v51 }
 0x259   : > { %4329 = vmatpush3.bf16.msra.mxu0 %v4328_v3 }
 0x25a   : > { %4297 = vmatpush3.bf16.msra.mxu1 %v4296_v50  ;;  %4363 = vmatprep.subr.bf16.mxu0 %v4362_v54  ;;  %v3365_v54 = vld [vmem:[%s7159_s3 + $0x42] ss:$8 sm:$0xf] }
 0x25b   : > { %4331 = vmatprep.subr.bf16.mxu1 %v4330_v7 }
 0x2dd   : > { %v1343_v9 = vpop.xlane.xlu0 %1342 }
 0x2de   : > { %v1344_v55 = vmul.f32 0.00048828125, %v1343_v9  ;;  %v3366_v9 = vld [vmem:[%s7159_s3 + $0x42] ss:$8 sm:$0xf0] }
 0x2e0   : > { %v1345_v11 = vadd.f32 1e-05, %v1344_v55  ;;  %v4332_v55 = vpack.c.bf16 %v1656_v62, %v1655_v35  ;;  %v1707_v35 = vld [vmem:[#allocation2 + $0x3a0] sm:$0xff] }
 0x2e2   : > { %4836 = vrsqrt.f32 %v1345_v11 }
 0x2ec   : > { %v6118_v46 = vpop.eup %4836 }
 0x2ed   : > { %v1348_v27 = vmul.f32 %v6118_v46, %v5978_v58  ;;  %v1350_v31 = vmul.f32 %v6118_v46, %v6004_v0  ;;  %v1347_v34 = vmul.f32 %v6118_v46, %v5975_v57  ;;  %v1349_v45 = vmul.f32 %v6118_v46, %v5995_v2  ;;  %v1688_v2 = vld [vmem:[#allocation2 + $0x308] sm:$0xff] }
 0x2ee   : > { %v1352_v39 = vmul.f32 %v6118_v46, %v6016_v12  ;;  %v1354_v49 = vmul.f32 %v6118_v46, %v6030_v20  ;;  %v1510_v58 = vrot.slane %v6104_v18, %v5991_v63  ;;  %v3361_v12 = vld [vmem:[%s7159_s3 + $0x41] ss:$8 sm:$0xf]  ;;  %v4364_v11 = vpack.c.bf16 %v1688_v2, %v1687_v1 }
 0x2ef   : > { %v1454_v0 = vmul.f32 %v1380_v19, %v1348_v27  ;;  %v1456_v38 = vmul.f32 %v1388_v56, %v1350_v31  ;;  %v1453_v59 = vmul.f32 %v1376_v21, %v1347_v34  ;;  %v1455_v57 = vmul.f32 %v1384_v22, %v1349_v45  ;;  %v3362_v20 = vld [vmem:[%s7159_s3 + $0x41] ss:$8 sm:$0xf0] }
 0x2f0   : > { %v1458_v50 = vmul.f32 %v1396_v26, %v1352_v39  ;;  %v1460_v3 = vmul.f32 %v1404_v44, %v1354_v49  ;;  %v1706_v19 = vld [vmem:[#allocation2 + $0x398] sm:$0xff]  ;;  %v1657_v22 = vld [vmem:[#allocation2 + $0x210] sm:$0xff]  ;;  %v1675_v44 = vld [vmem:[#allocation2 + $0x2a0] sm:$0xff]  ;;  %v6172_v27 = vor.u32 %v3362_v20, %v3361_v12  ;;  %v4334_v31 = vpack.c.bf16 %v1674_v15, %v1673_v43 }
 0x2f1   : > { %v6150_v42 = vadd.f32 %v1486_v13, %v1454_v0  ;;  %v6152_v5 = vadd.f32 %v1494_v52, %v1456_v38  ;;  %v6154_v47 = vadd.f32 %v1482_v23, %v1453_v59  ;;  %v6156_v7 = vadd.f32 %v1490_v25, %v1455_v57  ;;  %v1658_v23 = vld [vmem:[#allocation2 + $0x218] sm:$0xff]  ;;  %v1689_v25 = vld [vmem:[#allocation2 + $0x310] sm:$0xff]  ;;  %v1676_v45 = vld [vmem:[#allocation2 + $0x2a8] sm:$0xff] }
 0x2f2   : > { %v6164_v40 = vadd.f32 %v1502_v37, %v1458_v50  ;;  %v6166_v14 = vadd.f32 %v1510_v58, %v1460_v3  ;;  %v1690_v26 = vld [vmem:[#allocation2 + $0x318] sm:$0xff]  ;;  %v4366_v34 = vpack.c.bf16 %v1706_v19, %v1705_v41  ;;  %v1708_v39 = vld [vmem:[#allocation2 + $0x3a8] sm:$0xff]  ;;  %v6184_v58 = vor.u32 %v3366_v9, %v3365_v54  ;;  %v1659_v59 = vld [vmem:[#allocation2 + $0x220] sm:$0xff] }
 0x2f3   : > { %v1576_v56 = vmax.f32 %v6150_v42, 0.0  ;;  %v1578_v13 = vmax.f32 %v6152_v5, 0.0  ;;  %v1575_v52 = vmax.f32 %v6154_v47, 0.0  ;;  %v1577_v21 = vmax.f32 %v6156_v7, 0.0  ;;  %v1660_v57 = vld [vmem:[#allocation2 + $0x228] sm:$0xff]  ;;  %v1691_v2 = vld [vmem:[#allocation2 + $0x320] sm:$0xff] }
 0x2f4   : > { %v1580_v37 = vmax.f32 %v6164_v40, 0.0  ;;  %v1582_v49 = vmax.f32 %v6166_v14, 0.0  ;;  %v4336_v0 = vpack.c.bf16 %v1658_v23, %v1657_v22  ;;  %v4368_v38 = vpack.c.bf16 %v1690_v26, %v1689_v25  ;;  %v1692_v50 = vld [vmem:[#allocation2 + $0x328] sm:$0xff]  ;;  %v1677_v3 = vld [vmem:[#allocation2 + $0x2b0] sm:$0xff]  ;;  %v1678_v20 = vld [vmem:[#allocation2 + $0x2b8] sm:$0xff] }
 0x2f5   : > { %1916 = vmatprep.mubr.f32.mxu1 %v1576_v56  ;;  %1986 = vmatprep.mubr.f32.mxu0 %v1578_v13  ;;  %v4338_v62 = vpack.c.bf16 %v1676_v45, %v1675_v44  ;;  %v4370_v1 = vpack.c.bf16 %v1708_v39, %v1707_v35  ;;  %v1424_v12 = vrot.slane %v6172_v27, %v5966_v36  ;;  %v1709_v43 = vld [vmem:[#allocation2 + $0x3b0] sm:$0xff]  ;;  %v1710_v54 = vld [vmem:[#allocation2 + $0x3b8] sm:$0xff]  ;;  %v1680_v35 = vld [vmem:[#allocation2 + $0x2c8] sm:$0xff] }
 0x2f6   : > { %1917 = vmatmul.mubr.f32.vlgmr.msra.gmra.mrb[8].mxu1 %v1575_v52  ;;  %1987 = vmatmul.mubr.f32.vlgmr.msra.gmra.mrb[10].mxu0 %v1577_v21  ;;  %v1432_v9 = vrot.slane %v6172_v27, %v5988_v61  ;;  %v1530_v15 = vrot.slane %v6184_v58, %v5966_v36  ;;  %v4372_v41 = vpack.c.bf16 %v1692_v50, %v1691_v2  ;;  %v1661_v19 = vld [vmem:[#allocation2 + $0x230] sm:$0xff]  ;;  %v1662_v22 = vld [vmem:[#allocation2 + $0x238] sm:$0xff]  ;;  %v1711_v39 = vld [vmem:[#allocation2 + $0x3c0] sm:$0xff] }
 0x2f7   : > { %4333 = vmatpush3.bf16.msra.mxu1 %v4332_v55  ;;  %4365 = vmatpush3.bf16.msra.mxu0 %v4364_v11  ;;  %v4340_v55 = vpack.c.bf16 %v1660_v57, %v1659_v59  ;;  %v1359_v11 = vmul.f32 %v6118_v46, %v6066_v4  ;;  %v1361_v23 = vmul.f32 %v6118_v46, %v6077_v48  ;;  %v1694_v4 = vld [vmem:[#allocation2 + $0x338] sm:$0xff]  ;;  %v1663_v2 = vld [vmem:[#allocation2 + $0x240] sm:$0xff]  ;;  %v1664_v50 = vld [vmem:[#allocation2 + $0x248] sm:$0xff] }
 0x2f8   : > { %2056 = vmatprep.mubr.f32.mxu1 %v1580_v37  ;;  %2126 = vmatprep.mubr.f32.mxu0 %v1582_v49  ;;  %v1538_v25 = vrot.slane %v6184_v58, %v5988_v61  ;;  %v4342_v26 = vpack.c.bf16 %v1678_v20, %v1677_v3  ;;  %v4374_v44 = vpack.c.bf16 %v1710_v54, %v1709_v43  ;;  %v1695_v20 = vld [vmem:[#allocation2 + $0x340] sm:$0xff]  ;;  %v1681_v43 = vld [vmem:[#allocation2 + $0x2d0] sm:$0xff]  ;;  %v1682_v54 = vld [vmem:[#allocation2 + $0x2d8] sm:$0xff] }
 0x2f9   : > { %4335 = vmatprep.subr.bf16.mxu1 %v4334_v31  ;;  %4367 = vmatprep.subr.bf16.mxu0 %v4366_v34  ;;  %v1693_v31 = vld [vmem:[#allocation2 + $0x330] sm:$0xff]  ;;  %v1679_v34 = vld [vmem:[#allocation2 + $0x2c0] sm:$0xff]  ;;  %v1465_v45 = vmul.f32 %v1424_v12, %v1359_v11  ;;  %v4344_v48 = vpack.c.bf16 %v1662_v22, %v1661_v19  ;;  %v1696_v12 = vld [vmem:[#allocation2 + $0x348] sm:$0xff] }
 0x2fa   : > { %v4376_v57 = vpack.c.bf16 %v1694_v4, %v1693_v31  ;;  %v1713_v11 = vld [vmem:[#allocation2 + $0x3d0] sm:$0xff]  ;;  %v1666_v19 = vld [vmem:[#allocation2 + $0x258] sm:$0xff]  ;;  %v1684_v31 = vld [vmem:[#allocation2 + $0x2e8] sm:$0xff] }
 0x2fb   : > { %4337 = vmatpush3.bf16.msra.mxu1 %v4336_v0  ;;  %4369 = vmatpush3.bf16.msra.mxu0 %v4368_v38  ;;  %v1712_v0 = vld [vmem:[#allocation2 + $0x3c8] sm:$0xff]  ;;  %v1467_v38 = vmul.f32 %v1432_v9, %v1361_v23  ;;  %v6202_v59 = vadd.f32 %v1530_v15, %v1465_v45  ;;  %v1714_v9 = vld [vmem:[#allocation2 + $0x3d8] sm:$0xff]  ;;  %v4380_v15 = vpack.c.bf16 %v1696_v12, %v1695_v20  ;;  %v1697_v22 = vld [vmem:[#allocation2 + $0x350] sm:$0xff] }
 0x2fc   : > { %4339 = vmatprep.subr.bf16.mxu1 %v4338_v62  ;;  %4371 = vmatprep.subr.bf16.mxu0 %v4370_v1  ;;  %v4346_v1 = vpack.c.bf16 %v1680_v35, %v1679_v34  ;;  %v4378_v3 = vpack.c.bf16 %v1712_v0, %v1711_v39  ;;  %v4350_v23 = vpack.c.bf16 %v1682_v54, %v1681_v43  ;;  %v1715_v4 = vld [vmem:[#allocation2 + $0x3e0] sm:$0xff]  ;;  %v1716_v34 = vld [vmem:[#allocation2 + $0x3e8] sm:$0xff]  ;;  %v1686_v20 = vld [vmem:[#allocation2 + $0x2f8] sm:$0xff] }
 0x2fd   : > { %v6204_v62 = vadd.f32 %v1538_v25, %v1467_v38  ;;  %v4382_v25 = vpack.c.bf16 %v1714_v9, %v1713_v11  ;;  %v1392_v45 = vrot.slane %v6102_v16, %v5966_v36  ;;  %v1400_v35 = vrot.slane %v6102_v16, %v5988_v61  ;;  %v1717_v43 = vld [vmem:[#allocation2 + $0x3f0] sm:$0xff]  ;;  %v1718_v54 = vld [vmem:[#allocation2 + $0x3f8] sm:$0xff]  ;;  %v2512_v7 = vld [vmem:[%s7161_s5 + $0x320] sm:$0xff] }
 0x2fe   : > { %v1351_v12 = vmul.f32 %v6118_v46, %v6009_v8  ;;  %v1353_v16 = vmul.f32 %v6118_v46, %v6023_v17  ;;  %v1356_v11 = vmul.f32 %v6118_v46, %v6044_v30  ;;  %v1412_v9 = vrot.slane %v6172_v27, %v5956_v29  ;;  %v2466_v5 = vld [vmem:[%s7161_s5 + $0x1b0] sm:$0xff] }
 0x2ff   : > { %4341 = vmatpush3.bf16.msra.mxu1 %v4340_v55  ;;  %4373 = vmatpush3.bf16.msra.mxu0 %v4372_v41  ;;  %v4348_v55 = vpack.c.bf16 %v1664_v50, %v1663_v2  ;;  %v1665_v41 = vld [vmem:[#allocation2 + $0x250] sm:$0xff]  ;;  %v1699_v2 = vld [vmem:[#allocation2 + $0x360] sm:$0xff]  ;;  %v4386_v50 = vpack.c.bf16 %v1716_v34, %v1715_v4  ;;  %v1358_v8 = vmul.f32 %v6118_v46, %v6059_v60  ;;  %v1768_v4 = vld [vmem:[#allocation2 + $0x588] sm:$0xff] }
 0x300   : > { %4343 = vmatprep.subr.bf16.mxu1 %v4342_v26  ;;  %4375 = vmatprep.subr.bf16.mxu0 %v4374_v44  ;;  %v1698_v26 = vld [vmem:[#allocation2 + $0x358] sm:$0xff]  ;;  %v1683_v44 = vld [vmem:[#allocation2 + $0x2e0] sm:$0xff]  ;;  %v4352_v39 = vpack.c.bf16 %v1666_v19, %v1665_v41  ;;  %v1420_v17 = vrot.slane %v6172_v27, %v5962_v33  ;;  %v1462_v34 = vmul.f32 %v1412_v9, %v1356_v11  ;;  %v2530_v14 = vld [vmem:[%s7161_s5 + $0x3b0] sm:$0xff] }
 0x301   : > { %v4384_v0 = vpack.c.bf16 %v1698_v26, %v1697_v22  ;;  %v4354_v38 = vpack.c.bf16 %v1684_v31, %v1683_v44  ;;  %v1669_v22 = vld [vmem:[#allocation2 + $0x270] sm:$0xff]  ;;  %v1702_v26 = vld [vmem:[#allocation2 + $0x378] sm:$0xff]  ;;  %v1457_v44 = vmul.f32 %v1392_v45, %v1351_v12  ;;  %v1736_v31 = vld [vmem:[#allocation2 + $0x488] sm:$0xff] }
 0x302   : > { %v1767_v60 = vld [vmem:[#allocation2 + $0x580] sm:$0xff]  ;;  %v1752_v12 = vld [vmem:[#allocation2 + $0x508] sm:$0xff]  ;;  %v1770_v11 = vld [vmem:[#allocation2 + $0x598] sm:$0xff] }
 0x303   : > { %4345 = vmatpush3.bf16.msra.mxu1 %v4344_v48  ;;  %4377 = vmatpush3.bf16.msra.mxu0 %v4376_v57  ;;  %v1667_v48 = vld [vmem:[#allocation2 + $0x260] sm:$0xff]  ;;  %v1668_v57 = vld [vmem:[#allocation2 + $0x268] sm:$0xff] }
 0x304   : > { %4347 = vmatprep.subr.bf16.mxu1 %v4346_v1  ;;  %4379 = vmatprep.subr.bf16.mxu0 %v4378_v3  ;;  %v1700_v1 = vld [vmem:[#allocation2 + $0x368] sm:$0xff]  ;;  %v1685_v3 = vld [vmem:[#allocation2 + $0x2f0] sm:$0xff]  ;;  %v4356_v41 = vpack.c.bf16 %v1668_v57, %v1667_v48  ;;  %v1526_v48 = vrot.slane %v6184_v58, %v5962_v33 }
 0x305   : > { %v4388_v19 = vpack.c.bf16 %v1700_v1, %v1699_v2  ;;  %v4358_v30 = vpack.c.bf16 %v1686_v20, %v1685_v3  ;;  %v1719_v1 = vld [vmem:[#allocation2 + $0x400] sm:$0xff]  ;;  %v1720_v3 = vld [vmem:[#allocation2 + $0x408] sm:$0xff] }
 0x306   : > { %v4396_v9 = vpack.c.bf16 %v1720_v3, %v1719_v1  ;;  %v1774_v1 = vld [vmem:[#allocation2 + $0x5b8] sm:$0xff] }
 0x307   : > { %4349 = vmatpush3.bf16.msra.mxu1 %v4348_v55  ;;  %4381 = vmatpush3.bf16.msra.mxu0 %v4380_v15  ;;  %v1498_v55 = vrot.slane %v6104_v18, %v5966_v36  ;;  %v1506_v15 = vrot.slane %v6104_v18, %v5988_v61  ;;  %v4390_v36 = vpack.c.bf16 %v1718_v54, %v1717_v43  ;;  %v1735_v18 = vld [vmem:[#allocation2 + $0x480] sm:$0xff]  ;;  %v1738_v43 = vld [vmem:[#allocation2 + $0x498] sm:$0xff]  ;;  %v1769_v54 = vld [vmem:[#allocation2 + $0x590] sm:$0xff] }
 0x308   : > { %4351 = vmatprep.subr.bf16.mxu1 %v4350_v23  ;;  %4383 = vmatprep.subr.bf16.mxu0 %v4382_v25  ;;  %v1670_v23 = vld [vmem:[#allocation2 + $0x278] sm:$0xff]  ;;  %v1701_v25 = vld [vmem:[#allocation2 + $0x370] sm:$0xff]  ;;  %v1459_v61 = vmul.f32 %v1400_v35, %v1353_v16  ;;  %v4394_v2 = vpack.c.bf16 %v1736_v31, %v1735_v18  ;;  %v1772_v18 = vld [vmem:[#allocation2 + $0x5a8] sm:$0xff] }
 0x309   : > { %v4392_v57 = vpack.c.bf16 %v1702_v26, %v1701_v25  ;;  %v6230_v45 = vadd.f32 %v1498_v55, %v1457_v44  ;;  %v1737_v16 = vld [vmem:[#allocation2 + $0x490] sm:$0xff]  ;;  %v1754_v25 = vld [vmem:[#allocation2 + $0x518] sm:$0xff]  ;;  %v1740_v26 = vld [vmem:[#allocation2 + $0x4a8] sm:$0xff] }
 0x30a   : > { %v6232_v35 = vadd.f32 %v1506_v15, %v1459_v61  ;;  %v1771_v61 = vld [vmem:[#allocation2 + $0x5a0] sm:$0xff] }
 0x30b   : > { %4353 = vmatpush3.bf16.msra.mxu1 %v4352_v39  ;;  %4385 = vmatpush3.bf16.msra.mxu0 %v4384_v0  ;;  %v1518_v39 = vrot.slane %v6184_v58, %v5956_v29  ;;  %v1464_v0 = vmul.f32 %v1420_v17, %v1358_v8  ;;  %v1751_v29 = vld [vmem:[#allocation2 + $0x500] sm:$0xff]  ;;  %v1579_v55 = vmax.f32 %v6230_v45, 0.0  ;;  %v1721_v17 = vld [vmem:[#allocation2 + $0x410] sm:$0xff] }
 0x30c   : > { %4355 = vmatprep.subr.bf16.mxu1 %v4354_v38  ;;  %4387 = vmatprep.subr.bf16.mxu0 %v4386_v50  ;;  %v4360_v38 = vpack.c.bf16 %v1670_v23, %v1669_v22  ;;  %v4426_v50 = vpack.c.bf16 %v1768_v4, %v1767_v60  ;;  %v1581_v15 = vmax.f32 %v6232_v35, 0.0  ;;  %v4428_v8 = vpack.c.bf16 %v1752_v12, %v1751_v29  ;;  %v2576_v35 = vld [vmem:[%s7161_s5 + $0x520] sm:$0xff] }
 0x30d   : > { %v6234_v20 = vadd.f32 %v1518_v39, %v1462_v34  ;;  %v6236_v33 = vadd.f32 %v1526_v48, %v1464_v0  ;;  %v4398_v22 = vpack.c.bf16 %v1738_v43, %v1737_v16  ;;  %v4430_v23 = vpack.c.bf16 %v1770_v11, %v1769_v54  ;;  %v1723_v34 = vld [vmem:[#allocation2 + $0x420] sm:$0xff]  ;;  %v1724_v39 = vld [vmem:[#allocation2 + $0x428] sm:$0xff]  ;;  %v1725_v16 = vld [vmem:[#allocation2 + $0x430] sm:$0xff] }
 0x30e   : > { %v1755_v0 = vld [vmem:[#allocation2 + $0x520] sm:$0xff]  ;;  %v4434_v48 = vpack.c.bf16 %v1772_v18, %v1771_v61  ;;  %v4404_v3 = vpack.c.bf16 %v1724_v39, %v1723_v34  ;;  %v1726_v43 = vld [vmem:[#allocation2 + $0x438] sm:$0xff]  ;;  %v1757_v54 = vld [vmem:[#allocation2 + $0x530] sm:$0xff] }
 0x30f   : > { %4357 = vmatpush3.bf16.msra.mxu1 %v4356_v41  ;;  %4389 = vmatpush3.bf16.msra.mxu0 %v4388_v19  ;;  %v1722_v41 = vld [vmem:[#allocation2 + $0x418] sm:$0xff]  ;;  %v1753_v19 = vld [vmem:[#allocation2 + $0x510] sm:$0xff]  ;;  %v1586_v44 = vmax.f32 %v6236_v33, 0.0  ;;  %v1759_v61 = vld [vmem:[#allocation2 + $0x540] sm:$0xff] }
 0x310   : > { %4359 = vmatprep.subr.bf16.mxu1 %v4358_v30  ;;  %4391 = vmatprep.subr.bf16.mxu0 %v4390_v36  ;;  %v1584_v30 = vmax.f32 %v6234_v20, 0.0  ;;  %v1739_v36 = vld [vmem:[#allocation2 + $0x4a0] sm:$0xff]  ;;  %v4400_v31 = vpack.c.bf16 %v1722_v41, %v1721_v17  ;;  %v4432_v60 = vpack.c.bf16 %v1754_v25, %v1753_v19  ;;  %v1744_v17 = vld [vmem:[#allocation2 + $0x4c8] sm:$0xff]  ;;  %v1777_v34 = vld [vmem:[#allocation2 + $0x5d0] sm:$0xff] }
 0x311   : > { %v4402_v4 = vpack.c.bf16 %v1740_v26, %v1739_v36  ;;  %v1775_v41 = vld [vmem:[#allocation2 + $0x5c0] sm:$0xff]  ;;  %v1776_v19 = vld [vmem:[#allocation2 + $0x5c8] sm:$0xff]  ;;  %v1778_v39 = vld [vmem:[#allocation2 + $0x5d8] sm:$0xff] }
 0x312   : > { %v1727_v36 = vld [vmem:[#allocation2 + $0x440] sm:$0xff]  ;;  %v1728_v26 = vld [vmem:[#allocation2 + $0x448] sm:$0xff]  ;;  %v4442_v18 = vpack.c.bf16 %v1776_v19, %v1775_v41  ;;  %v2594_v33 = vld [vmem:[%s7161_s5 + $0x5b0] sm:$0xff] }
 0x313   : > { %4361 = vmatpush3.bf16.msra.mxu1 %v4360_v38  ;;  %4393 = vmatpush3.bf16.msra.mxu0 %v4392_v57  ;;  %v1756_v38 = vld [vmem:[#allocation2 + $0x528] sm:$0xff]  ;;  %v1741_v57 = vld [vmem:[#allocation2 + $0x4b0] sm:$0xff]  ;;  %v1763_v19 = vld [vmem:[#allocation2 + $0x560] sm:$0xff] }
 0x314   : > { %4395 = vmatprep.subr.bf16.mxu1 %v4394_v2  ;;  %4427 = vmatprep.subr.bf16.mxu0 %v4426_v50  ;;  %v1742_v2 = vld [vmem:[#allocation2 + $0x4b8] sm:$0xff]  ;;  %v1773_v50 = vld [vmem:[#allocation2 + $0x5b0] sm:$0xff]  ;;  %v4436_v29 = vpack.c.bf16 %v1756_v38, %v1755_v0  ;;  %v4412_v0 = vpack.c.bf16 %v1728_v26, %v1727_v36  ;;  %v1732_v41 = vld [vmem:[#allocation2 + $0x468] sm:$0xff] }
 0x315   : > { %v4406_v12 = vpack.c.bf16 %v1742_v2, %v1741_v57  ;;  %v4438_v11 = vpack.c.bf16 %v1774_v1, %v1773_v50  ;;  %v1729_v57 = vld [vmem:[#allocation2 + $0x450] sm:$0xff]  ;;  %v1730_v2 = vld [vmem:[#allocation2 + $0x458] sm:$0xff]  ;;  %v4446_v1 = vpack.c.bf16 %v1778_v39, %v1777_v34  ;;  %v1428_v34 = vrot.slane %v6172_v27, %v5969_v51 }
 0x316   : > { %2057 = vmatmul.mubr.f32.vlgmr.msra.gmra.mrb[10].mxu1 %v1579_v55  ;;  %2127 = vmatmul.mubr.f32.vlgmr.msra.gmra.mrb[12].mxu0 %v1581_v15  ;;  %v1761_v50 = vld [vmem:[#allocation2 + $0x550] sm:$0xff]  ;;  %v1750_v26 = vld [vmem:[#allocation2 + $0x4f8] sm:$0xff]  ;;  %v1514_v39 = vrot.slane %v6184_v58, %v5954_v28 }
 0x317   : > { %4397 = vmatpush3.bf16.msra.mxu1 %v4396_v9  ;;  %2196 = vmatprep.mubr.f32.mxu1 %v1584_v30  ;;  %v1758_v9 = vld [vmem:[#allocation2 + $0x538] sm:$0xff]  ;;  %v1749_v36 = vld [vmem:[#allocation2 + $0x4f0] sm:$0xff] }
 0x318   : > { %4429 = vmatpush3.bf16.msra.mxu0 %v4428_v8  ;;  %2266 = vmatprep.mubr.f32.mxu0 %v1586_v44  ;;  %v1743_v8 = vld [vmem:[#allocation2 + $0x4c0] sm:$0xff] }
 0x319   : > { %4399 = vmatprep.subr.bf16.mxu1 %v4398_v22  ;;  %4431 = vmatprep.subr.bf16.mxu0 %v4430_v23  ;;  %v4408_v22 = vpack.c.bf16 %v1726_v43, %v1725_v16  ;;  %v4440_v23 = vpack.c.bf16 %v1758_v9, %v1757_v54  ;;  %v4410_v25 = vpack.c.bf16 %v1744_v17, %v1743_v8  ;;  %v1779_v16 = vld [vmem:[#allocation2 + $0x5e0] sm:$0xff]  ;;  %v1780_v43 = vld [vmem:[#allocation2 + $0x5e8] sm:$0xff] }
 0x31a   : > { %v4416_v54 = vpack.c.bf16 %v1730_v2, %v1729_v57  ;;  %v1731_v17 = vld [vmem:[#allocation2 + $0x460] sm:$0xff]  ;;  %v1733_v57 = vld [vmem:[#allocation2 + $0x470] sm:$0xff] }
 0x31b   : > { %4401 = vmatpush3.bf16.msra.mxu1 %v4400_v31  ;;  %v1760_v31 = vld [vmem:[#allocation2 + $0x548] sm:$0xff]  ;;  %v1765_v2 = vld [vmem:[#allocation2 + $0x570] sm:$0xff] }
 0x31c   : > { %4433 = vmatpush3.bf16.msra.mxu0 %v4432_v60  ;;  %4403 = vmatprep.subr.bf16.mxu1 %v4402_v4  ;;  %v1745_v60 = vld [vmem:[#allocation2 + $0x4d0] sm:$0xff]  ;;  %v1746_v4 = vld [vmem:[#allocation2 + $0x4d8] sm:$0xff] }
 0x31d   : > { %4435 = vmatprep.subr.bf16.mxu0 %v4434_v48  ;;  %v4444_v48 = vpack.c.bf16 %v1760_v31, %v1759_v61  ;;  %v4414_v38 = vpack.c.bf16 %v1746_v4, %v1745_v60  ;;  %v1357_v61 = vmul.f32 %v6118_v46, %v6052_v53  ;;  %v1781_v31 = vld [vmem:[#allocation2 + $0x5f0] sm:$0xff]  ;;  %v1782_v60 = vld [vmem:[#allocation2 + $0x5f8] sm:$0xff]  ;;  %v1360_v4 = vmul.f32 %v6118_v46, %v6072_v6 }
 0x31e   : > { %v1436_v53 = vrot.slane %v6172_v27, %v5991_v63  ;;  %v1734_v6 = vld [vmem:[#allocation2 + $0x478] sm:$0xff] }
 0x31f   : > { %4405 = vmatpush3.bf16.msra.mxu1 %v4404_v3  ;;  %v1762_v3 = vld [vmem:[#allocation2 + $0x558] sm:$0xff] }
 0x320   : > { %4437 = vmatpush3.bf16.msra.mxu0 %v4436_v29  ;;  %4407 = vmatprep.subr.bf16.mxu1 %v4406_v12  ;;  %v1747_v29 = vld [vmem:[#allocation2 + $0x4e0] sm:$0xff]  ;;  %v1748_v12 = vld [vmem:[#allocation2 + $0x4e8] sm:$0xff]  ;;  %v4448_v9 = vpack.c.bf16 %v1762_v3, %v1761_v50  ;;  %v1766_v3 = vld [vmem:[#allocation2 + $0x578] sm:$0xff] }
 0x321   : > { %4439 = vmatprep.subr.bf16.mxu0 %v4438_v11  ;;  %v1408_v11 = vrot.slane %v6172_v27, %v5954_v28  ;;  %v4418_v8 = vpack.c.bf16 %v1748_v12, %v1747_v29  ;;  %v1522_v28 = vrot.slane %v6184_v58, %v5960_v32  ;;  %v1799_v12 = vld [vmem:[#allocation2 + $0x680] sm:$0xff] }
 0x323   : > { %4409 = vmatpush3.bf16.msra.mxu1 %v4408_v22  ;;  %v1355_v22 = vmul.f32 %v6118_v46, %v6037_v24  ;;  %v4420_v24 = vpack.c.bf16 %v1732_v41, %v1731_v17  ;;  %v1783_v41 = vld [vmem:[#allocation2 + $0x600] sm:$0xff] }
 0x324   : > { %4441 = vmatpush3.bf16.msra.mxu0 %v4440_v23  ;;  %4411 = vmatprep.subr.bf16.mxu1 %v4410_v25  ;;  %v4450_v23 = vpack.c.bf16 %v1780_v43, %v1779_v16  ;;  %v1764_v25 = vld [vmem:[#allocation2 + $0x568] sm:$0xff]  ;;  %v1534_v43 = vrot.slane %v6184_v58, %v5969_v51 }
 0x325   : > { %4443 = vmatprep.subr.bf16.mxu0 %v4442_v18  ;;  %v1416_v18 = vrot.slane %v6172_v27, %v5960_v32  ;;  %v1461_v50 = vmul.f32 %v1408_v11, %v1355_v22  ;;  %v1832_v16 = vld [vmem:[#allocation2 + $0x788] sm:$0xff]  ;;  %v1466_v27 = vmul.f32 %v1428_v34, %v1360_v4  ;;  %v1542_v11 = vrot.slane %v6184_v58, %v5991_v63  ;;  %v1785_v34 = vld [vmem:[#allocation2 + $0x610] sm:$0xff] }
 0x326   : > { %v1816_v51 = vld [vmem:[#allocation2 + $0x708] sm:$0xff] }
 0x327   : > { %4413 = vmatpush3.bf16.msra.mxu1 %v4412_v0  ;;  %v1362_v0 = vmul.f32 %v6118_v46, %v6082_v10  ;;  %v1463_v29 = vmul.f32 %v1416_v18, %v1357_v61  ;;  %v1800_v10 = vld [vmem:[#allocation2 + $0x688] sm:$0xff]  ;;  %v1831_v46 = vld [vmem:[#allocation2 + $0x780] sm:$0xff]  ;;  %v6274_v17 = vadd.f32 %v1514_v39, %v1461_v50  ;;  %v1802_v61 = vld [vmem:[#allocation2 + $0x698] sm:$0xff] }
 0x328   : > { %4445 = vmatpush3.bf16.msra.mxu0 %v4444_v48  ;;  %4415 = vmatprep.subr.bf16.mxu1 %v4414_v38  ;;  %v4452_v48 = vpack.c.bf16 %v1764_v25, %v1763_v19  ;;  %v4422_v38 = vpack.c.bf16 %v1750_v26, %v1749_v36  ;;  %v4458_v32 = vpack.c.bf16 %v1800_v10, %v1799_v12  ;;  %v1784_v19 = vld [vmem:[#allocation2 + $0x608] sm:$0xff]  ;;  %v1815_v25 = vld [vmem:[#allocation2 + $0x700] sm:$0xff]  ;;  %v1801_v26 = vld [vmem:[#allocation2 + $0x690] sm:$0xff] }
 0x329   : > { %4447 = vmatprep.subr.bf16.mxu0 %v4446_v1  ;;  %v4454_v1 = vpack.c.bf16 %v1782_v60, %v1781_v31  ;;  %v6276_v22 = vadd.f32 %v1522_v28, %v1463_v29  ;;  %v6278_v36 = vadd.f32 %v1534_v43, %v1466_v27  ;;  %v4460_v63 = vpack.c.bf16 %v1784_v19, %v1783_v41  ;;  %v1833_v18 = vld [vmem:[#allocation2 + $0x790] sm:$0xff]  ;;  %v1834_v31 = vld [vmem:[#allocation2 + $0x798] sm:$0xff]  ;;  %v1835_v50 = vld [vmem:[#allocation2 + $0x7a0] sm:$0xff] }
 0x32a   : > { %v1583_v60 = vmax.f32 %v6274_v17, 0.0  ;;  %v4492_v4 = vpack.c.bf16 %v1816_v51, %v1815_v25  ;;  %v1817_v39 = vld [vmem:[#allocation2 + $0x710] sm:$0xff]  ;;  %v1787_v10 = vld [vmem:[#allocation2 + $0x620] sm:$0xff]  ;;  %v1820_v43 = vld [vmem:[#allocation2 + $0x728] sm:$0xff] }
 0x32b   : > { %4417 = vmatpush3.bf16.msra.mxu1 %v4416_v54  ;;  %v4424_v54 = vpack.c.bf16 %v1734_v6, %v1733_v57  ;;  %v1804_v57 = vld [vmem:[#allocation2 + $0x6a8] sm:$0xff]  ;;  %v1588_v6 = vmax.f32 %v6278_v36, 0.0  ;;  %v1790_v25 = vld [vmem:[#allocation2 + $0x638] sm:$0xff]  ;;  %v1821_v51 = vld [vmem:[#allocation2 + $0x730] sm:$0xff] }
 0x32c   : > { %4449 = vmatpush3.bf16.msra.mxu0 %v4448_v9  ;;  %4419 = vmatprep.subr.bf16.mxu1 %v4418_v8  ;;  %v1468_v9 = vmul.f32 %v1436_v53, %v1362_v0  ;;  %v4456_v8 = vpack.c.bf16 %v1766_v3, %v1765_v2  ;;  %v1585_v0 = vmax.f32 %v6276_v22, 0.0  ;;  %v4462_v53 = vpack.c.bf16 %v1802_v61, %v1801_v26  ;;  %v1822_v61 = vld [vmem:[#allocation2 + $0x738] sm:$0xff]  ;;  %v2640_v22 = vld [vmem:[%s7161_s5 + $0x720] sm:$0xff] }
 0x32d   : > { %4451 = vmatprep.subr.bf16.mxu0 %v4450_v23  ;;  %v4490_v23 = vpack.c.bf16 %v1832_v16, %v1831_v46  ;;  %v4494_v2 = vpack.c.bf16 %v1834_v31, %v1833_v18  ;;  %v1788_v46 = vld [vmem:[#allocation2 + $0x628] sm:$0xff]  ;;  %v1819_v16 = vld [vmem:[#allocation2 + $0x720] sm:$0xff] }
 0x32e   : > { %v6280_v58 = vadd.f32 %v1542_v11, %v1468_v9  ;;  %v1806_v9 = vld [vmem:[#allocation2 + $0x6b8] sm:$0xff]  ;;  %v1837_v11 = vld [vmem:[#allocation2 + $0x7b0] sm:$0xff]  ;;  %v4500_v41 = vpack.c.bf16 %v1820_v43, %v1819_v16  ;;  %v1808_v18 = vld [vmem:[#allocation2 + $0x6c8] sm:$0xff] }
 0x32f   : > { %4421 = vmatpush3.bf16.msra.mxu1 %v4420_v24  ;;  %v1786_v24 = vld [vmem:[#allocation2 + $0x618] sm:$0xff]  ;;  %v1839_v31 = vld [vmem:[#allocation2 + $0x7c0] sm:$0xff]  ;;  %v1793_v16 = vld [vmem:[#allocation2 + $0x650] sm:$0xff] }
 0x330   : > { %4453 = vmatpush3.bf16.msra.mxu0 %v4452_v48  ;;  %4423 = vmatprep.subr.bf16.mxu1 %v4422_v38  ;;  %v1818_v48 = vld [vmem:[#allocation2 + $0x718] sm:$0xff]  ;;  %v1803_v38 = vld [vmem:[#allocation2 + $0x6a0] sm:$0xff]  ;;  %v1590_v3 = vmax.f32 %v6280_v58, 0.0  ;;  %v4464_v29 = vpack.c.bf16 %v1786_v24, %v1785_v34  ;;  %v4504_v24 = vpack.c.bf16 %v1822_v61, %v1821_v51  ;;  %v1825_v43 = vld [vmem:[#allocation2 + $0x750] sm:$0xff] }
 0x331   : > { %4455 = vmatprep.subr.bf16.mxu0 %v4454_v1  ;;  %v1836_v1 = vld [vmem:[#allocation2 + $0x7a8] sm:$0xff]  ;;  %v4496_v28 = vpack.c.bf16 %v1818_v48, %v1817_v39  ;;  %v4466_v12 = vpack.c.bf16 %v1804_v57, %v1803_v38  ;;  %v1823_v38 = vld [vmem:[#allocation2 + $0x740] sm:$0xff]  ;;  %v2658_v58 = vld [vmem:[%s7161_s5 + $0x7b0] sm:$0xff] }
 0x332   : > { %v4498_v27 = vpack.c.bf16 %v1836_v1, %v1835_v50  ;;  %v1792_v48 = vld [vmem:[#allocation2 + $0x648] sm:$0xff]  ;;  %v1809_v50 = vld [vmem:[#allocation2 + $0x6d0] sm:$0xff]  ;;  %v1810_v1 = vld [vmem:[#allocation2 + $0x6d8] sm:$0xff] }
 0x333   : > { %4425 = vmatpush3.bf16.msra.mxu1 %v4424_v54  ;;  %v1805_v54 = vld [vmem:[#allocation2 + $0x6b0] sm:$0xff]  ;;  %v1795_v51 = vld [vmem:[#allocation2 + $0x660] sm:$0xff] }
 0x334   : > { %4457 = vmatpush3.bf16.msra.mxu0 %v4456_v8  ;;  %4459 = vmatprep.subr.bf16.mxu1 %v4458_v32  ;;  %v1838_v8 = vld [vmem:[#allocation2 + $0x7b8] sm:$0xff]  ;;  %v4468_v32 = vpack.c.bf16 %v1788_v46, %v1787_v10  ;;  %v4470_v19 = vpack.c.bf16 %v1806_v9, %v1805_v54  ;;  %v4478_v46 = vpack.c.bf16 %v1810_v1, %v1809_v50  ;;  %v1827_v61 = vld [vmem:[#allocation2 + $0x760] sm:$0xff] }
 0x335   : > { %4491 = vmatprep.subr.bf16.mxu0 %v4490_v23  ;;  %v1789_v23 = vld [vmem:[#allocation2 + $0x630] sm:$0xff]  ;;  %v4502_v26 = vpack.c.bf16 %v1838_v8, %v1837_v11  ;;  %v1826_v9 = vld [vmem:[#allocation2 + $0x758] sm:$0xff]  ;;  %v1811_v11 = vld [vmem:[#allocation2 + $0x6e0] sm:$0xff] }
 0x336   : > { %2197 = vmatmul.mubr.f32.vlgmr.msra.gmra.mrb[12].mxu1 %v1583_v60  ;;  %v4472_v34 = vpack.c.bf16 %v1790_v25, %v1789_v23  ;;  %v1812_v8 = vld [vmem:[#allocation2 + $0x6e8] sm:$0xff]  ;;  %v4512_v23 = vpack.c.bf16 %v1826_v9, %v1825_v43  ;;  %v1830_v1 = vld [vmem:[#allocation2 + $0x778] sm:$0xff]  ;;  %v2412_v43 = vld [vmem:[%s7161_s5] sm:$0xff] }
 0x337   : > { %2267 = vmatmul.mubr.f32.vlgmr.msra.gmra.mrb[14].mxu0 %v1585_v0  ;;  %4461 = vmatpush3.bf16.msra.mxu1 %v4460_v63  ;;  %v1807_v63 = vld [vmem:[#allocation2 + $0x6c0] sm:$0xff]  ;;  %v4482_v25 = vpack.c.bf16 %v1812_v8, %v1811_v11  ;;  %v2445_v8 = vld [vmem:[%s7161_s5 + $0x108] sm:$0xff] }
 0x338   : > { %2336 = vmatprep.mubr.f32.mxu1 %v1588_v6  ;;  %4493 = vmatpush3.bf16.msra.mxu0 %v4492_v4  ;;  %v1840_v4 = vld [vmem:[#allocation2 + $0x7c8] sm:$0xff]  ;;  %v4474_v39 = vpack.c.bf16 %v1808_v18, %v1807_v63  ;;  %v2444_v11 = vld [vmem:[%s7161_s5 + $0x100] sm:$0xff] }
 0x339   : > { %2406 = vmatprep.mubr.f32.mxu0 %v1590_v3  ;;  %4463 = vmatprep.subr.bf16.mxu1 %v4462_v53  ;;  %v1791_v53 = vld [vmem:[#allocation2 + $0x640] sm:$0xff]  ;;  %v4506_v57 = vpack.c.bf16 %v1840_v4, %v1839_v31  ;;  %v1828_v18 = vld [vmem:[#allocation2 + $0x768] sm:$0xff]  ;;  %v1813_v31 = vld [vmem:[#allocation2 + $0x6f0] sm:$0xff] }
 0x33a   : > { %4495 = vmatprep.subr.bf16.mxu0 %v4494_v2  ;;  %v1824_v2 = vld [vmem:[#allocation2 + $0x748] sm:$0xff]  ;;  %v1814_v4 = vld [vmem:[#allocation2 + $0x6f8] sm:$0xff] }
 0x33b   : > { %4465 = vmatpush3.bf16.msra.mxu1 %v4464_v29  ;;  %v1841_v29 = vld [vmem:[#allocation2 + $0x7d0] sm:$0xff]  ;;  %v4508_v10 = vpack.c.bf16 %v1824_v2, %v1823_v38 }
 0x33c   : > { %4497 = vmatpush3.bf16.msra.mxu0 %v4496_v28  ;;  %4467 = vmatprep.subr.bf16.mxu1 %v4466_v12  ;;  %v1842_v28 = vld [vmem:[#allocation2 + $0x7d8] sm:$0xff]  ;;  %v4476_v12 = vpack.c.bf16 %v1792_v48, %v1791_v53  ;;  %v4516_v53 = vpack.c.bf16 %v1828_v18, %v1827_v61  ;;  %v4486_v48 = vpack.c.bf16 %v1814_v4, %v1813_v31  ;;  %v1797_v38 = vld [vmem:[#allocation2 + $0x670] sm:$0xff]  ;;  %v1589_v31 = vmax.f32 %v6204_v62, 0.0 }
 0x33d   : > { %4499 = vmatprep.subr.bf16.mxu0 %v4498_v27  ;;  %v1794_v27 = vld [vmem:[#allocation2 + $0x658] sm:$0xff]  ;;  %v4510_v54 = vpack.c.bf16 %v1842_v28, %v1841_v29  ;;  %v1829_v2 = vld [vmem:[#allocation2 + $0x770] sm:$0xff]  ;;  %v2428_v29 = vld [vmem:[%s7161_s5 + $0x80] sm:$0xff] }
 0x33e   : > { %v2429_v28 = vld [vmem:[%s7161_s5 + $0x88] sm:$0xff]  ;;  %v2414_v61 = vld [vmem:[%s7161_s5 + $0x10] sm:$0xff] }
 0x33f   : > { %4469 = vmatpush3.bf16.msra.mxu1 %v4468_v32  ;;  %v1843_v32 = vld [vmem:[#allocation2 + $0x7e0] sm:$0xff]  ;;  %v2446_v18 = vld [vmem:[%s7161_s5 + $0x110] sm:$0xff] }
 0x340   : > { %4501 = vmatpush3.bf16.msra.mxu0 %v4500_v41  ;;  %4471 = vmatprep.subr.bf16.mxu1 %v4470_v19  ;;  %v1844_v41 = vld [vmem:[#allocation2 + $0x7e8] sm:$0xff]  ;;  %v4480_v19 = vpack.c.bf16 %v1794_v27, %v1793_v16  ;;  %v4520_v16 = vpack.c.bf16 %v1830_v1, %v1829_v2  ;;  %v4522_v27 = vpack.c.bf16 %v2429_v28, %v2428_v29  ;;  %v2416_v1 = vld [vmem:[%s7161_s5 + $0x20] sm:$0xff] }
 0x341   : > { %4503 = vmatprep.subr.bf16.mxu0 %v4502_v26  ;;  %v1796_v26 = vld [vmem:[#allocation2 + $0x668] sm:$0xff]  ;;  %v4514_v63 = vpack.c.bf16 %v1844_v41, %v1843_v32  ;;  %v2430_v32 = vld [vmem:[%s7161_s5 + $0x90] sm:$0xff]  ;;  %v2431_v41 = vld [vmem:[%s7161_s5 + $0x98] sm:$0xff] }
 0x342   : > { %v4526_v4 = vpack.c.bf16 %v2431_v41, %v2430_v32  ;;  %v2417_v29 = vld [vmem:[%s7161_s5 + $0x28] sm:$0xff]  ;;  %v2448_v28 = vld [vmem:[%s7161_s5 + $0x120] sm:$0xff] }
 0x343   : > { %4473 = vmatpush3.bf16.msra.mxu1 %v4472_v34  ;;  %v1845_v34 = vld [vmem:[#allocation2 + $0x7f0] sm:$0xff]  ;;  %v2436_v32 = vld [vmem:[%s7161_s5 + $0xc0] sm:$0xff]  ;;  %v2437_v41 = vld [vmem:[%s7161_s5 + $0xc8] sm:$0xff] }
 0x344   : > { %4505 = vmatpush3.bf16.msra.mxu0 %v4504_v24  ;;  %4475 = vmatprep.subr.bf16.mxu1 %v4474_v39  ;;  %v1846_v24 = vld [vmem:[#allocation2 + $0x7f8] sm:$0xff]  ;;  %v4484_v39 = vpack.c.bf16 %v1796_v26, %v1795_v51  ;;  %v1587_v51 = vmax.f32 %v6202_v59, 0.0  ;;  %v4556_v26 = vpack.c.bf16 %v2445_v8, %v2444_v11 }
 0x345   : > { %4507 = vmatprep.subr.bf16.mxu0 %v4506_v57  ;;  %v1798_v57 = vld [vmem:[#allocation2 + $0x678] sm:$0xff]  ;;  %v4518_v50 = vpack.c.bf16 %v1846_v24, %v1845_v34  ;;  %v2432_v24 = vld [vmem:[%s7161_s5 + $0xa0] sm:$0xff] }
 0x346   : > { %v2447_v34 = vld [vmem:[%s7161_s5 + $0x118] sm:$0xff] }
 0x347   : > { %4477 = vmatpush3.bf16.msra.mxu1 %v4476_v12  ;;  %v2460_v12 = vld [vmem:[%s7161_s5 + $0x180] sm:$0xff]  ;;  %v4560_v2 = vpack.c.bf16 %v2447_v34, %v2446_v18  ;;  %v2451_v8 = vld [vmem:[%s7161_s5 + $0x138] sm:$0xff]  ;;  %v2421_v18 = vld [vmem:[%s7161_s5 + $0x48] sm:$0xff] }
 0x348   : > { %4509 = vmatpush3.bf16.msra.mxu0 %v4508_v10  ;;  %4479 = vmatprep.subr.bf16.mxu1 %v4478_v46  ;;  %v2461_v10 = vld [vmem:[%s7161_s5 + $0x188] sm:$0xff]  ;;  %v4488_v46 = vpack.c.bf16 %v1798_v57, %v1797_v38 }
 0x349   : > { %4511 = vmatprep.subr.bf16.mxu0 %v4510_v54  ;;  %v2413_v54 = vld [vmem:[%s7161_s5 + $0x8] sm:$0xff]  ;;  %v4554_v9 = vpack.c.bf16 %v2461_v10, %v2460_v12  ;;  %v2434_v12 = vld [vmem:[%s7161_s5 + $0xb0] sm:$0xff]  ;;  %v2435_v10 = vld [vmem:[%s7161_s5 + $0xb8] sm:$0xff] }
 0x34a   : > { %v2465_v38 = vld [vmem:[%s7161_s5 + $0x1a8] sm:$0xff] }
 0x34b   : > { %4481 = vmatpush3.bf16.msra.mxu1 %v4480_v19  ;;  %v4524_v19 = vpack.c.bf16 %v2413_v54, %v2412_v43  ;;  %v2418_v43 = vld [vmem:[%s7161_s5 + $0x30] sm:$0xff]  ;;  %v2419_v54 = vld [vmem:[%s7161_s5 + $0x38] sm:$0xff] }
 0x34c   : > { %4513 = vmatpush3.bf16.msra.mxu0 %v4512_v23  ;;  %4483 = vmatprep.subr.bf16.mxu1 %v4482_v25  ;;  %v2462_v23 = vld [vmem:[%s7161_s5 + $0x190] sm:$0xff]  ;;  %v2463_v25 = vld [vmem:[%s7161_s5 + $0x198] sm:$0xff] }
 0x34d   : > { %4515 = vmatprep.subr.bf16.mxu0 %v4514_v63  ;;  %v2415_v63 = vld [vmem:[%s7161_s5 + $0x18] sm:$0xff] }
 0x34e   : > { %v4528_v57 = vpack.c.bf16 %v2415_v63, %v2414_v61  ;;  %v4538_v61 = vpack.c.bf16 %v2437_v41, %v2436_v32  ;;  %v2420_v63 = vld [vmem:[%s7161_s5 + $0x40] sm:$0xff]  ;;  %v2442_v32 = vld [vmem:[%s7161_s5 + $0xf0] sm:$0xff]  ;;  %v2443_v41 = vld [vmem:[%s7161_s5 + $0xf8] sm:$0xff] }
 0x34f   : > { %4485 = vmatpush3.bf16.msra.mxu1 %v4484_v39  ;;  %v2433_v39 = vld [vmem:[%s7161_s5 + $0xa8] sm:$0xff] }
 0x350   : > { %4517 = vmatpush3.bf16.msra.mxu0 %v4516_v53  ;;  %4487 = vmatprep.subr.bf16.mxu1 %v4486_v48  ;;  %v4558_v53 = vpack.c.bf16 %v2463_v25, %v2462_v23  ;;  %v2464_v48 = vld [vmem:[%s7161_s5 + $0x1a0] sm:$0xff]  ;;  %v2469_v23 = vld [vmem:[%s7161_s5 + $0x1c8] sm:$0xff]  ;;  %v4536_v25 = vpack.c.bf16 %v2419_v54, %v2418_v43 }
 0x351   : > { %4519 = vmatprep.subr.bf16.mxu0 %v4518_v50  ;;  %v4530_v50 = vpack.c.bf16 %v2433_v39, %v2432_v24  ;;  %v4562_v42 = vpack.c.bf16 %v2465_v38, %v2464_v48  ;;  %v2453_v24 = vld [vmem:[%s7161_s5 + $0x148] sm:$0xff]  ;;  %v2438_v39 = vld [vmem:[%s7161_s5 + $0xd0] sm:$0xff]  ;;  %v2471_v38 = vld [vmem:[%s7161_s5 + $0x1d8] sm:$0xff] }
 0x352   : > { %v2470_v48 = vld [vmem:[%s7161_s5 + $0x1d0] sm:$0xff]  ;;  %v2424_v43 = vld [vmem:[%s7161_s5 + $0x60] sm:$0xff]  ;;  %v2425_v54 = vld [vmem:[%s7161_s5 + $0x68] sm:$0xff] }
 0x353   : > { %4489 = vmatpush3.bf16.msra.mxu1 %v4488_v46  ;;  %v4532_v46 = vpack.c.bf16 %v2417_v29, %v2416_v1  ;;  %v2422_v1 = vld [vmem:[%s7161_s5 + $0x50] sm:$0xff]  ;;  %v2423_v29 = vld [vmem:[%s7161_s5 + $0x58] sm:$0xff] }
 0x354   : > { %4521 = vmatpush3.bf16.msra.mxu0 %v4520_v16  ;;  %4523 = vmatprep.subr.bf16.mxu1 %v4522_v27  ;;  %v4534_v27 = vpack.c.bf16 %v2435_v10, %v2434_v12  ;;  %v2440_v12 = vld [vmem:[%s7161_s5 + $0xe0] sm:$0xff]  ;;  %v2441_v10 = vld [vmem:[%s7161_s5 + $0xe8] sm:$0xff] }
 0x355   : > { %4555 = vmatprep.subr.bf16.mxu0 %v4554_v9  ;;  %v2450_v9 = vld [vmem:[%s7161_s5 + $0x130] sm:$0xff] }
 0x356   : > { %2337 = vmatmul.mubr.f32.vlgmr.msra.gmra.mrb[14].mxu1 %v1587_v51 }
 0x357   : > { %2407 = vmatmul.mubr.f32.vlgmr.msra.gmra.mrb[16].mxu0 %v1589_v31  ;;  %4525 = vmatpush3.bf16.msra.mxu1 %v4524_v19  ;;  %v2468_v19 = vld [vmem:[%s7161_s5 + $0x1c0] sm:$0xff] }
 0x358   : > { %2732 = vmatprep.mubr.f32.mxu1 %v1576_v56  ;;  %4557 = vmatpush3.bf16.msra.mxu0 %v4556_v26  ;;  %v2449_v56 = vld [vmem:[%s7161_s5 + $0x128] sm:$0xff]  ;;  %v4568_v26 = vpack.c.bf16 %v2451_v8, %v2450_v9  ;;  %v4570_v34 = vpack.c.bf16 %v2469_v23, %v2468_v19  ;;  %v2456_v9 = vld [vmem:[%s7161_s5 + $0x160] sm:$0xff]  ;;  %v2474_v19 = vld [vmem:[%s7161_s5 + $0x1f0] sm:$0xff] }
 0x359   : > { %2802 = vmatprep.mubr.f32.mxu0 %v1578_v13  ;;  %4527 = vmatprep.subr.bf16.mxu1 %v4526_v4  ;;  %v2467_v13 = vld [vmem:[%s7161_s5 + $0x1b8] sm:$0xff]  ;;  %v4564_v16 = vpack.c.bf16 %v2449_v56, %v2448_v28  ;;  %v2452_v4 = vld [vmem:[%s7161_s5 + $0x140] sm:$0xff]  ;;  %v2454_v28 = vld [vmem:[%s7161_s5 + $0x150] sm:$0xff] }
 0x35a   : > { %4559 = vmatprep.subr.bf16.mxu0 %v4558_v53  ;;  %v4566_v11 = vpack.c.bf16 %v2467_v13, %v2466_v5  ;;  %v2439_v53 = vld [vmem:[%s7161_s5 + $0xd8] sm:$0xff]  ;;  %v2472_v5 = vld [vmem:[%s7161_s5 + $0x1e0] sm:$0xff]  ;;  %v2473_v13 = vld [vmem:[%s7161_s5 + $0x1e8] sm:$0xff] }
 0x35b   : > { %4529 = vmatpush3.bf16.msra.mxu1 %v4528_v57  ;;  %v4540_v57 = vpack.c.bf16 %v2421_v18, %v2420_v63  ;;  %v2455_v56 = vld [vmem:[%s7161_s5 + $0x158] sm:$0xff]  ;;  %v2457_v8 = vld [vmem:[%s7161_s5 + $0x168] sm:$0xff]  ;;  %v2426_v63 = vld [vmem:[%s7161_s5 + $0x70] sm:$0xff] }
 0x35c   : > { %4561 = vmatpush3.bf16.msra.mxu0 %v4560_v2  ;;  %4531 = vmatprep.subr.bf16.mxu1 %v4530_v50  ;;  %v4572_v2 = vpack.c.bf16 %v2453_v24, %v2452_v4  ;;  %v4542_v50 = vpack.c.bf16 %v2439_v53, %v2438_v39  ;;  %v2475_v23 = vld [vmem:[%s7161_s5 + $0x1f8] sm:$0xff]  ;;  %v2458_v4 = vld [vmem:[%s7161_s5 + $0x170] sm:$0xff]  ;;  %v2492_v39 = vld [vmem:[%s7161_s5 + $0x280] sm:$0xff] }
 0x35d   : > { %4563 = vmatprep.subr.bf16.mxu0 %v4562_v42  ;;  %v4574_v42 = vpack.c.bf16 %v2471_v38, %v2470_v48  ;;  %v2427_v18 = vld [vmem:[%s7161_s5 + $0x78] sm:$0xff]  ;;  %v2493_v53 = vld [vmem:[%s7161_s5 + $0x288] sm:$0xff]  ;;  %v2524_v48 = vld [vmem:[%s7161_s5 + $0x380] sm:$0xff] }
 0x35e   : > { %v2459_v24 = vld [vmem:[%s7161_s5 + $0x178] sm:$0xff]  ;;  %v2525_v38 = vld [vmem:[%s7161_s5 + $0x388] sm:$0xff] }
 0x35f   : > { %4533 = vmatpush3.bf16.msra.mxu1 %v4532_v46  ;;  %v4544_v46 = vpack.c.bf16 %v2423_v29, %v2422_v1  ;;  %v2476_v1 = vld [vmem:[%s7161_s5 + $0x200] sm:$0xff]  ;;  %v2477_v29 = vld [vmem:[%s7161_s5 + $0x208] sm:$0xff] }
 0x360   : > { %4565 = vmatpush3.bf16.msra.mxu0 %v4564_v16  ;;  %4535 = vmatprep.subr.bf16.mxu1 %v4534_v27  ;;  %v4576_v16 = vpack.c.bf16 %v2455_v56, %v2454_v28  ;;  %v4546_v27 = vpack.c.bf16 %v2441_v10, %v2440_v12  ;;  %v4618_v28 = vpack.c.bf16 %v2525_v38, %v2524_v48  ;;  %v2509_v56 = vld [vmem:[%s7161_s5 + $0x308] sm:$0xff]  ;;  %v2494_v12 = vld [vmem:[%s7161_s5 + $0x290] sm:$0xff]  ;;  %v2495_v10 = vld [vmem:[%s7161_s5 + $0x298] sm:$0xff] }
 0x361   : > { %4567 = vmatprep.subr.bf16.mxu0 %v4566_v11  ;;  %v4578_v11 = vpack.c.bf16 %v2473_v13, %v2472_v5  ;;  %v4588_v5 = vpack.c.bf16 %v2477_v29, %v2476_v1  ;;  %v2526_v13 = vld [vmem:[%s7161_s5 + $0x390] sm:$0xff]  ;;  %v2515_v38 = vld [vmem:[%s7161_s5 + $0x338] sm:$0xff]  ;;  %v2533_v1 = vld [vmem:[%s7161_s5 + $0x3c8] sm:$0xff] }
 0x363   : > { %4537 = vmatpush3.bf16.msra.mxu1 %v4536_v25  ;;  %v4548_v25 = vpack.c.bf16 %v2425_v54, %v2424_v43  ;;  %v2479_v43 = vld [vmem:[%s7161_s5 + $0x218] sm:$0xff]  ;;  %v2510_v54 = vld [vmem:[%s7161_s5 + $0x310] sm:$0xff] }
 0x364   : > { %4569 = vmatpush3.bf16.msra.mxu0 %v4568_v26  ;;  %4539 = vmatprep.subr.bf16.mxu1 %v4538_v61  ;;  %v4580_v26 = vpack.c.bf16 %v2457_v8, %v2456_v9  ;;  %v4550_v61 = vpack.c.bf16 %v2443_v41, %v2442_v32  ;;  %v4590_v9 = vpack.c.bf16 %v2495_v10, %v2494_v12  ;;  %v2496_v8 = vld [vmem:[%s7161_s5 + $0x2a0] sm:$0xff]  ;;  %v2497_v32 = vld [vmem:[%s7161_s5 + $0x2a8] sm:$0xff] }
 0x365   : > { %4571 = vmatprep.subr.bf16.mxu0 %v4570_v34  ;;  %v4582_v34 = vpack.c.bf16 %v2475_v23, %v2474_v19  ;;  %v2528_v19 = vld [vmem:[%s7161_s5 + $0x3a0] sm:$0xff]  ;;  %v2529_v23 = vld [vmem:[%s7161_s5 + $0x3a8] sm:$0xff] }
 0x366   : > { %v4626_v40 = vpack.c.bf16 %v2529_v23, %v2528_v19  ;;  %v2485_v12 = vld [vmem:[%s7161_s5 + $0x248] sm:$0xff]  ;;  %v2516_v10 = vld [vmem:[%s7161_s5 + $0x340] sm:$0xff]  ;;  %v2519_v23 = vld [vmem:[%s7161_s5 + $0x358] sm:$0xff] }
 0x367   : > { %4541 = vmatpush3.bf16.msra.mxu1 %v4540_v57  ;;  %v4552_v57 = vpack.c.bf16 %v2427_v18, %v2426_v63  ;;  %v2499_v63 = vld [vmem:[%s7161_s5 + $0x2b8] sm:$0xff] }
 0x368   : > { %4573 = vmatpush3.bf16.msra.mxu0 %v4572_v2  ;;  %4543 = vmatprep.subr.bf16.mxu1 %v4542_v50  ;;  %v4584_v2 = vpack.c.bf16 %v2459_v24, %v2458_v4  ;;  %v4586_v50 = vpack.c.bf16 %v2493_v53, %v2492_v39  ;;  %v2482_v24 = vld [vmem:[%s7161_s5 + $0x230] sm:$0xff]  ;;  %v2483_v39 = vld [vmem:[%s7161_s5 + $0x238] sm:$0xff] }
 0x369   : > { %4575 = vmatprep.subr.bf16.mxu0 %v4574_v42  ;;  %v2508_v42 = vld [vmem:[%s7161_s5 + $0x300] sm:$0xff]  ;;  %v2514_v53 = vld [vmem:[%s7161_s5 + $0x330] sm:$0xff]  ;;  %v4600_v29 = vpack.c.bf16 %v2483_v39, %v2482_v24  ;;  %v2539_v24 = vld [vmem:[%s7161_s5 + $0x3f8] sm:$0xff] }
 0x36b   : > { %4545 = vmatpush3.bf16.msra.mxu1 %v4544_v46  ;;  %v2527_v46 = vld [vmem:[%s7161_s5 + $0x398] sm:$0xff] }
 0x36c   : > { %4577 = vmatpush3.bf16.msra.mxu0 %v4576_v16  ;;  %4547 = vmatprep.subr.bf16.mxu1 %v4546_v27  ;;  %v4620_v16 = vpack.c.bf16 %v2509_v56, %v2508_v42  ;;  %v2478_v27 = vld [vmem:[%s7161_s5 + $0x210] sm:$0xff]  ;;  %v4622_v41 = vpack.c.bf16 %v2527_v46, %v2526_v13  ;;  %v2484_v56 = vld [vmem:[%s7161_s5 + $0x240] sm:$0xff]  ;;  %v2517_v13 = vld [vmem:[%s7161_s5 + $0x348] sm:$0xff] }
 0x36d   : > { %4579 = vmatprep.subr.bf16.mxu0 %v4578_v11  ;;  %v2511_v11 = vld [vmem:[%s7161_s5 + $0x318] sm:$0xff]  ;;  %v2502_v46 = vld [vmem:[%s7161_s5 + $0x2d0] sm:$0xff] }
 0x36e   : > { %v4624_v47 = vpack.c.bf16 %v2511_v11, %v2510_v54  ;;  %v4604_v54 = vpack.c.bf16 %v2485_v12, %v2484_v56  ;;  %v2589_v56 = vld [vmem:[%s7161_s5 + $0x588] sm:$0xff] }
 0x36f   : > { %4549 = vmatpush3.bf16.msra.mxu1 %v4548_v25  ;;  %v4592_v25 = vpack.c.bf16 %v2479_v43, %v2478_v27  ;;  %v2534_v27 = vld [vmem:[%s7161_s5 + $0x3d0] sm:$0xff]  ;;  %v2535_v43 = vld [vmem:[%s7161_s5 + $0x3d8] sm:$0xff] }
 0x370   : > { %4581 = vmatpush3.bf16.msra.mxu0 %v4580_v26  ;;  %4551 = vmatprep.subr.bf16.mxu1 %v4550_v61  ;;  %v2480_v26 = vld [vmem:[%s7161_s5 + $0x220] sm:$0xff]  ;;  %v2481_v61 = vld [vmem:[%s7161_s5 + $0x228] sm:$0xff]  ;;  %v4638_v19 = vpack.c.bf16 %v2535_v43, %v2534_v27 }
 0x371   : > { %4583 = vmatprep.subr.bf16.mxu0 %v4582_v34  ;;  %v4596_v18 = vpack.c.bf16 %v2481_v61, %v2480_v26  ;;  %v2537_v26 = vld [vmem:[%s7161_s5 + $0x3e8] sm:$0xff]  ;;  %v2572_v27 = vld [vmem:[%s7161_s5 + $0x500] sm:$0xff] }
 0x372   : > { %v2573_v43 = vld [vmem:[%s7161_s5 + $0x508] sm:$0xff] }
 0x373   : > { %4553 = vmatpush3.bf16.msra.mxu1 %v4552_v57  ;;  %v2500_v57 = vld [vmem:[%s7161_s5 + $0x2c0] sm:$0xff] }
 0x374   : > { %4585 = vmatpush3.bf16.msra.mxu0 %v4584_v2  ;;  %4587 = vmatprep.subr.bf16.mxu1 %v4586_v50  ;;  %v2501_v2 = vld [vmem:[%s7161_s5 + $0x2c8] sm:$0xff]  ;;  %v2532_v50 = vld [vmem:[%s7161_s5 + $0x3c0] sm:$0xff] }
 0x375   : > { %4619 = vmatprep.subr.bf16.mxu0 %v4618_v28  ;;  %v4632_v28 = vpack.c.bf16 %v2515_v38, %v2514_v53  ;;  %v4602_v42 = vpack.c.bf16 %v2501_v2, %v2500_v57  ;;  %v2490_v38 = vld [vmem:[%s7161_s5 + $0x270] sm:$0xff]  ;;  %v2491_v57 = vld [vmem:[%s7161_s5 + $0x278] sm:$0xff] }
 0x376   : > { %2733 = vmatmul.mubr.f32.vlgmr.msra.gmra.mrb[16].mxu1 %v1575_v52  ;;  %v4594_v52 = vpack.c.bf16 %v2497_v32, %v2496_v8  ;;  %v2486_v8 = vld [vmem:[%s7161_s5 + $0x250] sm:$0xff]  ;;  %v2487_v32 = vld [vmem:[%s7161_s5 + $0x258] sm:$0xff]  ;;  %v4616_v12 = vpack.c.bf16 %v2491_v57, %v2490_v38  ;;  %v2564_v57 = vld [vmem:[%s7161_s5 + $0x4c0] sm:$0xff] }
 0x377   : > { %2803 = vmatmul.mubr.f32.vlgmr.msra.gmra.mrb[18].mxu0 %v1577_v21  ;;  %4589 = vmatpush3.bf16.msra.mxu1 %v4588_v5  ;;  %v2513_v21 = vld [vmem:[%s7161_s5 + $0x328] sm:$0xff]  ;;  %v4634_v5 = vpack.c.bf16 %v2533_v1, %v2532_v50  ;;  %v4608_v61 = vpack.c.bf16 %v2487_v32, %v2486_v8  ;;  %v2522_v2 = vld [vmem:[%s7161_s5 + $0x370] sm:$0xff]  ;;  %v2523_v1 = vld [vmem:[%s7161_s5 + $0x378] sm:$0xff] }
 0x378   : > { %2872 = vmatprep.mubr.f32.mxu1 %v1580_v37  ;;  %4621 = vmatpush3.bf16.msra.mxu0 %v4620_v16  ;;  %v2498_v37 = vld [vmem:[%s7161_s5 + $0x2b0] sm:$0xff]  ;;  %v4628_v4 = vpack.c.bf16 %v2513_v21, %v2512_v7  ;;  %v2503_v16 = vld [vmem:[%s7161_s5 + $0x2d8] sm:$0xff]  ;;  %v2488_v21 = vld [vmem:[%s7161_s5 + $0x260] sm:$0xff] }
 0x379   : > { %2942 = vmatprep.mubr.f32.mxu0 %v1582_v49  ;;  %4591 = vmatprep.subr.bf16.mxu1 %v4590_v9  ;;  %v2531_v49 = vld [vmem:[%s7161_s5 + $0x3b8] sm:$0xff]  ;;  %v4598_v34 = vpack.c.bf16 %v2499_v63, %v2498_v37  ;;  %v4636_v9 = vpack.c.bf16 %v2517_v13, %v2516_v10  ;;  %v4606_v11 = vpack.c.bf16 %v2503_v16, %v2502_v46  ;;  %v2489_v37 = vld [vmem:[%s7161_s5 + $0x268] sm:$0xff]  ;;  %v2520_v63 = vld [vmem:[%s7161_s5 + $0x360] sm:$0xff] }
 0x37a   : > { %4623 = vmatprep.subr.bf16.mxu0 %v4622_v41  ;;  %v4630_v48 = vpack.c.bf16 %v2531_v49, %v2530_v14  ;;  %v2518_v41 = vld [vmem:[%s7161_s5 + $0x350] sm:$0xff]  ;;  %v2521_v49 = vld [vmem:[%s7161_s5 + $0x368] sm:$0xff]  ;;  %v4612_v39 = vpack.c.bf16 %v2489_v37, %v2488_v21  ;;  %v4648_v10 = vpack.c.bf16 %v2523_v1, %v2522_v2  ;;  %v2540_v13 = vld [vmem:[%s7161_s5 + $0x400] sm:$0xff] }
 0x37b   : > { %4593 = vmatpush3.bf16.msra.mxu1 %v4592_v25  ;;  %v2504_v25 = vld [vmem:[%s7161_s5 + $0x2e0] sm:$0xff]  ;;  %v4640_v7 = vpack.c.bf16 %v2519_v23, %v2518_v41  ;;  %v4644_v53 = vpack.c.bf16 %v2521_v49, %v2520_v63  ;;  %v2541_v46 = vld [vmem:[%s7161_s5 + $0x408] sm:$0xff]  ;;  %v2590_v8 = vld [vmem:[%s7161_s5 + $0x590] sm:$0xff]  ;;  %v4684_v41 = vpack.c.bf16 %v2573_v43, %v2572_v27 }
 0x37c   : > { %4625 = vmatpush3.bf16.msra.mxu0 %v4624_v47  ;;  %4595 = vmatprep.subr.bf16.mxu1 %v4594_v52  ;;  %v2505_v47 = vld [vmem:[%s7161_s5 + $0x2e8] sm:$0xff]  ;;  %v2536_v52 = vld [vmem:[%s7161_s5 + $0x3e0] sm:$0xff]  ;;  %v2591_v32 = vld [vmem:[%s7161_s5 + $0x598] sm:$0xff] }
 0x37d   : > { %4627 = vmatprep.subr.bf16.mxu0 %v4626_v40  ;;  %v4610_v40 = vpack.c.bf16 %v2505_v47, %v2504_v25  ;;  %v4642_v14 = vpack.c.bf16 %v2537_v26, %v2536_v52  ;;  %v2543_v23 = vld [vmem:[%s7161_s5 + $0x418] sm:$0xff]  ;;  %v2574_v25 = vld [vmem:[%s7161_s5 + $0x510] sm:$0xff]  ;;  %v2560_v26 = vld [vmem:[%s7161_s5 + $0x4a0] sm:$0xff] }
 0x37e   : > { %v2575_v52 = vld [vmem:[%s7161_s5 + $0x518] sm:$0xff]  ;;  %v2593_v21 = vld [vmem:[%s7161_s5 + $0x5a8] sm:$0xff]  ;;  %v2544_v63 = vld [vmem:[%s7161_s5 + $0x420] sm:$0xff] }
 0x37f   : > { %4597 = vmatpush3.bf16.msra.mxu1 %v4596_v18  ;;  %v2506_v18 = vld [vmem:[%s7161_s5 + $0x2f0] sm:$0xff]  ;;  %v4688_v45 = vpack.c.bf16 %v2575_v52, %v2574_v25  ;;  %v2563_v49 = vld [vmem:[%s7161_s5 + $0x4b8] sm:$0xff]  ;;  %v2565_v2 = vld [vmem:[%s7161_s5 + $0x4c8] sm:$0xff] }
 0x380   : > { %4629 = vmatpush3.bf16.msra.mxu0 %v4628_v4  ;;  %4599 = vmatprep.subr.bf16.mxu1 %v4598_v34  ;;  %v2507_v4 = vld [vmem:[%s7161_s5 + $0x2f8] sm:$0xff]  ;;  %v2538_v34 = vld [vmem:[%s7161_s5 + $0x3f0] sm:$0xff]  ;;  %v2597_v1 = vld [vmem:[%s7161_s5 + $0x5c8] sm:$0xff] }
 0x381   : > { %4631 = vmatprep.subr.bf16.mxu0 %v4630_v48  ;;  %v4614_v48 = vpack.c.bf16 %v2507_v4, %v2506_v18  ;;  %v4646_v50 = vpack.c.bf16 %v2539_v24, %v2538_v34  ;;  %v2546_v24 = vld [vmem:[%s7161_s5 + $0x430] sm:$0xff]  ;;  %v2579_v38 = vld [vmem:[%s7161_s5 + $0x538] sm:$0xff]  ;;  %v2568_v25 = vld [vmem:[%s7161_s5 + $0x4e0] sm:$0xff] }
 0x382   : > { %v2598_v27 = vld [vmem:[%s7161_s5 + $0x5d0] sm:$0xff]  ;;  %v2599_v43 = vld [vmem:[%s7161_s5 + $0x5d8] sm:$0xff]  ;;  %v2600_v52 = vld [vmem:[%s7161_s5 + $0x5e0] sm:$0xff] }
 0x383   : > { %4601 = vmatpush3.bf16.msra.mxu1 %v4600_v29  ;;  %v2556_v29 = vld [vmem:[%s7161_s5 + $0x480] sm:$0xff] }
 0x384   : > { %4633 = vmatpush3.bf16.msra.mxu0 %v4632_v28  ;;  %4603 = vmatprep.subr.bf16.mxu1 %v4602_v42  ;;  %v2557_v28 = vld [vmem:[%s7161_s5 + $0x488] sm:$0xff]  ;;  %v2588_v42 = vld [vmem:[%s7161_s5 + $0x580] sm:$0xff] }
 0x385   : > { %4635 = vmatprep.subr.bf16.mxu0 %v4634_v5  ;;  %v4650_v5 = vpack.c.bf16 %v2557_v28, %v2556_v29  ;;  %v4682_v16 = vpack.c.bf16 %v2589_v56, %v2588_v42  ;;  %v4666_v42 = vpack.c.bf16 %v2565_v2, %v2564_v57  ;;  %v2548_v56 = vld [vmem:[%s7161_s5 + $0x440] sm:$0xff] }
 0x387   : > { %4605 = vmatpush3.bf16.msra.mxu1 %v4604_v54  ;;  %v2558_v54 = vld [vmem:[%s7161_s5 + $0x490] sm:$0xff] }
 0x388   : > { %4637 = vmatpush3.bf16.msra.mxu0 %v4636_v9  ;;  %4607 = vmatprep.subr.bf16.mxu1 %v4606_v11  ;;  %v2559_v9 = vld [vmem:[%s7161_s5 + $0x498] sm:$0xff]  ;;  %v4652_v11 = vpack.c.bf16 %v2541_v46, %v2540_v13  ;;  %v2581_v13 = vld [vmem:[%s7161_s5 + $0x548] sm:$0xff]  ;;  %v2566_v46 = vld [vmem:[%s7161_s5 + $0x4d0] sm:$0xff] }
 0x389   : > { %4639 = vmatprep.subr.bf16.mxu0 %v4638_v19  ;;  %v2542_v19 = vld [vmem:[%s7161_s5 + $0x410] sm:$0xff]  ;;  %v4654_v47 = vpack.c.bf16 %v2559_v9, %v2558_v54 }
 0x38a   : > { %v4656_v37 = vpack.c.bf16 %v2543_v23, %v2542_v19  ;;  %v4702_v19 = vpack.c.bf16 %v2599_v43, %v2598_v27  ;;  %v2583_v23 = vld [vmem:[%s7161_s5 + $0x558] sm:$0xff]  ;;  %v2606_v27 = vld [vmem:[%s7161_s5 + $0x610] sm:$0xff] }
 0x38b   : > { %4609 = vmatpush3.bf16.msra.mxu1 %v4608_v61  ;;  %v2561_v61 = vld [vmem:[%s7161_s5 + $0x4a8] sm:$0xff]  ;;  %v2607_v43 = vld [vmem:[%s7161_s5 + $0x618] sm:$0xff] }
 0x38c   : > { %4641 = vmatpush3.bf16.msra.mxu0 %v4640_v7  ;;  %4611 = vmatprep.subr.bf16.mxu1 %v4610_v40  ;;  %v4686_v7 = vpack.c.bf16 %v2591_v32, %v2590_v8  ;;  %v2592_v40 = vld [vmem:[%s7161_s5 + $0x5a0] sm:$0xff]  ;;  %v2550_v8 = vld [vmem:[%s7161_s5 + $0x450] sm:$0xff]  ;;  %v2551_v32 = vld [vmem:[%s7161_s5 + $0x458] sm:$0xff] }
 0x38d   : > { %4643 = vmatprep.subr.bf16.mxu0 %v4642_v14  ;;  %v2545_v14 = vld [vmem:[%s7161_s5 + $0x428] sm:$0xff]  ;;  %v4690_v20 = vpack.c.bf16 %v2593_v21, %v2592_v40  ;;  %v2552_v21 = vld [vmem:[%s7161_s5 + $0x460] sm:$0xff] }
 0x38e   : > { %v4660_v18 = vpack.c.bf16 %v2545_v14, %v2544_v63  ;;  %v2585_v63 = vld [vmem:[%s7161_s5 + $0x568] sm:$0xff]  ;;  %v2570_v14 = vld [vmem:[%s7161_s5 + $0x4f0] sm:$0xff] }
 0x38f   : > { %4613 = vmatpush3.bf16.msra.mxu1 %v4612_v39  ;;  %v2547_v39 = vld [vmem:[%s7161_s5 + $0x438] sm:$0xff] }
 0x390   : > { %4645 = vmatpush3.bf16.msra.mxu0 %v4644_v53  ;;  %4615 = vmatprep.subr.bf16.mxu1 %v4614_v48  ;;  %v2578_v53 = vld [vmem:[%s7161_s5 + $0x530] sm:$0xff]  ;;  %v4664_v29 = vpack.c.bf16 %v2547_v39, %v2546_v24  ;;  %v2587_v24 = vld [vmem:[%s7161_s5 + $0x578] sm:$0xff]  ;;  %v2620_v39 = vld [vmem:[%s7161_s5 + $0x680] sm:$0xff] }
 0x391   : > { %4647 = vmatprep.subr.bf16.mxu0 %v4646_v50  ;;  %v2596_v50 = vld [vmem:[%s7161_s5 + $0x5c0] sm:$0xff]  ;;  %v4696_v28 = vpack.c.bf16 %v2579_v38, %v2578_v53  ;;  %v2621_v53 = vld [vmem:[%s7161_s5 + $0x688] sm:$0xff] }
 0x392   : > { %v2653_v38 = vld [vmem:[%s7161_s5 + $0x788] sm:$0xff] }
 0x393   : > { %4617 = vmatpush3.bf16.msra.mxu1 %v4616_v12  ;;  %v2549_v12 = vld [vmem:[%s7161_s5 + $0x448] sm:$0xff] }
 0x394   : > { %4649 = vmatpush3.bf16.msra.mxu0 %v4648_v10  ;;  %4651 = vmatprep.subr.bf16.mxu1 %v4650_v5  ;;  %v2580_v10 = vld [vmem:[%s7161_s5 + $0x540] sm:$0xff]  ;;  %v4698_v5 = vpack.c.bf16 %v2597_v1, %v2596_v50  ;;  %v4668_v54 = vpack.c.bf16 %v2549_v12, %v2548_v56  ;;  %v4714_v50 = vpack.c.bf16 %v2621_v53, %v2620_v39  ;;  %v2637_v56 = vld [vmem:[%s7161_s5 + $0x708] sm:$0xff]  ;;  %v2622_v12 = vld [vmem:[%s7161_s5 + $0x690] sm:$0xff] }
 0x395   : > { %4683 = vmatprep.subr.bf16.mxu0 %v4682_v16  ;;  %v2567_v16 = vld [vmem:[%s7161_s5 + $0x4d8] sm:$0xff]  ;;  %v4700_v9 = vpack.c.bf16 %v2581_v13, %v2580_v10  ;;  %v2604_v1 = vld [vmem:[%s7161_s5 + $0x600] sm:$0xff]  ;;  %v2654_v13 = vld [vmem:[%s7161_s5 + $0x790] sm:$0xff] }
 0x396   : > { %2873 = vmatmul.mubr.f32.vlgmr.msra.gmra.mrb[18].mxu1 %v1579_v55  ;;  %v4658_v55 = vpack.c.bf16 %v2561_v61, %v2560_v26  ;;  %v2601_v26 = vld [vmem:[%s7161_s5 + $0x5e8] sm:$0xff]  ;;  %v4672_v61 = vpack.c.bf16 %v2551_v32, %v2550_v8  ;;  %v2623_v10 = vld [vmem:[%s7161_s5 + $0x698] sm:$0xff]  ;;  %v2624_v8 = vld [vmem:[%s7161_s5 + $0x6a0] sm:$0xff] }
 0x397   : > { %2943 = vmatmul.mubr.f32.vlgmr.msra.gmra.mrb[20].mxu0 %v1581_v15  ;;  %4653 = vmatpush3.bf16.msra.mxu1 %v4652_v11  ;;  %v2577_v15 = vld [vmem:[%s7161_s5 + $0x528] sm:$0xff]  ;;  %v4670_v11 = vpack.c.bf16 %v2567_v16, %v2566_v46  ;;  %v2655_v46 = vld [vmem:[%s7161_s5 + $0x798] sm:$0xff]  ;;  %v2630_v39 = vld [vmem:[%s7161_s5 + $0x6d0] sm:$0xff] }
 0x398   : > { %3012 = vmatprep.mubr.f32.mxu1 %v1584_v30  ;;  %4685 = vmatpush3.bf16.msra.mxu0 %v4684_v41  ;;  %v2562_v30 = vld [vmem:[%s7161_s5 + $0x4b0] sm:$0xff]  ;;  %v4692_v4 = vpack.c.bf16 %v2577_v15, %v2576_v35  ;;  %v2571_v35 = vld [vmem:[%s7161_s5 + $0x4f8] sm:$0xff]  ;;  %v2625_v32 = vld [vmem:[%s7161_s5 + $0x6a8] sm:$0xff] }
 0x399   : > { %3082 = vmatprep.mubr.f32.mxu0 %v1586_v44  ;;  %4655 = vmatprep.subr.bf16.mxu1 %v4654_v47  ;;  %v2595_v44 = vld [vmem:[%s7161_s5 + $0x5b8] sm:$0xff]  ;;  %v4662_v34 = vpack.c.bf16 %v2563_v49, %v2562_v30  ;;  %v2582_v41 = vld [vmem:[%s7161_s5 + $0x550] sm:$0xff]  ;;  %v2569_v47 = vld [vmem:[%s7161_s5 + $0x4e8] sm:$0xff] }
 0x39a   : > { %4687 = vmatprep.subr.bf16.mxu0 %v4686_v7  ;;  %v4694_v48 = vpack.c.bf16 %v2595_v44, %v2594_v33  ;;  %v4704_v7 = vpack.c.bf16 %v2583_v23, %v2582_v41  ;;  %v4674_v40 = vpack.c.bf16 %v2569_v47, %v2568_v25  ;;  %v2603_v15 = vld [vmem:[%s7161_s5 + $0x5f8] sm:$0xff]  ;;  %v4678_v33 = vpack.c.bf16 %v2571_v35, %v2570_v14  ;;  %v2554_v44 = vld [vmem:[%s7161_s5 + $0x470] sm:$0xff]  ;;  %v2657_v23 = vld [vmem:[%s7161_s5 + $0x7a8] sm:$0xff] }
 0x39b   : > { %4657 = vmatpush3.bf16.msra.mxu1 %v4656_v37  ;;  %v2553_v37 = vld [vmem:[%s7161_s5 + $0x468] sm:$0xff]  ;;  %v4750_v41 = vpack.c.bf16 %v2655_v46, %v2654_v13  ;;  %v4720_v25 = vpack.c.bf16 %v2607_v43, %v2606_v27  ;;  %v2608_v47 = vld [vmem:[%s7161_s5 + $0x620] sm:$0xff]  ;;  %v2631_v53 = vld [vmem:[%s7161_s5 + $0x6d8] sm:$0xff] }
 0x39c   : > { %4689 = vmatpush3.bf16.msra.mxu0 %v4688_v45  ;;  %4659 = vmatprep.subr.bf16.mxu1 %v4658_v55  ;;  %v2584_v45 = vld [vmem:[%s7161_s5 + $0x560] sm:$0xff]  ;;  %v4706_v55 = vpack.c.bf16 %v2601_v26, %v2600_v52  ;;  %v4676_v30 = vpack.c.bf16 %v2553_v37, %v2552_v21  ;;  %v2609_v52 = vld [vmem:[%s7161_s5 + $0x628] sm:$0xff]  ;;  %v2627_v26 = vld [vmem:[%s7161_s5 + $0x6b8] sm:$0xff] }
 0x39d   : > { %4691 = vmatprep.subr.bf16.mxu0 %v4690_v20  ;;  %v2602_v20 = vld [vmem:[%s7161_s5 + $0x5f0] sm:$0xff]  ;;  %v4708_v49 = vpack.c.bf16 %v2585_v63, %v2584_v45  ;;  %v2611_v37 = vld [vmem:[%s7161_s5 + $0x638] sm:$0xff]  ;;  %v2628_v14 = vld [vmem:[%s7161_s5 + $0x6c0] sm:$0xff] }
 0x39e   : > { %v2610_v21 = vld [vmem:[%s7161_s5 + $0x630] sm:$0xff]  ;;  %v2643_v63 = vld [vmem:[%s7161_s5 + $0x738] sm:$0xff]  ;;  %v2629_v35 = vld [vmem:[%s7161_s5 + $0x6c8] sm:$0xff] }
 0x39f   : > { %4661 = vmatpush3.bf16.msra.mxu1 %v4660_v18  ;;  %v2555_v18 = vld [vmem:[%s7161_s5 + $0x478] sm:$0xff]  ;;  %v2642_v45 = vld [vmem:[%s7161_s5 + $0x730] sm:$0xff]  ;;  %v2665_v13 = vld [vmem:[%s7161_s5 + $0x7e8] sm:$0xff] }
 0x3a0   : > { %4693 = vmatpush3.bf16.msra.mxu0 %v4692_v4  ;;  %4663 = vmatprep.subr.bf16.mxu1 %v4662_v34  ;;  %v2586_v4 = vld [vmem:[%s7161_s5 + $0x570] sm:$0xff]  ;;  %v4710_v34 = vpack.c.bf16 %v2603_v15, %v2602_v20  ;;  %v4680_v57 = vpack.c.bf16 %v2555_v18, %v2554_v44  ;;  %v2660_v20 = vld [vmem:[%s7161_s5 + $0x7c0] sm:$0xff]  ;;  %v2661_v15 = vld [vmem:[%s7161_s5 + $0x7c8] sm:$0xff] }
 0x3a1   : > { %4695 = vmatprep.subr.bf16.mxu0 %v4694_v48  ;;  %v2652_v48 = vld [vmem:[%s7161_s5 + $0x780] sm:$0xff]  ;;  %v4712_v2 = vpack.c.bf16 %v2587_v24, %v2586_v4  ;;  %v2613_v18 = vld [vmem:[%s7161_s5 + $0x648] sm:$0xff] }
 0x3a2   : > { %v2612_v44 = vld [vmem:[%s7161_s5 + $0x640] sm:$0xff]  ;;  %v2645_v24 = vld [vmem:[%s7161_s5 + $0x748] sm:$0xff] }
 0x3a3   : > { %4665 = vmatpush3.bf16.msra.mxu1 %v4664_v29  ;;  %v2605_v29 = vld [vmem:[%s7161_s5 + $0x608] sm:$0xff]  ;;  %v2644_v4 = vld [vmem:[%s7161_s5 + $0x740] sm:$0xff] }
 0x3a4   : > { %4697 = vmatpush3.bf16.msra.mxu0 %v4696_v28  ;;  %4667 = vmatprep.subr.bf16.mxu1 %v4666_v42  ;;  %v4746_v28 = vpack.c.bf16 %v2653_v38, %v2652_v48  ;;  %v2636_v42 = vld [vmem:[%s7161_s5 + $0x700] sm:$0xff]  ;;  %v2662_v48 = vld [vmem:[%s7161_s5 + $0x7d0] sm:$0xff]  ;;  %v2663_v38 = vld [vmem:[%s7161_s5 + $0x7d8] sm:$0xff] }
 0x3a5   : > { %4699 = vmatprep.subr.bf16.mxu0 %v4698_v5  ;;  %v4716_v5 = vpack.c.bf16 %v2605_v29, %v2604_v1  ;;  %v4748_v16 = vpack.c.bf16 %v2637_v56, %v2636_v42  ;;  %v2614_v1 = vld [vmem:[%s7161_s5 + $0x650] sm:$0xff]  ;;  %v2615_v29 = vld [vmem:[%s7161_s5 + $0x658] sm:$0xff]  ;;  %v4766_v42 = vpack.c.bf16 %v2663_v38, %v2662_v48  ;;  %v2616_v43 = vld [vmem:[%s7161_s5 + $0x660] sm:$0xff] }
 0x3a6   : > { %v2647_v56 = vld [vmem:[%s7161_s5 + $0x758] sm:$0xff]  ;;  %v4736_v46 = vpack.c.bf16 %v2615_v29, %v2614_v1 }
 0x3a7   : > { %4669 = vmatpush3.bf16.msra.mxu1 %v4668_v54  ;;  %v2638_v54 = vld [vmem:[%s7161_s5 + $0x710] sm:$0xff] }
 0x3a8   : > { %4701 = vmatpush3.bf16.msra.mxu0 %v4700_v9  ;;  %4671 = vmatprep.subr.bf16.mxu1 %v4670_v11  ;;  %v4718_v9 = vpack.c.bf16 %v2623_v10, %v2622_v12  ;;  %v2639_v11 = vld [vmem:[%s7161_s5 + $0x718] sm:$0xff]  ;;  %v2632_v12 = vld [vmem:[%s7161_s5 + $0x6e0] sm:$0xff]  ;;  %v2633_v10 = vld [vmem:[%s7161_s5 + $0x6e8] sm:$0xff] }
 0x3a9   : > { %4703 = vmatprep.subr.bf16.mxu0 %v4702_v19  ;;  %v2656_v19 = vld [vmem:[%s7161_s5 + $0x7a0] sm:$0xff]  ;;  %v4752_v17 = vpack.c.bf16 %v2639_v11, %v2638_v54  ;;  %v4738_v27 = vpack.c.bf16 %v2633_v10, %v2632_v12  ;;  %v2617_v54 = vld [vmem:[%s7161_s5 + $0x668] sm:$0xff] }
 0x3aa   : > { %v4754_v36 = vpack.c.bf16 %v2657_v23, %v2656_v19  ;;  %v2634_v19 = vld [vmem:[%s7161_s5 + $0x6f0] sm:$0xff]  ;;  %v2635_v23 = vld [vmem:[%s7161_s5 + $0x6f8] sm:$0xff] }
 0x3ab   : > { %4673 = vmatpush3.bf16.msra.mxu1 %v4672_v61  ;;  %v4724_v61 = vpack.c.bf16 %v2609_v52, %v2608_v47  ;;  %v2666_v47 = vld [vmem:[%s7161_s5 + $0x7f0] sm:$0xff]  ;;  %v2667_v52 = vld [vmem:[%s7161_s5 + $0x7f8] sm:$0xff] }
 0x3ac   : > { %4705 = vmatpush3.bf16.msra.mxu0 %v4704_v7  ;;  %4675 = vmatprep.subr.bf16.mxu1 %v4674_v40 }
 0x3ad   : > { %4707 = vmatprep.subr.bf16.mxu0 %v4706_v55 }
 0x3af   : > { %4677 = vmatpush3.bf16.msra.mxu1 %v4676_v30  ;;  %v4728_v30 = vpack.c.bf16 %v2611_v37, %v2610_v21  ;;  %v2651_v21 = vld [vmem:[%s7161_s5 + $0x778] sm:$0xff] }
 0x3b0   : > { %4709 = vmatpush3.bf16.msra.mxu0 %v4708_v49  ;;  %4679 = vmatprep.subr.bf16.mxu1 %v4678_v33  ;;  %v4760_v49 = vpack.c.bf16 %v2643_v63, %v2642_v45  ;;  %v4730_v33 = vpack.c.bf16 %v2629_v35, %v2628_v14 }
 0x3b1   : > { %4711 = vmatprep.subr.bf16.mxu0 %v4710_v34  ;;  %v4762_v34 = vpack.c.bf16 %v2661_v15, %v2660_v20 }
 0x3b3   : > { %4681 = vmatpush3.bf16.msra.mxu1 %v4680_v57  ;;  %v4732_v57 = vpack.c.bf16 %v2613_v18, %v2612_v44 }
 0x3b4   : > { %4713 = vmatpush3.bf16.msra.mxu0 %v4712_v2  ;;  %4715 = vmatprep.subr.bf16.mxu1 %v4714_v50  ;;  %v4764_v2 = vpack.c.bf16 %v2645_v24, %v2644_v4  ;;  %v4734_v50 = vpack.c.bf16 %v2631_v53, %v2630_v39 }
 0x3b5   : > { %4747 = vmatprep.subr.bf16.mxu0 %v4746_v28  ;;  %v2646_v28 = vld [vmem:[%s7161_s5 + $0x750] sm:$0xff] }
 0x3b6   : > { %3013 = vmatmul.mubr.f32.vlgmr.msra.gmra.mrb[20].mxu1 %v1583_v60  ;;  %v4722_v60 = vpack.c.bf16 %v2625_v32, %v2624_v8 }
 0x3b7   : > { %3083 = vmatmul.mubr.f32.vlgmr.msra.gmra.mrb[22].mxu0 %v1585_v0  ;;  %4717 = vmatpush3.bf16.msra.mxu1 %v4716_v5  ;;  %v2641_v0 = vld [vmem:[%s7161_s5 + $0x728] sm:$0xff]  ;;  %v2664_v5 = vld [vmem:[%s7161_s5 + $0x7e0] sm:$0xff] }
 0x3b8   : > { %3152 = vmatprep.mubr.f32.mxu1 %v1588_v6  ;;  %4749 = vmatpush3.bf16.msra.mxu0 %v4748_v16  ;;  %v2626_v6 = vld [vmem:[%s7161_s5 + $0x6b0] sm:$0xff]  ;;  %v4756_v7 = vpack.c.bf16 %v2641_v0, %v2640_v22  ;;  %v4768_v16 = vpack.c.bf16 %v2647_v56, %v2646_v28  ;;  %v4770_v32 = vpack.c.bf16 %v2665_v13, %v2664_v5 }
 0x3b9   : > { %3222 = vmatprep.mubr.f32.mxu0 %v1590_v3  ;;  %4719 = vmatprep.subr.bf16.mxu1 %v4718_v9  ;;  %v2659_v3 = vld [vmem:[%s7161_s5 + $0x7b8] sm:$0xff]  ;;  %v4726_v40 = vpack.c.bf16 %v2627_v26, %v2626_v6  ;;  %v2648_v9 = vld [vmem:[%s7161_s5 + $0x760] sm:$0xff]  ;;  %v4740_v0 = vpack.c.bf16 %v2617_v54, %v2616_v43  ;;  %v4742_v26 = vpack.c.bf16 %v2635_v23, %v2634_v19 }
 0x3ba   : > { %4751 = vmatprep.subr.bf16.mxu0 %v4750_v41  ;;  %v4758_v55 = vpack.c.bf16 %v2659_v3, %v2658_v58  ;;  %v2649_v41 = vld [vmem:[%s7161_s5 + $0x768] sm:$0xff]  ;;  %v2618_v58 = vld [vmem:[%s7161_s5 + $0x670] sm:$0xff]  ;;  %v2619_v3 = vld [vmem:[%s7161_s5 + $0x678] sm:$0xff] }
 0x3bb   : > { %4721 = vmatpush3.bf16.msra.mxu1 %v4720_v25  ;;  %v3367_v25 = vld [vmem:[%s7162_s6] ss:$0 sm:$0xff]  ;;  %v4772_v6 = vpack.c.bf16 %v2649_v41, %v2648_v9  ;;  %v4744_v45 = vpack.c.bf16 %v2619_v3, %v2618_v58 }
 0x3bc   : > { %4753 = vmatpush3.bf16.msra.mxu0 %v4752_v17  ;;  %4723 = vmatprep.subr.bf16.mxu1 %v4722_v60 }
 0x3bd   : > { %4755 = vmatprep.subr.bf16.mxu0 %v4754_v36 }
 0x3bf   : > { %4725 = vmatpush3.bf16.msra.mxu1 %v4724_v61 }
 0x3c0   : > { %4757 = vmatpush3.bf16.msra.mxu0 %v4756_v7  ;;  %4727 = vmatprep.subr.bf16.mxu1 %v4726_v40  ;;  %v4774_v7 = vpack.c.bf16 %v2667_v52, %v2666_v47  ;;  %v2650_v40 = vld [vmem:[%s7161_s5 + $0x770] sm:$0xff] }
 0x3c1   : > { %4759 = vmatprep.subr.bf16.mxu0 %v4758_v55  ;;  %v4776_v55 = vpack.c.bf16 %v2651_v21, %v2650_v40 }
 0x3c3   : > { %4729 = vmatpush3.bf16.msra.mxu1 %v4728_v30 }
 0x3c4   : > { %4761 = vmatpush3.bf16.msra.mxu0 %v4760_v49  ;;  %4731 = vmatprep.subr.bf16.mxu1 %v4730_v33 }
 0x3c5   : > { %4763 = vmatprep.subr.bf16.mxu0 %v4762_v34 }
 0x3c7   : > { %4733 = vmatpush3.bf16.msra.mxu1 %v4732_v57 }
 0x3c8   : > { %4765 = vmatpush3.bf16.msra.mxu0 %v4764_v2  ;;  %4735 = vmatprep.subr.bf16.mxu1 %v4734_v50 }
 0x3c9   : > { %v3423_v11 = vpop.f32.mrb[8].mxu1  ;;  %v3458_v8 = vpop.f32.mrb[10].mxu0  ;;  %4767 = vmatprep.subr.bf16.mxu0 %v4766_v42 }
 0x3ca   : > { %v3424_v17 = vpop.f32.mrb[9].mxu1  ;;  %v3459_v60 = vpop.f32.mrb[11].mxu0 }
 0x3cb   : > { %v3425_v22 = vadd.f32 %v3424_v17, %v3423_v11  ;;  %v3460_v36 = vadd.f32 %v3459_v60, %v3458_v8  ;;  %4737 = vmatpush3.bf16.msra.mxu1 %v4736_v46 }
 0x3cc   : > { %4769 = vmatpush3.bf16.msra.mxu0 %v4768_v16  ;;  %4739 = vmatprep.subr.bf16.mxu1 %v4738_v27 }
 0x3cd   : > { %v1919_v61 = vadd.f32 %v3425_v22, %v3367_v25  ;;  %4771 = vmatprep.subr.bf16.mxu0 %v4770_v32 }
 0x3cf   : > { %v1989_v37 = vadd.f32 %v3460_v36, %v1919_v61  ;;  %4741 = vmatpush3.bf16.msra.mxu1 %v4740_v0 }
 0x3d0   : > { %4773 = vmatpush3.bf16.msra.mxu0 %v4772_v6  ;;  %4743 = vmatprep.subr.bf16.mxu1 %v4742_v26 }
 0x3d1   : > { %4775 = vmatprep.subr.bf16.mxu0 %v4774_v7 }
 0x3d3   : > { %4745 = vmatpush3.bf16.msra.mxu1 %v4744_v45 }
 0x3d4   : > { %4777 = vmatpush3.bf16.msra.mxu0 %v4776_v55 }
 0x3d6   : > { %3153 = vmatmul.mubr.f32.vlgmr.msra.gmra.mrb[22].mxu1 %v1587_v51 }
 0x3d7   : > { %3223 = vmatmul.mubr.f32.vlgmr.msra.gmra.mrb[24].mxu0 %v1589_v31 }
 0x3e9   : > { %v3493_v63 = vpop.f32.mrb[10].mxu1  ;;  %v3528_v14 = vpop.f32.mrb[12].mxu0 }
 0x3ea   : > { %v3494_v35 = vpop.f32.mrb[11].mxu1  ;;  %v3529_v20 = vpop.f32.mrb[13].mxu0 }
 0x3eb   : > { %v3495_v15 = vadd.f32 %v3494_v35, %v3493_v63  ;;  %v3530_v30 = vadd.f32 %v3529_v20, %v3528_v14  ;;  %v3368_v20 = vld [vmem:[%s7162_s6 + $0x1] ss:$0 sm:$0xff] }
 0x3ed   : > { %v2059_v49 = vadd.f32 %v3495_v15, %v1989_v37 }
 0x3ef   : > { %v2129_v33 = vadd.f32 %v3530_v30, %v2059_v49  ;;  %v3369_v49 = vld [vmem:[%s7162_s6 + $0x2] ss:$0 sm:$0xff] }
 0x409   : > { %v3563_v44 = vpop.f32.mrb[12].mxu1 }
 0x40a   : > { %v3598_v18 = vpop.f32.mrb[14].mxu0  ;;  %v3564_v4 = vpop.f32.mrb[13].mxu1 }
 0x40b   : > { %v3565_v34 = vadd.f32 %v3564_v4, %v3563_v44  ;;  %v3599_v24 = vpop.f32.mrb[15].mxu0 }
 0x40c   : > { %v3600_v39 = vadd.f32 %v3599_v24, %v3598_v18 }
 0x40d   : > { %v2199_v53 = vadd.f32 %v3565_v34, %v2129_v33 }
 0x40f   : > { %v2269_v59 = vadd.f32 %v3600_v39, %v2199_v53 }
 0x429   : > { %v3633_v51 = vpop.f32.mrb[14].mxu1 }
 0x42a   : > { %v3668_v48 = vpop.f32.mrb[16].mxu0  ;;  %v3634_v62 = vpop.f32.mrb[15].mxu1 }
 0x42b   : > { %v3635_v31 = vadd.f32 %v3634_v62, %v3633_v51  ;;  %v3669_v38 = vpop.f32.mrb[17].mxu0 }
 0x42c   : > { %v3670_v57 = vadd.f32 %v3669_v38, %v3668_v48 }
 0x42d   : > { %v2339_v2 = vadd.f32 %v3635_v31, %v2269_v59 }
 0x42f   : > { %v2409_v50 = vadd.f32 %v3670_v57, %v2339_v2 }
 0x449   : > { %v3703_v1 = vpop.f32.mrb[16].mxu1 }
 0x44a   : > { %v3738_v29 = vpop.f32.mrb[18].mxu0  ;;  %v3704_v28 = vpop.f32.mrb[17].mxu1 }
 0x44b   : > { %v3705_v42 = vadd.f32 %v3704_v28, %v3703_v1  ;;  %v3739_v56 = vpop.f32.mrb[19].mxu0 }
 0x44c   : > { %v3740_v12 = vadd.f32 %v3739_v56, %v3738_v29 }
 0x44e   : > { %v2805_v10 = vadd.f32 %v3740_v12, %v3705_v42 }
 0x469   : > { %v3773_v5 = vpop.f32.mrb[18].mxu1 }
 0x46a   : > { %v3808_v13 = vpop.f32.mrb[20].mxu0  ;;  %v3774_v46 = vpop.f32.mrb[19].mxu1 }
 0x46b   : > { %v3775_v16 = vadd.f32 %v3774_v46, %v3773_v5  ;;  %v3809_v27 = vpop.f32.mrb[21].mxu0 }
 0x46c   : > { %v3810_v43 = vadd.f32 %v3809_v27, %v3808_v13 }
 0x46d   : > { %v2875_v54 = vadd.f32 %v3775_v16, %v2805_v10 }
 0x46f   : > { %v2945_v9 = vadd.f32 %v3810_v43, %v2875_v54 }
 0x489   : > { %v3843_v11 = vpop.f32.mrb[20].mxu1 }
 0x48a   : > { %v3878_v8 = vpop.f32.mrb[22].mxu0  ;;  %v3844_v32 = vpop.f32.mrb[21].mxu1 }
 0x48b   : > { %v3845_v41 = vadd.f32 %v3844_v32, %v3843_v11  ;;  %v3879_v19 = vpop.f32.mrb[23].mxu0 }
 0x48c   : > { %v3880_v23 = vadd.f32 %v3879_v19, %v3878_v8 }
 0x48d   : > { %v3015_v25 = vadd.f32 %v3845_v41, %v2945_v9 }
 0x48f   : > { %v3085_v17 = vadd.f32 %v3880_v23, %v3015_v25 }
 0x4a9   : > { %v3913_v60 = vpop.f32.mrb[22].mxu1 }
 0x4aa   : > { %v3948_v47 = vpop.f32.mrb[24].mxu0  ;;  %v3914_v52 = vpop.f32.mrb[23].mxu1 }
 0x4ab   : > { %v3915_v22 = vadd.f32 %v3914_v52, %v3913_v60  ;;  %v3949_v36 = vpop.f32.mrb[25].mxu0 }
 0x4ac   : > { %v3950_v0 = vadd.f32 %v3949_v36, %v3948_v47 }
 0x4ad   : > { %v3155_v6 = vadd.f32 %v3915_v22, %v3085_v17 }
 0x4af   : > { %v3225_v26 = vadd.f32 %v3950_v0, %v3155_v6 }
 0x4b1   : > { %v3228_v58 = vmul.f32 0.015625, %v3225_v26 }
 0x4b3   : > { %3231 = vperm.xlu1 %4835, %v3228_v58   ;;  %v3238_v40 = vmul.f32 %v3228_v58, %v3228_v58 }
 0x4b5   : > { %v3239_v21 = vmul.f32 64.0, %v3238_v40 }
 0x532   : > { %v3232_v3 = vpop.permute.xlu1 %3231 }
 0x533   : > { %v3234_v61 = vsub.f32 %v2409_v50, %v3232_v3 }
 0x535   : > { %v3235_v7 = vmul.f32 %v3234_v61, %v3234_v61 }
 0x537   : > { %3236 = vadd.xlane.f32.xlu1 %v3235_v7 }
 0x5c4   : > { %v3237_v37 = vpop.xlane.xlu1 %3236 }
 0x5c5   : > { %v3240_v45 = vsub.f32 %v3237_v37, %v3239_v21 }
 0x5c7   : > { %v3241_v55 = vmul.f32 0.015625, %v3240_v45 }
 0x5c9   : > { %v3242_v63 = vmax.f32 %v3241_v55, 0.0 }
 0x5cb   : > { %v3243_v14 = vadd.f32 1e-05, %v3242_v63 }
 0x5cd   : > { %4838 = vrsqrt.f32 %v3243_v14 }
 0x5d7   : > { %v4839_v35 = vpop.eup %4838 }
 0x5d8   : > { %3247 = vperm.xlu0 %4834, %v4839_v35  }
 0x657   : > { %v3248_v15 = vpop.permute.xlu0 %3247 }
 0x658   : > { %v3250_v30 = vmul.f32 %v3248_v15, %v3234_v61 }
 0x65a   : > { %v3256_v33 = vmul.f32 %v3368_v20, %v3250_v30 }
 0x65c   : > { %v3262_v44 = vadd.f32 %v3369_v49, %v3256_v33 }
 0x65e   : > { %3263 = vst [vmem:[%s284_s15] sm:$0xff] %v3262_v44 }
 0x65f   : > { %4881 = shalt.err (!%p4878_p7)
}
 0x660   : > { %s4882_s8 = scalar_lea.hbm %s7114_s21, 128  ;;  %s4886_s18 = scalar_lea.hbm %s7163_s7, 256 }
 0x661   : > { %p4883_p8 = scmp.ne.s32.totalorder %s7114_s21, %s4882_s8  ;;  %p4887_p1 = scmp.lt.u32.totalorder %s7114_s21, %s7163_s7 }
 0x662   : > { %p4888_p0 = scmp.lt.u32.totalorder %s4886_s18, %s4882_s8  ;;  %p4890_p6 = scmp.lt.u32.totalorder %s4882_s8, %s7114_s21 }
 0x663   : > { %p4884_p11 = pnand %p4883_p8, %p7174_p9 }
 0x664   : > { %p4889_p5 = por %p4888_p0, %p4887_p1 }
 0x665   : > { %p4885_p13 = pneg %p4884_p11 }
 0x666   : > { %p4891_p10 = por %p4890_p6, %p4889_p5 }
 0x668   : > { %p4892_p12 = pnand %p4891_p10, %p4885_p13 }
 0x66a   : > { %4895 = shalt.err (!%p4892_p12)
}
 0x66b   : > { %4782 = dma.vmem_to_hbm [thread:$0]  (%p7174_p9), %s7116_s20, 128, %s7114_s21, %s3265_s22  }
 0x66c PF: > { %p4794_p2 = scmp.ge.s32.totalorder %s4934_s27, 2  ;;  %s3290_s13 = sand.u32 1, %s4922_s24  }
 0x66d   : > { %p7175_p3 = scmp.ne.s32.totalorder %s7168_s12, 0  ;;  %s3291_s19 = scalar_lea.sflag [#allocation4], %s3290_s13 }
 0x66f   : > { %p4789_p4 = pnand %p4794_p2, %p7175_p3 }
 0x671   : > { %4917 = dma.done.wait (!%p4789_p4), %s3291_s19, 128  }
 0x672   : > { %4919 = vsyncadd (!%p4789_p4), %s3291_s19, 4294967168  ;;  %p18_p7 = scmp.ge.s32.totalorder %s5009_s30, 4   ;;  %s7176_s24 = smov %s4926_s25 }
 0x673   : > { %s7177_s25 = smov %s4930_s26  ;;  %s7178_s26 = smov %s5020_s10 }
 0x674   : > { %s7179_s27 = smov %s5009_s30  ;;  %20 = sbr.rel (!%p18_p7) target bundleno = 4 (0x4), region = 93 }
 0x67b   :  { %3296 = vsyncpa [#allocation3], 1 }
 0x67c   :  { %3298 = vsyncpa [#allocation3 + $0x1], 1 }
 0x67d   :  { %3299 = vsyncpa [#allocation4], 1 }
 0x67e   :  { %3301 = vsyncpa [#allocation4 + $0x1], 1 }

</bundles_post_ra>
